<compile_context>
chip_gen: v5e
topology: v5e:2x2
jax: 0.10.0
libtpu: 0.0.40
codegen_flags: <defaults>
</compile_context>

<pallas_src>
import jax
import jax.numpy as jnp
from jax import lax
from jax.experimental import pallas as pl
from jax.experimental.pallas import tpu as pltpu


def _make_kernel(Wp, L, Cp, Cout):
    """Kernel factory. Wp: canvas row stride, L = Hp*Wp, Cp: sublane-padded input channels."""

    def fill_im2col(m_ref, v, k, c):
        # m_ref[t*c + ci, q] = v[ci, q + s_t], t = ky*k + kx, s_t = (ky-r)*Wp + (kx-r), r = k//2.
        # Wrapped head/tail columns ([0, -s) / [L-s, L)) are intentionally left UNWRITTEN:
        # |s_t| <= r*Wp + r <= 2*Wp + 2, so those columns always fall inside the 2-px halo of the
        # canvas, whose outputs are either select-masked to 0 (conv1 -> y1) or stripped by the
        # caller (final output).  Content columns p satisfy 2*Wp+2 <= p <= L-2*Wp-3, so they only
        # ever read properly written data.  (Halo >= max conv radius; asserted in the wrapper.)
        r = k // 2
        for ky in range(k):
            for kx in range(k):
                t = ky * k + kx
                s = (ky - r) * Wp + (kx - r)
                r0 = t * c
                if s > 0:
                    m_ref[r0:r0 + c, 0:L - s] = v[:, s:L]
                elif s < 0:
                    m_ref[r0:r0 + c, -s:L] = v[:, 0:L + s]
                else:
                    m_ref[r0:r0 + c, :] = v

    def kernel(x_ref, w13_ref, b1_ref, w2_ref, b3_ref, mask_ref, o_ref, m1_ref, m2_ref):
        # x_ref:    (1, Cp, L)        zero-padded x2-upsampled canvas, lane-dense, matmul dtype
        # w13_ref:  (2*Cout, 25*Cp)   conv1 & conv3 5x5 weights fused (rows [0:Cout] / [Cout:])
        # b1_ref:   (Cout, 1) f32     conv1 bias          b3_ref: (Cout, 1) f32  conv3 bias
        # w2_ref:   (Cout, 9*Cout)    conv2 3x3 weights (no bias)
        # mask_ref: (1, L) f32        1 inside the H2 x W2 content region of the canvas
        # o_ref:    (1, Cout, L)      lane-dense output canvas (halo stripped by caller)
        # m1_ref:   (25*Cp, L)        shared 5x5 im2col scratch (matmul dtype)
        # m2_ref:   (9*Cout, L)       3x3 im2col scratch (matmul dtype)
        x_can = x_ref[0]                                            # (Cp, L)

        # Shared 5x5 im2col, consumed once by the fused conv1 + conv3-skip contraction.
        fill_im2col(m1_ref, x_can, 5, Cp)
        y13 = jnp.dot(w13_ref[...], m1_ref[...], preferred_element_type=jnp.float32)

        inside = mask_ref[...] > 0.0                                # (1, L) content-region mask
        # conv1 + bias + ReLU, zeroed over the halo.  Select (not multiply) so stale im2col tail
        # garbage in halo columns can never leak; y1 is then its own zero padding for the 3x3 conv.
        y1 = jnp.where(inside, jnp.maximum(y13[:Cout] + b1_ref[...], 0.0), 0.0)

        fill_im2col(m2_ref, y1.astype(m2_ref.dtype), 3, Cout)
        y2 = jnp.dot(w2_ref[...], m2_ref[...], preferred_element_type=jnp.float32)
        y3 = y13[Cout:] + b3_ref[...]
        o_ref[0] = jnp.maximum(y2 + y3, 0.0).astype(o_ref.dtype)

    return kernel


def resnet_up_projection(x_nchw, params, matmul_dtype=jnp.bfloat16):
    """ResNetUpProjection forward. x_nchw: (N, Cin, H, W) -> (N, Cout, 2H, 2W).

    matmul_dtype: dtype of the MXU operands (canvas / im2col / weights). bf16 gives native MXU
    throughput on v5e/v6e/v7x (f32 accumulate); float32 is the exact mode used for tight testing.
    """
    w1, b1, w2, w3, b3 = params                       # HWIO conv weights + biases
    N, Cin, H, W = x_nchw.shape
    Cout = w1.shape[-1]
    H2, W2 = 2 * H, 2 * W
    Hp, Wp = H2 + 4, W2 + 4                           # canvas = upsampled image + 2-px zero halo
    L = Hp * Wp
    f32 = jnp.float32
    mm = jnp.dtype(matmul_dtype)

    # Halo invariant: halo width (2) >= max conv radius, so un-zeroed im2col wrap columns always
    # stay inside the halo (masked / stripped).  Do NOT change kernel sizes without revisiting.
    assert max(5, 3) // 2 <= 2
    # m2 tap blocks and the fused y13 row split need Cout sublane-aligned.
    assert Cout % 8 == 0, "Cout must be a multiple of 8"

    # Pad input channels to the native sublane tile of the matmul dtype so every im2col store
    # starts on a tile boundary (8 rows for f32, 16 for bf16).  Padded rows / weight cols are zero.
    sub = 8 * (4 // mm.itemsize)
    Cp = ((Cin + sub - 1) // sub) * sub

    # Canvas: nearest x2 upsample + 2-px zero pad + channel pad, flattened lane-dense (N, Cp, L).
    xu = jnp.repeat(jnp.repeat(x_nchw, 2, axis=2), 2, axis=3)              # (N, Cin, H2, W2)
    x_can = jnp.pad(xu, ((0, 0), (0, Cp - Cin), (2, 2), (2, 2)))           # (N, Cp, Hp, Wp)
    x_can = x_can.reshape(N, Cp, L).astype(mm)

    # 1 inside the H2 x W2 content region of the canvas (halo rows/cols are 0).
    mask = jnp.zeros((Hp, Wp), f32).at[2:2 + H2, 2:2 + W2].set(1.0).reshape(1, L)

    # Weights -> fused matmul form; row order (ky, kx, cin) matches the im2col layout.
    def as_mat5(w):                                    # (5,5,Cin,Cout) -> (Cout, 25*Cp)
        wp = jnp.pad(w, ((0, 0), (0, 0), (0, Cp - Cin), (0, 0)))
        return wp.reshape(25 * Cp, Cout).T

    w13 = jnp.concatenate([as_mat5(w1), as_mat5(w3)], axis=0).astype(mm)   # (2*Cout, 25*Cp)
    w2m = w2.reshape(9 * Cout, Cout).T.astype(mm)                          # (Cout, 9*Cout)
    b1c = b1.reshape(Cout, 1).astype(f32)
    b3c = b3.reshape(Cout, 1).astype(f32)

    out_dtype = x_nchw.dtype
    flops = 2 * N * L * (2 * Cout * 25 * Cp + Cout * 9 * Cout)
    bytes_accessed = int(x_can.size * mm.itemsize + w13.size * mm.itemsize
                         + w2m.size * mm.itemsize
                         + 4 * (b1c.size + b3c.size + mask.size)
                         + N * Cout * L * jnp.dtype(out_dtype).itemsize)

    out_flat = pl.pallas_call(
        _make_kernel(Wp, L, Cp, Cout),
        out_shape=jax.ShapeDtypeStruct((N, Cout, L), out_dtype),
        grid_spec=pltpu.PrefetchScalarGridSpec(
            num_scalar_prefetch=0,
            grid=(N,),
            in_specs=[
                pl.BlockSpec((1, Cp, L), lambda n: (n, 0, 0)),
                pl.BlockSpec((2 * Cout, 25 * Cp), lambda n: (0, 0)),
                pl.BlockSpec((Cout, 1), lambda n: (0, 0)),
                pl.BlockSpec((Cout, 9 * Cout), lambda n: (0, 0)),
                pl.BlockSpec((Cout, 1), lambda n: (0, 0)),
                pl.BlockSpec((1, L), lambda n: (0, 0)),
            ],
            out_specs=pl.BlockSpec((1, Cout, L), lambda n: (n, 0, 0)),
            scratch_shapes=[
                pltpu.VMEM((25 * Cp, L), mm),      # shared 5x5 im2col (conv1 + conv3 skip)
                pltpu.VMEM((9 * Cout, L), mm),     # 3x3 im2col (conv2)
            ],
        ),
        compiler_params=pltpu.CompilerParams(
            dimension_semantics=("parallel",),
            vmem_limit_bytes=32 * 1024 * 1024,
        ),
        cost_estimate=pl.CostEstimate(flops=flops, transcendentals=0,
                                      bytes_accessed=bytes_accessed),
    )(x_can, w13, b1c, w2m, b3c, mask)

    # Free reshape + cheap halo strip; output is already NCHW.
    return out_flat.reshape(N, Cout, Hp, Wp)[:, :, 2:2 + H2, 2:2 + W2]


def _reference(x_nchw, params):
    """Pure-JAX f32 reference (mirrors the PyTorch forward)."""
    w1, b1, w2, w3, b3 = params  # HWIO weights
    dn = ("NCHW", "HWIO", "NCHW")
    x = jnp.repeat(jnp.repeat(x_nchw, 2, axis=2), 2, axis=3)  # nearest upsample x2
    y = lax.conv_general_dilated(x, w1, (1, 1), [(2, 2), (2, 2)], dimension_numbers=dn)
    y = jnp.maximum(y + b1.reshape(1, -1, 1, 1), 0.0)
    y = lax.conv_general_dilated(y, w2, (1, 1), [(1, 1), (1, 1)], dimension_numbers=dn)
    y3 = lax.conv_general_dilated(x, w3, (1, 1), [(2, 2), (2, 2)], dimension_numbers=dn)
    y3 = y3 + b3.reshape(1, -1, 1, 1)
    return jnp.maximum(y + y3, 0.0)


if __name__ == "__main__":
    inplanes, outplanes = 4, 8
    N, H, W = 2, 16, 16

    key = jax.random.PRNGKey(0)
    kx, k1, kb1, k2, k3, kb3 = jax.random.split(key, 6)

    x = jax.random.normal(kx, (N, inplanes, H, W), jnp.float32)
    w1 = 0.1 * jax.random.normal(k1, (5, 5, inplanes, outplanes), jnp.float32)
    b1 = 0.1 * jax.random.normal(kb1, (outplanes,), jnp.float32)
    w2 = 0.1 * jax.random.normal(k2, (3, 3, outplanes, outplanes), jnp.float32)
    # NOTE: the PyTorch module declares conv3 as (outplanes, outplanes) but applies it to the
    # upsampled input, so it only typechecks when inplanes == outplanes; here conv3 takes the
    # upsampled input's channel count (identical to the module whenever inplanes == outplanes).
    w3 = 0.1 * jax.random.normal(k3, (5, 5, inplanes, outplanes), jnp.float32)
    b3 = 0.1 * jax.random.normal(kb3, (outplanes,), jnp.float32)
    params = (w1, b1, w2, w3, b3)

    ref = jax.block_until_ready(_reference(x, params))

    # Default bf16 MXU-operand mode (per perf review): f32 accumulation, ~1e-2-level error,
    # so the tolerance is loosened accordingly.
    out_bf16 = jax.block_until_ready(resnet_up_projection(x, params))
    assert out_bf16.shape == (N, outplanes, 2 * H, 2 * W), out_bf16.shape
    assert jnp.allclose(out_bf16, ref, atol=1e-1, rtol=1e-1), \
        float(jnp.max(jnp.abs(out_bf16 - ref)))

    # f32 "exact" mode: must match the reference tightly.
    out_f32 = jax.block_until_ready(resnet_up_projection(x, params, matmul_dtype=jnp.float32))
    assert jnp.allclose(out_f32, ref, atol=1e-4, rtol=1e-4), \
        float(jnp.max(jnp.abs(out_f32 - ref)))

    print("KERNEL_OK")
</pallas_src>

<mosaic_0001>
module attributes {stable_mosaic.version = 11 : i64} {
  func.func @kernel(%arg0: i32, %arg1: memref<1x16x1296xbf16, #tpu.memory_space<vmem>>, %arg2: memref<16x400xbf16, #tpu.memory_space<vmem>>, %arg3: memref<8x1xf32, #tpu.memory_space<vmem>>, %arg4: memref<8x72xbf16, #tpu.memory_space<vmem>>, %arg5: memref<8x1xf32, #tpu.memory_space<vmem>>, %arg6: memref<1x1296xf32, #tpu.memory_space<vmem>>, %arg7: memref<1x8x1296xf32, #tpu.memory_space<vmem>>, %arg8: memref<400x1296xbf16, #tpu.memory_space<vmem>>, %arg9: memref<72x1296xbf16, #tpu.memory_space<vmem>>) attributes {dimension_semantics = [#tpu.dimension_semantics<parallel>], iteration_bounds = array<i64: 2>, scalar_prefetch = 0 : i64, scratch_operands = 2 : i64, tpu.core_type = #tpu.core_type<tc>, window_params = [{transform_indices = @transform_0, window_bounds = array<i64: 1, 16, 1296>}, {pipeline_mode = #tpu.pipeline_mode<synchronous>, transform_indices = @transform_1, window_bounds = array<i64: 16, 400>}, {pipeline_mode = #tpu.pipeline_mode<synchronous>, transform_indices = @transform_2, window_bounds = array<i64: 8, 1>}, {pipeline_mode = #tpu.pipeline_mode<synchronous>, transform_indices = @transform_3, window_bounds = array<i64: 8, 72>}, {pipeline_mode = #tpu.pipeline_mode<synchronous>, transform_indices = @transform_4, window_bounds = array<i64: 8, 1>}, {pipeline_mode = #tpu.pipeline_mode<synchronous>, transform_indices = @transform_5, window_bounds = array<i64: 1, 1296>}, {transform_indices = @transform_6, window_bounds = array<i64: 1, 8, 1296>}]} {
    %c0 = arith.constant 0 : index
    %c0_0 = arith.constant 0 : index
    %c0_1 = arith.constant 0 : index
    %0 = vector.load %arg1[%c0, %c0_0, %c0_1] : memref<1x16x1296xbf16, #tpu.memory_space<vmem>>, vector<1x16x1296xbf16>
    %1 = vector.shape_cast %0 : vector<1x16x1296xbf16> to vector<16x1296xbf16>
    %2 = vector.extract_strided_slice %1 {offsets = [0, 0], sizes = [16, 1222], strides = [1, 1]} : vector<16x1296xbf16> to vector<16x1222xbf16>
    %c0_2 = arith.constant 0 : index
    %c74 = arith.constant 74 : index
    %3 = vector.load %arg8[%c0_2, %c74] : memref<400x1296xbf16, #tpu.memory_space<vmem>>, vector<16x1222xbf16>
    tpu.vector_store %arg8[%c0_2, %c74], %2 {strides = array<i32>} : memref<400x1296xbf16, #tpu.memory_space<vmem>>, vector<16x1222xbf16>,
    %4 = vector.extract_strided_slice %1 {offsets = [0, 0], sizes = [16, 1223], strides = [1, 1]} : vector<16x1296xbf16> to vector<16x1223xbf16>
    %c16 = arith.constant 16 : index
    %c73 = arith.constant 73 : index
    %5 = vector.load %arg8[%c16, %c73] : memref<400x1296xbf16, #tpu.memory_space<vmem>>, vector<16x1223xbf16>
    tpu.vector_store %arg8[%c16, %c73], %4 {strides = array<i32>} : memref<400x1296xbf16, #tpu.memory_space<vmem>>, vector<16x1223xbf16>,
    %6 = vector.extract_strided_slice %1 {offsets = [0, 0], sizes = [16, 1224], strides = [1, 1]} : vector<16x1296xbf16> to vector<16x1224xbf16>
    %c32 = arith.constant 32 : index
    %c72 = arith.constant 72 : index
    %7 = vector.load %arg8[%c32, %c72] : memref<400x1296xbf16, #tpu.memory_space<vmem>>, vector<16x1224xbf16>
    tpu.vector_store %arg8[%c32, %c72], %6 {strides = array<i32>} : memref<400x1296xbf16, #tpu.memory_space<vmem>>, vector<16x1224xbf16>,
    %8 = vector.extract_strided_slice %1 {offsets = [0, 0], sizes = [16, 1225], strides = [1, 1]} : vector<16x1296xbf16> to vector<16x1225xbf16>
    %c48 = arith.constant 48 : index
    %c71 = arith.constant 71 : index
    %9 = vector.load %arg8[%c48, %c71] : memref<400x1296xbf16, #tpu.memory_space<vmem>>, vector<16x1225xbf16>
    tpu.vector_store %arg8[%c48, %c71], %8 {strides = array<i32>} : memref<400x1296xbf16, #tpu.memory_space<vmem>>, vector<16x1225xbf16>,
    %10 = vector.extract_strided_slice %1 {offsets = [0, 0], sizes = [16, 1226], strides = [1, 1]} : vector<16x1296xbf16> to vector<16x1226xbf16>
    %c64 = arith.constant 64 : index
    %c70 = arith.constant 70 : index
    %11 = vector.load %arg8[%c64, %c70] : memref<400x1296xbf16, #tpu.memory_space<vmem>>, vector<16x1226xbf16>
    tpu.vector_store %arg8[%c64, %c70], %10 {strides = array<i32>} : memref<400x1296xbf16, #tpu.memory_space<vmem>>, vector<16x1226xbf16>,
    %12 = vector.extract_strided_slice %1 {offsets = [0, 0], sizes = [16, 1258], strides = [1, 1]} : vector<16x1296xbf16> to vector<16x1258xbf16>
    %c80 = arith.constant 80 : index
    %c38 = arith.constant 38 : index
    %13 = vector.load %arg8[%c80, %c38] : memref<400x1296xbf16, #tpu.memory_space<vmem>>, vector<16x1258xbf16>
    tpu.vector_store %arg8[%c80, %c38], %12 {strides = array<i32>} : memref<400x1296xbf16, #tpu.memory_space<vmem>>, vector<16x1258xbf16>,
    %14 = vector.extract_strided_slice %1 {offsets = [0, 0], sizes = [16, 1259], strides = [1, 1]} : vector<16x1296xbf16> to vector<16x1259xbf16>
    %c96 = arith.constant 96 : index
    %c37 = arith.constant 37 : index
    %15 = vector.load %arg8[%c96, %c37] : memref<400x1296xbf16, #tpu.memory_space<vmem>>, vector<16x1259xbf16>
    tpu.vector_store %arg8[%c96, %c37], %14 {strides = array<i32>} : memref<400x1296xbf16, #tpu.memory_space<vmem>>, vector<16x1259xbf16>,
    %16 = vector.extract_strided_slice %1 {offsets = [0, 0], sizes = [16, 1260], strides = [1, 1]} : vector<16x1296xbf16> to vector<16x1260xbf16>
    %c112 = arith.constant 112 : index
    %c36 = arith.constant 36 : index
    %17 = vector.load %arg8[%c112, %c36] : memref<400x1296xbf16, #tpu.memory_space<vmem>>, vector<16x1260xbf16>
    tpu.vector_store %arg8[%c112, %c36], %16 {strides = array<i32>} : memref<400x1296xbf16, #tpu.memory_space<vmem>>, vector<16x1260xbf16>,
    %18 = vector.extract_strided_slice %1 {offsets = [0, 0], sizes = [16, 1261], strides = [1, 1]} : vector<16x1296xbf16> to vector<16x1261xbf16>
    %c128 = arith.constant 128 : index
    %c35 = arith.constant 35 : index
    %19 = vector.load %arg8[%c128, %c35] : memref<400x1296xbf16, #tpu.memory_space<vmem>>, vector<16x1261xbf16>
    tpu.vector_store %arg8[%c128, %c35], %18 {strides = array<i32>} : memref<400x1296xbf16, #tpu.memory_space<vmem>>, vector<16x1261xbf16>,
    %20 = vector.extract_strided_slice %1 {offsets = [0, 0], sizes = [16, 1262], strides = [1, 1]} : vector<16x1296xbf16> to vector<16x1262xbf16>
    %c144 = arith.constant 144 : index
    %c34 = arith.constant 34 : index
    %21 = vector.load %arg8[%c144, %c34] : memref<400x1296xbf16, #tpu.memory_space<vmem>>, vector<16x1262xbf16>
    tpu.vector_store %arg8[%c144, %c34], %20 {strides = array<i32>} : memref<400x1296xbf16, #tpu.memory_space<vmem>>, vector<16x1262xbf16>,
    %22 = vector.extract_strided_slice %1 {offsets = [0, 0], sizes = [16, 1294], strides = [1, 1]} : vector<16x1296xbf16> to vector<16x1294xbf16>
    %c160 = arith.constant 160 : index
    %c2 = arith.constant 2 : index
    %23 = vector.load %arg8[%c160, %c2] : memref<400x1296xbf16, #tpu.memory_space<vmem>>, vector<16x1294xbf16>
    tpu.vector_store %arg8[%c160, %c2], %22 {strides = array<i32>} : memref<400x1296xbf16, #tpu.memory_space<vmem>>, vector<16x1294xbf16>,
    %24 = vector.extract_strided_slice %1 {offsets = [0, 0], sizes = [16, 1295], strides = [1, 1]} : vector<16x1296xbf16> to vector<16x1295xbf16>
    %c176 = arith.constant 176 : index
    %c1 = arith.constant 1 : index
    %25 = vector.load %arg8[%c176, %c1] : memref<400x1296xbf16, #tpu.memory_space<vmem>>, vector<16x1295xbf16>
    tpu.vector_store %arg8[%c176, %c1], %24 {strides = array<i32>} : memref<400x1296xbf16, #tpu.memory_space<vmem>>, vector<16x1295xbf16>,
    %c192 = arith.constant 192 : index
    %c0_3 = arith.constant 0 : index
    %26 = vector.load %arg8[%c192, %c0_3] : memref<400x1296xbf16, #tpu.memory_space<vmem>>, vector<16x1296xbf16>
    tpu.vector_store %arg8[%c192, %c0_3], %1 {strides = array<i32>} : memref<400x1296xbf16, #tpu.memory_space<vmem>>, vector<16x1296xbf16>,
    %27 = vector.extract_strided_slice %1 {offsets = [0, 1], sizes = [16, 1295], strides = [1, 1]} : vector<16x1296xbf16> to vector<16x1295xbf16>
    %c208 = arith.constant 208 : index
    %c0_4 = arith.constant 0 : index
    %28 = vector.load %arg8[%c208, %c0_4] : memref<400x1296xbf16, #tpu.memory_space<vmem>>, vector<16x1295xbf16>
    tpu.vector_store %arg8[%c208, %c0_4], %27 {strides = array<i32>} : memref<400x1296xbf16, #tpu.memory_space<vmem>>, vector<16x1295xbf16>,
    %29 = vector.extract_strided_slice %1 {offsets = [0, 2], sizes = [16, 1294], strides = [1, 1]} : vector<16x1296xbf16> to vector<16x1294xbf16>
    %c224 = arith.constant 224 : index
    %c0_5 = arith.constant 0 : index
    %30 = vector.load %arg8[%c224, %c0_5] : memref<400x1296xbf16, #tpu.memory_space<vmem>>, vector<16x1294xbf16>
    tpu.vector_store %arg8[%c224, %c0_5], %29 {strides = array<i32>} : memref<400x1296xbf16, #tpu.memory_space<vmem>>, vector<16x1294xbf16>,
    %31 = vector.extract_strided_slice %1 {offsets = [0, 34], sizes = [16, 1262], strides = [1, 1]} : vector<16x1296xbf16> to vector<16x1262xbf16>
    %c240 = arith.constant 240 : index
    %c0_6 = arith.constant 0 : index
    %32 = vector.load %arg8[%c240, %c0_6] : memref<400x1296xbf16, #tpu.memory_space<vmem>>, vector<16x1262xbf16>
    tpu.vector_store %arg8[%c240, %c0_6], %31 {strides = array<i32>} : memref<400x1296xbf16, #tpu.memory_space<vmem>>, vector<16x1262xbf16>,
    %33 = vector.extract_strided_slice %1 {offsets = [0, 35], sizes = [16, 1261], strides = [1, 1]} : vector<16x1296xbf16> to vector<16x1261xbf16>
    %c256 = arith.constant 256 : index
    %c0_7 = arith.constant 0 : index
    %34 = vector.load %arg8[%c256, %c0_7] : memref<400x1296xbf16, #tpu.memory_space<vmem>>, vector<16x1261xbf16>
    tpu.vector_store %arg8[%c256, %c0_7], %33 {strides = array<i32>} : memref<400x1296xbf16, #tpu.memory_space<vmem>>, vector<16x1261xbf16>,
    %35 = vector.extract_strided_slice %1 {offsets = [0, 36], sizes = [16, 1260], strides = [1, 1]} : vector<16x1296xbf16> to vector<16x1260xbf16>
    %c272 = arith.constant 272 : index
    %c0_8 = arith.constant 0 : index
    %36 = vector.load %arg8[%c272, %c0_8] : memref<400x1296xbf16, #tpu.memory_space<vmem>>, vector<16x1260xbf16>
    tpu.vector_store %arg8[%c272, %c0_8], %35 {strides = array<i32>} : memref<400x1296xbf16, #tpu.memory_space<vmem>>, vector<16x1260xbf16>,
    %37 = vector.extract_strided_slice %1 {offsets = [0, 37], sizes = [16, 1259], strides = [1, 1]} : vector<16x1296xbf16> to vector<16x1259xbf16>
    %c288 = arith.constant 288 : index
    %c0_9 = arith.constant 0 : index
    %38 = vector.load %arg8[%c288, %c0_9] : memref<400x1296xbf16, #tpu.memory_space<vmem>>, vector<16x1259xbf16>
    tpu.vector_store %arg8[%c288, %c0_9], %37 {strides = array<i32>} : memref<400x1296xbf16, #tpu.memory_space<vmem>>, vector<16x1259xbf16>,
    %39 = vector.extract_strided_slice %1 {offsets = [0, 38], sizes = [16, 1258], strides = [1, 1]} : vector<16x1296xbf16> to vector<16x1258xbf16>
    %c304 = arith.constant 304 : index
    %c0_10 = arith.constant 0 : index
    %40 = vector.load %arg8[%c304, %c0_10] : memref<400x1296xbf16, #tpu.memory_space<vmem>>, vector<16x1258xbf16>
    tpu.vector_store %arg8[%c304, %c0_10], %39 {strides = array<i32>} : memref<400x1296xbf16, #tpu.memory_space<vmem>>, vector<16x1258xbf16>,
    %41 = vector.extract_strided_slice %1 {offsets = [0, 70], sizes = [16, 1226], strides = [1, 1]} : vector<16x1296xbf16> to vector<16x1226xbf16>
    %c320 = arith.constant 320 : index
    %c0_11 = arith.constant 0 : index
    %42 = vector.load %arg8[%c320, %c0_11] : memref<400x1296xbf16, #tpu.memory_space<vmem>>, vector<16x1226xbf16>
    tpu.vector_store %arg8[%c320, %c0_11], %41 {strides = array<i32>} : memref<400x1296xbf16, #tpu.memory_space<vmem>>, vector<16x1226xbf16>,
    %43 = vector.extract_strided_slice %1 {offsets = [0, 71], sizes = [16, 1225], strides = [1, 1]} : vector<16x1296xbf16> to vector<16x1225xbf16>
    %c336 = arith.constant 336 : index
    %c0_12 = arith.constant 0 : index
    %44 = vector.load %arg8[%c336, %c0_12] : memref<400x1296xbf16, #tpu.memory_space<vmem>>, vector<16x1225xbf16>
    tpu.vector_store %arg8[%c336, %c0_12], %43 {strides = array<i32>} : memref<400x1296xbf16, #tpu.memory_space<vmem>>, vector<16x1225xbf16>,
    %45 = vector.extract_strided_slice %1 {offsets = [0, 72], sizes = [16, 1224], strides = [1, 1]} : vector<16x1296xbf16> to vector<16x1224xbf16>
    %c352 = arith.constant 352 : index
    %c0_13 = arith.constant 0 : index
    %46 = vector.load %arg8[%c352, %c0_13] : memref<400x1296xbf16, #tpu.memory_space<vmem>>, vector<16x1224xbf16>
    tpu.vector_store %arg8[%c352, %c0_13], %45 {strides = array<i32>} : memref<400x1296xbf16, #tpu.memory_space<vmem>>, vector<16x1224xbf16>,
    %47 = vector.extract_strided_slice %1 {offsets = [0, 73], sizes = [16, 1223], strides = [1, 1]} : vector<16x1296xbf16> to vector<16x1223xbf16>
    %c368 = arith.constant 368 : index
    %c0_14 = arith.constant 0 : index
    %48 = vector.load %arg8[%c368, %c0_14] : memref<400x1296xbf16, #tpu.memory_space<vmem>>, vector<16x1223xbf16>
    tpu.vector_store %arg8[%c368, %c0_14], %47 {strides = array<i32>} : memref<400x1296xbf16, #tpu.memory_space<vmem>>, vector<16x1223xbf16>,
    %49 = vector.extract_strided_slice %1 {offsets = [0, 74], sizes = [16, 1222], strides = [1, 1]} : vector<16x1296xbf16> to vector<16x1222xbf16>
    %c384 = arith.constant 384 : index
    %c0_15 = arith.constant 0 : index
    %50 = vector.load %arg8[%c384, %c0_15] : memref<400x1296xbf16, #tpu.memory_space<vmem>>, vector<16x1222xbf16>
    tpu.vector_store %arg8[%c384, %c0_15], %49 {strides = array<i32>} : memref<400x1296xbf16, #tpu.memory_space<vmem>>, vector<16x1222xbf16>,
    %c0_16 = arith.constant 0 : index
    %c0_17 = arith.constant 0 : index
    %51 = vector.load %arg2[%c0_16, %c0_17] : memref<16x400xbf16, #tpu.memory_space<vmem>>, vector<16x400xbf16>
    %c0_18 = arith.constant 0 : index
    %c0_19 = arith.constant 0 : index
    %52 = vector.load %arg8[%c0_18, %c0_19] : memref<400x1296xbf16, #tpu.memory_space<vmem>>, vector<400x1296xbf16>
    %cst = arith.constant dense<0.000000e+00> : vector<16x1296xf32>
    %53 = tpu.matmul %51, %52, %cst {dimension_numbers = #tpu.dot_dimension_numbers<[1], [0], [0], [1], [0, 0, 1, 1], [], []>} : vector<16x400xbf16>, vector<400x1296xbf16>, vector<16x1296xf32> -> vector<16x1296xf32>
    %c0_20 = arith.constant 0 : index
    %c0_21 = arith.constant 0 : index
    %54 = vector.load %arg6[%c0_20, %c0_21] : memref<1x1296xf32, #tpu.memory_space<vmem>>, vector<1x1296xf32>
    %cst_22 = arith.constant 0.000000e+00 : f32
    %55 = vector.broadcast %cst_22 : f32 to vector<1x1296xf32>
    %56 = arith.cmpf ogt, %54, %55 : vector<1x1296xf32>
    %57 = vector.extract_strided_slice %53 {offsets = [0, 0], sizes = [8, 1296], strides = [1, 1]} : vector<16x1296xf32> to vector<8x1296xf32>
    %c0_23 = arith.constant 0 : index
    %c0_24 = arith.constant 0 : index
    %58 = vector.load %arg3[%c0_23, %c0_24] : memref<8x1xf32, #tpu.memory_space<vmem>>, vector<8x1xf32>
    %59 = vector.broadcast %58 : vector<8x1xf32> to vector<8x1296xf32>
    %60 = arith.addf %57, %59 : vector<8x1296xf32>
    %cst_25 = arith.constant 0.000000e+00 : f32
    %61 = vector.broadcast %cst_25 : f32 to vector<8x1296xf32>
    %62 = arith.maximumf %60, %61 : vector<8x1296xf32>
    %cst_26 = arith.constant 0.000000e+00 : f32
    %63 = vector.shape_cast %56 : vector<1x1296xi1> to vector<1x1296xi1>
    %64 = vector.broadcast %63 : vector<1x1296xi1> to vector<8x1296xi1>
    %65 = vector.broadcast %cst_26 : f32 to vector<8x1296xf32>
    %66 = arith.select %64, %62, %65 : vector<8x1296xi1>, vector<8x1296xf32>
    %67 = arith.truncf %66 : vector<8x1296xf32> to vector<8x1296xbf16>
    %68 = vector.extract_strided_slice %67 {offsets = [0, 0], sizes = [8, 1259], strides = [1, 1]} : vector<8x1296xbf16> to vector<8x1259xbf16>
    %c0_27 = arith.constant 0 : index
    %c37_28 = arith.constant 37 : index
    %69 = vector.load %arg9[%c0_27, %c37_28] : memref<72x1296xbf16, #tpu.memory_space<vmem>>, vector<8x1259xbf16>
    tpu.vector_store %arg9[%c0_27, %c37_28], %68 {strides = array<i32>} : memref<72x1296xbf16, #tpu.memory_space<vmem>>, vector<8x1259xbf16>,
    %70 = vector.extract_strided_slice %67 {offsets = [0, 0], sizes = [8, 1260], strides = [1, 1]} : vector<8x1296xbf16> to vector<8x1260xbf16>
    %c8 = arith.constant 8 : index
    %c36_29 = arith.constant 36 : index
    %71 = vector.load %arg9[%c8, %c36_29] : memref<72x1296xbf16, #tpu.memory_space<vmem>>, vector<8x1260xbf16>
    tpu.vector_store %arg9[%c8, %c36_29], %70 {strides = array<i32>} : memref<72x1296xbf16, #tpu.memory_space<vmem>>, vector<8x1260xbf16>,
    %72 = vector.extract_strided_slice %67 {offsets = [0, 0], sizes = [8, 1261], strides = [1, 1]} : vector<8x1296xbf16> to vector<8x1261xbf16>
    %c16_30 = arith.constant 16 : index
    %c35_31 = arith.constant 35 : index
    %73 = vector.load %arg9[%c16_30, %c35_31] : memref<72x1296xbf16, #tpu.memory_space<vmem>>, vector<8x1261xbf16>
    tpu.vector_store %arg9[%c16_30, %c35_31], %72 {strides = array<i32>} : memref<72x1296xbf16, #tpu.memory_space<vmem>>, vector<8x1261xbf16>,
    %74 = vector.extract_strided_slice %67 {offsets = [0, 0], sizes = [8, 1295], strides = [1, 1]} : vector<8x1296xbf16> to vector<8x1295xbf16>
    %c24 = arith.constant 24 : index
    %c1_32 = arith.constant 1 : index
    %75 = vector.load %arg9[%c24, %c1_32] : memref<72x1296xbf16, #tpu.memory_space<vmem>>, vector<8x1295xbf16>
    tpu.vector_store %arg9[%c24, %c1_32], %74 {strides = array<i32>} : memref<72x1296xbf16, #tpu.memory_space<vmem>>, vector<8x1295xbf16>,
    %c32_33 = arith.constant 32 : index
    %c0_34 = arith.constant 0 : index
    %76 = vector.load %arg9[%c32_33, %c0_34] : memref<72x1296xbf16, #tpu.memory_space<vmem>>, vector<8x1296xbf16>
    tpu.vector_store %arg9[%c32_33, %c0_34], %67 {strides = array<i32>} : memref<72x1296xbf16, #tpu.memory_space<vmem>>, vector<8x1296xbf16>,
    %77 = vector.extract_strided_slice %67 {offsets = [0, 1], sizes = [8, 1295], strides = [1, 1]} : vector<8x1296xbf16> to vector<8x1295xbf16>
    %c40 = arith.constant 40 : index
    %c0_35 = arith.constant 0 : index
    %78 = vector.load %arg9[%c40, %c0_35] : memref<72x1296xbf16, #tpu.memory_space<vmem>>, vector<8x1295xbf16>
    tpu.vector_store %arg9[%c40, %c0_35], %77 {strides = array<i32>} : memref<72x1296xbf16, #tpu.memory_space<vmem>>, vector<8x1295xbf16>,
    %79 = vector.extract_strided_slice %67 {offsets = [0, 35], sizes = [8, 1261], strides = [1, 1]} : vector<8x1296xbf16> to vector<8x1261xbf16>
    %c48_36 = arith.constant 48 : index
    %c0_37 = arith.constant 0 : index
    %80 = vector.load %arg9[%c48_36, %c0_37] : memref<72x1296xbf16, #tpu.memory_space<vmem>>, vector<8x1261xbf16>
    tpu.vector_store %arg9[%c48_36, %c0_37], %79 {strides = array<i32>} : memref<72x1296xbf16, #tpu.memory_space<vmem>>, vector<8x1261xbf16>,
    %81 = vector.extract_strided_slice %67 {offsets = [0, 36], sizes = [8, 1260], strides = [1, 1]} : vector<8x1296xbf16> to vector<8x1260xbf16>
    %c56 = arith.constant 56 : index
    %c0_38 = arith.constant 0 : index
    %82 = vector.load %arg9[%c56, %c0_38] : memref<72x1296xbf16, #tpu.memory_space<vmem>>, vector<8x1260xbf16>
    tpu.vector_store %arg9[%c56, %c0_38], %81 {strides = array<i32>} : memref<72x1296xbf16, #tpu.memory_space<vmem>>, vector<8x1260xbf16>,
    %83 = vector.extract_strided_slice %67 {offsets = [0, 37], sizes = [8, 1259], strides = [1, 1]} : vector<8x1296xbf16> to vector<8x1259xbf16>
    %c64_39 = arith.constant 64 : index
    %c0_40 = arith.constant 0 : index
    %84 = vector.load %arg9[%c64_39, %c0_40] : memref<72x1296xbf16, #tpu.memory_space<vmem>>, vector<8x1259xbf16>
    tpu.vector_store %arg9[%c64_39, %c0_40], %83 {strides = array<i32>} : memref<72x1296xbf16, #tpu.memory_space<vmem>>, vector<8x1259xbf16>,
    %c0_41 = arith.constant 0 : index
    %c0_42 = arith.constant 0 : index
    %85 = vector.load %arg4[%c0_41, %c0_42] : memref<8x72xbf16, #tpu.memory_space<vmem>>, vector<8x72xbf16>
    %c0_43 = arith.constant 0 : index
    %c0_44 = arith.constant 0 : index
    %86 = vector.load %arg9[%c0_43, %c0_44] : memref<72x1296xbf16, #tpu.memory_space<vmem>>, vector<72x1296xbf16>
    %cst_45 = arith.constant dense<0.000000e+00> : vector<8x1296xf32>
    %87 = tpu.matmul %85, %86, %cst_45 {dimension_numbers = #tpu.dot_dimension_numbers<[1], [0], [0], [1], [0, 0, 1, 1], [], []>} : vector<8x72xbf16>, vector<72x1296xbf16>, vector<8x1296xf32> -> vector<8x1296xf32>
    %88 = vector.extract_strided_slice %53 {offsets = [8, 0], sizes = [8, 1296], strides = [1, 1]} : vector<16x1296xf32> to vector<8x1296xf32>
    %c0_46 = arith.constant 0 : index
    %c0_47 = arith.constant 0 : index
    %89 = vector.load %arg5[%c0_46, %c0_47] : memref<8x1xf32, #tpu.memory_space<vmem>>, vector<8x1xf32>
    %90 = vector.broadcast %89 : vector<8x1xf32> to vector<8x1296xf32>
    %91 = arith.addf %88, %90 : vector<8x1296xf32>
    %92 = arith.addf %87, %91 : vector<8x1296xf32>
    %cst_48 = arith.constant 0.000000e+00 : f32
    %93 = vector.broadcast %cst_48 : f32 to vector<8x1296xf32>
    %94 = arith.maximumf %92, %93 : vector<8x1296xf32>
    %c0_49 = arith.constant 0 : index
    %c0_50 = arith.constant 0 : index
    %c0_51 = arith.constant 0 : index
    %95 = vector.load %arg7[%c0_49, %c0_50, %c0_51] : memref<1x8x1296xf32, #tpu.memory_space<vmem>>, vector<1x8x1296xf32>
    %96 = vector.shape_cast %95 : vector<1x8x1296xf32> to vector<8x1296xf32>
    %97 = vector.shape_cast %94 : vector<8x1296xf32> to vector<1x8x1296xf32>
    tpu.vector_store %arg7[%c0_49, %c0_50, %c0_51], %97 {strides = array<i32>} : memref<1x8x1296xf32, #tpu.memory_space<vmem>>, vector<1x8x1296xf32>,
    return
  }
  func.func @transform_0(%arg0: i32) -> (i32, i32, i32) {
    %c0_i32 = arith.constant 0 : i32
    %c0_i32_0 = arith.constant 0 : i32
    %c0_i32_1 = arith.constant 0 : i32
    return %arg0, %c0_i32, %c0_i32_0 : i32, i32, i32
  }
  func.func @transform_1(%arg0: i32) -> (i32, i32) {
    %c0_i32 = arith.constant 0 : i32
    %c0_i32_0 = arith.constant 0 : i32
    %c0_i32_1 = arith.constant 0 : i32
    return %c0_i32, %c0_i32_0 : i32, i32
  }
  func.func @transform_2(%arg0: i32) -> (i32, i32) {
    %c0_i32 = arith.constant 0 : i32
    %c0_i32_0 = arith.constant 0 : i32
    %c0_i32_1 = arith.constant 0 : i32
    return %c0_i32, %c0_i32_0 : i32, i32
  }
  func.func @transform_3(%arg0: i32) -> (i32, i32) {
    %c0_i32 = arith.constant 0 : i32
    %c0_i32_0 = arith.constant 0 : i32
    %c0_i32_1 = arith.constant 0 : i32
    return %c0_i32, %c0_i32_0 : i32, i32
  }
  func.func @transform_4(%arg0: i32) -> (i32, i32) {
    %c0_i32 = arith.constant 0 : i32
    %c0_i32_0 = arith.constant 0 : i32
    %c0_i32_1 = arith.constant 0 : i32
    return %c0_i32, %c0_i32_0 : i32, i32
  }
  func.func @transform_5(%arg0: i32) -> (i32, i32) {
    %c0_i32 = arith.constant 0 : i32
    %c0_i32_0 = arith.constant 0 : i32
    %c0_i32_1 = arith.constant 0 : i32
    return %c0_i32, %c0_i32_0 : i32, i32
  }
  func.func @transform_6(%arg0: i32) -> (i32, i32, i32) {
    %c0_i32 = arith.constant 0 : i32
    %c0_i32_0 = arith.constant 0 : i32
    %c0_i32_1 = arith.constant 0 : i32
    return %arg0, %c0_i32, %c0_i32_0 : i32, i32, i32
  }
}

</mosaic_0001>

<bundles_post_ra>
// kernel: tpu_custom_call.1
= control target key start
LH: loop header
LB: loop body
LE: loop exit
PB: predicated region body
PF: predicated region fallthrough
CT: control target
= control target key end

     0   :  { %s10684_s0 = inlined_call_operand.hbm [shape: bf16[2,16,1296], index: 0, kind: input, shape index: {}]   ;;  %s10685_s1 = inlined_call_operand.hbm [shape: bf16[16,400], index: 1, kind: input, shape index: {}]   ;;  %s10686_s2 = inlined_call_operand.vmem [shape: f32[8,1], index: 2, kind: input, shape index: {}]   ;;  %s10687_s3 = inlined_call_operand.vmem [shape: bf16[8,72], index: 3, kind: input, shape index: {}]   ;;  %s10688_s4 = inlined_call_operand.vmem [shape: f32[8,1], index: 4, kind: input, shape index: {}]   ;;  %s10689_s5 = inlined_call_operand.vmem [shape: f32[1,1296], index: 5, kind: input, shape index: {}]   ;;  %s10690_s6 = inlined_call_operand.hbm [shape: f32[2,8,1296], index: 6, kind: output, shape index: {}]  }
   0x1   :  { %10787 = sst [smem:[#allocation17_spill]] %s10685_s1 }
   0x2   :  { %11 = vsyncpa [#allocation5], 0 }
   0x3   :  { %13 = vsyncpa [#allocation5 + $0x1], 0 }
   0x4   :  { %14 = vsyncpa [#allocation8], 0 }
   0x5   :  { %15 = vsyncpa [#allocation6], 0 }
   0x6   :  { %17 = vsyncpa [#allocation6 + $0x1], 0  ;;  %s7498_s21 = smov 0   ;;  %s7500_s22 = smov 0  }
   0x7   :  { %s7502_s23 = smov 0   ;;  %s7504_s24 = smov 0  }
   0x8 LB: > { %s7519_s25 = sadd.s32 4294967295, %s7431_s24   ;;  %s5548_s26 = sadd.s32 4294967294, %s7431_s24   ;;  %s7431_s24 = sphi %s7504_s24, %s11046_s24   ;;  %s7427_s23 = sphi %s7502_s23, %s11045_s23   ;;  %s7423_s22 = sphi %s7500_s22, %s11044_s22   ;;  %s7419_s21 = sphi %s7498_s21, %s11043_s21  }
   0x9   : > { %p43_p0 = scmp.ne.s32.totalorder %s7423_s22, %s7419_s21  ;;  %p44_p1 = scmp.eq.s32.totalorder %s7519_s25, 0 }
   0xa   : > { %p172_p2 = scmp.eq.s32.totalorder %s7519_s25, 1  ;;  %p178_p3 = scmp.eq.s32.totalorder %s5548_s26, 1 }
   0xb   : > { %p7528_p4 = por %p44_p1, %p43_p0  ;;  %p5549_p5 = scmp.ge.s32.totalorder %s7431_s24, 1 }
   0xc   : > { %p7533_p6 = por %p178_p3, %p43_p0  ;;  %p185_p7 = scmp.lt.s32.totalorder %s7431_s24, 3 }
   0xd   : > { %s10790_s1 = sld [smem:[#allocation17_spill]]  ;;  %s7433_s9 = smov [#allocation7]  }
   0xe   : > { %p7541_p8 = pnand %p5549_p5, %p185_p7  ;;  %s198_s10 = sshll.u32 %s7433_s9, 4  ;;  %s199_s10 = int_to_ptr.vmem [resolvable:$true] %s198_s10 }
   0xf   : > { %s7551_s11 = sadd.s32 1, %s7431_s24   ;;  %s7434_s12 = smov 256  }
  0x10   : > { %p7207_p9 = pneg %p7541_p8  ;;  %s7435_s13 = smov 16  }
  0x11   : > { %s27_s14 = ssub.s32 %s7431_s24, %s7551_s11  ;;  %s30_s15 = sadd.s32 1, %s7427_s23 }
  0x12   : > { %p7208_p10 = pnand %p7207_p9, %p44_p1  ;;  %p28_p12 = scmp.eq.s32.totalorder %s27_s14, 0 }
  0x13   : > { %s196_s7 = sshll.u32 %s10790_s1, 4  ;;  %p37_p13 = scmp.ne.s32.totalorder %s7427_s23, %s7423_s22  ;;  %s197_s7 = int_to_ptr.hbm [resolvable:$true] %s196_s7 }
  0x14   : > { %7210 = dma.hbm_to_vmem [thread:$0]  (!%p7208_p10), %s197_s7, 512, %s199_s10, [#allocation8], %s7434_s12, %s7434_s12, %s7435_s13  }
  0x15   : > { %p38_p0 = scmp.eq.s32.totalorder %s7431_s24, 0  ;;  %p7220_p3 = scmp.lt.s32.totalorder %s7431_s24, 2 }
  0x16   : > { %s7561_s16 = scalar_select %p28_p12, %s7427_s23, %s30_s15  }
  0x17   : > { %p39_p5 = por %p38_p0, %p37_p13  ;;  %p7565_p7 = por %p172_p2, %p37_p13 }
  0x18   : > { %10792 = sst [smem:[#allocation13_spill]] %s7561_s16  ;;  %s224_s18 = sand.u32 1, %s7427_s23  }
  0x19   : > { %s7196_s19 = smul.u32 88, %s7431_s24  ;;  %p7574_p9 = pnand %p7220_p3, %p39_p5 }
  0x1a   : > { %s7195_s20 = smul.u32 88, %s224_s18  ;;  %s225_s13 = scalar_lea.sflag [#allocation5], %s224_s18 }
  0x1b   : > { %s233_s30 = scalar_lea.hbm %s10684_s0, %s7196_s19  ;;  %p7335_p10 = pneg %p7574_p9 }
  0x1c   : > { %s234_s9 = sshll.u32 %s233_s30, 4  ;;  %s228_s10 = scalar_lea.vmem [#allocation4], %s7195_s20  ;;  %s235_s9 = int_to_ptr.hbm [resolvable:$true] %s234_s9 }
  0x1d   : > { %s236_s12 = sshll.u32 %s228_s10, 4  ;;  %s7331_s14 = sshra.s32 %s235_s9, 4  ;;  %s237_s12 = int_to_ptr.vmem [resolvable:$true] %s236_s12  ;;  %s7332_s14 = int_to_ptr.hbm [resolvable:$true] %s7331_s14 }
  0x1e   : > { %s7333_s15 = scalar_lea.hbm %s7332_s14, 88  ;;  %s7338_s29 = scalar_lea.hbm %s10684_s0, 176 }
  0x1f   : > { %p7334_p2 = scmp.ne.s32.totalorder %s7332_s14, %s7333_s15  ;;  %p7339_p0 = scmp.lt.s32.totalorder %s7332_s14, %s10684_s0 }
  0x20   : > { %p7340_p3 = scmp.lt.s32.totalorder %s7338_s29, %s7333_s15 }
  0x21   : > { %p7336_p12 = pnand %p7335_p10, %p7334_p2 }
  0x22   : > { %p7341_p5 = por %p7340_p3, %p7339_p0 }
  0x23   : > { %p7337_p13 = pneg %p7336_p12 }
  0x25   : > { %p7342_p11 = pnand %p7341_p5, %p7337_p13 }
  0x27   : > { %7345 = shalt.err (!%p7342_p11)
}
  0x28   : > { %s7436_s18 = smov 704   ;;  %s7437_s20 = smov 44  }
  0x29   : > { %7214 = dma.hbm_to_vmem [thread:$0]  (!%p7574_p9), %s235_s9, 1408, %s237_s12, %s225_s13, %s7436_s18, %s7436_s18, %s7437_s20  }
  0x2a   : > { %248 = sbr.rel (%p7541_p8) target bundleno = 1413 (0x585), region = 44 }
  0x2f   : > { %s7591_s30 = sand.u32 1, %s7423_s22  }
  0x30   : > { %s10691_s1 = smul.u32 88, %s7591_s30  ;;  %s251_s16 = scalar_lea.sflag [#allocation5], %s7591_s30 }
  0x32   : > { %s7597_s10 = scalar_lea.vmem [#allocation4], %s10691_s1 }
  0x33   : > { %7406 = dma.done.wait (%p7528_p4), %s251_s16, 1408  }
  0x34   : > { %7408 = vsyncadd (%p7528_p4), %s251_s16, 4294965888 }
  0x35   : > { %7410 = dma.done.wait (%p44_p1), [#allocation8], 512  }
  0x36   : > { %7412 = vsyncadd (%p44_p1), [#allocation8], 4294966784  ;;  %v7608_v0 = vld [vmem:[%s7597_s10 + $0x20] sm:$0xff]  ;;  %v7611_v1 = vld [vmem:[%s7597_s10 + $0x10] sm:$0xff]  ;;  %s7438_s27 = smov 74   ;;  %s7439_s8 = smov 73  }
  0x37   : > { %v7614_v2 = vld [vmem:[%s7597_s10] sm:$0xff]  ;;  %320 = vrot.lane.b32.xlu2 %v7608_v0, %s7438_s27  ;;  %1233 = vst [vmem:[#allocation2 + $0x440] sm:$0xff] %v7608_v0  ;;  %316 = vrot.lane.b32.xlu1 %v7611_v1, %s7438_s27  ;;  %v7626_v3 = vld [vmem:[%s7597_s10 + $0x2c] sm:$0xff]  ;;  %s7440_s7 = smov 72   ;;  %s7441_s9 = smov 71   ;;  %vm10698_vm0 = vcmask 125952  }
  0x38   : > { %1231 = vst [vmem:[#allocation2 + $0x430] sm:$0xff] %v7611_v1  ;;  %312 = vrot.lane.b32.xlu0 %v7614_v2, %s7438_s27  ;;  %v7630_v4 = vld [vmem:[%s7597_s10 + $0x18] sm:$0xff]  ;;  %v7634_v5 = vld [vmem:[%s7597_s10 + $0x8] sm:$0xff]  ;;  %vm374_vm1 = vcmask 1044048   ;;  %vm375_vm2 = vcmask 1047556   ;;  %vm342_vm3 = vcmask 605184  }
  0x39   : > { %1229 = vst [vmem:[#allocation2 + $0x420] sm:$0xff] %v7614_v2  ;;  %v7638_v6 = vld [vmem:[%s7597_s10 + $0x44] sm:$0xff]  ;;  %v7642_v7 = vld [vmem:[%s7597_s10 + $0x3c] sm:$0xff]  ;;  %v7646_v8 = vld [vmem:[%s7597_s10 + $0x34] sm:$0xff]  ;;  %s7442_s12 = smov 70   ;;  %vm344_vm5 = vcmask 1043456  }
  0x3a   : > { %1235 = vst [vmem:[#allocation2 + $0x44c] sm:$0xff] %v7626_v3  ;;  %v7654_v9 = vld [vmem:[%s7597_s10 + $0x4c] sm:$0xff]  ;;  %vm7698_vm4 = vmor %vm375_vm2, %vm374_vm1  ;;  %s7443_s13 = smov 38   ;;  %vm526_vm6 = vcmask 1044032   ;;  %vm451_vm7 = vcmask 1044040   ;;  %vm10692_vm8 = vcmask 588800  }
  0x3b   : > { %1232 = vst [vmem:[#allocation2 + $0x438] sm:$0xff] %v7630_v4  ;;  %vm420_vm9 = vcmask 596992   ;;  %vm7769_vm10 = vmor %vm375_vm2, %vm526_vm6  ;;  %s7444_s14 = smov 37   ;;  %vm601_vm12 = vcmask 1044024   ;;  %vm570_vm13 = vcmask 580608   ;;  %s7445_s15 = smov 36  }
  0x3c   : > { %1230 = vst [vmem:[#allocation2 + $0x428] sm:$0xff] %v7634_v5  ;;  %vm7775_vm11 = vmor %vm375_vm2, %vm451_vm7  ;;  %s7446_s19 = smov 35   ;;  %vm751_vm15 = vcmask 1043760   ;;  %vm676_vm1 = vcmask 1044016   ;;  %s7447_s26 = smov 34  }
  0x3d   : > { %1238 = vst [vmem:[#allocation2 + $0x464] sm:$0xff] %v7638_v6  ;;  %vm7873_vm14 = vmor %vm375_vm2, %vm601_vm12  ;;  %s7448_s29 = smov 2   ;;  %s7449_s18 = smov 1   ;;  %vm976_vm12 = vcmask 1043736  }
  0x3e   : > { %1237 = vst [vmem:[#allocation2 + $0x45c] sm:$0xff] %v7642_v7  ;;  %vm7972_vm6 = vmor %vm375_vm2, %vm751_vm15  ;;  %vm10694_vm15 = vcmask 293888   ;;  %s7450_s20 = smov 55   ;;  %s7451_s16 = smov 56  }
  0x3f   : > { %322 = vrot.lane.b32.xlu2 %v7626_v3, %s7438_s27  ;;  %318 = vrot.lane.b32.xlu1 %v7630_v4, %s7438_s27  ;;  %1236 = vst [vmem:[#allocation2 + $0x454] sm:$0xff] %v7646_v8  ;;  %vm7978_vm7 = vmor %vm375_vm2, %vm676_vm1  ;;  %s7461_s1 = smov 54  }
  0x40   : > { %314 = vrot.lane.b32.xlu0 %v7634_v5, %s7438_s27  ;;  %1239 = vst [vmem:[#allocation2 + $0x46c] sm:$0xff] %v7654_v9  ;;  %vm8185_vm1 = vmor %vm375_vm2, %vm976_vm12  ;;  %vm1101_vm12 = vcmask 15360  }
  0x47   : > { %328 = vrot.lane.b32.xlu2 %v7638_v6, %s7438_s27  ;;  %326 = vrot.lane.b32.xlu1 %v7642_v7, %s7438_s27 }
  0x48   : > { %324 = vrot.lane.b32.xlu0 %v7646_v8, %s7438_s27 }
  0x4f   : > { %392 = vrot.lane.b32.xlu2 %v7634_v5, %s7439_s8  ;;  %390 = vrot.lane.b32.xlu1 %v7614_v2, %s7439_s8 }
  0x50   : > { %330 = vrot.lane.b32.xlu0 %v7654_v9, %s7438_s27  ;;  %s7453_s27 = smov 94  }
  0x57   : > { %398 = vrot.lane.b32.xlu2 %v7608_v0, %s7439_s8  ;;  %396 = vrot.lane.b32.xlu1 %v7630_v4, %s7439_s8 }
  0x58   : > { %394 = vrot.lane.b32.xlu0 %v7611_v1, %s7439_s8 }
  0x5f   : > { %404 = vrot.lane.b32.xlu2 %v7642_v7, %s7439_s8  ;;  %402 = vrot.lane.b32.xlu1 %v7646_v8, %s7439_s8 }
  0x60   : > { %400 = vrot.lane.b32.xlu0 %v7626_v3, %s7439_s8 }
  0x67   : > { %465 = vrot.lane.b32.xlu2 %v7614_v2, %s7440_s7  ;;  %408 = vrot.lane.b32.xlu1 %v7654_v9, %s7439_s8 }
  0x68   : > { %406 = vrot.lane.b32.xlu0 %v7638_v6, %s7439_s8  ;;  %s7454_s8 = smov 58  }
  0x6f   : > { %471 = vrot.lane.b32.xlu2 %v7630_v4, %s7440_s7  ;;  %469 = vrot.lane.b32.xlu1 %v7611_v1, %s7440_s7 }
  0x70   : > { %467 = vrot.lane.b32.xlu0 %v7634_v5, %s7440_s7 }
  0x77   : > { %477 = vrot.lane.b32.xlu2 %v7646_v8, %s7440_s7  ;;  %475 = vrot.lane.b32.xlu1 %v7626_v3, %s7440_s7 }
  0x78   : > { %473 = vrot.lane.b32.xlu0 %v7608_v0, %s7440_s7 }
  0x7f   : > { %483 = vrot.lane.b32.xlu2 %v7654_v9, %s7440_s7  ;;  %481 = vrot.lane.b32.xlu1 %v7638_v6, %s7440_s7 }
  0x80   : > { %479 = vrot.lane.b32.xlu0 %v7642_v7, %s7440_s7  ;;  %s7455_s7 = smov 126  }
  0x87   : > { %544 = vrot.lane.b32.xlu2 %v7611_v1, %s7441_s9  ;;  %542 = vrot.lane.b32.xlu1 %v7634_v5, %s7441_s9 }
  0x88   : > { %540 = vrot.lane.b32.xlu0 %v7614_v2, %s7441_s9 }
  0x8f   : > { %550 = vrot.lane.b32.xlu2 %v7626_v3, %s7441_s9  ;;  %548 = vrot.lane.b32.xlu1 %v7608_v0, %s7441_s9 }
  0x90   : > { %546 = vrot.lane.b32.xlu0 %v7630_v4, %s7441_s9 }
  0x91   : > { %v321_v10 = vpop.permute.xlu2 %320 }
  0x92   : > { %v336_v11 = vrot.slane %v321_v10, 4 }
  0x94   : > { %383 = vst.msk [vmem:[#allocation2 + $0x28] sm:$0xf] %vm10698_vm0, %v336_v11 }
  0x97   : > { %556 = vrot.lane.b32.xlu2 %v7638_v6, %s7441_s9  ;;  %554 = vrot.lane.b32.xlu1 %v7642_v7, %s7441_s9 }
  0x98   : > { %552 = vrot.lane.b32.xlu0 %v7646_v8, %s7441_s9 }
  0x99   : > { %v323_v12 = vpop.permute.xlu2 %322 }
  0x9a   : > { %v337_v14 = vrot.slane %v323_v12, 4 }
  0x9c   : > { %v353_v15 = vsel %vm342_vm3, %v337_v14, %v323_v12 }
  0x9d   : > { %384 = vst.msk [vmem:[#allocation2 + $0x2c] sm:$0xff] %vm7698_vm4, %v353_v15 }
  0x9f   : > { %617 = vrot.lane.b32.xlu2 %v7634_v5, %s7442_s12  ;;  %615 = vrot.lane.b32.xlu1 %v7614_v2, %s7442_s12 }
  0xa0   : > { %558 = vrot.lane.b32.xlu0 %v7654_v9, %s7441_s9  ;;  %s7456_s9 = smov 90  }
  0xa1   : > { %v7710_v16 = vpop.permute.xlu2 %328 }
  0xa2   : > { %v340_v37 = vrot.slane %v7710_v16, 4 }
  0xa7   : > { %623 = vrot.lane.b32.xlu2 %v7608_v0, %s7442_s12  ;;  %621 = vrot.lane.b32.xlu1 %v7630_v4, %s7442_s12 }
  0xa8   : > { %619 = vrot.lane.b32.xlu0 %v7611_v1, %s7442_s12 }
  0xa9   : > { %v317_v17 = vpop.permute.xlu1 %316  ;;  %v7718_v18 = vpop.permute.xlu2 %392 }
  0xaa   : > { %v313_v19 = vpop.permute.xlu0 %312  ;;  %v334_v24 = vrot.slane %v317_v17, 4  ;;  %v411_v49 = vrot.slane %v7718_v18, 4 }
  0xab   : > { %v332_v20 = vrot.slane %v313_v19, 4 }
  0xad   : > { %v343_v21 = vsel %vm342_vm3, %v332_v20, %v313_v19 }
  0xae   : > { %377 = vst.msk [vmem:[#allocation2] sm:$0xff] %vm7698_vm4, %v343_v21  ;;  %vm645_vm4 = vcmask 572416  }
  0xaf   : > { %629 = vrot.lane.b32.xlu2 %v7642_v7, %s7442_s12  ;;  %627 = vrot.lane.b32.xlu1 %v7646_v8, %s7442_s12 }
  0xb0   : > { %625 = vrot.lane.b32.xlu0 %v7626_v3, %s7442_s12 }
  0xb1   : > { %v319_v22 = vpop.permute.xlu1 %318  ;;  %v7729_v23 = vpop.permute.xlu2 %398 }
  0xb2   : > { %v335_v25 = vrot.slane %v319_v22, 4  ;;  %v414_v26 = vrot.slane %v7729_v23, 4  ;;  %v315_v27 = vpop.permute.xlu0 %314 }
  0xb3   : > { %v333_v28 = vrot.slane %v315_v27, 4 }
  0xb4   : > { %v349_v29 = vsel %vm344_vm5, %v334_v24, %v335_v25  ;;  %v351_v30 = vsel %vm344_vm5, %v335_v25, %v336_v11  ;;  %458 = vst.msk [vmem:[#allocation2 + $0x80] sm:$0xf] %vm10698_vm0, %v414_v26 }
  0xb5   : > { %v350_v31 = vsel %vm342_vm3, %v349_v29, %v319_v22  ;;  %v352_v32 = vsel %vm342_vm3, %v351_v30, %v321_v10  ;;  %v345_v33 = vsel %vm344_vm5, %v332_v20, %v333_v28  ;;  %v347_v34 = vsel %vm344_vm5, %v333_v28, %v334_v24 }
  0xb6   : > { %380 = vst [vmem:[#allocation2 + $0x18] sm:$0xff] %v350_v31  ;;  %v346_v35 = vsel %vm342_vm3, %v345_v33, %v315_v27  ;;  %v348_v36 = vsel %vm342_vm3, %v347_v34, %v317_v17 }
  0xb7   : > { %381 = vst [vmem:[#allocation2 + $0x20] sm:$0xff] %v352_v32  ;;  %690 = vrot.lane.b32.xlu2 %v7614_v2, %s7443_s13  ;;  %633 = vrot.lane.b32.xlu1 %v7654_v9, %s7442_s12 }
  0xb8   : > { %378 = vst [vmem:[#allocation2 + $0x8] sm:$0xff] %v346_v35  ;;  %631 = vrot.lane.b32.xlu0 %v7638_v6, %s7442_s12  ;;  %s7457_s12 = smov 127  }
  0xb9   : > { %379 = vst [vmem:[#allocation2 + $0x10] sm:$0xff] %v348_v36  ;;  %v327_v38 = vpop.permute.xlu1 %326  ;;  %v7750_v39 = vpop.permute.xlu2 %404 }
  0xba   : > { %v339_v40 = vrot.slane %v327_v38, 4  ;;  %v325_v41 = vpop.permute.xlu0 %324  ;;  %v417_v21 = vrot.slane %v7750_v39, 4 }
  0xbb   : > { %v338_v42 = vrot.slane %v325_v41, 4 }
  0xbc   : > { %v358_v43 = vsel %vm344_vm5, %v339_v40, %v340_v37 }
  0xbd   : > { %v359_v44 = vsel %vm342_vm3, %v358_v43, %v7710_v16  ;;  %v354_v45 = vsel %vm344_vm5, %v337_v14, %v338_v42  ;;  %v356_v46 = vsel %vm344_vm5, %v338_v42, %v339_v40 }
  0xbe   : > { %387 = vst [vmem:[#allocation2 + $0x44] sm:$0xff] %v359_v44  ;;  %v355_v47 = vsel %vm342_vm3, %v354_v45, %v325_v41  ;;  %v357_v48 = vsel %vm342_vm3, %v356_v46, %v327_v38 }
  0xbf   : > { %385 = vst [vmem:[#allocation2 + $0x34] sm:$0xff] %v355_v47  ;;  %696 = vrot.lane.b32.xlu2 %v7630_v4, %s7443_s13  ;;  %694 = vrot.lane.b32.xlu1 %v7611_v1, %s7443_s13 }
  0xc0   : > { %386 = vst [vmem:[#allocation2 + $0x3c] sm:$0xff] %v357_v48  ;;  %692 = vrot.lane.b32.xlu0 %v7634_v5, %s7443_s13 }
  0xc1   : > { %v7766_v50 = vpop.permute.xlu2 %465  ;;  %v391_v51 = vpop.permute.xlu1 %390 }
  0xc2   : > { %v485_v53 = vrot.slane %v7766_v50, 4  ;;  %v410_v54 = vrot.slane %v391_v51, 4  ;;  %v331_v55 = vpop.permute.xlu0 %330 }
  0xc3   : > { %v341_v57 = vrot.slane %v331_v55, 4 }
  0xc4   : > { %v496_v58 = vsel %vm10692_vm8, %v485_v53, %v7766_v50  ;;  %v421_v59 = vsel %vm420_vm9, %v410_v54, %v391_v51  ;;  %v422_v60 = vsel %vm344_vm5, %v410_v54, %v411_v49 }
  0xc5   : > { %528 = vst.msk [vmem:[#allocation2 + $0xb0] sm:$0xff] %vm7769_vm10, %v496_v58  ;;  %v423_v61 = vsel %vm420_vm9, %v422_v60, %v7718_v18  ;;  %v360_v62 = vsel %vm344_vm5, %v340_v37, %v341_v57 }
  0xc6   : > { %453 = vst.msk [vmem:[#allocation2 + $0x58] sm:$0xff] %vm7775_vm11, %v421_v59  ;;  %v361_v63 = vsel %vm342_vm3, %v360_v62, %v331_v55  ;;  %vm720_vm3 = vcmask 310272  }
  0xc7   : > { %454 = vst [vmem:[#allocation2 + $0x60] sm:$0xff] %v423_v61  ;;  %702 = vrot.lane.b32.xlu2 %v7646_v8, %s7443_s13  ;;  %700 = vrot.lane.b32.xlu1 %v7626_v3, %s7443_s13 }
  0xc8   : > { %388 = vst [vmem:[#allocation2 + $0x4c] sm:$0xff] %v361_v63  ;;  %698 = vrot.lane.b32.xlu0 %v7608_v0, %s7443_s13 }
  0xc9   : > { %389 = vst.msk [vmem:[#allocation2 + $0x54] sm:$0xf] %vm10698_vm0, %v341_v57  ;;  %v7800_v10 = vpop.permute.xlu2 %471  ;;  %v397_v11 = vpop.permute.xlu1 %396 }
  0xca   : > { %v413_v12 = vrot.slane %v397_v11, 4  ;;  %v395_v13 = vpop.permute.xlu0 %394  ;;  %v488_v42 = vrot.slane %v7800_v10, 4 }
  0xcb   : > { %v412_v14 = vrot.slane %v395_v13, 4 }
  0xcc   : > { %v428_v15 = vsel %vm344_vm5, %v413_v12, %v414_v26 }
  0xcd   : > { %v429_v16 = vsel %vm420_vm9, %v428_v15, %v7729_v23  ;;  %v424_v17 = vsel %vm344_vm5, %v411_v49, %v412_v14  ;;  %v426_v18 = vsel %vm344_vm5, %v412_v14, %v413_v12 }
  0xce   : > { %457 = vst [vmem:[#allocation2 + $0x78] sm:$0xff] %v429_v16  ;;  %v425_v19 = vsel %vm420_vm9, %v424_v17, %v395_v13  ;;  %v427_v20 = vsel %vm420_vm9, %v426_v18, %v397_v11 }
  0xcf   : > { %455 = vst [vmem:[#allocation2 + $0x68] sm:$0xff] %v425_v19  ;;  %708 = vrot.lane.b32.xlu2 %v7654_v9, %s7443_s13  ;;  %706 = vrot.lane.b32.xlu1 %v7638_v6, %s7443_s13 }
  0xd0   : > { %456 = vst [vmem:[#allocation2 + $0x70] sm:$0xff] %v427_v20  ;;  %704 = vrot.lane.b32.xlu0 %v7642_v7, %s7443_s13  ;;  %s7458_s13 = smov 91  }
  0xd1   : > { %v7818_v22 = vpop.permute.xlu2 %477  ;;  %v403_v23 = vpop.permute.xlu1 %402 }
  0xd2   : > { %v416_v24 = vrot.slane %v403_v23, 4  ;;  %v401_v25 = vpop.permute.xlu0 %400  ;;  %v491_v57 = vrot.slane %v7818_v22, 4 }
  0xd3   : > { %v415_v26 = vrot.slane %v401_v25, 4 }
  0xd4   : > { %v433_v27 = vsel %vm344_vm5, %v416_v24, %v417_v21 }
  0xd5   : > { %v434_v28 = vsel %vm420_vm9, %v433_v27, %v7750_v39  ;;  %v430_v29 = vsel %vm420_vm9, %v415_v26, %v401_v25  ;;  %v431_v30 = vsel %vm344_vm5, %v415_v26, %v416_v24 }
  0xd6   : > { %461 = vst [vmem:[#allocation2 + $0x94] sm:$0xff] %v434_v28  ;;  %v432_v31 = vsel %vm420_vm9, %v431_v30, %v403_v23 }
  0xd7   : > { %459 = vst.msk [vmem:[#allocation2 + $0x84] sm:$0xff] %vm7775_vm11, %v430_v29  ;;  %769 = vrot.lane.b32.xlu2 %v7611_v1, %s7444_s14  ;;  %767 = vrot.lane.b32.xlu1 %v7634_v5, %s7444_s14 }
  0xd8   : > { %460 = vst [vmem:[#allocation2 + $0x8c] sm:$0xff] %v432_v31  ;;  %765 = vrot.lane.b32.xlu0 %v7614_v2, %s7444_s14 }
  0xd9   : > { %v7834_v32 = vpop.permute.xlu2 %483  ;;  %v409_v33 = vpop.permute.xlu1 %408 }
  0xda   : > { %v494_v34 = vrot.slane %v7834_v32, 4  ;;  %v419_v35 = vrot.slane %v409_v33, 4  ;;  %v407_v36 = vpop.permute.xlu0 %406 }
  0xdb   : > { %v418_v37 = vrot.slane %v407_v36, 4 }
  0xdc   : > { %539 = vst.msk [vmem:[#allocation2 + $0x104] sm:$0xf] %vm10698_vm0, %v494_v34 }
  0xdd   : > { %464 = vst.msk [vmem:[#allocation2 + $0xac] sm:$0xf] %vm10698_vm0, %v419_v35  ;;  %v435_v38 = vsel %vm344_vm5, %v417_v21, %v418_v37  ;;  %v437_v39 = vsel %vm344_vm5, %v418_v37, %v419_v35 }
  0xde   : > { %v436_v40 = vsel %vm420_vm9, %v435_v38, %v407_v36  ;;  %v438_v41 = vsel %vm420_vm9, %v437_v39, %v409_v33  ;;  %vm826_vm9 = vcmask 1043752  }
  0xdf   : > { %462 = vst [vmem:[#allocation2 + $0x9c] sm:$0xff] %v436_v40  ;;  %775 = vrot.lane.b32.xlu2 %v7626_v3, %s7444_s14  ;;  %773 = vrot.lane.b32.xlu1 %v7608_v0, %s7444_s14  ;;  %vm8081_vm11 = vmor %vm375_vm2, %vm826_vm9  ;;  %vm1134_vm9 = vcmask 1043472  }
  0xe0   : > { %463 = vst [vmem:[#allocation2 + $0xa4] sm:$0xff] %v438_v41  ;;  %771 = vrot.lane.b32.xlu0 %v7630_v4, %s7444_s14 }
  0xe1   : > { %v7852_v43 = vpop.permute.xlu2 %544  ;;  %v470_v44 = vpop.permute.xlu1 %469 }
  0xe2   : > { %v487_v45 = vrot.slane %v470_v44, 4  ;;  %v468_v46 = vpop.permute.xlu0 %467  ;;  %v562_v25 = vrot.slane %v7852_v43, 4 }
  0xe3   : > { %v486_v47 = vrot.slane %v468_v46, 4 }
  0xe4   : > { %v501_v48 = vsel %vm344_vm5, %v487_v45, %v488_v42 }
  0xe5   : > { %v502_v49 = vsel %vm10692_vm8, %v501_v48, %v7800_v10  ;;  %v497_v51 = vsel %vm344_vm5, %v485_v53, %v486_v47  ;;  %v499_v54 = vsel %vm344_vm5, %v486_v47, %v487_v45 }
  0xe6   : > { %531 = vst [vmem:[#allocation2 + $0xc8] sm:$0xff] %v502_v49  ;;  %v498_v55 = vsel %vm10692_vm8, %v497_v51, %v468_v46  ;;  %v500_v56 = vsel %vm10692_vm8, %v499_v54, %v470_v44 }
  0xe7   : > { %529 = vst [vmem:[#allocation2 + $0xb8] sm:$0xff] %v498_v55  ;;  %781 = vrot.lane.b32.xlu2 %v7638_v6, %s7444_s14  ;;  %779 = vrot.lane.b32.xlu1 %v7642_v7, %s7444_s14 }
  0xe8   : > { %530 = vst [vmem:[#allocation2 + $0xc0] sm:$0xff] %v500_v56  ;;  %777 = vrot.lane.b32.xlu0 %v7646_v8, %s7444_s14 }
  0xe9   : > { %v7870_v50 = vpop.permute.xlu2 %550  ;;  %v476_v53 = vpop.permute.xlu1 %475 }
  0xea   : > { %v565_v59 = vrot.slane %v7870_v50, 4  ;;  %v490_v60 = vrot.slane %v476_v53, 4  ;;  %v474_v61 = vpop.permute.xlu0 %473 }
  0xeb   : > { %v489_v62 = vrot.slane %v474_v61, 4 }
  0xec   : > { %v580_v63 = vsel %vm570_vm13, %v565_v59, %v7870_v50  ;;  %v505_v10 = vsel %vm10692_vm8, %v490_v60, %v476_v53  ;;  %v506_v11 = vsel %vm344_vm5, %v490_v60, %v491_v57 }
  0xed   : > { %609 = vst.msk [vmem:[#allocation2 + $0x134] sm:$0xff] %vm7873_vm14, %v580_v63  ;;  %v507_v12 = vsel %vm10692_vm8, %v506_v11, %v7818_v22  ;;  %v503_v13 = vsel %vm344_vm5, %v488_v42, %v489_v62 }
  0xee   : > { %534 = vst.msk [vmem:[#allocation2 + $0xdc] sm:$0xff] %vm7769_vm10, %v505_v10  ;;  %v504_v14 = vsel %vm10692_vm8, %v503_v13, %v474_v61  ;;  %vm10693_vm10 = vcmask 302080  }
  0xef   : > { %535 = vst [vmem:[#allocation2 + $0xe4] sm:$0xff] %v507_v12  ;;  %842 = vrot.lane.b32.xlu2 %v7634_v5, %s7445_s15  ;;  %840 = vrot.lane.b32.xlu1 %v7614_v2, %s7445_s15 }
  0xf0   : > { %532 = vst [vmem:[#allocation2 + $0xd0] sm:$0xff] %v504_v14  ;;  %783 = vrot.lane.b32.xlu0 %v7654_v9, %s7444_s14 }
  0xf1   : > { %533 = vst.msk [vmem:[#allocation2 + $0xd8] sm:$0xf] %vm10698_vm0, %v489_v62  ;;  %v7899_v15 = vpop.permute.xlu2 %556  ;;  %v482_v52 = vpop.permute.xlu1 %481 }
  0xf2   : > { %v493_v16 = vrot.slane %v482_v52, 4  ;;  %v480_v17 = vpop.permute.xlu0 %479  ;;  %v568_v46 = vrot.slane %v7899_v15, 4 }
  0xf3   : > { %v492_v18 = vrot.slane %v480_v17, 4 }
  0xf4   : > { %v512_v19 = vsel %vm344_vm5, %v493_v16, %v494_v34 }
  0xf5   : > { %v513_v20 = vsel %vm10692_vm8, %v512_v19, %v7834_v32  ;;  %v508_v21 = vsel %vm344_vm5, %v491_v57, %v492_v18  ;;  %v510_v22 = vsel %vm344_vm5, %v492_v18, %v493_v16 }
  0xf6   : > { %538 = vst [vmem:[#allocation2 + $0xfc] sm:$0xff] %v513_v20  ;;  %v509_v23 = vsel %vm10692_vm8, %v508_v21, %v480_v17  ;;  %v511_v24 = vsel %vm10692_vm8, %v510_v22, %v482_v52  ;;  %vm1360_vm8 = vcmask 1031168  }
  0xf7   : > { %536 = vst [vmem:[#allocation2 + $0xec] sm:$0xff] %v509_v23  ;;  %848 = vrot.lane.b32.xlu2 %v7608_v0, %s7445_s15  ;;  %846 = vrot.lane.b32.xlu1 %v7630_v4, %s7445_s15 }
  0xf8   : > { %537 = vst [vmem:[#allocation2 + $0xf4] sm:$0xff] %v511_v24  ;;  %844 = vrot.lane.b32.xlu0 %v7611_v1, %s7445_s15 }
  0xf9   : > { %v7917_v26 = vpop.permute.xlu2 %617  ;;  %v543_v27 = vpop.permute.xlu1 %542 }
  0xfa   : > { %v561_v28 = vrot.slane %v543_v27, 4  ;;  %v541_v29 = vpop.permute.xlu0 %540  ;;  %v636_v61 = vrot.slane %v7917_v26, 4 }
  0xfb   : > { %v560_v30 = vrot.slane %v541_v29, 4 }
  0xfc   : > { %v574_v31 = vsel %vm344_vm5, %v561_v28, %v562_v25 }
  0xfd   : > { %v575_v32 = vsel %vm570_vm13, %v574_v31, %v7852_v43  ;;  %v571_v33 = vsel %vm570_vm13, %v560_v30, %v541_v29  ;;  %v572_v34 = vsel %vm344_vm5, %v560_v30, %v561_v28 }
  0xfe   : > { %605 = vst [vmem:[#allocation2 + $0x118] sm:$0xff] %v575_v32  ;;  %v573_v35 = vsel %vm570_vm13, %v572_v34, %v543_v27 }
  0xff   : > { %603 = vst.msk [vmem:[#allocation2 + $0x108] sm:$0xff] %vm7873_vm14, %v571_v33  ;;  %854 = vrot.lane.b32.xlu2 %v7642_v7, %s7445_s15  ;;  %852 = vrot.lane.b32.xlu1 %v7646_v8, %s7445_s15  ;;  %vm10695_vm14 = vcmask 285696  }
 0x100   : > { %604 = vst [vmem:[#allocation2 + $0x110] sm:$0xff] %v573_v35  ;;  %850 = vrot.lane.b32.xlu0 %v7626_v3, %s7445_s15 }
 0x101   : > { %v7933_v36 = vpop.permute.xlu2 %623  ;;  %v549_v37 = vpop.permute.xlu1 %548 }
 0x102   : > { %v639_v38 = vrot.slane %v7933_v36, 4  ;;  %v564_v39 = vrot.slane %v549_v37, 4  ;;  %v547_v40 = vpop.permute.xlu0 %546 }
 0x103   : > { %v563_v41 = vrot.slane %v547_v40, 4 }
 0x104   : > { %683 = vst.msk [vmem:[#allocation2 + $0x188] sm:$0xf] %vm10698_vm0, %v639_v38 }
 0x105   : > { %608 = vst.msk [vmem:[#allocation2 + $0x130] sm:$0xf] %vm10698_vm0, %v564_v39  ;;  %v576_v42 = vsel %vm344_vm5, %v562_v25, %v563_v41  ;;  %v578_v43 = vsel %vm344_vm5, %v563_v41, %v564_v39 }
 0x106   : > { %v577_v44 = vsel %vm570_vm13, %v576_v42, %v547_v40  ;;  %v579_v45 = vsel %vm570_vm13, %v578_v43, %v549_v37 }
 0x107   : > { %606 = vst [vmem:[#allocation2 + $0x120] sm:$0xff] %v577_v44  ;;  %915 = vrot.lane.b32.xlu2 %v7614_v2, %s7446_s19  ;;  %858 = vrot.lane.b32.xlu1 %v7654_v9, %s7445_s15 }
 0x108   : > { %607 = vst [vmem:[#allocation2 + $0x128] sm:$0xff] %v579_v45  ;;  %856 = vrot.lane.b32.xlu0 %v7638_v6, %s7445_s15 }
 0x109   : > { %v7951_v47 = vpop.permute.xlu2 %629  ;;  %v555_v48 = vpop.permute.xlu1 %554 }
 0x10a   : > { %v567_v49 = vrot.slane %v555_v48, 4  ;;  %v553_v51 = vpop.permute.xlu0 %552  ;;  %v642_v30 = vrot.slane %v7951_v47, 4 }
 0x10b   : > { %v566_v54 = vrot.slane %v553_v51, 4 }
 0x10c   : > { %v585_v55 = vsel %vm344_vm5, %v567_v49, %v568_v46 }
 0x10d   : > { %v586_v56 = vsel %vm570_vm13, %v585_v55, %v7899_v15  ;;  %v581_v57 = vsel %vm344_vm5, %v565_v59, %v566_v54  ;;  %v583_v53 = vsel %vm344_vm5, %v566_v54, %v567_v49  ;;  %v8056_v55 = vld [vmem:[%s7597_s10 + $0x28] sm:$0xf] }
 0x10e   : > { %612 = vst [vmem:[#allocation2 + $0x14c] sm:$0xff] %v586_v56  ;;  %v582_v58 = vsel %vm570_vm13, %v581_v57, %v553_v51  ;;  %v584_v60 = vsel %vm570_vm13, %v583_v53, %v555_v48 }
 0x10f   : > { %610 = vst [vmem:[#allocation2 + $0x13c] sm:$0xff] %v582_v58  ;;  %921 = vrot.lane.b32.xlu2 %v7630_v4, %s7446_s19  ;;  %919 = vrot.lane.b32.xlu1 %v7611_v1, %s7446_s19 }
 0x110   : > { %611 = vst [vmem:[#allocation2 + $0x144] sm:$0xff] %v584_v60  ;;  %917 = vrot.lane.b32.xlu0 %v7634_v5, %s7446_s19 }
 0x111   : > { %v7969_v50 = vpop.permute.xlu2 %690  ;;  %v616_v59 = vpop.permute.xlu1 %615  ;;  %1234 = vst.msk [vmem:[#allocation2 + $0x448] sm:$0xf] %vm10698_vm0, %v8056_v55 }
 0x112   : > { %v710_v63 = vrot.slane %v7969_v50, 4  ;;  %v635_v10 = vrot.slane %v616_v59, 4  ;;  %v559_v11 = vpop.permute.xlu0 %558 }
 0x113   : > { %v569_v13 = vrot.slane %v559_v11, 4 }
 0x114   : > { %v721_v14 = vsel %vm720_vm3, %v710_v63, %v7969_v50  ;;  %v646_v15 = vsel %vm645_vm4, %v635_v10, %v616_v59  ;;  %v647_v52 = vsel %vm344_vm5, %v635_v10, %v636_v61 }
 0x115   : > { %753 = vst.msk [vmem:[#allocation2 + $0x1b8] sm:$0xff] %vm7972_vm6, %v721_v14  ;;  %v648_v16 = vsel %vm645_vm4, %v647_v52, %v7917_v26  ;;  %v587_v17 = vsel %vm344_vm5, %v568_v46, %v569_v13 }
 0x116   : > { %678 = vst.msk [vmem:[#allocation2 + $0x160] sm:$0xff] %vm7978_vm7, %v646_v15  ;;  %v588_v18 = vsel %vm570_vm13, %v587_v17, %v559_v11  ;;  %vm901_vm13 = vcmask 1043744  }
 0x117   : > { %679 = vst [vmem:[#allocation2 + $0x168] sm:$0xff] %v648_v16  ;;  %927 = vrot.lane.b32.xlu2 %v7646_v8, %s7446_s19  ;;  %925 = vrot.lane.b32.xlu1 %v7626_v3, %s7446_s19 }
 0x118   : > { %613 = vst [vmem:[#allocation2 + $0x154] sm:$0xff] %v588_v18  ;;  %923 = vrot.lane.b32.xlu0 %v7608_v0, %s7446_s19 }
 0x119   : > { %614 = vst.msk [vmem:[#allocation2 + $0x15c] sm:$0xf] %vm10698_vm0, %v569_v13  ;;  %v8003_v19 = vpop.permute.xlu2 %696  ;;  %v622_v20 = vpop.permute.xlu1 %621 }
 0x11a   : > { %v638_v21 = vrot.slane %v622_v20, 4  ;;  %v620_v22 = vpop.permute.xlu0 %619  ;;  %v713_v54 = vrot.slane %v8003_v19, 4 }
 0x11b   : > { %v637_v23 = vrot.slane %v620_v22, 4 }
 0x11c   : > { %v653_v24 = vsel %vm344_vm5, %v638_v21, %v639_v38 }
 0x11d   : > { %v654_v25 = vsel %vm645_vm4, %v653_v24, %v7933_v36  ;;  %v649_v26 = vsel %vm344_vm5, %v636_v61, %v637_v23  ;;  %v651_v27 = vsel %vm344_vm5, %v637_v23, %v638_v21 }
 0x11e   : > { %682 = vst [vmem:[#allocation2 + $0x180] sm:$0xff] %v654_v25  ;;  %v650_v28 = vsel %vm645_vm4, %v649_v26, %v620_v22  ;;  %v652_v29 = vsel %vm645_vm4, %v651_v27, %v622_v20  ;;  %v8110_v26 = vld [vmem:[%s7597_s10 + $0x54] sm:$0xf]  ;;  %s7452_s10 = smov 57  }
 0x11f   : > { %680 = vst [vmem:[#allocation2 + $0x170] sm:$0xff] %v650_v28  ;;  %933 = vrot.lane.b32.xlu2 %v7654_v9, %s7446_s19  ;;  %931 = vrot.lane.b32.xlu1 %v7638_v6, %s7446_s19 }
 0x120   : > { %681 = vst [vmem:[#allocation2 + $0x178] sm:$0xff] %v652_v29  ;;  %929 = vrot.lane.b32.xlu0 %v7642_v7, %s7446_s19 }
 0x121   : > { %v8021_v31 = vpop.permute.xlu2 %702  ;;  %v628_v32 = vpop.permute.xlu1 %627  ;;  %1240 = vst.msk [vmem:[#allocation2 + $0x474] sm:$0xf] %vm10698_vm0, %v8110_v26 }
 0x122   : > { %v641_v33 = vrot.slane %v628_v32, 4  ;;  %v626_v34 = vpop.permute.xlu0 %625  ;;  %v716_v14 = vrot.slane %v8021_v31, 4 }
 0x123   : > { %v640_v35 = vrot.slane %v626_v34, 4 }
 0x124   : > { %v658_v36 = vsel %vm344_vm5, %v641_v33, %v642_v30 }
 0x125   : > { %v659_v37 = vsel %vm645_vm4, %v658_v36, %v7951_v47  ;;  %v655_v38 = vsel %vm645_vm4, %v640_v35, %v626_v34  ;;  %v656_v39 = vsel %vm344_vm5, %v640_v35, %v641_v33 }
 0x126   : > { %686 = vst [vmem:[#allocation2 + $0x19c] sm:$0xff] %v659_v37  ;;  %v657_v40 = vsel %vm645_vm4, %v656_v39, %v628_v32 }
 0x127   : > { %684 = vst.msk [vmem:[#allocation2 + $0x18c] sm:$0xff] %vm7978_vm7, %v655_v38  ;;  %994 = vrot.lane.b32.xlu2 %v7611_v1, %s7447_s26  ;;  %992 = vrot.lane.b32.xlu1 %v7634_v5, %s7447_s26 }
 0x128   : > { %685 = vst [vmem:[#allocation2 + $0x194] sm:$0xff] %v657_v40  ;;  %990 = vrot.lane.b32.xlu0 %v7614_v2, %s7447_s26 }
 0x129   : > { %v8037_v41 = vpop.permute.xlu2 %708  ;;  %v634_v42 = vpop.permute.xlu1 %633 }
 0x12a   : > { %v719_v43 = vrot.slane %v8037_v41, 4  ;;  %v644_v44 = vrot.slane %v634_v42, 4  ;;  %v632_v45 = vpop.permute.xlu0 %631 }
 0x12b   : > { %v643_v46 = vrot.slane %v632_v45, 4 }
 0x12c   : > { %764 = vst.msk [vmem:[#allocation2 + $0x20c] sm:$0xf] %vm10698_vm0, %v719_v43 }
 0x12d   : > { %689 = vst.msk [vmem:[#allocation2 + $0x1b4] sm:$0xf] %vm10698_vm0, %v644_v44  ;;  %v660_v47 = vsel %vm344_vm5, %v642_v30, %v643_v46  ;;  %v662_v48 = vsel %vm344_vm5, %v643_v46, %v644_v44 }
 0x12e   : > { %v661_v49 = vsel %vm645_vm4, %v660_v47, %v632_v45  ;;  %v663_v51 = vsel %vm645_vm4, %v662_v48, %v634_v42  ;;  %vm1051_vm4 = vcmask 1043728  }
 0x12f   : > { %687 = vst [vmem:[#allocation2 + $0x1a4] sm:$0xff] %v661_v49  ;;  %1000 = vrot.lane.b32.xlu2 %v7626_v3, %s7447_s26  ;;  %998 = vrot.lane.b32.xlu1 %v7608_v0, %s7447_s26  ;;  %vm8301_vm7 = vmor %vm375_vm2, %vm1051_vm4  ;;  %vm1215_vm4 = vcmask 1043464  }
 0x130   : > { %688 = vst [vmem:[#allocation2 + $0x1ac] sm:$0xff] %v663_v51  ;;  %996 = vrot.lane.b32.xlu0 %v7630_v4, %s7447_s26 }
 0x131   : > { %v8058_v56 = vpop.permute.xlu2 %769  ;;  %v695_v57 = vpop.permute.xlu1 %694 }
 0x132   : > { %v712_v53 = vrot.slane %v695_v57, 4  ;;  %v693_v58 = vpop.permute.xlu0 %692  ;;  %v787_v36 = vrot.slane %v8058_v56, 4 }
 0x133   : > { %v711_v60 = vrot.slane %v693_v58, 4 }
 0x134   : > { %v726_v61 = vsel %vm344_vm5, %v712_v53, %v713_v54 }
 0x135   : > { %v727_v59 = vsel %vm720_vm3, %v726_v61, %v8003_v19  ;;  %v722_v10 = vsel %vm344_vm5, %v710_v63, %v711_v60  ;;  %v724_v11 = vsel %vm344_vm5, %v711_v60, %v712_v53 }
 0x136   : > { %756 = vst [vmem:[#allocation2 + $0x1d0] sm:$0xff] %v727_v59  ;;  %v723_v12 = vsel %vm720_vm3, %v722_v10, %v693_v58  ;;  %v725_v13 = vsel %vm720_vm3, %v724_v11, %v695_v57 }
 0x137   : > { %754 = vst [vmem:[#allocation2 + $0x1c0] sm:$0xff] %v723_v12  ;;  %1006 = vrot.lane.b32.xlu2 %v7638_v6, %s7447_s26  ;;  %1004 = vrot.lane.b32.xlu1 %v7642_v7, %s7447_s26 }
 0x138   : > { %755 = vst [vmem:[#allocation2 + $0x1c8] sm:$0xff] %v725_v13  ;;  %1002 = vrot.lane.b32.xlu0 %v7646_v8, %s7447_s26 }
 0x139   : > { %v8078_v50 = vpop.permute.xlu2 %775  ;;  %v701_v63 = vpop.permute.xlu1 %700 }
 0x13a   : > { %v790_v52 = vrot.slane %v8078_v50, 4  ;;  %v715_v16 = vrot.slane %v701_v63, 4  ;;  %v699_v17 = vpop.permute.xlu0 %698 }
 0x13b   : > { %v714_v18 = vrot.slane %v699_v17, 4 }
 0x13c   : > { %v805_v19 = vsel %vm10693_vm10, %v790_v52, %v8078_v50  ;;  %v730_v20 = vsel %vm720_vm3, %v715_v16, %v701_v63  ;;  %v731_v21 = vsel %vm344_vm5, %v715_v16, %v716_v14 }
 0x13d   : > { %834 = vst.msk [vmem:[#allocation2 + $0x23c] sm:$0xff] %vm8081_vm11, %v805_v19  ;;  %v732_v22 = vsel %vm720_vm3, %v731_v21, %v8021_v31  ;;  %v728_v23 = vsel %vm344_vm5, %v713_v54, %v714_v18 }
 0x13e   : > { %759 = vst.msk [vmem:[#allocation2 + $0x1e4] sm:$0xff] %vm7972_vm6, %v730_v20  ;;  %v729_v24 = vsel %vm720_vm3, %v728_v23, %v699_v17  ;;  %v8209_v23 = vld [vmem:[#allocation2 + $0x420] sm:$0xff]  ;;  %vm1020_vm6 = vcmask 277504  }
 0x13f   : > { %760 = vst [vmem:[#allocation2 + $0x1ec] sm:$0xff] %v732_v22  ;;  %1069 = vrot.lane.b32.xlu2 %v7634_v5, %s7448_s29  ;;  %1067 = vrot.lane.b32.xlu1 %v7614_v2, %s7448_s29 }
 0x140   : > { %757 = vst [vmem:[#allocation2 + $0x1d8] sm:$0xff] %v729_v24  ;;  %1008 = vrot.lane.b32.xlu0 %v7654_v9, %s7447_s26  ;;  %v8213_v24 = vld [vmem:[#allocation2 + $0x438] sm:$0xff]  ;;  %s7459_s26 = smov 92  }
 0x141   : > { %758 = vst.msk [vmem:[#allocation2 + $0x1e0] sm:$0xf] %vm10698_vm0, %v714_v18  ;;  %v8107_v25 = vpop.permute.xlu2 %781  ;;  %v707_v62 = vpop.permute.xlu1 %706 }
 0x142   : > { %v718_v27 = vrot.slane %v707_v62, 4  ;;  %v705_v28 = vpop.permute.xlu0 %704 }
 0x143   : > { %v717_v29 = vrot.slane %v705_v28, 4 }
 0x144   : > { %v737_v30 = vsel %vm344_vm5, %v718_v27, %v719_v43 }
 0x145   : > { %v738_v31 = vsel %vm720_vm3, %v737_v30, %v8037_v41  ;;  %v733_v32 = vsel %vm344_vm5, %v716_v14, %v717_v29  ;;  %v735_v33 = vsel %vm344_vm5, %v717_v29, %v718_v27 }
 0x146   : > { %763 = vst [vmem:[#allocation2 + $0x204] sm:$0xff] %v738_v31  ;;  %v734_v34 = vsel %vm720_vm3, %v733_v32, %v705_v28  ;;  %v736_v35 = vsel %vm720_vm3, %v735_v33, %v707_v62  ;;  %vm8191_vm3 = vmor %vm375_vm2, %vm901_vm13 }
 0x147   : > { %761 = vst [vmem:[#allocation2 + $0x1f4] sm:$0xff] %v734_v34  ;;  %1075 = vrot.lane.b32.xlu2 %v7608_v0, %s7448_s29  ;;  %1073 = vrot.lane.b32.xlu1 %v7630_v4, %s7448_s29  ;;  %vm8396_vm13 = vmor %vm375_vm2, %vm1134_vm9  ;;  %vm1996_vm9 = vcmask 457728  }
 0x148   : > { %762 = vst [vmem:[#allocation2 + $0x1fc] sm:$0xff] %v736_v35  ;;  %1071 = vrot.lane.b32.xlu0 %v7611_v1, %s7448_s29 }
 0x149   : > { %v8130_v37 = vpop.permute.xlu2 %842  ;;  %v768_v38 = vpop.permute.xlu1 %767 }
 0x14a   : > { %v786_v39 = vrot.slane %v768_v38, 4  ;;  %v766_v40 = vpop.permute.xlu0 %765  ;;  %v861_v12 = vrot.slane %v8130_v37, 4 }
 0x14b   : > { %v785_v41 = vrot.slane %v766_v40, 4 }
 0x14c   : > { %v799_v42 = vsel %vm344_vm5, %v786_v39, %v787_v36 }
 0x14d   : > { %v800_v0 = vsel %vm10693_vm10, %v799_v42, %v8058_v56  ;;  %v796_v43 = vsel %vm10693_vm10, %v785_v41, %v766_v40  ;;  %v797_v4 = vsel %vm344_vm5, %v785_v41, %v786_v39  ;;  %v793_v56 = vrot.slane %v8107_v25, 4  ;;  %v8242_v40 = vld [vmem:[#allocation2 + $0x428] sm:$0xff] }
 0x14e   : > { %830 = vst [vmem:[#allocation2 + $0x220] sm:$0xff] %v800_v0  ;;  %v798_v44 = vsel %vm10693_vm10, %v797_v4, %v768_v38  ;;  %v8237_v38 = vld [vmem:[#allocation2 + $0x44c] sm:$0xff] }
 0x14f   : > { %828 = vst.msk [vmem:[#allocation2 + $0x210] sm:$0xff] %vm8081_vm11, %v796_v43  ;;  %1081 = vrot.lane.b32.xlu2 %v7646_v8, %s7448_s29  ;;  %1079 = vrot.lane.b32.xlu1 %v7626_v3, %s7448_s29 }
 0x150   : > { %829 = vst [vmem:[#allocation2 + $0x218] sm:$0xff] %v798_v44  ;;  %1077 = vrot.lane.b32.xlu0 %v8056_v55, %s7448_s29 }
 0x151   : > { %v8146_v1 = vpop.permute.xlu2 %848  ;;  %v774_v45 = vpop.permute.xlu1 %773 }
 0x152   : > { %v864_v46 = vrot.slane %v8146_v1, 4  ;;  %v789_v47 = vrot.slane %v774_v45, 4  ;;  %v772_v48 = vpop.permute.xlu0 %771 }
 0x153   : > { %v788_v49 = vrot.slane %v772_v48, 4 }
 0x154   : > { %908 = vst.msk [vmem:[#allocation2 + $0x290] sm:$0xf] %vm10698_vm0, %v864_v46 }
 0x155   : > { %833 = vst.msk [vmem:[#allocation2 + $0x238] sm:$0xf] %vm10698_vm0, %v789_v47  ;;  %v801_v3 = vsel %vm344_vm5, %v787_v36, %v788_v49  ;;  %v803_v8 = vsel %vm344_vm5, %v788_v49, %v789_v47 }
 0x156   : > { %v802_v51 = vsel %vm10693_vm10, %v801_v3, %v772_v48  ;;  %v804_v54 = vsel %vm10693_vm10, %v803_v8, %v774_v45 }
 0x157   : > { %831 = vst [vmem:[#allocation2 + $0x228] sm:$0xff] %v802_v51  ;;  %1087 = vrot.lane.b32.xlu2 %v7654_v9, %s7448_s29  ;;  %1085 = vrot.lane.b32.xlu1 %v7638_v6, %s7448_s29 }
 0x158   : > { %832 = vst [vmem:[#allocation2 + $0x230] sm:$0xff] %v804_v54  ;;  %1083 = vrot.lane.b32.xlu0 %v7642_v7, %s7448_s29 }
 0x159   : > { %v8164_v57 = vpop.permute.xlu2 %854  ;;  %v780_v53 = vpop.permute.xlu1 %779 }
 0x15a   : > { %v792_v58 = vrot.slane %v780_v53, 4  ;;  %v778_v60 = vpop.permute.xlu0 %777  ;;  %v867_v39 = vrot.slane %v8164_v57, 4 }
 0x15b   : > { %v791_v61 = vrot.slane %v778_v60, 4 }
 0x15c   : > { %v810_v59 = vsel %vm344_vm5, %v792_v58, %v793_v56 }
 0x15d   : > { %v811_v9 = vsel %vm10693_vm10, %v810_v59, %v8107_v25  ;;  %v806_v6 = vsel %vm344_vm5, %v790_v52, %v791_v61  ;;  %v808_v10 = vsel %vm344_vm5, %v791_v61, %v792_v58  ;;  %v8217_v25 = vld [vmem:[#allocation2 + $0x430] sm:$0xff] }
 0x15e   : > { %837 = vst [vmem:[#allocation2 + $0x254] sm:$0xff] %v811_v9  ;;  %v807_v7 = vsel %vm10693_vm10, %v806_v6, %v778_v60  ;;  %v809_v11 = vsel %vm10693_vm10, %v808_v10, %v780_v53  ;;  %v5837_v6 = vld [vmem:[#allocation2 + $0x210] sm:$0xf]  ;;  %v6947_v10 = vld [vmem:[#allocation2 + $0x238] sm:$0xf0] }
 0x15f   : > { %835 = vst [vmem:[#allocation2 + $0x244] sm:$0xff] %v807_v7  ;;  %1150 = vrot.lane.b32.xlu2 %v7634_v5, %s7449_s18  ;;  %1148 = vrot.lane.b32.xlu1 %v7614_v2, %s7449_s18 }
 0x160   : > { %836 = vst [vmem:[#allocation2 + $0x24c] sm:$0xff] %v809_v11  ;;  %1089 = vrot.lane.b32.xlu0 %v8110_v26, %s7448_s29  ;;  %s7460_s29 = smov 93  }
 0x161   : > { %v8182_v13 = vpop.permute.xlu2 %915  ;;  %v841_v14 = vpop.permute.xlu1 %840 }
 0x162   : > { %v935_v2 = vrot.slane %v8182_v13, 4  ;;  %v860_v5 = vrot.slane %v841_v14, 4  ;;  %v784_v63 = vpop.permute.xlu0 %783 }
 0x163   : > { %v794_v16 = vrot.slane %v784_v63, 4 }
 0x164   : > { %v946_v17 = vsel %vm10695_vm14, %v935_v2, %v8182_v13  ;;  %v871_v18 = vsel %vm10694_vm15, %v860_v5, %v841_v14  ;;  %v872_v19 = vsel %vm344_vm5, %v860_v5, %v861_v12 }
 0x165   : > { %978 = vst.msk [vmem:[#allocation2 + $0x2c0] sm:$0xff] %vm8185_vm1, %v946_v17  ;;  %v873_v20 = vsel %vm10694_vm15, %v872_v19, %v8130_v37  ;;  %v812_v21 = vsel %vm344_vm5, %v793_v56, %v794_v16  ;;  %v8233_v37 = vld [vmem:[#allocation2 + $0x454] sm:$0xff]  ;;  %v6936_v17 = vld [vmem:[#allocation2 + $0x1e0] sm:$0xf0] }
 0x166   : > { %903 = vst.msk [vmem:[#allocation2 + $0x268] sm:$0xff] %vm8191_vm3, %v871_v18  ;;  %v813_v22 = vsel %vm10693_vm10, %v812_v21, %v784_v63  ;;  %v5838_v63 = vor.u32 %v6947_v10, %v5837_v6  ;;  %v5617_v10 = vld [vmem:[#allocation2 + $0x58] sm:$0xf]  ;;  %vm10702_vm10 = vcmask 736256  }
 0x167   : > { %904 = vst [vmem:[#allocation2 + $0x270] sm:$0xff] %v873_v20  ;;  %2038 = vrot.lane.b32.xlu2 %v8209_v23, %s7450_s20  ;;  %1154 = vrot.lane.b32.xlu1 %v8213_v24, %s7449_s18 }
 0x168   : > { %838 = vst [vmem:[#allocation2 + $0x25c] sm:$0xff] %v813_v22  ;;  %1152 = vrot.lane.b32.xlu0 %v8217_v25, %s7449_s18 }
 0x169   : > { %839 = vst.msk [vmem:[#allocation2 + $0x264] sm:$0xf] %vm10698_vm0, %v794_v16  ;;  %v8222_v62 = vpop.permute.xlu2 %921  ;;  %v847_v27 = vpop.permute.xlu1 %846 }
 0x16a   : > { %v863_v28 = vrot.slane %v847_v27, 4  ;;  %v845_v29 = vpop.permute.xlu0 %844  ;;  %v938_v9 = vrot.slane %v8222_v62, 4 }
 0x16b   : > { %v862_v30 = vrot.slane %v845_v29, 4 }
 0x16c   : > { %v878_v31 = vsel %vm344_vm5, %v863_v28, %v864_v46 }
 0x16d   : > { %v879_v32 = vsel %vm10694_vm15, %v878_v31, %v8146_v1  ;;  %v874_v33 = vsel %vm344_vm5, %v861_v12, %v862_v30  ;;  %v876_v34 = vsel %vm344_vm5, %v862_v30, %v863_v28  ;;  %v5881_v60 = vld [vmem:[#allocation2 + $0x268] sm:$0xf] }
 0x16e   : > { %907 = vst [vmem:[#allocation2 + $0x288] sm:$0xff] %v879_v32  ;;  %v875_v35 = vsel %vm10694_vm15, %v874_v33, %v845_v29  ;;  %v877_v36 = vsel %vm10694_vm15, %v876_v34, %v847_v27  ;;  %v5793_v27 = vld [vmem:[#allocation2 + $0x1b8] sm:$0xf]  ;;  %v5749_v34 = vld [vmem:[#allocation2 + $0x160] sm:$0xf] }
 0x16f   : > { %905 = vst [vmem:[#allocation2 + $0x278] sm:$0xff] %v875_v35  ;;  %2052 = vrot.lane.b32.xlu2 %v8233_v37, %s7450_s20  ;;  %2050 = vrot.lane.b32.xlu1 %v8237_v38, %s7450_s20  ;;  %v5794_v13 = vor.u32 %v6936_v17, %v5793_v27 }
 0x170   : > { %906 = vst [vmem:[#allocation2 + $0x280] sm:$0xff] %v877_v36  ;;  %2040 = vrot.lane.b32.xlu0 %v8242_v40, %s7450_s20 }
 0x171   : > { %v8246_v41 = vpop.permute.xlu2 %927  ;;  %v853_v42 = vpop.permute.xlu1 %852 }
 0x172   : > { %v866_v0 = vrot.slane %v853_v42, 4  ;;  %v851_v43 = vpop.permute.xlu0 %850 }
 0x173   : > { %v865_v4 = vrot.slane %v851_v43, 4 }
 0x174   : > { %v883_v44 = vsel %vm344_vm5, %v866_v0, %v867_v39 }
 0x175   : > { %v884_v1 = vsel %vm10694_vm15, %v883_v44, %v8164_v57  ;;  %v880_v45 = vsel %vm10694_vm15, %v865_v4, %v851_v43  ;;  %v881_v46 = vsel %vm344_vm5, %v865_v4, %v866_v0  ;;  %v5705_v43 = vld [vmem:[#allocation2 + $0x108] sm:$0xf]  ;;  %v6914_v4 = vld [vmem:[#allocation2 + $0x130] sm:$0xf0] }
 0x176   : > { %911 = vst [vmem:[#allocation2 + $0x2a4] sm:$0xff] %v884_v1  ;;  %v882_v47 = vsel %vm10694_vm15, %v881_v46, %v853_v42  ;;  %v5706_v46 = vor.u32 %v6914_v4, %v5705_v43 }
 0x177   : > { %909 = vst.msk [vmem:[#allocation2 + $0x294] sm:$0xff] %vm8191_vm3, %v880_v45  ;;  %1971 = vrot.lane.b32.xlu2 %v8237_v38, %s7451_s16  ;;  %1961 = vrot.lane.b32.xlu1 %v8242_v40, %s7451_s16 }
 0x178   : > { %910 = vst [vmem:[#allocation2 + $0x29c] sm:$0xff] %v882_v47  ;;  %1959 = vrot.lane.b32.xlu0 %v8209_v23, %s7451_s16 }
 0x179   : > { %v8262_v48 = vpop.permute.xlu2 %933  ;;  %v859_v49 = vpop.permute.xlu1 %858 }
 0x17a   : > { %v944_v3 = vrot.slane %v8262_v48, 4  ;;  %v869_v8 = vrot.slane %v859_v49, 4  ;;  %v857_v51 = vpop.permute.xlu0 %856 }
 0x17b   : > { %v868_v54 = vrot.slane %v857_v51, 4 }
 0x17c   : > { %989 = vst.msk [vmem:[#allocation2 + $0x314] sm:$0xf] %vm10698_vm0, %v944_v3 }
 0x17d   : > { %914 = vst.msk [vmem:[#allocation2 + $0x2bc] sm:$0xf] %vm10698_vm0, %v869_v8  ;;  %v885_v56 = vsel %vm344_vm5, %v867_v39, %v868_v54  ;;  %v887_v57 = vsel %vm344_vm5, %v868_v54, %v869_v8  ;;  %v5661_v54 = vld [vmem:[#allocation2 + $0xb0] sm:$0xf] }
 0x17e   : > { %v886_v53 = vsel %vm10694_vm15, %v885_v56, %v857_v51  ;;  %v888_v58 = vsel %vm10694_vm15, %v887_v57, %v859_v49  ;;  %v6958_v61 = vld [vmem:[#allocation2 + $0x290] sm:$0xf0]  ;;  %vm10730_vm15 = vcmask 1039360  }
 0x17f   : > { %912 = vst [vmem:[#allocation2 + $0x2ac] sm:$0xff] %v886_v53  ;;  %1882 = vrot.lane.b32.xlu2 %v8242_v40, %s7452_s10  ;;  %1880 = vrot.lane.b32.xlu1 %v8209_v23, %s7452_s10  ;;  %v5882_v59 = vor.u32 %v6958_v61, %v5881_v60 }
 0x180   : > { %913 = vst [vmem:[#allocation2 + $0x2b4] sm:$0xff] %v888_v58  ;;  %1973 = vrot.lane.b32.xlu0 %v8233_v37, %s7451_s16  ;;  %v6892_v58 = vld [vmem:[#allocation2 + $0x80] sm:$0xf0] }
 0x181   : > { %3923 = vmatpush.bf16.msra.mxu0 %v5882_v59  ;;  %v8280_v7 = vpop.permute.xlu2 %994  ;;  %v920_v11 = vpop.permute.xlu1 %919 }
 0x182   : > { %v937_v12 = vrot.slane %v920_v11, 4  ;;  %v918_v14 = vpop.permute.xlu0 %917 }
 0x183   : > { %v936_v5 = vrot.slane %v918_v14, 4 }
 0x184   : > { %v951_v16 = vsel %vm344_vm5, %v937_v12, %v938_v9 }
 0x185   : > { %v952_v18 = vsel %vm10695_vm14, %v951_v16, %v8222_v62  ;;  %v947_v19 = vsel %vm344_vm5, %v935_v2, %v936_v5  ;;  %v949_v20 = vsel %vm344_vm5, %v936_v5, %v937_v12  ;;  %3924 = vmatpush.bf16.msra.mxu0 %v5838_v63  ;;  %v941_v2 = vrot.slane %v8246_v41, 4  ;;  %v6925_v62 = vld [vmem:[#allocation2 + $0x188] sm:$0xf0] }
 0x186   : > { %981 = vst [vmem:[#allocation2 + $0x2d8] sm:$0xff] %v952_v18  ;;  %v948_v21 = vsel %vm10695_vm14, %v947_v19, %v918_v14  ;;  %v950_v22 = vsel %vm10695_vm14, %v949_v20, %v920_v11  ;;  %v5750_v36 = vor.u32 %v6925_v62, %v5749_v34  ;;  %v5573_v11 = vld [vmem:[#allocation2] sm:$0xf]  ;;  %v6881_v12 = vld [vmem:[#allocation2 + $0x28] sm:$0xf0] }
 0x187   : > { %979 = vst [vmem:[#allocation2 + $0x2c8] sm:$0xff] %v948_v21  ;;  %1405 = vrot.lane.b32.xlu2 %v8209_v23, %s7453_s27  ;;  %1894 = vrot.lane.b32.xlu1 %v8233_v37, %s7452_s10  ;;  %v5574_v18 = vor.u32 %v6881_v12, %v5573_v11 }
 0x188   : > { %980 = vst [vmem:[#allocation2 + $0x2d0] sm:$0xff] %v950_v22  ;;  %1892 = vrot.lane.b32.xlu0 %v8237_v38, %s7452_s10 }
 0x189   : > { %3925 = vmatpush.bf16.msra.mxu0 %v5794_v13  ;;  %v8298_v28 = vpop.permute.xlu2 %1000  ;;  %v926_v29 = vpop.permute.xlu1 %925 }
 0x18a   : > { %v1015_v31 = vrot.slane %v8298_v28, 4  ;;  %v940_v32 = vrot.slane %v926_v29, 4  ;;  %v924_v33 = vpop.permute.xlu0 %923 }
 0x18b   : > { %v939_v35 = vrot.slane %v924_v33, 4 }
 0x18c   : > { %v1030_v39 = vsel %vm1020_vm6, %v1015_v31, %v8298_v28  ;;  %v955_v42 = vsel %vm10695_vm14, %v940_v32, %v926_v29  ;;  %v956_v0 = vsel %vm344_vm5, %v940_v32, %v941_v2 }
 0x18d   : > { %1059 = vst.msk [vmem:[#allocation2 + $0x344] sm:$0xff] %vm8301_vm7, %v1030_v39  ;;  %v957_v44 = vsel %vm10695_vm14, %v956_v0, %v8246_v41  ;;  %v953_v1 = vsel %vm344_vm5, %v938_v9, %v939_v35  ;;  %3926 = vmatpush.bf16.msra.mxu0 %v5750_v36  ;;  %v6903_v41 = vld [vmem:[#allocation2 + $0xd8] sm:$0xf0] }
 0x18e   : > { %984 = vst.msk [vmem:[#allocation2 + $0x2ec] sm:$0xff] %vm8185_vm1, %v955_v42  ;;  %v954_v45 = vsel %vm10695_vm14, %v953_v1, %v924_v33  ;;  %v5662_v57 = vor.u32 %v6903_v41, %v5661_v54 }
 0x18f   : > { %985 = vst [vmem:[#allocation2 + $0x2f4] sm:$0xff] %v957_v44  ;;  %1419 = vrot.lane.b32.xlu2 %v8233_v37, %s7453_s27  ;;  %1417 = vrot.lane.b32.xlu1 %v8237_v38, %s7453_s27 }
 0x190   : > { %982 = vst [vmem:[#allocation2 + $0x2e0] sm:$0xff] %v954_v45  ;;  %1407 = vrot.lane.b32.xlu0 %v8242_v40, %s7453_s27 }
 0x191   : > { %983 = vst.msk [vmem:[#allocation2 + $0x2e8] sm:$0xf] %vm10698_vm0, %v939_v35  ;;  %3927 = vmatpush.bf16.msra.mxu0 %v5706_v46  ;;  %v8327_v47 = vpop.permute.xlu2 %1006  ;;  %v932_v49 = vpop.permute.xlu1 %931 }
 0x192   : > { %v943_v8 = vrot.slane %v932_v49, 4  ;;  %v930_v51 = vpop.permute.xlu0 %929  ;;  %v1018_v35 = vrot.slane %v8327_v47, 4 }
 0x193   : > { %v942_v56 = vrot.slane %v930_v51, 4 }
 0x194   : > { %v962_v53 = vsel %vm344_vm5, %v943_v8, %v944_v3  ;;  %v1012_v3 = vrot.slane %v8280_v7, 4 }
 0x195   : > { %v963_v60 = vsel %vm10695_vm14, %v962_v53, %v8262_v48  ;;  %v958_v61 = vsel %vm344_vm5, %v941_v2, %v942_v56  ;;  %v960_v59 = vsel %vm344_vm5, %v942_v56, %v943_v8  ;;  %3928 = vmatpush.bf16.msra.mxu0 %v5662_v57  ;;  %v5618_v48 = vor.u32 %v6892_v58, %v5617_v10 }
 0x196   : > { %988 = vst [vmem:[#allocation2 + $0x30c] sm:$0xff] %v963_v60  ;;  %v959_v9 = vsel %vm10695_vm14, %v958_v61, %v930_v51  ;;  %v961_v6 = vsel %vm10695_vm14, %v960_v59, %v932_v49  ;;  %vm10779_vm14 = vcmask 744448  }
 0x197   : > { %986 = vst [vmem:[#allocation2 + $0x2fc] sm:$0xff] %v959_v9  ;;  %1813 = vrot.lane.b32.xlu2 %v8237_v38, %s7454_s8  ;;  %1803 = vrot.lane.b32.xlu1 %v8242_v40, %s7454_s8 }
 0x198   : > { %987 = vst [vmem:[#allocation2 + $0x304] sm:$0xff] %v961_v6  ;;  %1801 = vrot.lane.b32.xlu0 %v8209_v23, %s7454_s8 }
 0x199   : > { %3929 = vmatpush.bf16.msra.mxu0 %v5618_v48  ;;  %v8345_v14 = vpop.permute.xlu2 %1069  ;;  %v993_v5 = vpop.permute.xlu1 %992 }
 0x19a   : > { %v1011_v63 = vrot.slane %v993_v5, 4  ;;  %v991_v16 = vpop.permute.xlu0 %990 }
 0x19b   : > { %v1010_v17 = vrot.slane %v991_v16, 4 }
 0x19c   : > { %v1024_v19 = vsel %vm344_vm5, %v1011_v63, %v1012_v3 }
 0x19d   : > { %v1025_v20 = vsel %vm1020_vm6, %v1024_v19, %v8280_v7  ;;  %v1021_v21 = vsel %vm1020_vm6, %v1010_v17, %v991_v16  ;;  %v1022_v22 = vsel %vm344_vm5, %v1010_v17, %v1011_v63  ;;  %3930 = vmatpush.bf16.msra.mxu0 %v5574_v18 }
 0x19e   : > { %1055 = vst [vmem:[#allocation2 + $0x328] sm:$0xff] %v1025_v20  ;;  %v1023_v27 = vsel %vm1020_vm6, %v1022_v22, %v993_v5 }
 0x19f   : > { %1053 = vst.msk [vmem:[#allocation2 + $0x318] sm:$0xff] %vm8301_vm7, %v1021_v21  ;;  %1325 = vrot.lane.b32.xlu2 %v8242_v40, %s7455_s7  ;;  %1323 = vrot.lane.b32.xlu1 %v8209_v23, %s7455_s7  ;;  %vm8468_vm7 = vmor %vm375_vm2, %vm1215_vm4  ;;  %vm2075_vm2 = vcmask 449536   ;;  %vm10771_vm4 = vcmask 474112  }
 0x1a0   : > { %1054 = vst [vmem:[#allocation2 + $0x320] sm:$0xff] %v1023_v27  ;;  %1815 = vrot.lane.b32.xlu0 %v8233_v37, %s7454_s8 }
 0x1a1   : > { %v8361_v7 = vpop.permute.xlu2 %1075  ;;  %v999_v13 = vpop.permute.xlu1 %998 }
 0x1a2   : > { %v1014_v2 = vrot.slane %v999_v13, 4  ;;  %v997_v62 = vpop.permute.xlu0 %996  ;;  %v1095_v61 = vrot.slane %v8361_v7, 4 }
 0x1a3   : > { %v1013_v29 = vrot.slane %v997_v62, 4 }
 0x1a4   : > { %1058 = vst.msk [vmem:[#allocation2 + $0x340] sm:$0xf] %vm10698_vm0, %v1014_v2 }
 0x1a5   : > { %v1026_v30 = vsel %vm344_vm5, %v1012_v3, %v1013_v29  ;;  %v1028_v32 = vsel %vm344_vm5, %v1013_v29, %v1014_v2 }
 0x1a6   : > { %v1027_v33 = vsel %vm1020_vm6, %v1026_v30, %v997_v62  ;;  %v1029_v34 = vsel %vm1020_vm6, %v1028_v32, %v999_v13 }
 0x1a7   : > { %1056 = vst [vmem:[#allocation2 + $0x330] sm:$0xff] %v1027_v33  ;;  %1722 = vrot.lane.b32.xlu2 %v8209_v23, %s7456_s9  ;;  %1337 = vrot.lane.b32.xlu1 %v8233_v37, %s7455_s7 }
 0x1a8   : > { %1057 = vst [vmem:[#allocation2 + $0x338] sm:$0xff] %v1029_v34  ;;  %1335 = vrot.lane.b32.xlu0 %v8237_v38, %s7455_s7 }
 0x1a9   : > { %v8375_v36 = vpop.permute.xlu2 %1081  ;;  %v1005_v39 = vpop.permute.xlu1 %1004 }
 0x1aa   : > { %v1017_v42 = vrot.slane %v1005_v39, 4  ;;  %v1003_v0 = vpop.permute.xlu0 %1002  ;;  %v1097_v16 = vrot.slane %v8375_v36, 4 }
 0x1ab   : > { %v1016_v43 = vrot.slane %v1003_v0, 4 }
 0x1ac   : > { %v1035_v4 = vsel %vm344_vm5, %v1017_v42, %v1018_v35 }
 0x1ad   : > { %v1036_v44 = vsel %vm1020_vm6, %v1035_v4, %v8327_v47  ;;  %v1031_v1 = vsel %vm344_vm5, %v1015_v31, %v1016_v43  ;;  %v1033_v45 = vsel %vm344_vm5, %v1016_v43, %v1017_v42  ;;  %v1092_v47 = vrot.slane %v8345_v14, 4 }
 0x1ae   : > { %1062 = vst [vmem:[#allocation2 + $0x35c] sm:$0xff] %v1036_v44  ;;  %v1032_v46 = vsel %vm1020_vm6, %v1031_v1, %v1003_v0  ;;  %v1034_v41 = vsel %vm1020_vm6, %v1033_v45, %v1005_v39 }
 0x1af   : > { %1060 = vst [vmem:[#allocation2 + $0x34c] sm:$0xff] %v1032_v46  ;;  %1736 = vrot.lane.b32.xlu2 %v8233_v37, %s7456_s9  ;;  %1734 = vrot.lane.b32.xlu1 %v8237_v38, %s7456_s9 }
 0x1b0   : > { %1061 = vst [vmem:[#allocation2 + $0x354] sm:$0xff] %v1034_v41  ;;  %1724 = vrot.lane.b32.xlu0 %v8242_v40, %s7456_s9 }
 0x1b1   : > { %v8393_v28 = vpop.permute.xlu2 %1087  ;;  %v1068_v31 = vpop.permute.xlu1 %1067 }
 0x1b2   : > { %v1091_v8 = vrot.slane %v1068_v31, 4  ;;  %v1009_v51 = vpop.permute.xlu0 %1008  ;;  %v1100_v13 = vrot.slane %v8393_v28, 4 }
 0x1b3   : > { %v1019_v54 = vrot.slane %v1009_v51, 4 }
 0x1b4   : > { %v1102_v56 = vsel %vm1101_vm12, %v1091_v8, %v1068_v31  ;;  %v1103_v57 = vsel %vm344_vm5, %v1091_v8, %v1092_v47 }
 0x1b5   : > { %v1104_v53 = vsel %vm1101_vm12, %v1103_v57, %v8345_v14  ;;  %1136 = vst.msk [vmem:[#allocation2 + $0x370] sm:$0xff] %vm8396_vm13, %v1102_v56  ;;  %v1037_v58 = vsel %vm344_vm5, %v1018_v35, %v1019_v54 }
 0x1b6   : > { %1137 = vst [vmem:[#allocation2 + $0x378] sm:$0xff] %v1104_v53  ;;  %v1038_v60 = vsel %vm1020_vm6, %v1037_v58, %v1009_v51  ;;  %vm10729_vm6 = vcmask 7168  }
 0x1b7   : > { %1063 = vst [vmem:[#allocation2 + $0x364] sm:$0xff] %v1038_v60  ;;  %1253 = vrot.lane.b32.xlu2 %v8237_v38, %s7457_s12  ;;  %1243 = vrot.lane.b32.xlu1 %v8242_v40, %s7457_s12 }
 0x1b8   : > { %1064 = vst.msk [vmem:[#allocation2 + $0x36c] sm:$0xf] %vm10698_vm0, %v1019_v54  ;;  %1241 = vrot.lane.b32.xlu0 %v8209_v23, %s7457_s12 }
 0x1b9   : > { %v8416_v59 = vpop.permute.xlu2 %1150  ;;  %v1074_v9 = vpop.permute.xlu1 %1073 }
 0x1ba   : > { %v1094_v6 = vrot.slane %v1074_v9, 4  ;;  %v1072_v10 = vpop.permute.xlu0 %1071  ;;  %v1173_v0 = vrot.slane %v8416_v59, 4 }
 0x1bb   : > { %v1093_v48 = vrot.slane %v1072_v10, 4 }
 0x1bc   : > { %v1109_v3 = vsel %vm344_vm5, %v1094_v6, %v1095_v61 }
 0x1bd   : > { %v1110_v11 = vsel %vm1101_vm12, %v1109_v3, %v8361_v7  ;;  %v1105_v12 = vsel %vm344_vm5, %v1092_v47, %v1093_v48  ;;  %v1107_v14 = vsel %vm344_vm5, %v1093_v48, %v1094_v6 }
 0x1be   : > { %1140 = vst [vmem:[#allocation2 + $0x390] sm:$0xff] %v1110_v11  ;;  %v1106_v5 = vsel %vm1101_vm12, %v1105_v12, %v1072_v10  ;;  %v1108_v63 = vsel %vm1101_vm12, %v1107_v14, %v1074_v9 }
 0x1bf   : > { %1138 = vst [vmem:[#allocation2 + $0x380] sm:$0xff] %v1106_v5  ;;  %1645 = vrot.lane.b32.xlu2 %v8242_v40, %s7458_s13  ;;  %1643 = vrot.lane.b32.xlu1 %v8209_v23, %s7458_s13 }
 0x1c0   : > { %1139 = vst [vmem:[#allocation2 + $0x388] sm:$0xff] %v1108_v63  ;;  %1255 = vrot.lane.b32.xlu0 %v8233_v37, %s7457_s12 }
 0x1c1   : > { %v8432_v17 = vpop.permute.xlu2 %2038  ;;  %v1080_v18 = vpop.permute.xlu1 %1079 }
 0x1c2   : > { %v1096_v19 = vrot.slane %v1080_v18, 4  ;;  %v1078_v20 = vpop.permute.xlu0 %1077  ;;  %v2062_v10 = vrot.slane %v8432_v17, 4 }
 0x1c3   : > { %v1111_v21 = vsel %vm1101_vm12, %v1095_v61, %v1078_v20 }
 0x1c4   : > { %v1112_v22 = vsel %vm1101_vm12, %v1096_v19, %v1080_v18  ;;  %v1113_v27 = vsel %vm344_vm5, %v1096_v19, %v1097_v16  ;;  %1141 = vst.msk [vmem:[#allocation2 + $0x398] sm:$0xf] %vm10698_vm0, %v1111_v21 }
 0x1c5   : > { %v1114_v7 = vsel %vm1101_vm12, %v1113_v27, %v8375_v36  ;;  %1142 = vst.msk [vmem:[#allocation2 + $0x39c] sm:$0xff] %vm8396_vm13, %v1112_v22  ;;  %vm10720_vm13 = vcmask 769024  }
 0x1c6   : > { %1143 = vst [vmem:[#allocation2 + $0x3a4] sm:$0xff] %v1114_v7 }
 0x1c7   : > { %1564 = vrot.lane.b32.xlu2 %v8209_v23, %s7459_s26  ;;  %1657 = vrot.lane.b32.xlu1 %v8233_v37, %s7458_s13 }
 0x1c8   : > { %1655 = vrot.lane.b32.xlu0 %v8237_v38, %s7458_s13 }
 0x1c9   : > { %v8449_v2 = vpop.permute.xlu2 %2052  ;;  %v1086_v62 = vpop.permute.xlu1 %1085 }
 0x1ca   : > { %v1099_v29 = vrot.slane %v1086_v62, 4  ;;  %v1084_v30 = vpop.permute.xlu0 %1083  ;;  %v10714_v60 = vrot.slane %v8449_v2, 4 }
 0x1cb   : > { %v1098_v32 = vrot.slane %v1084_v30, 4 }
 0x1cc   : > { %v1119_v33 = vsel %vm344_vm5, %v1099_v29, %v1100_v13 }
 0x1cd   : > { %v1120_v34 = vsel %vm1101_vm12, %v1119_v33, %v8393_v28  ;;  %v1115_v35 = vsel %vm344_vm5, %v1097_v16, %v1098_v32  ;;  %v1117_v36 = vsel %vm344_vm5, %v1098_v32, %v1099_v29 }
 0x1ce   : > { %1146 = vst [vmem:[#allocation2 + $0x3bc] sm:$0xff] %v1120_v34  ;;  %v1116_v39 = vsel %vm1101_vm12, %v1115_v35, %v1084_v30  ;;  %v1118_v42 = vsel %vm1101_vm12, %v1117_v36, %v1086_v62 }
 0x1cf   : > { %1144 = vst [vmem:[#allocation2 + $0x3ac] sm:$0xff] %v1116_v39  ;;  %1578 = vrot.lane.b32.xlu2 %v8233_v37, %s7459_s26  ;;  %1576 = vrot.lane.b32.xlu1 %v8237_v38, %s7459_s26 }
 0x1d0   : > { %1145 = vst [vmem:[#allocation2 + $0x3b4] sm:$0xff] %v1118_v42  ;;  %1566 = vrot.lane.b32.xlu0 %v8242_v40, %s7459_s26 }
 0x1d1   : > { %v8465_v43 = vpop.permute.xlu2 %1971  ;;  %v1149_v4 = vpop.permute.xlu1 %1148 }
 0x1d2   : > { %v1172_v1 = vrot.slane %v1149_v4, 4  ;;  %v1090_v45 = vpop.permute.xlu0 %1089  ;;  %v1989_v29 = vrot.slane %v8465_v43, 4 }
 0x1d3   : > { %v1121_v46 = vsel %vm1101_vm12, %v1100_v13, %v1090_v45  ;;  %vm1917_vm12 = vcmask 465920  }
 0x1d4   : > { %v1183_v41 = vsel %vm10729_vm6, %v1172_v1, %v1149_v4  ;;  %v1184_v47 = vsel %vm344_vm5, %v1172_v1, %v1173_v0  ;;  %1147 = vst.msk [vmem:[#allocation2 + $0x3c4] sm:$0xf] %vm10698_vm0, %v1121_v46  ;;  %vm10777_vm0 = vcmask 752640  }
 0x1d5   : > { %v1185_v28 = vsel %vm10729_vm6, %v1184_v47, %v8416_v59  ;;  %1217 = vst.msk [vmem:[#allocation2 + $0x3c8] sm:$0xff] %vm8468_vm7, %v1183_v41 }
 0x1d6   : > { %1218 = vst [vmem:[#allocation2 + $0x3d0] sm:$0xff] %v1185_v28 }
 0x1d7   : > { %1487 = vrot.lane.b32.xlu2 %v8242_v40, %s7460_s29  ;;  %1485 = vrot.lane.b32.xlu1 %v8209_v23, %s7460_s29 }
 0x1d8   : > { %1160 = vrot.lane.b32.xlu0 %v8237_v38, %s7449_s18 }
 0x1d9   : > { %v8486_v31 = vpop.permute.xlu2 %1882  ;;  %v8488_v49 = vpop.permute.xlu1 %1154 }
 0x1da   : > { %v10696_v8 = vrot.slane %v8488_v49, 4  ;;  %v1153_v51 = vpop.permute.xlu0 %1152  ;;  %v1905_v22 = vrot.slane %v8486_v31, 4 }
 0x1db   : > { %v1174_v54 = vrot.slane %v1153_v51, 4 }
 0x1dd   : > { %v1186_v56 = vsel %vm344_vm5, %v1173_v0, %v1174_v54  ;;  %v1188_v57 = vsel %vm344_vm5, %v1174_v54, %v10696_v8 }
 0x1de   : > { %v1187_v53 = vsel %vm10729_vm6, %v1186_v56, %v1153_v51  ;;  %v1189_v58 = vsel %vm10729_vm6, %v1188_v57, %v8488_v49 }
 0x1df   : > { %1219 = vst [vmem:[#allocation2 + $0x3d8] sm:$0xff] %v1187_v53  ;;  %2117 = vrot.lane.b32.xlu2 %v8209_v23, %s7461_s1  ;;  %1499 = vrot.lane.b32.xlu1 %v8233_v37, %s7460_s29 }
 0x1e0   : > { %1220 = vst [vmem:[#allocation2 + $0x3e0] sm:$0xff] %v1189_v58  ;;  %1497 = vrot.lane.b32.xlu0 %v8237_v38, %s7460_s29 }
 0x1e1   : > { %v8505_v61 = vpop.permute.xlu2 %1405  ;;  %v2051_v59 = vpop.permute.xlu1 %2050 }
 0x1e2   : > { %v2068_v9 = vrot.slane %v2051_v59, 4  ;;  %v8507_v6 = vpop.permute.xlu0 %2040  ;;  %v1429_v57 = vrot.slane %v8505_v61, 4 }
 0x1e3   : > { %v10713_v23 = vrot.slane %v8507_v6, 4 }
 0x1e4   : > { %v2085_v48 = vsel %vm344_vm5, %v2068_v9, %v10714_v60 }
 0x1e5   : > { %v2086_v3 = vsel %vm2075_vm2, %v2051_v59, %v2085_v48  ;;  %v2074_v11 = vsel %vm344_vm5, %v2062_v10, %v10713_v23 }
 0x1e6   : > { %2112 = vst [vmem:[#allocation2 + $0x814] sm:$0xff] %v2086_v3  ;;  %v2076_v12 = vsel %vm2075_vm2, %v8432_v17, %v2074_v11 }
 0x1e7   : > { %2105 = vst [vmem:[#allocation2 + $0x7e8] sm:$0xff] %v2076_v12  ;;  %2131 = vrot.lane.b32.xlu2 %v8233_v37, %s7461_s1  ;;  %2129 = vrot.lane.b32.xlu1 %v8237_v38, %s7461_s1 }
 0x1e8   : > { %2119 = vrot.lane.b32.xlu0 %v8242_v40, %s7461_s1  ;;  %v8537_v40 = vld [vmem:[#allocation2 + $0x45c] sm:$0xff] }
 0x1e9   : > { %v8526_v14 = vpop.permute.xlu2 %1419  ;;  %v8528_v5 = vpop.permute.xlu1 %1961 }
 0x1ea   : > { %v1984_v63 = vrot.slane %v8528_v5, 4  ;;  %v1960_v16 = vpop.permute.xlu0 %1959  ;;  %v1436_v47 = vrot.slane %v8526_v14, 4 }
 0x1eb   : > { %v1983_v18 = vrot.slane %v1960_v16, 4 }
 0x1ed   : > { %v1995_v17 = vsel %vm344_vm5, %v1983_v18, %v1984_v63  ;;  %v7134_v19 = vld [vmem:[#allocation2 + $0x810] sm:$0xf0] }
 0x1ee   : > { %v1997_v20 = vsel %vm1996_vm9, %v1960_v16, %v1995_v17  ;;  %v6585_v38 = vld [vmem:[#allocation2 + $0x7e8] sm:$0xf] }
 0x1ef   : > { %2026 = vst [vmem:[#allocation2 + $0x790] sm:$0xff] %v1997_v20  ;;  %1327 = vrot.lane.b32.xlu2 %v8217_v25, %s7455_s7  ;;  %1421 = vrot.lane.b32.xlu1 %v8537_v40, %s7453_s27  ;;  %v6586_v21 = vor.u32 %v7134_v19, %v6585_v38 }
 0x1f0   : > { %1409 = vrot.lane.b32.xlu0 %v8217_v25, %s7453_s27 }
 0x1f1   : > { %3951 = vmatpush.bf16.msra.mxu2 %v6586_v21  ;;  %v8544_v27 = vpop.permute.xlu2 %1813  ;;  %v1881_v7 = vpop.permute.xlu1 %1880 }
 0x1f2   : > { %v1904_v13 = vrot.slane %v1881_v7, 4  ;;  %v8546_v62 = vpop.permute.xlu0 %1973 }
 0x1f3   : > { %v10710_v30 = vrot.slane %v8546_v62, 4 }
 0x1f4   : > { %v1916_v32 = vsel %vm344_vm5, %v1904_v13, %v1905_v22 }
 0x1f5   : > { %v1918_v33 = vsel %vm1917_vm12, %v1881_v7, %v1916_v32  ;;  %v2006_v34 = vsel %vm344_vm5, %v1989_v29, %v10710_v30  ;;  %v6980_v30 = vld [vmem:[#allocation2 + $0x340] sm:$0xf0] }
 0x1f6   : > { %1947 = vst [vmem:[#allocation2 + $0x738] sm:$0xff] %v1918_v33  ;;  %v2007_v35 = vsel %vm1996_vm9, %v8465_v43, %v2006_v34  ;;  %v6541_v45 = vld [vmem:[#allocation2 + $0x790] sm:$0xf] }
 0x1f7   : > { %2033 = vst [vmem:[#allocation2 + $0x7bc] sm:$0xff] %v2007_v35  ;;  %1257 = vrot.lane.b32.xlu2 %v8537_v40, %s7457_s12  ;;  %1245 = vrot.lane.b32.xlu1 %v8217_v25, %s7457_s12 }
 0x1f8   : > { %1339 = vrot.lane.b32.xlu0 %v8537_v40, %s7455_s7 }
 0x1f9   : > { %v8565_v36 = vpop.permute.xlu2 %1325  ;;  %v8567_v39 = vpop.permute.xlu1 %1894 }
 0x1fa   : > { %v10701_v42 = vrot.slane %v8567_v39, 4  ;;  %v1893_v0 = vpop.permute.xlu0 %1892  ;;  %v1348_v32 = vrot.slane %v8565_v36, 4 }
 0x1fb   : > { %v1910_v4 = vrot.slane %v1893_v0, 4 }
 0x1fd   : > { %v1927_v43 = vsel %vm344_vm5, %v1910_v4, %v10701_v42  ;;  %v6497_v48 = vld [vmem:[#allocation2 + $0x738] sm:$0xf]  ;;  %v1831_v4 = vrot.slane %v8544_v27, 4 }
 0x1fe   : > { %v1928_v1 = vsel %vm1917_vm12, %v1893_v0, %v1927_v43  ;;  %v7123_v46 = vld [vmem:[#allocation2 + $0x7b8] sm:$0xf0] }
 0x1ff   : > { %1954 = vst [vmem:[#allocation2 + $0x764] sm:$0xff] %v1928_v1  ;;  %1963 = vrot.lane.b32.xlu2 %v8217_v25, %s7451_s16  ;;  %2054 = vrot.lane.b32.xlu1 %v8537_v40, %s7450_s20  ;;  %v6542_v41 = vor.u32 %v7123_v46, %v6541_v45 }
 0x200   : > { %2042 = vrot.lane.b32.xlu0 %v8217_v25, %s7450_s20 }
 0x201   : > { %3952 = vmatpush.bf16.msra.mxu2 %v6542_v41  ;;  %v8581_v28 = vpop.permute.xlu2 %1722  ;;  %v1418_v51 = vpop.permute.xlu1 %1417 }
 0x202   : > { %v1435_v54 = vrot.slane %v1418_v51, 4  ;;  %v8583_v56 = vpop.permute.xlu0 %1407 }
 0x203   : > { %v1430_v53 = vrot.slane %v8583_v56, 4 }
 0x204   : > { %v1452_v58 = vsel %vm344_vm5, %v1435_v54, %v1436_v47 }
 0x205   : > { %v1453_v59 = vsel %vm10720_vm13, %v1418_v51, %v1452_v58  ;;  %v1441_v9 = vsel %vm344_vm5, %v1429_v57, %v1430_v53 }
 0x206   : > { %1480 = vst [vmem:[#allocation2 + $0x554] sm:$0xff] %v1453_v59  ;;  %v1443_v10 = vsel %vm10720_vm13, %v8505_v61, %v1441_v9  ;;  %v7112_v3 = vld [vmem:[#allocation2 + $0x760] sm:$0xf0] }
 0x207   : > { %1472 = vst [vmem:[#allocation2 + $0x528] sm:$0xff] %v1443_v10  ;;  %1884 = vrot.lane.b32.xlu2 %v8217_v25, %s7452_s10  ;;  %1162 = vrot.lane.b32.xlu1 %v8233_v37, %s7449_s18  ;;  %v6498_v11 = vor.u32 %v7112_v3, %v6497_v48 }
 0x208   : > { %1975 = vrot.lane.b32.xlu0 %v8537_v40, %s7451_s16 }
 0x209   : > { %3953 = vmatpush.bf16.msra.mxu2 %v6498_v11  ;;  %v8602_v12 = vpop.permute.xlu2 %1736  ;;  %v8604_v16 = vpop.permute.xlu1 %1803 }
 0x20a   : > { %v10709_v61 = vrot.slane %v8604_v16, 4  ;;  %v1802_v18 = vpop.permute.xlu0 %1801  ;;  %v10700_v11 = vrot.slane %v8602_v12, 4 }
 0x20b   : > { %v1825_v17 = vrot.slane %v1802_v18, 4 }
 0x20d   : > { %v1837_v19 = vsel %vm344_vm5, %v1825_v17, %v10709_v61  ;;  %v7046_v20 = vld [vmem:[#allocation2 + $0x550] sm:$0xf0]  ;;  %v6235_v37 = vld [vmem:[#allocation2 + $0x554] sm:$0xf0] }
 0x20e   : > { %v1839_v38 = vsel %vm10771_vm4, %v1802_v18, %v1837_v19  ;;  %v6233_v21 = vld [vmem:[#allocation2 + $0x528] sm:$0xf]  ;;  %v7041_v7 = vld [vmem:[#allocation2 + $0x52c] sm:$0xf] }
 0x20f   : > { %1868 = vst [vmem:[#allocation2 + $0x6e0] sm:$0xff] %v1839_v38  ;;  %1817 = vrot.lane.b32.xlu2 %v8537_v40, %s7454_s8  ;;  %1805 = vrot.lane.b32.xlu1 %v8217_v25, %s7454_s8  ;;  %v6234_v13 = vor.u32 %v7046_v20, %v6233_v21  ;;  %v6238_v29 = vor.u32 %v7041_v7, %v6235_v37  ;;  %v1746_v37 = vrot.slane %v8581_v28, 4 }
 0x210   : > { %1896 = vrot.lane.b32.xlu0 %v8537_v40, %s7452_s10 }
 0x211   : > { %3937 = vmatpush.bf16.msra.mxu1 %v6234_v13  ;;  %3993 = vmatpush.bf16.msrb.mxu0 %v6238_v29  ;;  %v8618_v33 = vpop.permute.xlu2 %1253  ;;  %v1324_v34 = vpop.permute.xlu1 %1323 }
 0x212   : > { %v1347_v35 = vrot.slane %v1324_v34, 4  ;;  %v8620_v0 = vpop.permute.xlu0 %1815 }
 0x213   : > { %v1832_v43 = vrot.slane %v8620_v0, 4 }
 0x214   : > { %v1359_v1 = vsel %vm344_vm5, %v1347_v35, %v1348_v32 }
 0x215   : > { %v1361_v45 = vsel %vm1360_vm8, %v1324_v34, %v1359_v1  ;;  %v1848_v46 = vsel %vm344_vm5, %v1831_v4, %v1832_v43 }
 0x216   : > { %1392 = vst [vmem:[#allocation2 + $0x4d0] sm:$0xff] %v1361_v45  ;;  %v1849_v41 = vsel %vm10771_vm4, %v8544_v27, %v1848_v46  ;;  %v6453_v10 = vld [vmem:[#allocation2 + $0x6e0] sm:$0xf] }
 0x217   : > { %1875 = vst [vmem:[#allocation2 + $0x70c] sm:$0xff] %v1849_v41  ;;  %1647 = vrot.lane.b32.xlu2 %v8217_v25, %s7458_s13  ;;  %1738 = vrot.lane.b32.xlu1 %v8537_v40, %s7456_s9 }
 0x218   : > { %1726 = vrot.lane.b32.xlu0 %v8217_v25, %s7456_s9 }
 0x219   : > { %v8639_v51 = vpop.permute.xlu2 %1645  ;;  %v8641_v54 = vpop.permute.xlu1 %1337 }
 0x21a   : > { %v1354_v57 = vrot.slane %v8641_v54, 4  ;;  %v1336_v58 = vpop.permute.xlu0 %1335 }
 0x21b   : > { %v1353_v59 = vrot.slane %v1336_v58, 4 }
 0x21d   : > { %v1370_v27 = vsel %vm344_vm5, %v1353_v59, %v1354_v57  ;;  %v6189_v29 = vld [vmem:[#allocation2 + $0x4d0] sm:$0xf]  ;;  %v7030_v34 = vld [vmem:[#allocation2 + $0x4d4] sm:$0xf] }
 0x21e   : > { %v1371_v9 = vsel %vm1360_vm8, %v1336_v58, %v1370_v27  ;;  %v7101_v48 = vld [vmem:[#allocation2 + $0x708] sm:$0xf0] }
 0x21f   : > { %1399 = vst [vmem:[#allocation2 + $0x4fc] sm:$0xff] %v1371_v9  ;;  %1580 = vrot.lane.b32.xlu2 %v8537_v40, %s7459_s26  ;;  %1568 = vrot.lane.b32.xlu1 %v8217_v25, %s7459_s26  ;;  %v6454_v3 = vor.u32 %v7101_v48, %v6453_v10 }
 0x220   : > { %1659 = vrot.lane.b32.xlu0 %v8537_v40, %s7458_s13 }
 0x221   : > { %3954 = vmatpush.bf16.msra.mxu2 %v6454_v3  ;;  %v8655_v18 = vpop.permute.xlu2 %1564  ;;  %v1735_v17 = vpop.permute.xlu1 %1734 }
 0x222   : > { %v1752_v19 = vrot.slane %v1735_v17, 4  ;;  %v8657_v20 = vpop.permute.xlu0 %1724  ;;  %v1588_v42 = vrot.slane %v8655_v18, 4 }
 0x223   : > { %v10699_v38 = vrot.slane %v8657_v20, 4 }
 0x224   : > { %v1769_v21 = vsel %vm344_vm5, %v1752_v19, %v10700_v11  ;;  %v10715_v19 = vrot.slane %v8639_v51, 4 }
 0x225   : > { %v1770_v7 = vsel %vm10702_vm10, %v1735_v17, %v1769_v21  ;;  %v1758_v13 = vsel %vm344_vm5, %v1746_v37, %v10699_v38 }
 0x226   : > { %1796 = vst [vmem:[#allocation2 + $0x6b4] sm:$0xff] %v1770_v7  ;;  %v1760_v35 = vsel %vm10702_vm10, %v8581_v28, %v1758_v13  ;;  %v7035_v4 = vld [vmem:[#allocation2 + $0x4f8] sm:$0xf0]  ;;  %v6191_v1 = vld [vmem:[#allocation2 + $0x4fc] sm:$0xf0]  ;;  %vm10705_vm10 = vcmask 760832  }
 0x227   : > { %1789 = vst [vmem:[#allocation2 + $0x688] sm:$0xff] %v1760_v35  ;;  %2121 = vrot.lane.b32.xlu2 %v8217_v25, %s7461_s1  ;;  %1501 = vrot.lane.b32.xlu1 %v8537_v40, %s7460_s29  ;;  %v6190_v45 = vor.u32 %v7035_v4, %v6189_v29  ;;  %v6194_v46 = vor.u32 %v7030_v34, %v6191_v1  ;;  %v1271_v29 = vrot.slane %v8618_v33, 4 }
 0x228   : > { %1489 = vrot.lane.b32.xlu0 %v8217_v25, %s7460_s29  ;;  %v8685_v25 = vld [vmem:[#allocation2 + $0x464] sm:$0xff] }
 0x229   : > { %3938 = vmatpush.bf16.msra.mxu1 %v6190_v45  ;;  %3994 = vmatpush.bf16.msrb.mxu0 %v6194_v46  ;;  %v8676_v41 = vpop.permute.xlu2 %1578  ;;  %v8678_v58 = vpop.permute.xlu1 %1243 }
 0x22a   : > { %v1266_v28 = vrot.slane %v8678_v58, 4  ;;  %v1242_v59 = vpop.permute.xlu0 %1241 }
 0x22b   : > { %v1265_v27 = vrot.slane %v1242_v59, 4 }
 0x22d   : > { %v1277_v9 = vsel %vm344_vm5, %v1265_v27, %v1266_v28  ;;  %v7090_v10 = vld [vmem:[#allocation2 + $0x6b0] sm:$0xf0] }
 0x22e   : > { %v1279_v48 = vsel %vm10730_vm15, %v1242_v59, %v1277_v9  ;;  %v6409_v3 = vld [vmem:[#allocation2 + $0x688] sm:$0xf] }
 0x22f   : > { %1310 = vst [vmem:[#allocation2 + $0x478] sm:$0xff] %v1279_v48  ;;  %1423 = vrot.lane.b32.xlu2 %v8685_v25, %s7453_s27  ;;  %1411 = vrot.lane.b32.xlu1 %v8213_v24, %s7453_s27  ;;  %v6410_v17 = vor.u32 %v7090_v10, %v6409_v3  ;;  %v6101_v48 = vld [vmem:[#allocation2 + $0x420] sm:$0xf] }
 0x230   : > { %2133 = vrot.lane.b32.xlu0 %v8537_v40, %s7461_s1 }
 0x231   : > { %3955 = vmatpush.bf16.msra.mxu2 %v6410_v17  ;;  %v8694_v37 = vpop.permute.xlu2 %1487  ;;  %v1644_v21 = vpop.permute.xlu1 %1643 }
 0x232   : > { %v1667_v7 = vrot.slane %v1644_v21, 4  ;;  %v8696_v13 = vpop.permute.xlu0 %1255 }
 0x233   : > { %v1272_v34 = vrot.slane %v8696_v13, 4 }
 0x234   : > { %v1679_v35 = vsel %vm344_vm5, %v1667_v7, %v10715_v19  ;;  %v7008_v7 = vld [vmem:[#allocation2 + $0x424] sm:$0xf]  ;;  %v6975_v19 = vld [vmem:[#allocation2 + $0x31c] sm:$0xf] }
 0x235   : > { %v1681_v4 = vsel %vm10779_vm14, %v1644_v21, %v1679_v35  ;;  %v1288_v1 = vsel %vm344_vm5, %v1271_v29, %v1272_v34 }
 0x236   : > { %1710 = vst [vmem:[#allocation2 + $0x630] sm:$0xff] %v1681_v4  ;;  %v1289_v45 = vsel %vm10730_vm15, %v8618_v33, %v1288_v1  ;;  %v7013_v33 = vld [vmem:[#allocation2 + $0x448] sm:$0xf0]  ;;  %v6145_v17 = vld [vmem:[#allocation2 + $0x478] sm:$0xf] }
 0x237   : > { %1317 = vst [vmem:[#allocation2 + $0x4a4] sm:$0xff] %v1289_v45  ;;  %1329 = vrot.lane.b32.xlu2 %v8213_v24, %s7455_s7  ;;  %2056 = vrot.lane.b32.xlu1 %v8685_v25, %s7450_s20  ;;  %v7019_v21 = vld [vmem:[#allocation2 + $0x47c] sm:$0xf]  ;;  %v6103_v4 = vld [vmem:[#allocation2 + $0x44c] sm:$0xf0] }
 0x238   : > { %2044 = vrot.lane.b32.xlu0 %v8213_v24, %s7450_s20  ;;  %v8726_v1 = vld [vmem:[#allocation2 + $0x438] sm:$0xff] }
 0x239   : > { %v8715_v46 = vpop.permute.xlu2 %2117  ;;  %v8717_v59 = vpop.permute.xlu1 %1657 }
 0x23a   : > { %v10697_v27 = vrot.slane %v8717_v59, 4  ;;  %v1656_v9 = vpop.permute.xlu0 %1655 }
 0x23b   : > { %v1673_v10 = vrot.slane %v1656_v9, 4 }
 0x23d   : > { %v1690_v3 = vsel %vm344_vm5, %v1673_v10, %v10697_v27  ;;  %v10712_v10 = vrot.slane %v8676_v41, 4  ;;  %v6106_v27 = vor.u32 %v7008_v7, %v6103_v4 }
 0x23e   : > { %v1691_v29 = vsel %vm10779_vm14, %v1656_v9, %v1690_v3  ;;  %v7024_v24 = vld [vmem:[#allocation2 + $0x4a0] sm:$0xf0]  ;;  %v6147_v35 = vld [vmem:[#allocation2 + $0x4a4] sm:$0xf0] }
 0x23f   : > { %1717 = vst [vmem:[#allocation2 + $0x65c] sm:$0xff] %v1691_v29  ;;  %1977 = vrot.lane.b32.xlu2 %v8685_v25, %s7451_s16  ;;  %1965 = vrot.lane.b32.xlu1 %v8726_v1, %s7451_s16  ;;  %v6146_v45 = vor.u32 %v7024_v24, %v6145_v17  ;;  %v6150_v8 = vor.u32 %v7019_v21, %v6147_v35  ;;  %v10704_v35 = vrot.slane %v8694_v37, 4 }
 0x240   : > { %1341 = vrot.lane.b32.xlu0 %v8685_v25, %s7455_s7  ;;  %v6102_v29 = vor.u32 %v7013_v33, %v6101_v48  ;;  %v6365_v33 = vld [vmem:[#allocation2 + $0x630] sm:$0xf] }
 0x241   : > { %3939 = vmatpush.bf16.msra.mxu1 %v6146_v45  ;;  %3995 = vmatpush.bf16.msrb.mxu0 %v6150_v8  ;;  %v8733_v9 = vpop.permute.xlu2 %2131  ;;  %v1577_v3 = vpop.permute.xlu1 %1576 }
 0x242   : > { %v1594_v38 = vrot.slane %v1577_v3, 4  ;;  %v8735_v11 = vpop.permute.xlu0 %1566 }
 0x243   : > { %v10707_v17 = vrot.slane %v8735_v11, 4 }
 0x244   : > { %v1611_v21 = vsel %vm344_vm5, %v1594_v38, %v10712_v10 }
 0x245   : > { %v1612_v24 = vsel %vm10777_vm0, %v1577_v3, %v1611_v21  ;;  %v1600_v8 = vsel %vm344_vm5, %v1588_v42, %v10707_v17  ;;  %3940 = vmatpush.bf16.msra.mxu1 %v6102_v29  ;;  %3996 = vmatpush.bf16.msrb.mxu0 %v6106_v27 }
 0x246   : > { %1638 = vst [vmem:[#allocation2 + $0x604] sm:$0xff] %v1612_v24  ;;  %v1602_v48 = vsel %vm10777_vm0, %v8655_v18, %v1600_v8  ;;  %v7079_v7 = vld [vmem:[#allocation2 + $0x658] sm:$0xf0] }
 0x247   : > { %1631 = vst [vmem:[#allocation2 + $0x5d8] sm:$0xff] %v1602_v48  ;;  %1886 = vrot.lane.b32.xlu2 %v8726_v1, %s7452_s10  ;;  %1259 = vrot.lane.b32.xlu1 %v8685_v25, %s7457_s12  ;;  %v6366_v38 = vor.u32 %v7079_v7, %v6365_v33 }
 0x248   : > { %1247 = vrot.lane.b32.xlu0 %v8726_v1, %s7457_s12 }
 0x249   : > { %3956 = vmatpush.bf16.msra.mxu2 %v6366_v38  ;;  %v8755_v42 = vpop.permute.xlu2 %1327  ;;  %v1486_v27 = vpop.permute.xlu1 %1485 }
 0x24a   : > { %v10708_v18 = vrot.slane %v8755_v42, 4  ;;  %v1509_v4 = vrot.slane %v1486_v27, 4  ;;  %v8758_v45 = vpop.permute.xlu0 %1160 }
 0x24b   : > { %v10711_v3 = vrot.slane %v8758_v45, 4 }
 0x24c   : > { %v1362_v29 = vsel %vm344_vm5, %v1348_v32, %v10708_v18  ;;  %v1521_v21 = vsel %vm344_vm5, %v1509_v4, %v10704_v35  ;;  %v2141_v18 = vrot.slane %v8715_v46, 4 }
 0x24d   : > { %v1363_v24 = vsel %vm1360_vm8, %v8565_v36, %v1362_v29  ;;  %v1523_v8 = vsel %vm10705_vm10, %v1486_v27, %v1521_v21  ;;  %v1193_v48 = vsel %vm10729_vm6, %v10711_v3, %v8758_v45  ;;  %v7068_v33 = vld [vmem:[#allocation2 + $0x600] sm:$0xf0]  ;;  %v5971_v3 = vld [vmem:[#allocation2 + $0x344] sm:$0xf0] }
 0x24e   : > { %1393 = vst [vmem:[#allocation2 + $0x4d8] sm:$0xff] %v1363_v24  ;;  %v6321_v7 = vld [vmem:[#allocation2 + $0x5d8] sm:$0xf] }
 0x24f   : > { %1552 = vst [vmem:[#allocation2 + $0x580] sm:$0xff] %v1523_v8  ;;  %1819 = vrot.lane.b32.xlu2 %v8685_v25, %s7454_s8  ;;  %1807 = vrot.lane.b32.xlu1 %v8726_v1, %s7454_s8  ;;  %v6322_v32 = vor.u32 %v7068_v33, %v6321_v7  ;;  %v6057_v7 = vld [vmem:[#allocation2 + $0x3c8] sm:$0xf] }
 0x250   : > { %1223 = vst.msk [vmem:[#allocation2 + $0x3f4] sm:$0xff] %vm8468_vm7, %v1193_v48  ;;  %1898 = vrot.lane.b32.xlu0 %v8685_v25, %s7452_s10 }
 0x251   : > { %3957 = vmatpush.bf16.msra.mxu2 %v6322_v32  ;;  %v8784_v36 = vpop.permute.xlu2 %1257  ;;  %v8786_v38 = vpop.permute.xlu1 %1499  ;;  %v6997_v32 = vld [vmem:[#allocation2 + $0x3cc] sm:$0xf] }
 0x252   : > { %v10703_v27 = vrot.slane %v8784_v36, 4  ;;  %v10706_v4 = vrot.slane %v8786_v38, 4  ;;  %v1498_v29 = vpop.permute.xlu0 %1497 }
 0x253   : > { %v1515_v21 = vrot.slane %v1498_v29, 4 }
 0x254   : > { %v1290_v24 = vsel %vm344_vm5, %v1272_v34, %v10703_v27 }
 0x255   : > { %v1291_v8 = vsel %vm10730_vm15, %v8696_v13, %v1290_v24  ;;  %v1532_v48 = vsel %vm344_vm5, %v1515_v21, %v10706_v4  ;;  %v10717_v13 = vrot.slane %v8733_v9, 4 }
 0x256   : > { %1318 = vst [vmem:[#allocation2 + $0x4ac] sm:$0xff] %v1291_v8  ;;  %v1533_v33 = vsel %vm10705_vm10, %v1498_v29, %v1532_v48  ;;  %v6991_v48 = vld [vmem:[#allocation2 + $0x398] sm:$0xf0]  ;;  %vm10778_vm10 = vcmask 441344  }
 0x257   : > { %1559 = vst [vmem:[#allocation2 + $0x5ac] sm:$0xff] %v1533_v33  ;;  %1740 = vrot.lane.b32.xlu2 %v8685_v25, %s7456_s9  ;;  %1728 = vrot.lane.b32.xlu1 %v8726_v1, %s7456_s9  ;;  %v7002_v34 = vld [vmem:[#allocation2 + $0x3f0] sm:$0xf0]  ;;  %v6059_v27 = vld [vmem:[#allocation2 + $0x3f4] sm:$0xf0] }
 0x258   : > { %1164 = vrot.lane.b32.xlu0 %v8537_v40, %s7449_s18  ;;  %v6058_v21 = vor.u32 %v7002_v34, %v6057_v7  ;;  %v6062_v24 = vor.u32 %v6997_v32, %v6059_v27  ;;  %v6015_v33 = vld [vmem:[#allocation2 + $0x39c] sm:$0xf0]  ;;  %v6013_v40 = vld [vmem:[#allocation2 + $0x370] sm:$0xf]  ;;  %v6986_v7 = vld [vmem:[#allocation2 + $0x374] sm:$0xf] }
 0x259   : > { %v8808_v8 = vpop.permute.xlu2 %1963  ;;  %v2130_v29 = vpop.permute.xlu1 %2129  ;;  %v6014_v34 = vor.u32 %v6991_v48, %v6013_v40  ;;  %v6277_v48 = vld [vmem:[#allocation2 + $0x580] sm:$0xf] }
 0x25a   : > { %3941 = vmatpush.bf16.msra.mxu1 %v6058_v21  ;;  %3997 = vmatpush.bf16.msrb.mxu0 %v6062_v24  ;;  %v10716_v35 = vrot.slane %v8808_v8, 4  ;;  %v2147_v4 = vrot.slane %v2130_v29, 4  ;;  %v8811_v17 = vpop.permute.xlu0 %2119  ;;  %v6018_v21 = vor.u32 %v6986_v7, %v6015_v33  ;;  %v5969_v24 = vld [vmem:[#allocation2 + $0x318] sm:$0xf]  ;;  %v5927_v7 = vld [vmem:[#allocation2 + $0x2ec] sm:$0xf0] }
 0x25b   : > { %v2142_v61 = vrot.slane %v8811_v17, 4 }
 0x25c   : > { %v1998_v27 = vsel %vm344_vm5, %v1984_v63, %v10716_v35  ;;  %v2164_v32 = vsel %vm344_vm5, %v2147_v4, %v10717_v13  ;;  %v5565_v63 = vld [vmem:[#allocation7 + $0x8] sm:$0xf]  ;;  %v6875_v35 = vld [vmem:[#allocation7 + $0x14] sm:$0xf0] }
 0x25d   : > { %v1999_v10 = vsel %vm1996_vm9, %v8528_v5, %v1998_v27  ;;  %v2165_v23 = vsel %vm10778_vm10, %v2130_v29, %v2164_v32  ;;  %v2153_v60 = vsel %vm344_vm5, %v2141_v18, %v2142_v61  ;;  %v5974_v18 = vor.u32 %v6975_v19, %v5971_v3  ;;  %v5925_v29 = vld [vmem:[#allocation2 + $0x2c0] sm:$0xf]  ;;  %v5557_v27 = vld [vmem:[#allocation7] sm:$0xf]  ;;  %v6874_v32 = vld [vmem:[#allocation7 + $0xc] sm:$0xf0] }
 0x25e   : > { %2027 = vst [vmem:[#allocation2 + $0x798] sm:$0xff] %v1999_v10  ;;  %v2155_v4 = vsel %vm10778_vm10, %v8715_v46, %v2153_v60  ;;  %3942 = vmatpush.bf16.msra.mxu1 %v6014_v34  ;;  %3998 = vmatpush.bf16.msrb.mxu0 %v6018_v21  ;;  %v7057_v33 = vld [vmem:[#allocation2 + $0x5a8] sm:$0xf0]  ;;  %v5970_v10 = vor.u32 %v6980_v30, %v5969_v24  ;;  %v6587_v3 = vld [vmem:[#allocation2 + $0x814] sm:$0xf0] }
 0x25f   : > { %2191 = vst [vmem:[#allocation2 + $0x86c] sm:$0xff] %v2165_v23  ;;  %1649 = vrot.lane.b32.xlu2 %v8726_v1, %s7458_s13  ;;  %2135 = vrot.lane.b32.xlu1 %v8685_v25, %s7461_s1  ;;  %v6278_v5 = vor.u32 %v7057_v33, %v6277_v48  ;;  %v6969_v60 = vld [vmem:[#allocation2 + $0x2e8] sm:$0xf0]  ;;  %v8837_v46 = vor.u32 %v6875_v35, %v5565_v63 }
 0x260   : > { %2184 = vst [vmem:[#allocation2 + $0x840] sm:$0xff] %v2155_v4  ;;  %2123 = vrot.lane.b32.xlu0 %v8726_v1, %s7461_s1  ;;  %v7129_v19 = vld [vmem:[#allocation2 + $0x7ec] sm:$0xf]  ;;  %v8847_v35 = vor.u32 %v6874_v32, %v5557_v27  ;;  %v5926_v63 = vor.u32 %v6969_v60, %v5925_v29  ;;  %v6964_v4 = vld [vmem:[#allocation2 + $0x2c4] sm:$0xf] }
 0x261   : > { %3958 = vmatpush.bf16.msra.mxu2 %v6278_v5  ;;  %v8839_v40 = vpop.permute.xlu2 %1884  ;;  %v8841_v23 = vpop.permute.xlu1 %1421  ;;  %v5930_v5 = vor.u32 %v6964_v4, %v5927_v7  ;;  %v6590_v29 = vor.u32 %v7129_v19, %v6587_v3  ;;  %v6543_v60 = vld [vmem:[#allocation2 + $0x7bc] sm:$0xf0] }
 0x262   : > { %3943 = vmatpush.bf16.msra.mxu1 %v5970_v10  ;;  %3999 = vmatpush.bf16.msrb.mxu0 %v5974_v18  ;;  %v10719_v34 = vrot.slane %v8839_v40, 4  ;;  %v10728_v21 = vrot.slane %v8841_v23, 4  ;;  %v8845_v30 = vpop.permute.xlu0 %1409  ;;  %v5839_v19 = vld [vmem:[#allocation2 + $0x23c] sm:$0xf0] }
 0x263   : > { %v10718_v24 = vrot.slane %v8845_v30, 4  ;;  %3931 = vmatmul.bf16.vlgmr.msra.gmra.mxu0 %v8847_v35  ;;  %v8877_v3 = vld [vmem:[#allocation2 + $0x440] sm:$0xff] }
 0x264   : > { %v1919_v48 = vsel %vm344_vm5, %v1905_v22, %v10719_v34  ;;  %v1454_v33 = vsel %vm344_vm5, %v1436_v47, %v10728_v21  ;;  %3959 = vmatmul.bf16.vlgmr.msra.gmra.mxu2 %v8837_v46  ;;  %v5883_v47 = vld [vmem:[#allocation2 + $0x294] sm:$0xf0]  ;;  %v5619_v21 = vld [vmem:[#allocation2 + $0x84] sm:$0xf0] }
 0x265   : > { %v1920_v10 = vsel %vm1917_vm12, %v8486_v31, %v1919_v48  ;;  %v1455_v18 = vsel %vm10720_vm13, %v8526_v14, %v1454_v33  ;;  %v1444_v22 = vsel %vm344_vm5, %v1430_v53, %v10718_v24  ;;  %v8873_v14 = vld [vmem:[#allocation2 + $0x46c] sm:$0xff] }
 0x266   : > { %1948 = vst [vmem:[#allocation2 + $0x740] sm:$0xff] %v1920_v10  ;;  %v1445_v7 = vsel %vm10720_vm13, %v8583_v56, %v1444_v22  ;;  %3944 = vmatpush.bf16.msra.mxu1 %v5926_v63  ;;  %4000 = vmatpush.bf16.msrb.mxu0 %v5930_v5  ;;  %v7145_v27 = vld [vmem:[#allocation2 + $0x868] sm:$0xf0]  ;;  %v6631_v31 = vld [vmem:[#allocation2 + $0x86c] sm:$0xf0]  ;;  %vm10731_vm13 = vcmask 130048  }
 0x267   : > { %1481 = vst [vmem:[#allocation2 + $0x55c] sm:$0xff] %v1455_v18  ;;  %1425 = vrot.lane.b32.xlu2 %v8873_v14, %s7453_s27  ;;  %v6629_v32 = vld [vmem:[#allocation2 + $0x840] sm:$0xf]  ;;  %v7140_v53 = vld [vmem:[#allocation2 + $0x844] sm:$0xf]  ;;  %1413 = vrot.lane.b32.xlu1 %v8877_v3, %s7453_s27 }
 0x268   : > { %1473 = vst [vmem:[#allocation2 + $0x530] sm:$0xff] %v1445_v7  ;;  %1661 = vrot.lane.b32.xlu0 %v8685_v25, %s7458_s13  ;;  %v6630_v56 = vor.u32 %v7145_v27, %v6629_v32  ;;  %v7118_v63 = vld [vmem:[#allocation2 + $0x794] sm:$0xf]  ;;  %v6634_v4 = vor.u32 %v7140_v53, %v6631_v31  ;;  %v6953_v48 = vld [vmem:[#allocation2 + $0x26c] sm:$0xf] }
 0x269   : > { %v6546_v33 = vor.u32 %v7118_v63, %v6543_v60  ;;  %v8883_v5 = vpop.permute.xlu2 %1817  ;;  %v8885_v10 = vpop.permute.xlu1 %1245  ;;  %v5886_v18 = vor.u32 %v6953_v48, %v5883_v47  ;;  %v6942_v22 = vld [vmem:[#allocation2 + $0x214] sm:$0xf]  ;;  %v5567_v7 = vld [vmem:[#allocation7 + $0x18] sm:$0xf0]  ;;  %v6499_v27 = vld [vmem:[#allocation2 + $0x764] sm:$0xf0] }
 0x26a   : > { %4007 = vmatpush.bf16.msrb.mxu1 %v6590_v29  ;;  %v6873_v29 = vld [vmem:[#allocation7 + $0xc] sm:$0xf]  ;;  %3972 = vmatpush.bf16.msra.mxu3 %v6630_v56  ;;  %v10726_v13 = vrot.slane %v8883_v5, 4  ;;  %v10721_v24 = vrot.slane %v8885_v10, 4  ;;  %v8889_v34 = vpop.permute.xlu0 %1339  ;;  %v7107_v53 = vld [vmem:[#allocation2 + $0x73c] sm:$0xf]  ;;  %v5842_v56 = vor.u32 %v6942_v22, %v5839_v19 }
 0x26b   : > { %4028 = vmatpush.bf16.msrb.mxu2 %v6634_v4  ;;  %v8891_v31 = vor.u32 %v6873_v29, %v5567_v7  ;;  %v10723_v60 = vrot.slane %v8889_v34, 4  ;;  %v6502_v48 = vor.u32 %v7107_v53, %v6499_v27  ;;  %v6455_v19 = vld [vmem:[#allocation2 + $0x70c] sm:$0xf0]  ;;  %v6931_v22 = vld [vmem:[#allocation2 + $0x1bc] sm:$0xf] }
 0x26c   : > { %v1850_v47 = vsel %vm344_vm5, %v1832_v43, %v10726_v13  ;;  %v1280_v32 = vsel %vm344_vm5, %v1266_v28, %v10721_v24  ;;  %v10824_v13 = vrot.slane %v8546_v62, 4 }
 0x26d   : > { %v1851_v63 = vsel %vm10771_vm4, %v8620_v0, %v1850_v47  ;;  %v1281_v4 = vsel %vm10730_vm15, %v8678_v58, %v1280_v32  ;;  %v1372_v43 = vsel %vm344_vm5, %v1354_v57, %v10723_v60  ;;  %6671 = vmatmul.msk.bf16.vlgmr.msra.gmra.mxu3 %vm10731_vm13, %v8891_v31  ;;  %v7096_v57 = vld [vmem:[#allocation2 + $0x6e4] sm:$0xf]  ;;  %v5751_v47 = vld [vmem:[#allocation2 + $0x18c] sm:$0xf0]  ;;  %vm10830_vm15 = vcmask 736256  }
 0x26e   : > { %4008 = vmatpush.bf16.msrb.mxu1 %v6546_v33  ;;  %3979 = vmatpush.bf16.msrb.mxu3 %v5886_v18  ;;  %v5795_v33 = vld [vmem:[#allocation2 + $0x1e4] sm:$0xf0]  ;;  %1876 = vst [vmem:[#allocation2 + $0x714] sm:$0xff] %v1851_v63  ;;  %v1373_v28 = vsel %vm1360_vm8, %v8641_v54, %v1372_v43  ;;  %v7047_v0 = vld [vmem:[#allocation2 + $0x558] sm:$0xf0]  ;;  %v6458_v54 = vor.u32 %v7096_v57, %v6455_v19  ;;  %v10820_v19 = vrot.slane %v8449_v2, 4 }
 0x26f   : > { %1311 = vst [vmem:[#allocation2 + $0x480] sm:$0xff] %v1281_v4  ;;  %v6241_v58 = vld [vmem:[#allocation2 + $0x530] sm:$0xf]  ;;  %1570 = vrot.lane.b32.xlu2 %v8726_v1, %s7459_s26  ;;  %2058 = vrot.lane.b32.xlu1 %v8873_v14, %s7450_s20  ;;  %v5798_v27 = vor.u32 %v6931_v22, %v5795_v33  ;;  %v7085_v63 = vld [vmem:[#allocation2 + $0x68c] sm:$0xf]  ;;  %v10821_v22 = vrot.slane %v8507_v6, 4 }
 0x270   : > { %1400 = vst [vmem:[#allocation2 + $0x504] sm:$0xff] %v1373_v28  ;;  %v6242_v18 = vor.u32 %v7047_v0, %v6241_v58  ;;  %2046 = vrot.lane.b32.xlu0 %v8877_v3, %s7450_s20  ;;  %v6411_v4 = vld [vmem:[#allocation2 + $0x6b4] sm:$0xf0]  ;;  %v10819_v28 = vrot.slane %v8639_v51, 4 }
 0x271   : > { %v8923_v29 = vpop.permute.xlu2 %1647  ;;  %v8925_v7 = vpop.permute.xlu1 %2054 }
 0x272   : > { %4009 = vmatpush.bf16.msrb.mxu1 %v6502_v48  ;;  %3980 = vmatpush.bf16.msrb.mxu3 %v5842_v56  ;;  %v10722_v32 = vrot.slane %v8923_v29, 4  ;;  %v10725_v53 = vrot.slane %v8925_v7, 4  ;;  %v8929_v56 = vpop.permute.xlu0 %2042  ;;  %v6920_v48 = vld [vmem:[#allocation2 + $0x164] sm:$0xf] }
 0x273   : > { %4049 = vmatpush.bf16.msra.mxu2 %v6242_v18  ;;  %v10724_v43 = vrot.slane %v8929_v56, 4  ;;  %v5754_v58 = vor.u32 %v6920_v48, %v5751_v47  ;;  %v6367_v48 = vld [vmem:[#allocation2 + $0x65c] sm:$0xf0] }
 0x274   : > { %v1682_v33 = vsel %vm344_vm5, %v10819_v28, %v10722_v32  ;;  %v2087_v0 = vsel %vm344_vm5, %v10820_v19, %v10725_v53  ;;  %6672 = vmatmul.msk.bf16.vlgmr.msrb.gmra.mxu2 %vm10731_vm13, %v8891_v31  ;;  %v5707_v28 = vld [vmem:[#allocation2 + $0x134] sm:$0xf0]  ;;  %v6909_v19 = vld [vmem:[#allocation2 + $0x10c] sm:$0xf]  ;;  %v7014_v32 = vld [vmem:[#allocation2 + $0x450] sm:$0xf0] }
 0x275   : > { %v1683_v57 = vsel %vm10779_vm14, %v8639_v51, %v1682_v33  ;;  %v2088_v18 = vsel %vm2075_vm2, %v8449_v2, %v2087_v0  ;;  %v6197_v51 = vld [vmem:[#allocation2 + $0x4d8] sm:$0xf]  ;;  %v7074_v2 = vld [vmem:[#allocation2 + $0x634] sm:$0xf]  ;;  %vm10832_vm13 = vmmov %vm10830_vm15 }
 0x276   : > { %4010 = vmatpush.bf16.msrb.mxu1 %v6458_v54  ;;  %3981 = vmatpush.bf16.msrb.mxu3 %v5798_v27  ;;  %v2077_v54 = vsel %vm344_vm5, %v10821_v22, %v10724_v43  ;;  %v6414_v27 = vor.u32 %v7085_v63, %v6411_v4  ;;  %1711 = vst [vmem:[#allocation2 + $0x638] sm:$0xff] %v1683_v57  ;;  %v6323_v57 = vld [vmem:[#allocation2 + $0x604] sm:$0xf0]  ;;  %v6898_v22 = vld [vmem:[#allocation2 + $0xb4] sm:$0xf] }
 0x277   : > { %v2078_v47 = vsel %vm2075_vm2, %v8507_v6, %v2077_v54  ;;  %2113 = vst [vmem:[#allocation2 + $0x81c] sm:$0xff] %v2088_v18  ;;  %v7036_v33 = vld [vmem:[#allocation2 + $0x500] sm:$0xf0]  ;;  %1343 = vrot.lane.b32.xlu2 %v8873_v14, %s7455_s7  ;;  %1331 = vrot.lane.b32.xlu1 %v8877_v3, %s7455_s7  ;;  %v6370_v6 = vor.u32 %v7074_v2, %v6367_v48  ;;  %v6153_v18 = vld [vmem:[#allocation2 + $0x480] sm:$0xf] }
 0x278   : > { %2106 = vst [vmem:[#allocation2 + $0x7f0] sm:$0xff] %v2078_v47  ;;  %v6198_v63 = vor.u32 %v7036_v33, %v6197_v51  ;;  %1582 = vrot.lane.b32.xlu0 %v8685_v25, %s7459_s26  ;;  %v5663_v54 = vld [vmem:[#allocation2 + $0xdc] sm:$0xf0]  ;;  %v7063_v51 = vld [vmem:[#allocation2 + $0x5dc] sm:$0xf] }
 0x279   : > { %v8961_v4 = vpop.permute.xlu2 %1580  ;;  %v8963_v0 = vpop.permute.xlu1 %1162  ;;  %v7025_v33 = vld [vmem:[#allocation2 + $0x4a8] sm:$0xf0]  ;;  %v6109_v2 = vld [vmem:[#allocation2 + $0x428] sm:$0xf]  ;;  %v5666_v53 = vor.u32 %v6898_v22, %v5663_v54 }
 0x27a   : > { %4011 = vmatpush.bf16.msrb.mxu1 %v6414_v27  ;;  %3982 = vmatpush.bf16.msrb.mxu3 %v5754_v58  ;;  %v5710_v58 = vor.u32 %v6909_v19, %v5707_v28  ;;  %v10727_v27 = vrot.slane %v8961_v4, 4  ;;  %v10733_v47 = vrot.slane %v8963_v0, 4  ;;  %v8967_v24 = vpop.permute.xlu0 %1975  ;;  %v10822_v28 = vrot.slane %v8676_v41, 4 }
 0x27b   : > { %4050 = vmatpush.bf16.msra.mxu2 %v6198_v63  ;;  %v1991_v48 = vrot.slane %v8967_v24, 4  ;;  %v10823_v63 = vrot.slane %v8758_v45, 4  ;;  %v6154_v43 = vor.u32 %v7025_v33, %v6153_v18  ;;  %v6279_v18 = vld [vmem:[#allocation2 + $0x5ac] sm:$0xf0]  ;;  %v6110_v54 = vor.u32 %v7014_v32, %v6109_v2  ;;  %v6876_v2 = vld [vmem:[#allocation2 + $0x4] sm:$0xf] }
 0x27c   : > { %v1613_v19 = vsel %vm344_vm5, %v10822_v28, %v10727_v27  ;;  %v6326_v27 = vor.u32 %v7063_v51, %v6323_v57  ;;  %v6887_v57 = vld [vmem:[#allocation2 + $0x5c] sm:$0xf] }
 0x27d   : > { %v1194_v60 = vsel %vm344_vm5, %v10823_v63, %v10733_v47  ;;  %v2008_v28 = vsel %vm344_vm5, %v10824_v13, %v1991_v48  ;;  %v7052_v13 = vld [vmem:[#allocation2 + $0x584] sm:$0xf]  ;;  %v10833_v47 = vrot.slane %v8755_v42, 4 }
 0x27e   : > { %4012 = vmatpush.bf16.msrb.mxu1 %v6370_v6  ;;  %3983 = vmatpush.bf16.msrb.mxu3 %v5710_v58  ;;  %v1614_v6 = vsel %vm10777_vm0, %v8676_v41, %v1613_v19  ;;  %v1195_v58 = vsel %vm10729_vm6, %v1194_v60, %v8963_v0  ;;  %v2009_v45 = vsel %vm1996_vm9, %v8546_v62, %v2008_v28  ;;  %v7135_v22 = vld [vmem:[#allocation2 + $0x818] sm:$0xf0]  ;;  %v10825_v28 = vrot.slane %v8604_v16, 4 }
 0x27f   : > { %1639 = vst [vmem:[#allocation2 + $0x60c] sm:$0xff] %v1614_v6  ;;  %4051 = vmatpush.bf16.msra.mxu2 %v6154_v43  ;;  %v6593_v41 = vld [vmem:[#allocation2 + $0x7f0] sm:$0xf]  ;;  %1491 = vrot.lane.b32.xlu2 %v8726_v1, %s7460_s29  ;;  %v6282_v62 = vor.u32 %v7052_v13, %v6279_v18  ;;  %v6959_v19 = vld [vmem:[#allocation2 + $0x298] sm:$0xf0]  ;;  %vm10829_vm6 = vcmask 769024  }
 0x280   : > { %1224 = vst [vmem:[#allocation2 + $0x3fc] sm:$0xff] %v1195_v58  ;;  %1979 = vrot.lane.b32.xlu1 %v8873_v14, %s7451_s16  ;;  %v6594_v60 = vor.u32 %v7135_v22, %v6593_v41  ;;  %1967 = vrot.lane.b32.xlu0 %v8877_v3, %s7451_s16  ;;  %v6872_v6 = vld [vmem:[#allocation7 + $0x4] sm:$0xf]  ;;  %v5559_v58 = vld [vmem:[#allocation7 + $0x10] sm:$0xf0]  ;;  %v10826_v41 = vrot.slane %v8567_v39, 4 }
 0x281   : > { %2034 = vst [vmem:[#allocation2 + $0x7c4] sm:$0xff] %v2009_v45  ;;  %v8997_v43 = vpop.permute.xlu2 %2121  ;;  %v8999_v32 = vpop.permute.xlu1 %1805  ;;  %v9016_v18 = vor.u32 %v6872_v6, %v5559_v58  ;;  %v6065_v6 = vld [vmem:[#allocation2 + $0x3d0] sm:$0xf] }
 0x282   : > { %4013 = vmatpush.bf16.msrb.mxu1 %v6326_v27  ;;  %3984 = vmatpush.bf16.msrb.mxu3 %v5666_v53  ;;  %v5622_v53 = vor.u32 %v6887_v57, %v5619_v21  ;;  %v5575_v27 = vld [vmem:[#allocation2 + $0x2c] sm:$0xf0]  ;;  %v10732_v51 = vrot.slane %v8997_v43, 4  ;;  %v10736_v1 = vrot.slane %v8999_v32, 4  ;;  %v9003_v33 = vpop.permute.xlu0 %1896  ;;  %v6948_v57 = vld [vmem:[#allocation2 + $0x240] sm:$0xf0] }
 0x283   : > { %4063 = vmatpush.bf16.msra.mxu0 %v6594_v60  ;;  %4052 = vmatpush.bf16.msra.mxu2 %v6110_v54  ;;  %v10735_v63 = vrot.slane %v9003_v33, 4  ;;  %v5578_v13 = vor.u32 %v6876_v2, %v5575_v27  ;;  %v5889_v60 = vld [vmem:[#allocation2 + $0x270] sm:$0xf] }
 0x284   : > { %v2156_v21 = vsel %vm344_vm5, %v2142_v61, %v10732_v51  ;;  %v1840_v45 = vsel %vm344_vm5, %v10825_v28, %v10736_v1  ;;  %3945 = vmatmul.bf16.vlgmr.msra.gmra.mxu1 %v9016_v18  ;;  %4001 = vmatmul.bf16.vlgmr.msrb.gmra.mxu0 %v9016_v18  ;;  %v6992_v28 = vld [vmem:[#allocation2 + $0x3a0] sm:$0xf0]  ;;  %v7102_v51 = vld [vmem:[#allocation2 + $0x710] sm:$0xf0] }
 0x285   : > { %v2157_v22 = vsel %vm10778_vm10, %v8811_v17, %v2156_v21  ;;  %v1841_v54 = vsel %vm10771_vm4, %v8604_v16, %v1840_v45  ;;  %v1929_v61 = vsel %vm344_vm5, %v10826_v41, %v10735_v63  ;;  %v6549_v17 = vld [vmem:[#allocation2 + $0x798] sm:$0xf] }
 0x286   : > { %4014 = vmatpush.bf16.msrb.mxu1 %v6282_v62  ;;  %3985 = vmatpush.bf16.msrb.mxu3 %v5622_v53  ;;  %2185 = vst [vmem:[#allocation2 + $0x848] sm:$0xff] %v2157_v22  ;;  %v1930_v62 = vsel %vm1917_vm12, %v8567_v39, %v1929_v61  ;;  %v5890_v53 = vor.u32 %v6959_v19, %v5889_v60  ;;  %v5845_v19 = vld [vmem:[#allocation2 + $0x218] sm:$0xf]  ;;  %v6937_v60 = vld [vmem:[#allocation2 + $0x1e8] sm:$0xf0] }
 0x287   : > { %v7003_v58 = vld [vmem:[#allocation2 + $0x3f8] sm:$0xf0]  ;;  %1869 = vst [vmem:[#allocation2 + $0x6e8] sm:$0xff] %v1841_v54  ;;  %1261 = vrot.lane.b32.xlu2 %v8873_v14, %s7457_s12  ;;  %v5846_v41 = vor.u32 %v6948_v57, %v5845_v19  ;;  %v5801_v19 = vld [vmem:[#allocation2 + $0x1c0] sm:$0xf] }
 0x288   : > { %v6066_v16 = vor.u32 %v7003_v58, %v6065_v6  ;;  %v7124_v21 = vld [vmem:[#allocation2 + $0x7c0] sm:$0xf0]  ;;  %1955 = vst [vmem:[#allocation2 + $0x76c] sm:$0xff] %v1930_v62  ;;  %1249 = vrot.lane.b32.xlu1 %v8877_v3, %s7457_s12  ;;  %1503 = vrot.lane.b32.xlu0 %v8685_v25, %s7460_s29  ;;  %v10827_v62 = vrot.slane %v8841_v23, 4  ;;  %v10828_v6 = vrot.slane %v8602_v12, 4 }
 0x289   : > { %v6550_v27 = vor.u32 %v7124_v21, %v6549_v17  ;;  %v9037_v39 = vpop.permute.xlu2 %1423  ;;  %v9039_v2 = vpop.permute.xlu1 %1738  ;;  %v10831_v21 = vrot.slane %v8657_v20, 4 }
 0x28a   : > { %3986 = vmatpush.bf16.msrb.mxu3 %v5578_v13  ;;  %4053 = vmatpush.bf16.msra.mxu2 %v6066_v16  ;;  %v10737_v45 = vrot.slane %v9037_v39, 4  ;;  %v10739_v22 = vrot.slane %v9039_v2, 4  ;;  %v9043_v54 = vpop.permute.xlu0 %1726  ;;  %v6021_v13 = vld [vmem:[#allocation2 + $0x378] sm:$0xf] }
 0x28b   : > { %4064 = vmatpush.bf16.msra.mxu0 %v6550_v27  ;;  %v10734_v61 = vrot.slane %v9043_v54, 4  ;;  %v6022_v57 = vor.u32 %v6992_v28, %v6021_v13  ;;  %v5802_v28 = vor.u32 %v6937_v60, %v5801_v19  ;;  %v6926_v13 = vld [vmem:[#allocation2 + $0x190] sm:$0xf0] }
 0x28c   : > { %v1771_v58 = vsel %vm344_vm5, %v10828_v6, %v10739_v22  ;;  %v5713_v22 = vld [vmem:[#allocation2 + $0x110] sm:$0xf] }
 0x28d   : > { %3987 = vmatmul.bf16.vlgmr.msrb.gmra.mxu3 %v8847_v35  ;;  %v1772_v17 = vsel %vm10830_vm15, %v8602_v12, %v1771_v58  ;;  %v1761_v27 = vsel %vm344_vm5, %v10831_v21, %v10734_v61  ;;  %v6915_v21 = vld [vmem:[#allocation2 + $0x138] sm:$0xf0]  ;;  %vm10837_vm15 = vcmask 760832  }
 0x28e   : > { %4035 = vmatpush.bf16.msra.mxu3 %v5890_v53  ;;  %v1456_v53 = vsel %vm344_vm5, %v10827_v62, %v10737_v45  ;;  %v6981_v62 = vld [vmem:[#allocation2 + $0x348] sm:$0xf0]  ;;  %v1762_v6 = vsel %vm10832_vm13, %v8657_v20, %v1761_v27  ;;  %4054 = vmatpush.bf16.msra.mxu2 %v6022_v57  ;;  %1797 = vst [vmem:[#allocation2 + $0x6bc] sm:$0xff] %v1772_v17  ;;  %v5757_v57 = vld [vmem:[#allocation2 + $0x168] sm:$0xf]  ;;  %v10835_v45 = vrot.slane %v8717_v59, 4 }
 0x28f   : > { %v1457_v16 = vsel %vm10829_vm6, %v8841_v23, %v1456_v53  ;;  %v6505_v23 = vld [vmem:[#allocation2 + $0x740] sm:$0xf]  ;;  %v7113_v53 = vld [vmem:[#allocation2 + $0x768] sm:$0xf0]  ;;  %1790 = vst [vmem:[#allocation2 + $0x690] sm:$0xff] %v1762_v6  ;;  %1809 = vrot.lane.b32.xlu2 %v8877_v3, %s7454_s8  ;;  %v5758_v6 = vor.u32 %v6926_v13, %v5757_v57  ;;  %vm10839_vm6 = vmmov %vm10837_vm15  ;;  %vm10842_vm13 = vcmask 769024  }
 0x290   : > { %1482 = vst [vmem:[#allocation2 + $0x564] sm:$0xff] %v1457_v16  ;;  %v6506_v58 = vor.u32 %v7113_v53, %v6505_v23  ;;  %1900 = vrot.lane.b32.xlu1 %v8873_v14, %s7452_s10  ;;  %1888 = vrot.lane.b32.xlu0 %v8877_v3, %s7452_s10  ;;  %v6970_v16 = vld [vmem:[#allocation2 + $0x2f0] sm:$0xf0]  ;;  %v6461_v17 = vld [vmem:[#allocation2 + $0x6e8] sm:$0xf] }
 0x291   : > { %v9074_v20 = vpop.permute.xlu2 %1329  ;;  %v9076_v60 = vpop.permute.xlu1 %1568  ;;  %v5933_v53 = vld [vmem:[#allocation2 + $0x2c8] sm:$0xf]  ;;  %v6462_v57 = vor.u32 %v7102_v51, %v6461_v17  ;;  %v5714_v51 = vor.u32 %v6915_v21, %v5713_v22  ;;  %v5669_v17 = vld [vmem:[#allocation2 + $0xb8] sm:$0xf] }
 0x292   : > { %4036 = vmatpush.bf16.msra.mxu3 %v5846_v41  ;;  %v5977_v41 = vld [vmem:[#allocation2 + $0x320] sm:$0xf]  ;;  %4065 = vmatpush.bf16.msra.mxu0 %v6506_v58  ;;  %v10738_v27 = vrot.slane %v9074_v20, 4  ;;  %v1590_v19 = vrot.slane %v9076_v60, 4  ;;  %v10834_v58 = vrot.slane %v8735_v11, 4  ;;  %v5934_v13 = vor.u32 %v6970_v16, %v5933_v53 }
 0x293   : > { %v5978_v12 = vor.u32 %v6981_v62, %v5977_v41  ;;  %v9080_v62 = vpop.permute.xlu0 %1659  ;;  %v6595_v41 = vld [vmem:[#allocation2 + $0x81c] sm:$0xf0]  ;;  %v6507_v53 = vld [vmem:[#allocation2 + $0x76c] sm:$0xf0] }
 0x294   : > { %v10744_v23 = vrot.slane %v9080_v62, 4  ;;  %v1603_v61 = vsel %vm344_vm5, %v10834_v58, %v1590_v19  ;;  %4015 = vmatmul.bf16.vlgmr.msrb.gmra.mxu1 %v8837_v46 }
 0x295   : > { %4055 = vmatpush.bf16.msra.mxu2 %v5978_v12  ;;  %v1364_v12 = vsel %vm344_vm5, %v10833_v47, %v10738_v27  ;;  %v1604_v1 = vsel %vm10777_vm0, %v8735_v11, %v1603_v61  ;;  %v7091_v16 = vld [vmem:[#allocation2 + $0x6b8] sm:$0xf0]  ;;  %v6904_v61 = vld [vmem:[#allocation2 + $0xe0] sm:$0xf0] }
 0x296   : > { %4037 = vmatpush.bf16.msra.mxu3 %v5802_v28  ;;  %v7130_v28 = vld [vmem:[#allocation2 + $0x7f4] sm:$0xf]  ;;  %v1365_v63 = vsel %vm1360_vm8, %v8755_v42, %v1364_v12  ;;  %v1692_v47 = vsel %vm344_vm5, %v10835_v45, %v10744_v23  ;;  %4066 = vmatpush.bf16.msra.mxu0 %v6462_v57  ;;  %v6551_v42 = vld [vmem:[#allocation2 + $0x7c4] sm:$0xf0]  ;;  %1632 = vst [vmem:[#allocation2 + $0x5e0] sm:$0xff] %v1604_v1 }
 0x297   : > { %v6598_v27 = vor.u32 %v7130_v28, %v6595_v41  ;;  %1394 = vst [vmem:[#allocation2 + $0x4e0] sm:$0xff] %v1365_v63  ;;  %v6417_v11 = vld [vmem:[#allocation2 + $0x690] sm:$0xf]  ;;  %1730 = vrot.lane.b32.xlu2 %v8877_v3, %s7456_s9  ;;  %v7119_v45 = vld [vmem:[#allocation2 + $0x79c] sm:$0xf]  ;;  %v5670_v41 = vor.u32 %v6904_v61, %v5669_v17 }
 0x298   : > { %v6418_v63 = vor.u32 %v7091_v16, %v6417_v11  ;;  %1166 = vrot.lane.b32.xlu1 %v8685_v25, %s7449_s18  ;;  %1821 = vrot.lane.b32.xlu0 %v8873_v14, %s7454_s8  ;;  %v6554_v22 = vor.u32 %v7119_v45, %v6551_v42  ;;  %v6893_v12 = vld [vmem:[#allocation2 + $0x88] sm:$0xf0]  ;;  %v10838_v16 = vrot.slane %v8694_v37, 4  ;;  %v5625_v11 = vld [vmem:[#allocation2 + $0x60] sm:$0xf] }
 0x299   : > { %4056 = vmatpush.bf16.msra.mxu2 %v5934_v13  ;;  %v9113_v1 = vpop.permute.xlu1 %1501  ;;  %v10836_v13 = vrot.slane %v8786_v38, 4  ;;  %v7097_v45 = vld [vmem:[#allocation2 + $0x6ec] sm:$0xf] }
 0x29a   : > { %4038 = vmatpush.bf16.msra.mxu3 %v5758_v6  ;;  %v1693_v6 = vsel %vm10779_vm14, %v8717_v59, %v1692_v47  ;;  %v9111_v59 = vpop.permute.xlu2 %1977  ;;  %4067 = vmatpush.bf16.msra.mxu0 %v6418_v63  ;;  %v7108_v47 = vld [vmem:[#allocation2 + $0x744] sm:$0xf]  ;;  %v5626_v63 = vor.u32 %v6893_v12, %v5625_v11  ;;  %v6419_v11 = vld [vmem:[#allocation2 + $0x6bc] sm:$0xf0]  ;;  %v7141_v23 = vld [vmem:[#allocation2 + $0x84c] sm:$0xf] }
 0x29b   : > { %1718 = vst [vmem:[#allocation2 + $0x664] sm:$0xff] %v1693_v6  ;;  %v10743_v21 = vrot.slane %v9111_v59, 4  ;;  %v9117_v28 = vpop.permute.xlu0 %1489  ;;  %v6510_v42 = vor.u32 %v7108_v47, %v6507_v53  ;;  %v5891_v53 = vld [vmem:[#allocation2 + $0x29c] sm:$0xf0] }
 0x29c   : > { %4057 = vmatmul.bf16.vlgmr.msra.gmra.mxu2 %v9016_v18  ;;  %v1511_v25 = vrot.slane %v9117_v28, 4 }
 0x29d   : > { %4119 = vmatpush.bf16.msrb.mxu2 %v6598_v27  ;;  %v10742_v27 = vrot.slane %v9113_v1, 4  ;;  %v2010_v58 = vsel %vm344_vm5, %v1991_v48, %v10743_v21  ;;  %v6329_v47 = vld [vmem:[#allocation2 + $0x5e0] sm:$0xf]  ;;  %v6637_v21 = vld [vmem:[#allocation2 + $0x848] sm:$0xf] }
 0x29e   : > { %4039 = vmatpush.bf16.msra.mxu3 %v5714_v51  ;;  %v2011_v6 = vsel %vm1996_vm9, %v8967_v24, %v2010_v58  ;;  %v1524_v48 = vsel %vm344_vm5, %v10838_v16, %v1511_v25  ;;  %v6373_v24 = vld [vmem:[#allocation2 + $0x638] sm:$0xf] }
 0x29f   : > { %v1534_v57 = vsel %vm344_vm5, %v10836_v13, %v10742_v27  ;;  %2035 = vst [vmem:[#allocation2 + $0x7cc] sm:$0xff] %v2011_v6  ;;  %v1525_v61 = vsel %vm10839_vm6, %v8694_v37, %v1524_v48  ;;  %1663 = vrot.lane.b32.xlu2 %v8873_v14, %s7458_s13  ;;  %v5581_v13 = vld [vmem:[#allocation2 + $0x8] sm:$0xf]  ;;  %vm10851_vm6 = vcmask 130048  }
 0x2a0   : > { %v1535_v51 = vsel %vm10837_vm15, %v8786_v38, %v1534_v57  ;;  %1553 = vst [vmem:[#allocation2 + $0x588] sm:$0xff] %v1525_v61  ;;  %1651 = vrot.lane.b32.xlu1 %v8877_v3, %s7458_s13  ;;  %1742 = vrot.lane.b32.xlu0 %v8873_v14, %s7456_s9  ;;  %v6954_v57 = vld [vmem:[#allocation2 + $0x274] sm:$0xf]  ;;  %vm10849_vm15 = vcmask 736256  }
 0x2a1   : > { %4120 = vmatpush.bf16.msrb.mxu2 %v6554_v22  ;;  %v6882_v22 = vld [vmem:[#allocation2 + $0x30] sm:$0xf0]  ;;  %1560 = vst [vmem:[#allocation2 + $0x5b4] sm:$0xff] %v1535_v51  ;;  %v9150_v12 = vpop.permute.xlu1 %1411 }
 0x2a2   : > { %4040 = vmatpush.bf16.msra.mxu3 %v5670_v41  ;;  %v7080_v17 = vld [vmem:[#allocation2 + $0x660] sm:$0xf0]  ;;  %v6463_v41 = vld [vmem:[#allocation2 + $0x714] sm:$0xf0]  ;;  %v9148_v37 = vpop.permute.xlu2 %1886  ;;  %v10747_v51 = vrot.slane %v9150_v12, 4  ;;  %v5582_v48 = vor.u32 %v6882_v22, %v5581_v13  ;;  %v10843_v13 = vrot.slane %v8733_v9, 4 }
 0x2a3   : > { %v6374_v38 = vor.u32 %v7080_v17, %v6373_v24  ;;  %v6466_v58 = vor.u32 %v7097_v45, %v6463_v41  ;;  %v10740_v6 = vrot.slane %v9148_v37, 4  ;;  %v9154_v16 = vpop.permute.xlu0 %2133  ;;  %v7069_v24 = vld [vmem:[#allocation2 + $0x608] sm:$0xf0]  ;;  %v10840_v45 = vrot.slane %v8839_v40, 4 }
 0x2a4   : > { %v2149_v61 = vrot.slane %v9154_v16, 4  ;;  %v6330_v22 = vor.u32 %v7069_v24, %v6329_v47  ;;  %v6375_v24 = vld [vmem:[#allocation2 + $0x664] sm:$0xf0] }
 0x2a5   : > { %4121 = vmatpush.bf16.msrb.mxu2 %v6510_v42  ;;  %4068 = vmatpush.bf16.msra.mxu0 %v6374_v38  ;;  %v7086_v42 = vld [vmem:[#allocation2 + $0x694] sm:$0xf]  ;;  %v1921_v17 = vsel %vm344_vm5, %v10840_v45, %v10740_v6  ;;  %v10841_v38 = vrot.slane %v8845_v30, 4  ;;  %v5847_v6 = vld [vmem:[#allocation2 + $0x244] sm:$0xf0] }
 0x2a6   : > { %4041 = vmatpush.bf16.msra.mxu3 %v5626_v63  ;;  %v5894_v63 = vor.u32 %v6954_v57, %v5891_v53  ;;  %v2166_v57 = vsel %vm344_vm5, %v10843_v13, %v2149_v61  ;;  %v6422_v45 = vor.u32 %v7086_v42, %v6419_v11  ;;  %v7075_v11 = vld [vmem:[#allocation2 + $0x63c] sm:$0xf] }
 0x2a7   : > { %v1446_v41 = vsel %vm344_vm5, %v10841_v38, %v10747_v51  ;;  %1493 = vrot.lane.b32.xlu2 %v8877_v3, %s7460_s29  ;;  %v6378_v38 = vor.u32 %v7075_v11, %v6375_v24 }
 0x2a8   : > { %v1447_v53 = vsel %vm10842_vm13, %v8845_v30, %v1446_v41  ;;  %v7058_v47 = vld [vmem:[#allocation2 + $0x5b0] sm:$0xf0]  ;;  %v6285_v30 = vld [vmem:[#allocation2 + $0x588] sm:$0xf]  ;;  %1584 = vrot.lane.b32.xlu1 %v8873_v14, %s7459_s26  ;;  %1572 = vrot.lane.b32.xlu0 %v8877_v3, %s7459_s26  ;;  %v5803_v41 = vld [vmem:[#allocation2 + $0x1ec] sm:$0xf0] }
 0x2a9   : > { %4122 = vmatpush.bf16.msrb.mxu2 %v6466_v58  ;;  %v1922_v58 = vsel %vm1917_vm12, %v8839_v40, %v1921_v17  ;;  %4069 = vmatpush.bf16.msra.mxu0 %v6330_v22  ;;  %1474 = vst [vmem:[#allocation2 + $0x538] sm:$0xff] %v1447_v53  ;;  %v6943_v40 = vld [vmem:[#allocation2 + $0x21c] sm:$0xf]  ;;  %v6286_v42 = vor.u32 %v7058_v47, %v6285_v30  ;;  %v9187_v17 = vpop.permute.xlu1 %2056  ;;  %v7064_v53 = vld [vmem:[#allocation2 + $0x5e4] sm:$0xf]  ;;  %v10845_v47 = vrot.slane %v8925_v7, 4 }
 0x2aa   : > { %4042 = vmatpush.bf16.msra.mxu3 %v5582_v48  ;;  %1949 = vst [vmem:[#allocation2 + $0x748] sm:$0xff] %v1922_v58  ;;  %v2167_v48 = vsel %vm10778_vm10, %v8733_v9, %v2166_v57  ;;  %v9185_v9 = vpop.permute.xlu2 %1819  ;;  %v6932_v57 = vld [vmem:[#allocation2 + $0x1c4] sm:$0xf]  ;;  %v6331_v30 = vld [vmem:[#allocation2 + $0x60c] sm:$0xf0]  ;;  %vm10854_vm13 = vcmask 1039360  }
 0x2ab   : > { %2192 = vst [vmem:[#allocation2 + $0x874] sm:$0xff] %v2167_v48  ;;  %v10741_v22 = vrot.slane %v9185_v9, 4  ;;  %v9191_v58 = vpop.permute.xlu0 %2044  ;;  %v6334_v27 = vor.u32 %v7064_v53, %v6331_v30 }
 0x2ac   : > { %v10746_v13 = vrot.slane %v9191_v58, 4 }
 0x2ad   : > { %4123 = vmatpush.bf16.msrb.mxu2 %v6422_v45  ;;  %4043 = vmatmul.bf16.vlgmr.msra.gmra.mxu3 %v8847_v35  ;;  %v10844_v45 = vrot.slane %v8883_v5, 4 }
 0x2ae   : > { %4091 = vmatpush.bf16.msrb.mxu3 %v5894_v63  ;;  %v5850_v63 = vor.u32 %v6943_v40, %v5847_v6  ;;  %4070 = vmatpush.bf16.msra.mxu0 %v6286_v42  ;;  %v10745_v6 = vrot.slane %v9187_v17, 4  ;;  %v5806_v40 = vor.u32 %v6932_v57, %v5803_v41  ;;  %v5759_v42 = vld [vmem:[#allocation2 + $0x194] sm:$0xf0]  ;;  %v7042_v41 = vld [vmem:[#allocation2 + $0x534] sm:$0xf] }
 0x2af   : > { %v1852_v48 = vsel %vm344_vm5, %v10844_v45, %v10741_v22  ;;  %v10846_v45 = vrot.slane %v8929_v56, 4  ;;  %v6243_v57 = vld [vmem:[#allocation2 + $0x55c] sm:$0xf0]  ;;  %2137 = vrot.lane.b32.xlu2 %v8873_v14, %s7461_s1 }
 0x2b0   : > { %v2089_v24 = vsel %vm344_vm5, %v10845_v47, %v10745_v6  ;;  %v1853_v11 = vsel %vm10771_vm4, %v8883_v5, %v1852_v48  ;;  %v6287_v47 = vld [vmem:[#allocation2 + $0x5b4] sm:$0xf0]  ;;  %v7048_v6 = vld [vmem:[#allocation2 + $0x560] sm:$0xf0]  ;;  %2125 = vrot.lane.b32.xlu1 %v8877_v3, %s7461_s1  ;;  %1505 = vrot.lane.b32.xlu0 %v8873_v14, %s7460_s29  ;;  %v6910_v14 = vld [vmem:[#allocation2 + $0x114] sm:$0xf] }
 0x2b1   : > { %4124 = vmatpush.bf16.msrb.mxu2 %v6378_v38  ;;  %v2090_v38 = vsel %vm2075_vm2, %v8925_v7, %v2089_v24  ;;  %v2079_v22 = vsel %vm344_vm5, %v10846_v45, %v10746_v13  ;;  %4071 = vmatmul.bf16.vlgmr.msra.gmra.mxu0 %v8837_v46  ;;  %1877 = vst [vmem:[#allocation2 + $0x71c] sm:$0xff] %v1853_v11  ;;  %v7053_v7 = vld [vmem:[#allocation2 + $0x58c] sm:$0xf]  ;;  %v6249_v48 = vld [vmem:[#allocation2 + $0x538] sm:$0xf]  ;;  %v10847_v11 = vrot.slane %v9039_v2, 4 }
 0x2b2   : > { %4092 = vmatpush.bf16.msrb.mxu3 %v5850_v63  ;;  %v6921_v63 = vld [vmem:[#allocation2 + $0x16c] sm:$0xf]  ;;  %v2080_v5 = vsel %vm2075_vm2, %v8929_v56, %v2079_v22  ;;  %2114 = vst [vmem:[#allocation2 + $0x824] sm:$0xff] %v2090_v38  ;;  %v7146_v45 = vld [vmem:[#allocation2 + $0x870] sm:$0xf0]  ;;  %v6250_v51 = vor.u32 %v7048_v6, %v6249_v48  ;;  %v9222_v56 = vpop.permute.xlu2 %1740  ;;  %v9224_v22 = vpop.permute.xlu1 %1965  ;;  %v6246_v6 = vor.u32 %v7042_v41, %v6243_v57 }
 0x2b3   : > { %v5762_v24 = vor.u32 %v6921_v63, %v5759_v42  ;;  %v6639_v53 = vld [vmem:[#allocation2 + $0x874] sm:$0xf0]  ;;  %2107 = vst [vmem:[#allocation2 + $0x7f8] sm:$0xff] %v2080_v5  ;;  %v6638_v30 = vor.u32 %v7146_v45, %v6637_v21  ;;  %v10749_v63 = vrot.slane %v9222_v56, 4  ;;  %v10753_v21 = vrot.slane %v9224_v22, 4 }
 0x2b4   : > { %v6642_v13 = vor.u32 %v7141_v23, %v6639_v53  ;;  %v9228_v23 = vpop.permute.xlu0 %1341  ;;  %v6199_v42 = vld [vmem:[#allocation2 + $0x504] sm:$0xf0]  ;;  %v7020_v53 = vld [vmem:[#allocation2 + $0x484] sm:$0xf] }
 0x2b5   : > { %4125 = vmatpush.bf16.msrb.mxu2 %v6334_v27  ;;  %v6290_v27 = vor.u32 %v7053_v7, %v6287_v47  ;;  %4084 = vmatpush.bf16.msra.mxu1 %v6638_v30  ;;  %v1356_v3 = vrot.slane %v9228_v23, 4  ;;  %v1773_v38 = vsel %vm344_vm5, %v10847_v11, %v10749_v63  ;;  %v10848_v47 = vrot.slane %v8808_v8, 4  ;;  %v5671_v45 = vld [vmem:[#allocation2 + $0xe4] sm:$0xf0]  ;;  %v5979_v63 = vld [vmem:[#allocation2 + $0x34c] sm:$0xf0] }
 0x2b6   : > { %4093 = vmatpush.bf16.msrb.mxu3 %v5806_v40  ;;  %v5715_v40 = vld [vmem:[#allocation2 + $0x13c] sm:$0xf0]  ;;  %4140 = vmatpush.bf16.msrb.mxu0 %v6642_v13  ;;  %v1774_v41 = vsel %vm10849_vm15, %v9039_v2, %v1773_v38  ;;  %v10850_v7 = vrot.slane %v8889_v34, 4  ;;  %vm10856_vm15 = vmmov %vm10851_vm6 }
 0x2b7   : > { %v2000_v5 = vsel %vm344_vm5, %v10848_v47, %v10753_v21  ;;  %v5718_v13 = vor.u32 %v6910_v14, %v5715_v40  ;;  %1798 = vst [vmem:[#allocation2 + $0x6c4] sm:$0xff] %v1774_v41  ;;  %2048 = vrot.lane.b32.xlu2 %v8056_v55, %s7450_s20  ;;  %v7009_v14 = vld [vmem:[#allocation2 + $0x42c] sm:$0xf]  ;;  %v6888_v41 = vld [vmem:[#allocation2 + $0x64] sm:$0xf] }
 0x2b8   : > { %v2001_v57 = vsel %vm1996_vm9, %v8808_v8, %v2000_v5  ;;  %v1374_v48 = vsel %vm344_vm5, %v10850_v7, %v1356_v3  ;;  %6673 = vmatmul.msk.bf16.vlgmr.msra.gmra.mxu1 %vm10851_vm6, %v8891_v31  ;;  %v6899_v8 = vld [vmem:[#allocation2 + $0xbc] sm:$0xf]  ;;  %1427 = vrot.lane.b32.xlu1 %v8110_v26, %s7453_s27  ;;  %vm10857_vm6 = vmmov %vm10854_vm13 }
 0x2b9   : > { %4126 = vmatpush.bf16.msrb.mxu2 %v6290_v27  ;;  %4105 = vmatpush.bf16.msrb.mxu1 %v6246_v6  ;;  %2028 = vst [vmem:[#allocation2 + $0x7a0] sm:$0xff] %v2001_v57  ;;  %v5674_v30 = vor.u32 %v6899_v8, %v5671_v45  ;;  %v5627_v27 = vld [vmem:[#allocation2 + $0x8c] sm:$0xf0]  ;;  %v10852_v57 = vrot.slane %v8923_v29, 4 }
 0x2ba   : > { %4094 = vmatpush.bf16.msrb.mxu3 %v5762_v24  ;;  %4161 = vmatpush.bf16.msra.mxu0 %v6250_v51  ;;  %v7031_v24 = vld [vmem:[#allocation2 + $0x4dc] sm:$0xf]  ;;  %v1375_v51 = vsel %vm1360_vm8, %v8889_v34, %v1374_v48  ;;  %v9261_v34 = vpop.permute.xlu2 %1649  ;;  %v9263_v40 = vpop.permute.xlu1 %1259  ;;  %v6155_v6 = vld [vmem:[#allocation2 + $0x4ac] sm:$0xf0]  ;;  %v10853_v48 = vrot.slane %v8784_v36, 4  ;;  %v5630_v45 = vor.u32 %v6888_v41, %v5627_v27 }
 0x2bb   : > { %v6202_v2 = vor.u32 %v7031_v24, %v6199_v42  ;;  %1401 = vst [vmem:[#allocation2 + $0x50c] sm:$0xff] %v1375_v51  ;;  %1415 = vrot.lane.b32.xlu0 %v8056_v55, %s7453_s27  ;;  %v6111_v42 = vld [vmem:[#allocation2 + $0x454] sm:$0xf0]  ;;  %v10750_v11 = vrot.slane %v9261_v34, 4  ;;  %v1274_v38 = vrot.slane %v9263_v40, 4  ;;  %v6158_v5 = vor.u32 %v7020_v53, %v6155_v6 }
 0x2bc   : > { %4127 = vmatmul.bf16.vlgmr.msrb.gmra.mxu2 %v8837_v46  ;;  %v9267_v47 = vpop.permute.xlu0 %1247  ;;  %v6114_v51 = vor.u32 %v7009_v14, %v6111_v42  ;;  %v10855_v53 = vrot.slane %v8885_v10, 4  ;;  %v6877_v6 = vld [vmem:[#allocation2 + $0xc] sm:$0xf]  ;;  %v6067_v14 = vld [vmem:[#allocation2 + $0x3fc] sm:$0xf0] }
 0x2bd   : > { %4106 = vmatpush.bf16.msrb.mxu1 %v6202_v2  ;;  %v1684_v7 = vsel %vm344_vm5, %v10852_v57, %v10750_v11  ;;  %v1292_v24 = vsel %vm344_vm5, %v10853_v48, %v1274_v38  ;;  %v5583_v57 = vld [vmem:[#allocation2 + $0x34] sm:$0xf0] }
 0x2be   : > { %4095 = vmatpush.bf16.msrb.mxu3 %v5718_v13  ;;  %v10752_v13 = vrot.slane %v9267_v47, 4  ;;  %v1685_v2 = vsel %vm10779_vm14, %v8923_v29, %v1684_v7  ;;  %v1293_v8 = vsel %vm10854_vm13, %v8784_v36, %v1292_v24  ;;  %v6960_v29 = vld [vmem:[#allocation2 + $0x2a0] sm:$0xf0]  ;;  %v6205_v36 = vld [vmem:[#allocation2 + $0x4e0] sm:$0xf]  ;;  %vm10860_vm13 = vcmask 769024  }
 0x2bf   : > { %1712 = vst [vmem:[#allocation2 + $0x640] sm:$0xff] %v1685_v2  ;;  %1345 = vrot.lane.b32.xlu2 %v8110_v26, %s7455_s7  ;;  %v5897_v41 = vld [vmem:[#allocation2 + $0x278] sm:$0xf] }
 0x2c0   : > { %1319 = vst [vmem:[#allocation2 + $0x4b4] sm:$0xff] %v1293_v8  ;;  %1333 = vrot.lane.b32.xlu1 %v8056_v55, %s7455_s7  ;;  %v6601_v11 = vld [vmem:[#allocation2 + $0x7f8] sm:$0xf]  ;;  %s7381_s7 = scalar_lea.hbm %s10690_s6, 176 }
 0x2c1   : > { %4107 = vmatpush.bf16.msrb.mxu1 %v6158_v5  ;;  %6674 = vmatmul.msk.bf16.vlgmr.msrb.gmra.mxu0 %vm10856_vm15, %v8891_v31  ;;  %v5586_v5 = vor.u32 %v6877_v6, %v5583_v57  ;;  %v6023_v57 = vld [vmem:[#allocation2 + $0x3a4] sm:$0xf0]  ;;  %vm10863_vm15 = vcmask 736256  }
 0x2c2   : > { %4096 = vmatpush.bf16.msrb.mxu3 %v5674_v30  ;;  %v1282_v30 = vsel %vm344_vm5, %v10855_v53, %v10752_v13  ;;  %v7037_v42 = vld [vmem:[#allocation2 + $0x508] sm:$0xf0]  ;;  %v9299_v48 = vpop.permute.xlu2 %1425  ;;  %v9301_v24 = vpop.permute.xlu1 %1807 }
 0x2c3   : > { %v1283_v27 = vsel %vm10857_vm6, %v8885_v10, %v1282_v30  ;;  %v6206_v7 = vor.u32 %v7037_v42, %v6205_v36  ;;  %2060 = vrot.lane.b32.xlu0 %v8110_v26, %s7450_s20  ;;  %v5898_v10 = vor.u32 %v6960_v29, %v5897_v41  ;;  %v1828_v2 = vrot.slane %v9301_v24, 4  ;;  %v6949_v30 = vld [vmem:[#allocation2 + $0x248] sm:$0xf0] }
 0x2c4   : > { %1312 = vst [vmem:[#allocation2 + $0x488] sm:$0xff] %v1283_v27  ;;  %v9305_v8 = vpop.permute.xlu0 %1898  ;;  %v10858_v27 = vrot.slane %v9037_v39, 4  ;;  %v10859_v36 = vrot.slane %v8999_v32, 4  ;;  %vm10865_vm6 = vcmask 7168  }
 0x2c5   : > { %4108 = vmatpush.bf16.msrb.mxu1 %v6114_v51  ;;  %4162 = vmatpush.bf16.msra.mxu0 %v6206_v7  ;;  %v10748_v51 = vrot.slane %v9299_v48, 4  ;;  %v10751_v6 = vrot.slane %v9305_v8, 4  ;;  %v10861_v7 = vrot.slane %v9003_v33, 4 }
 0x2c6   : > { %4097 = vmatpush.bf16.msrb.mxu3 %v5630_v45  ;;  %v6998_v45 = vld [vmem:[#allocation2 + $0x3d4] sm:$0xf]  ;;  %v1842_v42 = vsel %vm344_vm5, %v10859_v36, %v1828_v2  ;;  %v6117_v36 = vld [vmem:[#allocation2 + $0x430] sm:$0xf] }
 0x2c7   : > { %v6070_v53 = vor.u32 %v6998_v45, %v6067_v14  ;;  %v1458_v29 = vsel %vm344_vm5, %v10858_v27, %v10748_v51  ;;  %v1843_v41 = vsel %vm10771_vm4, %v8999_v32, %v1842_v42  ;;  %v6987_v27 = vld [vmem:[#allocation2 + $0x37c] sm:$0xf]  ;;  %v6938_v51 = vld [vmem:[#allocation2 + $0x1f0] sm:$0xf0]  ;;  %1251 = vrot.lane.b32.xlu2 %v8056_v55, %s7457_s12 }
 0x2c8   : > { %v1459_v14 = vsel %vm10860_vm13, %v9037_v39, %v1458_v29  ;;  %v6026_v39 = vor.u32 %v6987_v27, %v6023_v57  ;;  %v7026_v29 = vld [vmem:[#allocation2 + $0x4b0] sm:$0xf0]  ;;  %1870 = vst [vmem:[#allocation2 + $0x6f0] sm:$0xff] %v1843_v41  ;;  %v7015_v42 = vld [vmem:[#allocation2 + $0x458] sm:$0xf0]  ;;  %1981 = vrot.lane.b32.xlu1 %v8110_v26, %s7451_s16  ;;  %vm10868_vm13 = vcmask 760832  }
 0x2c9   : > { %4109 = vmatpush.bf16.msrb.mxu1 %v6070_v53  ;;  %1483 = vst [vmem:[#allocation2 + $0x56c] sm:$0xff] %v1459_v14  ;;  %v6976_v14 = vld [vmem:[#allocation2 + $0x324] sm:$0xf]  ;;  %v6927_v27 = vld [vmem:[#allocation2 + $0x198] sm:$0xf0] }
 0x2ca   : > { %4098 = vmatpush.bf16.msrb.mxu3 %v5586_v5  ;;  %v5853_v5 = vld [vmem:[#allocation2 + $0x220] sm:$0xf]  ;;  %v9336_v57 = vpop.permute.xlu1 %1728  ;;  %v9338_v41 = vpop.permute.xlu2 %1570 }
 0x2cb   : > { %v5854_v45 = vor.u32 %v6949_v30, %v5853_v5  ;;  %v6161_v32 = vld [vmem:[#allocation2 + $0x488] sm:$0xf]  ;;  %1969 = vrot.lane.b32.xlu0 %v8056_v55, %s7451_s16 }
 0x2cc   : > { %v5809_v30 = vld [vmem:[#allocation2 + $0x1c8] sm:$0xf]  ;;  %v6162_v5 = vor.u32 %v7026_v29, %v6161_v32  ;;  %v5935_v32 = vld [vmem:[#allocation2 + $0x2f4] sm:$0xf0] }
 0x2cd   : > { %4099 = vmatmul.bf16.vlgmr.msrb.gmra.mxu3 %v8847_v35  ;;  %4110 = vmatpush.bf16.msrb.mxu1 %v6026_v39  ;;  %v10755_v39 = vrot.slane %v9338_v41, 4 }
 0x2ce   : > { %4147 = vmatpush.bf16.msra.mxu3 %v5898_v10  ;;  %v1931_v10 = vsel %vm344_vm5, %v10861_v7, %v10751_v6  ;;  %4163 = vmatpush.bf16.msra.mxu0 %v6162_v5  ;;  %v1749_v7 = vrot.slane %v9336_v57, 4  ;;  %v5765_v5 = vld [vmem:[#allocation2 + $0x170] sm:$0xf]  ;;  %v7136_v6 = vld [vmem:[#allocation2 + $0x820] sm:$0xf0] }
 0x2cf   : > { %v1932_v53 = vsel %vm1917_vm12, %v9003_v33, %v1931_v10  ;;  %v5810_v33 = vor.u32 %v6938_v51, %v5809_v30  ;;  %v9341_v10 = vpop.permute.xlu0 %1164  ;;  %v10862_v51 = vrot.slane %v9043_v54, 4  ;;  %1902 = vrot.lane.b32.xlu2 %v8110_v26, %s7452_s10 }
 0x2d0   : > { %1956 = vst [vmem:[#allocation2 + $0x774] sm:$0xff] %v1932_v53  ;;  %v6118_v53 = vor.u32 %v7015_v42, %v6117_v36  ;;  %v10757_v29 = vrot.slane %v9341_v10, 4  ;;  %v10864_v42 = vrot.slane %v8963_v0, 4  ;;  %v5721_v0 = vld [vmem:[#allocation2 + $0x118] sm:$0xf]  ;;  %1890 = vrot.lane.b32.xlu1 %v8056_v55, %s7452_s10 }
 0x2d1   : > { %v1763_v30 = vsel %vm344_vm5, %v10862_v51, %v1749_v7 }
 0x2d2   : > { %4148 = vmatpush.bf16.msra.mxu3 %v5854_v45  ;;  %v5982_v45 = vor.u32 %v6976_v14, %v5979_v63  ;;  %v1605_v63 = vsel %vm344_vm5, %v1590_v19, %v10755_v39  ;;  %v1764_v36 = vsel %vm10863_vm15, %v9043_v54, %v1763_v30  ;;  %v5766_v14 = vor.u32 %v6927_v27, %v5765_v5  ;;  %v6916_v19 = vld [vmem:[#allocation2 + $0x140] sm:$0xf0]  ;;  %v6557_v27 = vld [vmem:[#allocation2 + $0x7a0] sm:$0xf]  ;;  %v9370_v30 = vpop.permute.xlu1 %2135 }
 0x2d3   : > { %v1606_v51 = vsel %vm10777_vm0, %v9076_v60, %v1605_v63  ;;  %1791 = vst [vmem:[#allocation2 + $0x698] sm:$0xff] %v1764_v36  ;;  %4164 = vmatpush.bf16.msra.mxu0 %v6118_v53  ;;  %v6602_v54 = vor.u32 %v7136_v6, %v6601_v11  ;;  %v5722_v60 = vor.u32 %v6916_v19, %v5721_v0  ;;  %v9374_v53 = vpop.permute.xlu2 %1343  ;;  %v10759_v11 = vrot.slane %v9370_v30, 4  ;;  %v6905_v6 = vld [vmem:[#allocation2 + $0xe8] sm:$0xf0] }
 0x2d4   : > { %4111 = vmatpush.bf16.msrb.mxu1 %v5982_v45  ;;  %v6965_v45 = vld [vmem:[#allocation2 + $0x2cc] sm:$0xf]  ;;  %1633 = vst [vmem:[#allocation2 + $0x5e8] sm:$0xff] %v1606_v51  ;;  %1263 = vrot.lane.b32.xlu0 %v8110_v26, %s7457_s12  ;;  %v10866_v51 = vrot.slane %v8997_v43, 4  ;;  %vm10869_vm15 = vcmask 769024  }
 0x2d5   : > { %v5938_v21 = vor.u32 %v6965_v45, %v5935_v32  ;;  %v10756_v32 = vrot.slane %v9374_v53, 4  ;;  %v2168_v36 = vsel %vm344_vm5, %v2149_v61, %v10759_v11 }
 0x2d6   : > { %4149 = vmatpush.bf16.msra.mxu3 %v5810_v33  ;;  %v1196_v33 = vsel %vm344_vm5, %v10864_v42, %v10757_v29  ;;  %v5677_v42 = vld [vmem:[#allocation2 + $0xc0] sm:$0xf]  ;;  %v2169_v45 = vsel %vm10778_vm10, %v9154_v16, %v2168_v36 }
 0x2d7   : > { %v1197_v13 = vsel %vm10865_vm6, %v1196_v33, %v9341_v10  ;;  %v7114_v33 = vld [vmem:[#allocation2 + $0x770] sm:$0xf0]  ;;  %2193 = vst [vmem:[#allocation2 + $0x87c] sm:$0xff] %v2169_v45  ;;  %v7299_v36 = vld [vmem:[#allocation2 + $0x440] sm:$0xff]  ;;  %v7103_v45 = vld [vmem:[#allocation2 + $0x718] sm:$0xf0] }
 0x2d8   : > { %1225 = vst [vmem:[#allocation2 + $0x404] sm:$0xff] %v1197_v13  ;;  %4112 = vmatpush.bf16.msrb.mxu1 %v5938_v21  ;;  %v9377_v21 = vpop.permute.xlu0 %2123  ;;  %v7125_v13 = vld [vmem:[#allocation2 + $0x7c8] sm:$0xf0]  ;;  %1156 = vrot.lane.b32.xlu2 %v7299_v36, %s7449_s18  ;;  %vm10872_vm6 = vcmask 1039360  }
 0x2d9   : > { %v10754_v5 = vrot.slane %v9377_v21, 4  ;;  %v6558_v63 = vor.u32 %v7125_v13, %v6557_v27  ;;  %v6513_v27 = vld [vmem:[#allocation2 + $0x748] sm:$0xf]  ;;  %1823 = vrot.lane.b32.xlu1 %v8110_v26, %s7454_s8 }
 0x2da   : > { %4150 = vmatpush.bf16.msra.mxu3 %v5766_v14  ;;  %v1376_v14 = vsel %vm344_vm5, %v1356_v3, %v10756_v32  ;;  %v6894_v3 = vld [vmem:[#allocation2 + $0x90] sm:$0xf0]  ;;  %v6514_v16 = vor.u32 %v7114_v33, %v6513_v27  ;;  %v6029_v27 = vld [vmem:[#allocation2 + $0x380] sm:$0xf]  ;;  %v6425_v36 = vld [vmem:[#allocation2 + $0x698] sm:$0xf] }
 0x2db   : > { %4113 = vmatmul.bf16.vlgmr.msrb.gmra.mxu1 %v9016_v18  ;;  %v2158_v19 = vsel %vm344_vm5, %v10866_v51, %v10754_v5  ;;  %v1377_v61 = vsel %vm1360_vm8, %v9228_v23, %v1376_v14  ;;  %v9408_v33 = vpop.permute.xlu2 %1491  ;;  %v9410_v14 = vpop.permute.xlu1 %1413  ;;  %v6883_v51 = vld [vmem:[#allocation2 + $0x38] sm:$0xf0]  ;;  %v6982_v5 = vld [vmem:[#allocation2 + $0x350] sm:$0xf0] }
 0x2dc   : > { %4175 = vmatpush.bf16.msra.mxu1 %v6602_v54  ;;  %v5678_v54 = vor.u32 %v6905_v6, %v5677_v42  ;;  %v2159_v0 = vsel %vm10778_vm10, %v8997_v43, %v2158_v19  ;;  %1402 = vst [vmem:[#allocation2 + $0x514] sm:$0xff] %v1377_v61  ;;  %v6469_v42 = vld [vmem:[#allocation2 + $0x6f0] sm:$0xf]  ;;  %v6993_v43 = vld [vmem:[#allocation2 + $0x3a8] sm:$0xf0]  ;;  %1811 = vrot.lane.b32.xlu0 %v8056_v55, %s7454_s8  ;;  %v10760_v19 = vrot.slane %v9408_v33, 4 }
 0x2dd   : > { %2186 = vst [vmem:[#allocation2 + $0x850] sm:$0xff] %v2159_v0  ;;  %v6470_v0 = vor.u32 %v7103_v45, %v6469_v42  ;;  %v6251_v45 = vld [vmem:[#allocation2 + $0x564] sm:$0xf0] }
 0x2de   : > { %4151 = vmatpush.bf16.msra.mxu3 %v5722_v60  ;;  %v6073_v60 = vld [vmem:[#allocation2 + $0x3d8] sm:$0xf]  ;;  %v7147_v39 = vld [vmem:[#allocation2 + $0x878] sm:$0xf0] }
 0x2df   : > { %v7004_v13 = vld [vmem:[#allocation2 + $0x400] sm:$0xf0] }
 0x2e0   : > { %4176 = vmatpush.bf16.msra.mxu1 %v6558_v63  ;;  %v5633_v63 = vld [vmem:[#allocation2 + $0x68] sm:$0xf]  ;;  %v6074_v6 = vor.u32 %v7004_v13, %v6073_v60  ;;  %v9414_v61 = vpop.permute.xlu0 %1661  ;;  %v5589_v60 = vld [vmem:[#allocation2 + $0x10] sm:$0xf]  ;;  %v6030_v13 = vor.u32 %v6993_v43, %v6029_v27  ;;  %1744 = vrot.lane.b32.xlu2 %v8110_v26, %s7456_s9 }
 0x2e1   : > { %v5634_v23 = vor.u32 %v6894_v3, %v5633_v63  ;;  %v7043_v3 = vld [vmem:[#allocation2 + $0x53c] sm:$0xf]  ;;  %v1526_v63 = vsel %vm344_vm5, %v1511_v25, %v10760_v19  ;;  %v5590_v42 = vor.u32 %v6883_v51, %v5589_v60  ;;  %v10870_v25 = vrot.slane %v9080_v62, 4  ;;  %v5899_v51 = vld [vmem:[#allocation2 + $0x2a4] sm:$0xf0]  ;;  %1732 = vrot.lane.b32.xlu1 %v8056_v55, %s7456_s9 }
 0x2e2   : > { %4152 = vmatpush.bf16.msra.mxu3 %v5678_v54  ;;  %4165 = vmatpush.bf16.msra.mxu0 %v6074_v6  ;;  %v10758_v54 = vrot.slane %v9410_v14, 4  ;;  %v10867_v6 = vrot.slane %v9150_v12, 4  ;;  %v1527_v43 = vsel %vm10868_vm13, %v9117_v28, %v1526_v63  ;;  %v6254_v29 = vor.u32 %v7043_v3, %v6251_v45  ;;  %v7032_v45 = vld [vmem:[#allocation2 + $0x4e4] sm:$0xf] }
 0x2e3   : > { %1554 = vst [vmem:[#allocation2 + $0x590] sm:$0xff] %v1527_v43  ;;  %v10761_v19 = vmov 0   ;;  %vm10874_vm13 = vcmask 130048  }
 0x2e4   : > { %4177 = vmatpush.bf16.msra.mxu1 %v6514_v16  ;;  %v1676_v16 = vrot.slane %v9414_v61, 4  ;;  %v6645_v63 = vld [vmem:[#allocation2 + $0x850] sm:$0xf]  ;;  %7285 = vset.pattern.permute.xlu1 %v10761_v19 }
 0x2e5   : > { %v6646_v3 = vor.u32 %v7147_v39, %v6645_v63  ;;  %v7021_v39 = vld [vmem:[#allocation2 + $0x48c] sm:$0xf]  ;;  %v6944_v63 = vld [vmem:[#allocation2 + $0x224] sm:$0xf]  ;;  %7286 = vset.pattern.permute.xlu2 %v10761_v19  ;;  %7287 = vset.pattern.permute.xlu0 %v10761_v19  ;;  %v7098_v19 = vld [vmem:[#allocation2 + $0x6f4] sm:$0xf] }
 0x2e6   : > { %4153 = vmatpush.bf16.msra.mxu3 %v5634_v23  ;;  %v1448_v23 = vsel %vm344_vm5, %v10867_v6, %v10758_v54  ;;  %v1694_v32 = vsel %vm344_vm5, %v10870_v25, %v1676_v16  ;;  %4166 = vmatpush.bf16.msra.mxu0 %v6030_v13  ;;  %v7092_v6 = vld [vmem:[#allocation2 + $0x6c0] sm:$0xf0]  ;;  %v6955_v54 = vld [vmem:[#allocation2 + $0x27c] sm:$0xf] }
 0x2e7   : > { %v1449_v27 = vsel %vm10869_vm15, %v9150_v12, %v1448_v23  ;;  %v1695_v60 = vsel %vm10779_vm14, %v9080_v62, %v1694_v32  ;;  %v6426_v28 = vor.u32 %v7092_v6, %v6425_v36  ;;  %v6207_v12 = vld [vmem:[#allocation2 + $0x50c] sm:$0xf0]  ;;  %v6971_v25 = vld [vmem:[#allocation2 + $0x2f8] sm:$0xf0]  ;;  %v6603_v32 = vld [vmem:[#allocation2 + $0x824] sm:$0xf0]  ;;  %v5902_v43 = vor.u32 %v6955_v54, %v5899_v51  ;;  %4196 = vmatpush.bf16.msra.mxu2 %v6646_v3 }
 0x2e8   : > { %4178 = vmatpush.bf16.msra.mxu1 %v6470_v0  ;;  %v5985_v0 = vld [vmem:[#allocation2 + $0x328] sm:$0xf]  ;;  %v5855_v23 = vld [vmem:[#allocation2 + $0x24c] sm:$0xf0]  ;;  %1475 = vst [vmem:[#allocation2 + $0x540] sm:$0xff] %v1449_v27  ;;  %v10871_v3 = vrot.slane %v9187_v17, 4  ;;  %1653 = vrot.lane.b32.xlu2 %v8056_v55, %s7458_s13 }
 0x2e9   : > { %v5986_v13 = vor.u32 %v6982_v5, %v5985_v0  ;;  %1719 = vst [vmem:[#allocation2 + $0x66c] sm:$0xff] %v1695_v60  ;;  %v7131_v62 = vld [vmem:[#allocation2 + $0x7fc] sm:$0xf]  ;;  %v7300_v36 = vld [vmem:[#allocation2 + $0x46c] sm:$0xff]  ;;  %v6210_v5 = vor.u32 %v7032_v45, %v6207_v12  ;;  %v6163_v27 = vld [vmem:[#allocation2 + $0x4b4] sm:$0xf0]  ;;  %v9449_v60 = vpop.permute.xlu0 %2046  ;;  %v5858_v54 = vor.u32 %v6944_v63, %v5855_v23  ;;  %2139 = vrot.lane.b32.xlu1 %v8110_v26, %s7461_s1 }
 0x2ea   : > { %4154 = vmatpush.bf16.msra.mxu3 %v5590_v42  ;;  %1168 = vrot.lane.b32.xlu0 %v7300_v36, %s7449_s18  ;;  %v9443_v42 = vpop.permute.xlu2 %1261  ;;  %v6606_v51 = vor.u32 %v7131_v62, %v6603_v32  ;;  %v6166_v11 = vor.u32 %v7021_v39, %v6163_v27  ;;  %v7120_v32 = vld [vmem:[#allocation2 + $0x7a4] sm:$0xf]  ;;  %v6559_v27 = vld [vmem:[#allocation2 + $0x7cc] sm:$0xf0]  ;;  %vm10878_vm15 = vcmask 736256  }
 0x2eb   : > { %4167 = vmatpush.bf16.msra.mxu0 %v5986_v13  ;;  %v10765_v6 = vrot.slane %v9443_v42, 4  ;;  %4203 = vmatpush.bf16.msrb.mxu2 %v5902_v43  ;;  %v2066_v13 = vrot.slane %v9449_v60, 4  ;;  %v7010_v43 = vld [vmem:[#allocation2 + $0x434] sm:$0xf] }
 0x2ec   : > { %4179 = vmatpush.bf16.msra.mxu1 %v6426_v28  ;;  %v5941_v28 = vld [vmem:[#allocation2 + $0x2d0] sm:$0xf]  ;;  %6675 = vmatmul.msk.bf16.vlgmr.msra.gmra.mxu2 %vm10874_vm13, %v8891_v31  ;;  %vm10882_vm13 = vcmask 760832  }
 0x2ed   : > { %4155 = vmatmul.bf16.vlgmr.msra.gmra.mxu3 %v8847_v35  ;;  %v5942_v36 = vor.u32 %v6971_v25, %v5941_v28  ;;  %v1294_v12 = vsel %vm344_vm5, %v1274_v38, %v10765_v6  ;;  %v10873_v25 = vrot.slane %v9191_v58, 4  ;;  %v5943_v6 = vld [vmem:[#allocation2 + $0x2fc] sm:$0xf0] }
 0x2ee   : > { %4217 = vmatpush.bf16.msrb.mxu3 %v6254_v29  ;;  %v9445_v29 = vpop.permute.xlu1 %2058  ;;  %v1295_v23 = vsel %vm10872_vm6, %v9263_v40, %v1294_v12  ;;  %v5811_v40 = vld [vmem:[#allocation2 + $0x1f4] sm:$0xf0] }
 0x2ef   : > { %v10766_v0 = vrot.slane %v9445_v29, 4  ;;  %v2081_v62 = vsel %vm344_vm5, %v10873_v25, %v2066_v13  ;;  %4168 = vmatpush.bf16.msra.mxu0 %v5942_v36  ;;  %1320 = vst [vmem:[#allocation2 + $0x4bc] sm:$0xff] %v1295_v23  ;;  %4204 = vmatpush.bf16.msrb.mxu2 %v5858_v54 }
 0x2f0   : > { %v2082_v39 = vsel %vm2075_vm2, %v9191_v58, %v2081_v62  ;;  %v7081_v28 = vld [vmem:[#allocation2 + $0x668] sm:$0xf0]  ;;  %v6922_v62 = vld [vmem:[#allocation2 + $0x174] sm:$0xf]  ;;  %1586 = vrot.lane.b32.xlu2 %v8110_v26, %s7459_s26 }
 0x2f1   : > { %v2091_v45 = vsel %vm344_vm5, %v10871_v3, %v10766_v0  ;;  %2108 = vst [vmem:[#allocation2 + $0x800] sm:$0xff] %v2082_v39  ;;  %v6933_v58 = vld [vmem:[#allocation2 + $0x1cc] sm:$0xf]  ;;  %v5767_v3 = vld [vmem:[#allocation2 + $0x19c] sm:$0xf0]  ;;  %v9492_v23 = vpop.permute.xlu0 %1582  ;;  %1574 = vrot.lane.b32.xlu1 %v8056_v55, %s7459_s26 }
 0x2f2   : > { %4218 = vmatpush.bf16.msrb.mxu3 %v6210_v5  ;;  %v6119_v5 = vld [vmem:[#allocation2 + $0x45c] sm:$0xf0]  ;;  %v2092_v38 = vsel %vm2075_vm2, %v9187_v17, %v2091_v45  ;;  %2127 = vrot.lane.b32.xlu0 %v8056_v55, %s7461_s1  ;;  %v9485_v12 = vpop.permute.xlu2 %1809  ;;  %v6515_v45 = vld [vmem:[#allocation2 + $0x774] sm:$0xf0]  ;;  %v1597_v25 = vrot.slane %v9492_v23, 4 }
 0x2f3   : > { %4231 = vmatpush.bf16.msrb.mxu0 %v6606_v51  ;;  %2115 = vst [vmem:[#allocation2 + $0x82c] sm:$0xff] %v2092_v38  ;;  %v6381_v17 = vld [vmem:[#allocation2 + $0x640] sm:$0xf]  ;;  %v6122_v63 = vor.u32 %v7010_v43, %v6119_v5  ;;  %v6562_v51 = vor.u32 %v7120_v32, %v6559_v27  ;;  %v10764_v43 = vrot.slane %v9485_v12, 4  ;;  %v6075_v38 = vld [vmem:[#allocation2 + $0x404] sm:$0xf0] }
 0x2f4   : > { %v6382_v36 = vor.u32 %v7081_v28, %v6381_v17  ;;  %4169 = vmatmul.bf16.vlgmr.msra.gmra.mxu0 %v9016_v18  ;;  %v7109_v32 = vld [vmem:[#allocation2 + $0x74c] sm:$0xf]  ;;  %v5770_v17 = vor.u32 %v6922_v62, %v5767_v3  ;;  %v6999_v28 = vld [vmem:[#allocation2 + $0x3dc] sm:$0xf]  ;;  %v6031_v62 = vld [vmem:[#allocation2 + $0x3ac] sm:$0xf0] }
 0x2f5   : > { %v1844_v39 = vsel %vm344_vm5, %v1828_v2, %v10764_v43  ;;  %v7076_v0 = vld [vmem:[#allocation2 + $0x644] sm:$0xf] }
 0x2f6   : > { %4219 = vmatpush.bf16.msrb.mxu3 %v6166_v11  ;;  %v9487_v54 = vpop.permute.xlu1 %1331  ;;  %v5814_v11 = vor.u32 %v6933_v58, %v5811_v40  ;;  %4180 = vmatpush.bf16.msra.mxu1 %v6382_v36  ;;  %v10875_v40 = vrot.slane %v9074_v20, 4  ;;  %v6518_v36 = vor.u32 %v7109_v32, %v6515_v45  ;;  %v5723_v45 = vld [vmem:[#allocation2 + $0x144] sm:$0xf0] }
 0x2f7   : > { %v10785_v5 = vrot.slane %v9487_v54, 4  ;;  %4232 = vmatpush.bf16.msrb.mxu0 %v6562_v51  ;;  %v10876_v51 = vrot.slane %v8961_v4, 4 }
 0x2f8   : > { %4205 = vmatpush.bf16.msrb.mxu2 %v5814_v11  ;;  %v6078_v11 = vor.u32 %v6999_v28, %v6075_v38  ;;  %v6988_v38 = vld [vmem:[#allocation2 + $0x384] sm:$0xf]  ;;  %v7087_v28 = vld [vmem:[#allocation2 + $0x69c] sm:$0xf]  ;;  %1158 = vrot.lane.b32.xlu2 %v8056_v55, %s7449_s18 }
 0x2f9   : > { %v1366_v27 = vsel %vm344_vm5, %v10875_v40, %v10785_v5  ;;  %v1615_v2 = vsel %vm344_vm5, %v10876_v51, %v1597_v25  ;;  %v5987_v51 = vld [vmem:[#allocation2 + $0x354] sm:$0xf0]  ;;  %1507 = vrot.lane.b32.xlu1 %v8110_v26, %s7460_s29  ;;  %v7011_v5 = vld [vmem:[#allocation2 + $0x43c] sm:$0xf] }
 0x2fa   : > { %4220 = vmatpush.bf16.msrb.mxu3 %v6122_v63  ;;  %v1845_v63 = vsel %vm10771_vm4, %v9301_v24, %v1844_v39  ;;  %v1367_v58 = vsel %vm1360_vm8, %v9074_v20, %v1366_v27  ;;  %v1616_v3 = vsel %vm10777_vm0, %v8961_v4, %v1615_v2  ;;  %v6471_v24 = vld [vmem:[#allocation2 + $0x71c] sm:$0xf0]  ;;  %v6911_v20 = vld [vmem:[#allocation2 + $0x11c] sm:$0xf]  ;;  %1665 = vrot.lane.b32.xlu0 %v8110_v26, %s7458_s13  ;;  %v9522_v4 = vpop.permute.xlu2 %1730  ;;  %v6900_v2 = vld [vmem:[#allocation2 + $0xc4] sm:$0xf] }
 0x2fb   : > { %1871 = vst [vmem:[#allocation2 + $0x6f8] sm:$0xff] %v1845_v63  ;;  %4233 = vmatpush.bf16.msrb.mxu0 %v6518_v36  ;;  %v6474_v32 = vor.u32 %v7098_v19, %v6471_v24  ;;  %v5726_v40 = vor.u32 %v6911_v20, %v5723_v45  ;;  %v6034_v27 = vor.u32 %v6988_v38, %v6031_v62  ;;  %v10763_v36 = vrot.slane %v9522_v4, 4  ;;  %v6977_v20 = vld [vmem:[#allocation2 + $0x32c] sm:$0xf] }
 0x2fc   : > { %1395 = vst [vmem:[#allocation2 + $0x4e8] sm:$0xff] %v1367_v58  ;;  %4206 = vmatpush.bf16.msrb.mxu2 %v5770_v17  ;;  %v5679_v17 = vld [vmem:[#allocation2 + $0xec] sm:$0xf0]  ;;  %v9528_v58 = vpop.permute.xlu0 %1967  ;;  %v10877_v45 = vrot.slane %v9111_v59, 4  ;;  %v5990_v43 = vor.u32 %v6977_v20, %v5987_v51 }
 0x2fd   : > { %1640 = vst [vmem:[#allocation2 + $0x614] sm:$0xff] %v1616_v3  ;;  %v10770_v19 = vrot.slane %v9528_v58, 4  ;;  %v1765_v3 = vsel %vm344_vm5, %v1749_v7, %v10763_v36  ;;  %v5682_v24 = vor.u32 %v6900_v2, %v5679_v17  ;;  %v10879_v7 = vrot.slane %v9224_v22, 4  ;;  %v6609_v2 = vld [vmem:[#allocation2 + $0x800] sm:$0xf] }
 0x2fe   : > { %4221 = vmatpush.bf16.msrb.mxu3 %v6078_v11  ;;  %v9524_v39 = vpop.permute.xlu1 %1979  ;;  %v6427_v11 = vld [vmem:[#allocation2 + $0x6c4] sm:$0xf0] }
 0x2ff   : > { %v10783_v63 = vrot.slane %v9524_v39, 4  ;;  %4234 = vmatpush.bf16.msrb.mxu0 %v6474_v32  ;;  %v6430_v38 = vor.u32 %v7087_v28, %v6427_v11  ;;  %v5635_v32 = vld [vmem:[#allocation2 + $0x94] sm:$0xf0]  ;;  %v2002_v36 = vsel %vm344_vm5, %v10879_v7, %v10770_v19  ;;  %v6337_v28 = vld [vmem:[#allocation2 + $0x5e8] sm:$0xf] }
 0x300   : > { %4207 = vmatpush.bf16.msrb.mxu2 %v5726_v40  ;;  %v1766_v40 = vsel %vm10878_vm15, %v9336_v57, %v1765_v3  ;;  %v2003_v17 = vsel %vm1996_vm9, %v9224_v22, %v2002_v36  ;;  %v7137_v57 = vld [vmem:[#allocation2 + $0x828] sm:$0xf0]  ;;  %v6966_v3 = vld [vmem:[#allocation2 + $0x2d4] sm:$0xf]  ;;  %vm10884_vm15 = vmmov %vm10882_vm13 }
 0x301   : > { %v2012_v62 = vsel %vm344_vm5, %v10877_v45, %v10783_v63  ;;  %v6383_v45 = vld [vmem:[#allocation2 + $0x66c] sm:$0xf0]  ;;  %1792 = vst [vmem:[#allocation2 + $0x6a0] sm:$0xff] %v1766_v40  ;;  %v6889_v11 = vld [vmem:[#allocation2 + $0x6c] sm:$0xf] }
 0x302   : > { %4222 = vmatpush.bf16.msrb.mxu3 %v6034_v27  ;;  %v2013_v27 = vsel %vm1996_vm9, %v9111_v59, %v2012_v62  ;;  %2029 = vst [vmem:[#allocation2 + $0x7a8] sm:$0xff] %v2003_v17  ;;  %v6386_v62 = vor.u32 %v7076_v0, %v6383_v45  ;;  %1495 = vrot.lane.b32.xlu0 %v8056_v55, %s7460_s29  ;;  %v9558_v22 = vpop.permute.xlu2 %1663  ;;  %v7065_v45 = vld [vmem:[#allocation2 + $0x5ec] sm:$0xf]  ;;  %v6878_v17 = vld [vmem:[#allocation2 + $0x14] sm:$0xf] }
 0x303   : > { %4235 = vmatpush.bf16.msrb.mxu0 %v6430_v38  ;;  %2036 = vst [vmem:[#allocation2 + $0x7d4] sm:$0xff] %v2013_v27  ;;  %v5638_v36 = vor.u32 %v6889_v11, %v5635_v32  ;;  %v10768_v20 = vrot.slane %v9558_v22, 4  ;;  %v6610_v0 = vor.u32 %v7137_v57, %v6609_v2  ;;  %v5591_v27 = vld [vmem:[#allocation2 + $0x3c] sm:$0xf0]  ;;  %v6962_v63 = vld [vmem:[#allocation2 + $0x2b0] sm:$0xf0] }
 0x304   : > { %4208 = vmatpush.bf16.msrb.mxu2 %v5682_v24  ;;  %v7070_v59 = vld [vmem:[#allocation2 + $0x610] sm:$0xf0]  ;;  %v6339_v24 = vld [vmem:[#allocation2 + $0x614] sm:$0xf0]  ;;  %v9563_v40 = vpop.permute.xlu0 %1503  ;;  %v6257_v32 = vld [vmem:[#allocation2 + $0x540] sm:$0xf] }
 0x305   : > { %v6338_v51 = vor.u32 %v7070_v59, %v6337_v28  ;;  %v1518_v55 = vrot.slane %v9563_v40, 4  ;;  %v6342_v28 = vor.u32 %v7065_v45, %v6339_v24  ;;  %v10880_v59 = vrot.slane %v9267_v47, 4 }
 0x306   : > { %4223 = vmatpush.bf16.msrb.mxu3 %v5990_v43  ;;  %v5946_v43 = vor.u32 %v6966_v3, %v5943_v6  ;;  %v9561_v38 = vpop.permute.xlu1 %1249  ;;  %v1696_v6 = vsel %vm344_vm5, %v1676_v16, %v10768_v20  ;;  %v5594_v3 = vor.u32 %v6878_v17, %v5591_v27  ;;  %v7049_v16 = vld [vmem:[#allocation2 + $0x568] sm:$0xf0]  ;;  %v6213_v27 = vld [vmem:[#allocation2 + $0x4e8] sm:$0xf] }
 0x307   : > { %4181 = vmatpush.bf16.msra.mxu1 %v6338_v51  ;;  %4236 = vmatpush.bf16.msrb.mxu0 %v6386_v62  ;;  %v1269_v7 = vrot.slane %v9561_v38, 4  ;;  %v1697_v57 = vsel %vm10779_vm14, %v9414_v61, %v1696_v6  ;;  %v10881_v51 = vrot.slane %v9113_v1, 4  ;;  %v4543_v62 = vld [vmem:[%s10686_s2] sm:$0xff]  ;;  %v7038_v6 = vld [vmem:[#allocation2 + $0x510] sm:$0xf0] }
 0x308   : > { %4209 = vmatpush.bf16.msrb.mxu2 %v5638_v36  ;;  %1720 = vst [vmem:[#allocation2 + $0x674] sm:$0xff] %v1697_v57  ;;  %4546 = vperm.xlu1 %7285, %v4543_v62  }
 0x309   : > { %v1284_v2 = vsel %vm344_vm5, %v10880_v59, %v1269_v7  ;;  %v1536_v11 = vsel %vm344_vm5, %v10881_v51, %v1518_v55  ;;  %v7142_v51 = vld [vmem:[#allocation2 + $0x854] sm:$0xf] }
 0x30a   : > { %4224 = vmatpush.bf16.msrb.mxu3 %v5946_v43  ;;  %v1285_v61 = vsel %vm10872_vm6, %v9267_v47, %v1284_v2  ;;  %v1537_v36 = vsel %vm10882_vm13, %v9113_v1, %v1536_v11  ;;  %v6258_v43 = vor.u32 %v7049_v16, %v6257_v32  ;;  %v7126_v24 = vld [vmem:[#allocation2 + $0x7d0] sm:$0xf0]  ;;  %1170 = vrot.lane.b32.xlu0 %v8110_v26, %s7449_s18  ;;  %v9594_v47 = vpop.permute.xlu2 %1493  ;;  %v10883_v26 = vrot.slane %v9408_v33, 4  ;;  %v6647_v11 = vld [vmem:[#allocation2 + $0x87c] sm:$0xf0] }
 0x30b   : > { %4237 = vmatpush.bf16.msrb.mxu0 %v6342_v28  ;;  %1313 = vst [vmem:[#allocation2 + $0x490] sm:$0xff] %v1285_v61  ;;  %v10767_v1 = vrot.slane %v9594_v47, 4  ;;  %v6214_v28 = vor.u32 %v7038_v6, %v6213_v27  ;;  %v10885_v16 = vrot.slane %v9305_v8, 4  ;;  %v10886_v61 = vrot.slane %v9148_v37, 4  ;;  %v6125_v27 = vld [vmem:[#allocation2 + $0x438] sm:$0xf] }
 0x30c   : > { %4210 = vmatpush.bf16.msrb.mxu2 %v5594_v3  ;;  %1561 = vst [vmem:[#allocation2 + $0x5bc] sm:$0xff] %v1537_v36  ;;  %v9599_v17 = vpop.permute.xlu0 %1888  ;;  %vm10890_vm6 = vcmask 7168   ;;  %vm2109_vm13 = vcmask 580612  }
 0x30d   : > { %4225 = vmatmul.bf16.vlgmr.msrb.gmra.mxu3 %v9016_v18  ;;  %v10769_v59 = vrot.slane %v9599_v17, 4  ;;  %v1528_v2 = vsel %vm344_vm5, %v10883_v26, %v10767_v1 }
 0x30e   : > { %4287 = vmatpush.bf16.msra.mxu3 %v6610_v0  ;;  %v6565_v0 = vld [vmem:[#allocation2 + $0x7a8] sm:$0xf]  ;;  %v9597_v32 = vpop.permute.xlu1 %1900  ;;  %v1529_v3 = vsel %vm10884_vm15, %v9408_v33, %v1528_v2  ;;  %vm9662_vm15 = vmor %vm2109_vm13, %vm344_vm5  ;;  %vm1397_vm13 = vcmask 109568  }
 0x30f   : > { %v6566_v45 = vor.u32 %v7126_v24, %v6565_v0  ;;  %4211 = vmatmul.bf16.vlgmr.msrb.gmra.mxu2 %v8847_v35  ;;  %v1914_v57 = vrot.slane %v9597_v32, 4  ;;  %v1923_v36 = vsel %vm344_vm5, %v10886_v61, %v10769_v59  ;;  %v7054_v24 = vld [vmem:[#allocation2 + $0x594] sm:$0xf]  ;;  %v7027_v0 = vld [vmem:[#allocation2 + $0x4b8] sm:$0xf0]  ;;  %1555 = vst [vmem:[#allocation2 + $0x598] sm:$0xff] %v1529_v3  ;;  %v6650_v59 = vor.u32 %v7142_v51, %v6647_v11 }
 0x310   : > { %4273 = vmatpush.bf16.msra.mxu2 %v6258_v43  ;;  %v6293_v43 = vld [vmem:[#allocation2 + $0x590] sm:$0xf]  ;;  %v6961_v3 = vld [vmem:[#allocation2 + $0x2a8] sm:$0xf0]  ;;  %v10887_v51 = vrot.slane %v9370_v30, 4 }
 0x311   : > { %v1933_v62 = vsel %vm344_vm5, %v10885_v16, %v1914_v57 }
 0x312   : > { %4288 = vmatpush.bf16.msra.mxu3 %v6566_v45  ;;  %v1934_v33 = vsel %vm1917_vm12, %v9305_v8, %v1933_v62  ;;  %v1924_v45 = vsel %vm1917_vm12, %v9148_v37, %v1923_v36  ;;  %v6169_v6 = vld [vmem:[#allocation2 + $0x490] sm:$0xf]  ;;  %v9625_v20 = vpop.permute.xlu2 %2137 }
 0x313   : > { %1957 = vst [vmem:[#allocation2 + $0x77c] sm:$0xff] %v1934_v33  ;;  %v7059_v26 = vld [vmem:[#allocation2 + $0x5b8] sm:$0xf0]  ;;  %v6295_v2 = vld [vmem:[#allocation2 + $0x5bc] sm:$0xf0]  ;;  %v6170_v16 = vor.u32 %v7027_v0, %v6169_v6  ;;  %v10773_v8 = vrot.slane %v9625_v20, 4 }
 0x314   : > { %4274 = vmatpush.bf16.msra.mxu2 %v6214_v28  ;;  %v7016_v28 = vld [vmem:[#allocation2 + $0x460] sm:$0xf0]  ;;  %1950 = vst [vmem:[#allocation2 + $0x750] sm:$0xff] %v1924_v45  ;;  %v6294_v1 = vor.u32 %v7059_v26, %v6293_v43  ;;  %v6298_v61 = vor.u32 %v7054_v24, %v6295_v2  ;;  %v9630_v62 = vpop.permute.xlu0 %1821  ;;  %v5905_v43 = vld [vmem:[#allocation2 + $0x280] sm:$0xf] }
 0x315   : > { %v6126_v19 = vor.u32 %v7016_v28, %v6125_v27  ;;  %v10775_v0 = vrot.slane %v9630_v62, 4  ;;  %v2170_v11 = vsel %vm344_vm5, %v10887_v51, %v10773_v8  ;;  %v10888_v27 = vrot.slane %v9341_v10, 4  ;;  %v6950_v6 = vld [vmem:[#allocation2 + $0x250] sm:$0xf0]  ;;  %v5861_v26 = vld [vmem:[#allocation2 + $0x228] sm:$0xf] }
 0x316   : > { %4182 = vmatpush.bf16.msra.mxu1 %v6294_v1  ;;  %4238 = vmatpush.bf16.msrb.mxu0 %v6298_v61  ;;  %v9628_v37 = vpop.permute.xlu1 %1166  ;;  %v5906_v1 = vor.u32 %v6961_v3, %v5905_v43  ;;  %v2171_v24 = vsel %vm10778_vm10, %v9370_v30, %v2170_v11  ;;  %v7082_v8 = vld [vmem:[#allocation2 + $0x670] sm:$0xf0] }
 0x317   : > { %v10774_v36 = vrot.slane %v9628_v37, 4  ;;  %2194 = vst [vmem:[#allocation2 + $0x884] sm:$0xff] %v2171_v24 }
 0x318   : > { %4275 = vmatpush.bf16.msra.mxu2 %v6170_v16  ;;  %v5862_v16 = vor.u32 %v6950_v6, %v5861_v26  ;;  %v10893_v6 = vrot.slane %v9261_v34, 4  ;;  %v5773_v26 = vld [vmem:[#allocation2 + $0x178] sm:$0xf] }
 0x319   : > { %v1198_v33 = vsel %vm344_vm5, %v10888_v27, %v10774_v36  ;;  %4183 = vmatmul.bf16.vlgmr.msra.gmra.mxu1 %v8837_v46  ;;  %4239 = vmatmul.bf16.vlgmr.msrb.gmra.mxu0 %v8837_v46  ;;  %v5817_v27 = vld [vmem:[#allocation2 + $0x1d0] sm:$0xf] }
 0x31a   : > { %4252 = vmatpush.bf16.msrb.mxu1 %v6650_v59  ;;  %v10889_v59 = vrot.slane %v9185_v9, 4  ;;  %v1199_v30 = vsel %vm10890_vm6, %v1198_v33, %v9628_v37  ;;  %v7115_v10 = vld [vmem:[#allocation2 + $0x778] sm:$0xf0]  ;;  %v2049_v3 = vpop.permute.xlu2 %2048  ;;  %vm10895_vm6 = vcmask 736256  }
 0x31b   : > { %1226 = vst [vmem:[#allocation2 + $0x40c] sm:$0xff] %v1199_v30  ;;  %v6521_v2 = vld [vmem:[#allocation2 + $0x750] sm:$0xf]  ;;  %v2067_v43 = vrot.slane %v2049_v3, 4 }
 0x31c   : > { %v1854_v45 = vsel %vm344_vm5, %v10889_v59, %v10775_v0  ;;  %4276 = vmatpush.bf16.msra.mxu2 %v6126_v19  ;;  %v6522_v61 = vor.u32 %v7115_v10, %v6521_v2  ;;  %v6939_v19 = vld [vmem:[#allocation2 + $0x1f8] sm:$0xf0]  ;;  %v9659_v11 = vpop.permute.xlu0 %1742  ;;  %v6928_v2 = vld [vmem:[#allocation2 + $0x1a0] sm:$0xf0]  ;;  %v10900_v0 = vrot.slane %v9377_v21, 4 }
 0x31d   : > { %v1855_v28 = vsel %vm10771_vm4, %v9185_v9, %v1854_v45  ;;  %v10784_v24 = vrot.slane %v9659_v11, 4  ;;  %v2083_v33 = vsel %vm344_vm5, %v2066_v13, %v2067_v43  ;;  %v5818_v59 = vor.u32 %v6939_v19, %v5817_v27  ;;  %v6477_v19 = vld [vmem:[#allocation2 + $0x6f8] sm:$0xf] }
 0x31e   : > { %4259 = vmatpush.bf16.msra.mxu1 %v5906_v1  ;;  %1878 = vst [vmem:[#allocation2 + $0x724] sm:$0xff] %v1855_v28  ;;  %4289 = vmatpush.bf16.msra.mxu3 %v6522_v61  ;;  %v9657_v51 = vpop.permute.xlu1 %1651  ;;  %v2084_v45 = vsel %vm2075_vm2, %v9449_v60, %v2083_v33  ;;  %v10894_v28 = vrot.slane %v9222_v56, 4  ;;  %v5774_v27 = vor.u32 %v6928_v2, %v5773_v26  ;;  %v5729_v26 = vld [vmem:[#allocation2 + $0x120] sm:$0xf]  ;;  %vm1315_vm4 = vcmask 117760  }
 0x31f   : > { %v10782_v1 = vrot.slane %v9657_v51, 4  ;;  %2111 = vst.msk [vmem:[#allocation2 + $0x808] sm:$0xff] %vm9662_vm15, %v2084_v45 }
 0x320   : > { %v1775_v10 = vsel %vm344_vm5, %v10894_v28, %v10784_v24  ;;  %v6917_v28 = vld [vmem:[#allocation2 + $0x148] sm:$0xf0]  ;;  %v6171_v24 = vld [vmem:[#allocation2 + $0x4bc] sm:$0xf0] }
 0x321   : > { %v1686_v30 = vsel %vm344_vm5, %v10893_v6, %v10782_v1  ;;  %v1776_v13 = vsel %vm10895_vm6, %v9222_v56, %v1775_v10  ;;  %v6994_v6 = vld [vmem:[#allocation2 + $0x3b0] sm:$0xf0]  ;;  %vm10898_vm6 = vcmask 130048   ;;  %v6956_v1 = vld [vmem:[#allocation2 + $0x284] sm:$0xf] }
 0x322   : > { %4260 = vmatpush.bf16.msra.mxu1 %v5862_v16  ;;  %v1687_v60 = vsel %vm10779_vm14, %v9261_v34, %v1686_v30  ;;  %v6081_v16 = vld [vmem:[#allocation2 + $0x3e0] sm:$0xf]  ;;  %v7005_v61 = vld [vmem:[#allocation2 + $0x408] sm:$0xf0]  ;;  %1799 = vst [vmem:[#allocation2 + $0x6cc] sm:$0xff] %v1776_v13  ;;  %v1346_v45 = vpop.permute.xlu2 %1345  ;;  %v10896_v13 = vrot.slane %v9374_v53, 4 }
 0x323   : > { %1713 = vst [vmem:[#allocation2 + $0x648] sm:$0xff] %v1687_v60  ;;  %v6082_v3 = vor.u32 %v7005_v61, %v6081_v16  ;;  %v1358_v34 = vrot.slane %v1346_v45, 4  ;;  %v6037_v30 = vld [vmem:[#allocation2 + $0x388] sm:$0xf]  ;;  %v5730_v61 = vor.u32 %v6917_v28, %v5729_v26  ;;  %v5993_v28 = vld [vmem:[#allocation2 + $0x330] sm:$0xf] }
 0x324   : > { %1404 = vst.msk [vmem:[#allocation2 + $0x524] sm:$0xf] %vm1397_vm13, %v1346_v45  ;;  %v6038_v2 = vor.u32 %v6994_v6, %v6037_v30  ;;  %v6906_v6 = vld [vmem:[#allocation2 + $0xf0] sm:$0xf0]  ;;  %v6433_v30 = vld [vmem:[#allocation2 + $0x6a0] sm:$0xf] }
 0x325   : > { %v7104_v43 = vld [vmem:[#allocation2 + $0x720] sm:$0xf0]  ;;  %4277 = vmatpush.bf16.msra.mxu2 %v6082_v3  ;;  %v1378_v16 = vsel %vm344_vm5, %v10896_v13, %v1358_v34  ;;  %v6983_v3 = vld [vmem:[#allocation2 + $0x358] sm:$0xf0]  ;;  %v9717_v13 = vpop.f32.mrf.mxu3 }
 0x326   : > { %4261 = vmatpush.bf16.msra.mxu1 %v5818_v59  ;;  %v6478_v33 = vor.u32 %v7104_v43, %v6477_v19  ;;  %v9690_v56 = vpop.permute.xlu1 %1584  ;;  %v9692_v59 = vpop.permute.xlu0 %1572  ;;  %v1379_v19 = vsel %vm1360_vm8, %v9374_v53, %v1378_v16  ;;  %v5994_v34 = vor.u32 %v6983_v3, %v5993_v28 }
 0x327   : > { %v10776_v10 = vrot.slane %v9690_v56, 4  ;;  %v10772_v60 = vrot.slane %v9692_v59, 4  ;;  %1403 = vst [vmem:[#allocation2 + $0x51c] sm:$0xff] %v1379_v19  ;;  %v6895_v19 = vld [vmem:[#allocation2 + $0x98] sm:$0xf0]  ;;  %v9723_v3 = vpop.f32.mrf.mxu2 }
 0x328   : > { %4290 = vmatpush.bf16.msra.mxu3 %v6478_v33 }
 0x329   : > { %v1617_v43 = vsel %vm344_vm5, %v1597_v25, %v10776_v10  ;;  %6676 = vmatmul.msk.bf16.vlgmr.msrb.gmra.mxu1 %vm10898_vm6, %v8891_v31  ;;  %4278 = vmatpush.bf16.msra.mxu2 %v6038_v2  ;;  %v5685_v25 = vld [vmem:[#allocation2 + $0xc8] sm:$0xf]  ;;  %v7093_v26 = vld [vmem:[#allocation2 + $0x6c8] sm:$0xf0]  ;;  %vm10899_vm6 = vcmask 1039360  }
 0x32a   : > { %4262 = vmatpush.bf16.msra.mxu1 %v5774_v27  ;;  %v10897_v27 = vrot.slane %v9338_v41, 4  ;;  %v1618_v53 = vsel %vm10777_vm0, %v9492_v23, %v1617_v43  ;;  %v5686_v2 = vor.u32 %v6906_v6, %v5685_v25  ;;  %v6434_v16 = vor.u32 %v7093_v26, %v6433_v30  ;;  %v9721_v23 = vpop.f32.mrf.mxu1  ;;  %v6389_v43 = vld [vmem:[#allocation2 + $0x648] sm:$0xf]  ;;  %v7132_v25 = vld [vmem:[#allocation2 + $0x804] sm:$0xf] }
 0x32b   : > { %1641 = vst [vmem:[#allocation2 + $0x61c] sm:$0xff] %v1618_v53  ;;  %v5641_v30 = vld [vmem:[#allocation2 + $0x70] sm:$0xf]  ;;  %v6390_v36 = vor.u32 %v7082_v8, %v6389_v43  ;;  %v7044_v8 = vld [vmem:[#allocation2 + $0x544] sm:$0xf] }
 0x32c   : > { %v1607_v33 = vsel %vm344_vm5, %v10897_v27, %v10772_v60  ;;  %v6972_v27 = vld [vmem:[#allocation2 + $0x300] sm:$0xf0]  ;;  %v9719_v60 = vpop.f32.mrf.mxu0  ;;  %4291 = vmatpush.bf16.msra.mxu3 %v6434_v16  ;;  %v5642_v16 = vor.u32 %v6895_v19, %v5641_v30  ;;  %v6567_v19 = vld [vmem:[#allocation2 + $0x7d4] sm:$0xf0] }
 0x32d   : > { %v1608_v45 = vsel %vm10777_vm0, %v9338_v41, %v1607_v33  ;;  %4279 = vmatpush.bf16.msra.mxu2 %v5994_v34  ;;  %v1252_v41 = vpop.permute.xlu2 %1251  ;;  %v6611_v33 = vld [vmem:[#allocation2 + $0x82c] sm:$0xf0]  ;;  %v5597_v30 = vld [vmem:[#allocation2 + $0x18] sm:$0xf]  ;;  %vm1951_vm0 = vcmask 596996  }
 0x32e   : > { %4263 = vmatpush.bf16.msra.mxu1 %v5730_v61  ;;  %1634 = vst [vmem:[#allocation2 + $0x5f0] sm:$0xff] %v1608_v45  ;;  %v5949_v61 = vld [vmem:[#allocation2 + $0x2d8] sm:$0xf]  ;;  %v1270_v53 = vrot.slane %v1252_v41, 4  ;;  %v9726_v6 = vpop.permute.xlu1 %2125  ;;  %v9728_v45 = vpop.permute.xlu0 %1505 }
 0x32f   : > { %1316 = vst.msk [vmem:[#allocation2 + $0x4a0] sm:$0xf] %vm1315_vm4, %v1252_v41  ;;  %v10781_v28 = vrot.slane %v9726_v6, 4  ;;  %v10780_v34 = vrot.slane %v9728_v45, 4  ;;  %v5950_v26 = vor.u32 %v6972_v27, %v5949_v61  ;;  %v6614_v61 = vor.u32 %v7132_v25, %v6611_v33 }
 0x330   : > { %4292 = vmatpush.bf16.msra.mxu3 %v6390_v36 }
 0x331   : > { %v2160_v10 = vsel %vm344_vm5, %v10900_v0, %v10781_v28  ;;  %v1538_v27 = vsel %vm344_vm5, %v1518_v55, %v10780_v34  ;;  %4280 = vmatpush.bf16.msra.mxu2 %v5950_v26  ;;  %v6259_v26 = vld [vmem:[#allocation2 + $0x56c] sm:$0xf0]  ;;  %v6479_v34 = vld [vmem:[#allocation2 + $0x724] sm:$0xf0] }
 0x332   : > { %4264 = vmatpush.bf16.msra.mxu1 %v5686_v2  ;;  %v1286_v2 = vsel %vm344_vm5, %v1269_v7, %v1270_v53  ;;  %v6884_v7 = vld [vmem:[#allocation2 + $0x40] sm:$0xf0]  ;;  %v7071_v0 = vld [vmem:[#allocation2 + $0x618] sm:$0xf0]  ;;  %v7121_v53 = vld [vmem:[#allocation2 + $0x7ac] sm:$0xf] }
 0x333   : > { %v1287_v41 = vsel %vm10899_vm6, %v9561_v38, %v1286_v2  ;;  %v2161_v38 = vsel %vm10778_vm10, %v9377_v21, %v2160_v10  ;;  %vm10901_vm6 = vcmask 760832   ;;  %v5598_v33 = vor.u32 %v6884_v7, %v5597_v30  ;;  %v6655_v28 = vld [vmem:[#allocation2 + $0x884] sm:$0xf0] }
 0x334   : > { %1314 = vst [vmem:[#allocation2 + $0x498] sm:$0xff] %v1287_v41  ;;  %v1539_v43 = vsel %vm10901_vm6, %v9563_v40, %v1538_v27  ;;  %4281 = vmatmul.bf16.vlgmr.msra.gmra.mxu2 %v9016_v18  ;;  %vm1477_vm10 = vcmask 900100   ;;  %v6570_v21 = vor.u32 %v7121_v53, %v6567_v19  ;;  %v6262_v10 = vor.u32 %v7044_v8, %v6259_v26  ;;  %v7033_v40 = vld [vmem:[#allocation2 + $0x4ec] sm:$0xf]  ;;  %vm9756_vm6 = vmor %vm1951_vm0, %vm344_vm5  ;;  %v6215_v8 = vld [vmem:[#allocation2 + $0x514] sm:$0xf0]  ;;  %v9762_v53 = vpop.f32.mrf.mxu2  ;;  %v9773_v26 = vpop.f32.mrf.mxu0 }
 0x335   : > { %2187 = vst [vmem:[#allocation2 + $0x858] sm:$0xff] %v2161_v38  ;;  %4343 = vmatpush.bf16.msrb.mxu2 %v6614_v61  ;;  %v6345_v55 = vld [vmem:[#allocation2 + $0x5f0] sm:$0xf]  ;;  %v1903_v2 = vpop.permute.xlu2 %1902  ;;  %v7110_v61 = vld [vmem:[#allocation2 + $0x754] sm:$0xf]  ;;  %vm9769_vm14 = vmor %vm1477_vm10, %vm344_vm5  ;;  %vm10909_vm0 = vcmask 769024  }
 0x336   : > { %4265 = vmatpush.bf16.msra.mxu1 %v5642_v16  ;;  %1562 = vst [vmem:[#allocation2 + $0x5c4] sm:$0xff] %v1539_v43  ;;  %v6346_v25 = vor.u32 %v7071_v0, %v6345_v55  ;;  %v9752_v16 = vpop.f32.mrf.mxu3  ;;  %v1915_v36 = vrot.slane %v1903_v2, 4  ;;  %v1428_v41 = vpop.permute.xlu1 %1427  ;;  %v6523_v38 = vld [vmem:[#allocation2 + $0x77c] sm:$0xf0]  ;;  %vm10910_vm10 = vmmov %vm10909_vm0 }
 0x337   : > { %10902 = vst [vmem:[#allocation14_spill] sm:$0xff] %v9752_v16  ;;  %v1416_v27 = vpop.permute.xlu0 %1415  ;;  %v1440_v43 = vrot.slane %v1428_v41, 4  ;;  %v9760_v0 = vpop.f32.mrf.mxu1  ;;  %v10908_v41 = vrot.slane %v9410_v14, 4  ;;  %v6929_v16 = vld [vmem:[#allocation2 + $0x1a8] sm:$0xf0] }
 0x338   : > { %4293 = vmatpush.bf16.msra.mxu3 %v6346_v25  ;;  %v1434_v19 = vrot.slane %v1416_v27, 4  ;;  %v1935_v30 = vsel %vm344_vm5, %v1914_v57, %v1915_v36  ;;  %v5907_v25 = vld [vmem:[#allocation2 + $0x2ac] sm:$0xf0]  ;;  %v6526_v36 = vor.u32 %v7110_v61, %v6523_v38  ;;  %v7148_v27 = vld [vmem:[#allocation2 + $0x880] sm:$0xf0] }
 0x339   : > { %4344 = vmatpush.bf16.msrb.mxu2 %v6570_v21  ;;  %v1936_v2 = vsel %vm1917_vm12, %v9597_v32, %v1935_v30  ;;  %v10907_v21 = vrot.slane %v9299_v48, 4  ;;  %v6301_v61 = vld [vmem:[#allocation2 + $0x598] sm:$0xf] }
 0x33a   : > { %4266 = vmatpush.bf16.msra.mxu1 %v5598_v33  ;;  %v6218_v33 = vor.u32 %v7033_v40, %v6215_v8  ;;  %v1450_v57 = vsel %vm344_vm5, %v10908_v41, %v1434_v19  ;;  %v7022_v40 = vld [vmem:[#allocation2 + $0x494] sm:$0xf]  ;;  %1958 = vst.msk [vmem:[#allocation2 + $0x784] sm:$0xff] %vm9756_vm6, %v1936_v2  ;;  %v5863_v19 = vld [vmem:[#allocation2 + $0x254] sm:$0xf0] }
 0x33b   : > { %v6174_v55 = vor.u32 %v7022_v40, %v6171_v24 }
 0x33c   : > { %v6653_v8 = vld [vmem:[#allocation2 + $0x858] sm:$0xf]  ;;  %v7143_v30 = vld [vmem:[#allocation2 + $0x85c] sm:$0xf] }
 0x33d   : > { %4267 = vmatmul.bf16.vlgmr.msra.gmra.mxu1 %v8847_v35  ;;  %4345 = vmatpush.bf16.msrb.mxu2 %v6526_v36  ;;  %v7060_v38 = vld [vmem:[#allocation2 + $0x5c0] sm:$0xf0]  ;;  %v6658_v41 = vor.u32 %v7143_v30, %v6655_v28 }
 0x33e   : > { %4329 = vmatpush.bf16.msrb.mxu1 %v6262_v10  ;;  %v1460_v10 = vsel %vm344_vm5, %v10907_v21, %v1440_v43  ;;  %v1451_v43 = vsel %vm10910_vm10, %v9410_v14, %v1450_v57  ;;  %v6654_v21 = vor.u32 %v7148_v27, %v6653_v8  ;;  %v6302_v2 = vor.u32 %v7060_v38, %v6301_v61  ;;  %v9794_v14 = vpop.permute.xlu2 %1156  ;;  %v1334_v28 = vpop.permute.xlu1 %1333  ;;  %v6435_v8 = vld [vmem:[#allocation2 + $0x6cc] sm:$0xf0] }
 0x33f   : > { %v1461_v32 = vsel %vm10909_vm0, %v9299_v48, %v1460_v10  ;;  %1479 = vst.msk [vmem:[#allocation2 + $0x548] sm:$0xff] %vm9769_vm14, %v1451_v43  ;;  %v7099_v48 = vld [vmem:[#allocation2 + $0x6fc] sm:$0xf]  ;;  %v5910_v10 = vor.u32 %v6956_v1, %v5907_v25  ;;  %v10786_v36 = vrot.slane %v9794_v14, 4  ;;  %v2061_v27 = vpop.permute.xlu0 %2060  ;;  %v6945_v43 = vld [vmem:[#allocation2 + $0x22c] sm:$0xf]  ;;  %v9800_v61 = vpop.f32.mrf.mxu1 }
 0x340   : > { %1484 = vst.msk [vmem:[#allocation2 + $0x574] sm:$0xff] %vm9769_vm14, %v1461_v32  ;;  %4308 = vmatpush.bf16.msra.mxu0 %v6654_v21  ;;  %v6482_v57 = vor.u32 %v7099_v48, %v6479_v34  ;;  %v6127_v32 = vld [vmem:[#allocation2 + $0x464] sm:$0xf0]  ;;  %4294 = vmatpush.bf16.msra.mxu3 %v6302_v2  ;;  %v1352_v1 = vrot.slane %v1334_v28, 4  ;;  %v2073_v34 = vrot.slane %v2061_v27, 4  ;;  %v5866_v30 = vor.u32 %v6945_v43, %v5863_v19  ;;  %v9802_v38 = vpop.f32.mrf.mxu2 }
 0x341   : > { %1398 = vst.msk [vmem:[#allocation2 + $0x4f8] sm:$0xf] %vm1397_vm13, %v1334_v28  ;;  %v5913_v25 = vld [vmem:[#allocation2 + $0x288] sm:$0xf]  ;;  %v10911_v21 = vrot.slane %v8488_v49, 4  ;;  %v6130_v2 = vor.u32 %v7011_v5, %v6127_v32  ;;  %vm10912_vm14 = vcmask 130048  }
 0x342   : > { %4330 = vmatpush.bf16.msrb.mxu1 %v6218_v33  ;;  %v9796_v33 = vpop.f32.mrf.mxu3  ;;  %4346 = vmatpush.bf16.msrb.mxu2 %v6482_v57  ;;  %v5914_v40 = vor.u32 %v6962_v63, %v5913_v25  ;;  %v7088_v48 = vld [vmem:[#allocation2 + $0x6a4] sm:$0xf]  ;;  %vm10913_vm13 = vcmask 7168   ;;  %v10915_v49 = vrot.slane %v9445_v29, 4  ;;  %v6951_v63 = vld [vmem:[#allocation2 + $0x258] sm:$0xf0] }
 0x343   : > { %v1190_v24 = vsel %vm344_vm5, %v10911_v21, %v10786_v36  ;;  %6677 = vmatmul.msk.bf16.vlgmr.msra.gmra.mxu0 %vm10912_vm14, %v8891_v31  ;;  %4295 = vmatmul.bf16.vlgmr.msra.gmra.mxu3 %v8837_v46  ;;  %v6438_v5 = vor.u32 %v7088_v48, %v6435_v8  ;;  %v5819_v32 = vld [vmem:[#allocation2 + $0x1fc] sm:$0xf0]  ;;  %v7077_v43 = vld [vmem:[#allocation2 + $0x64c] sm:$0xf]  ;;  %v5869_v25 = vld [vmem:[#allocation2 + $0x230] sm:$0xf] }
 0x344   : > { %4315 = vmatpush.bf16.msrb.mxu0 %v5910_v10  ;;  %4364 = vmatpush.bf16.msrb.mxu3 %v6658_v41  ;;  %v9811_v41 = vpop.f32.mrf.mxu0  ;;  %v1191_v19 = vsel %vm10913_vm13, %v1190_v24, %v9794_v14  ;;  %v10914_v10 = vrot.slane %v9487_v54, 4  ;;  %v2093_v28 = vsel %vm344_vm5, %v10915_v49, %v2073_v34  ;;  %v6083_v34 = vld [vmem:[#allocation2 + $0x40c] sm:$0xf0]  ;;  %v5870_v8 = vor.u32 %v6951_v63, %v5869_v25  ;;  %v6391_v21 = vld [vmem:[#allocation2 + $0x674] sm:$0xf0] }
 0x345   : > { %1221 = vst [vmem:[#allocation2 + $0x3e8] sm:$0xff] %v1191_v19  ;;  %vm1793_vm0 = vcmask 867332   ;;  %v6923_v19 = vld [vmem:[#allocation2 + $0x17c] sm:$0xf]  ;;  %vm10923_vm10 = vcmask 736256   ;;  %vm10930_vm13 = vcmask 130048  }
 0x346   : > { %4331 = vmatpush.bf16.msrb.mxu1 %v6174_v55  ;;  %v1368_v57 = vsel %vm344_vm5, %v10914_v10, %v1352_v1  ;;  %v2094_v55 = vsel %vm2075_vm2, %v9445_v29, %v2093_v28  ;;  %v6934_v1 = vld [vmem:[#allocation2 + $0x1d4] sm:$0xf]  ;;  %4347 = vmatpush.bf16.msrb.mxu2 %v6438_v5  ;;  %v1745_v48 = vpop.permute.xlu2 %1744  ;;  %v6394_v29 = vor.u32 %v7077_v43, %v6391_v21  ;;  %v1982_v49 = vpop.permute.xlu1 %1981  ;;  %v6347_v5 = vld [vmem:[#allocation2 + $0x61c] sm:$0xf0]  ;;  %vm9832_vm2 = vmor %vm1793_vm0, %vm344_vm5  ;;  %vm10931_vm0 = vcmask 744448  }
 0x347   : > { %v1369_v27 = vsel %vm1360_vm8, %v9487_v54, %v1368_v57  ;;  %2116 = vst.msk [vmem:[#allocation2 + $0x834] sm:$0xff] %vm9662_vm15, %v2094_v55  ;;  %v5822_v24 = vor.u32 %v6934_v1, %v5819_v32  ;;  %v5775_v54 = vld [vmem:[#allocation2 + $0x1a4] sm:$0xf0]  ;;  %vm2030_vm8 = vcmask 588804   ;;  %v1757_v57 = vrot.slane %v1745_v48, 4  ;;  %v1970_v28 = vpop.permute.xlu0 %1969  ;;  %v9836_v1 = vpop.f32.mrf.mxu1 }
 0x348   : > { %4371 = vmatpush.bf16.msra.mxu3 %v5914_v40  ;;  %4316 = vmatpush.bf16.msrb.mxu0 %v5866_v30  ;;  %1396 = vst [vmem:[#allocation2 + $0x4f0] sm:$0xff] %v1369_v27  ;;  %v7000_v40 = vld [vmem:[#allocation2 + $0x3e4] sm:$0xf]  ;;  %v1994_v32 = vrot.slane %v1982_v49, 4  ;;  %v1988_v27 = vrot.slane %v1970_v28, 4  ;;  %v9838_v25 = vpop.f32.mrf.mxu2  ;;  %vm9845_vm15 = vmor %vm2030_vm8, %vm344_vm5  ;;  %v5778_v48 = vor.u32 %v6923_v19, %v5775_v54  ;;  %v10924_v49 = vrot.slane %v9524_v39, 4 }
 0x349   : > { %v6940_v30 = vld [vmem:[#allocation2 + $0x200] sm:$0xf0]  ;;  %v6086_v9 = vor.u32 %v7000_v40, %v6083_v34  ;;  %v5825_v55 = vld [vmem:[#allocation2 + $0x1d8] sm:$0xf]  ;;  %10918 = vst [vmem:[#allocation15_spill] sm:$0xff] %v9836_v1  ;;  %vm10933_vm8 = vcmask 1039360  }
 0x34a   : > { %4332 = vmatpush.bf16.msrb.mxu1 %v6130_v2  ;;  %v9828_v10 = vpop.f32.mrf.mxu3  ;;  %v7066_v2 = vld [vmem:[#allocation2 + $0x5f4] sm:$0xf]  ;;  %4348 = vmatpush.bf16.msrb.mxu2 %v6394_v29  ;;  %v6039_v43 = vld [vmem:[#allocation2 + $0x3b4] sm:$0xf0]  ;;  %10919 = vst [vmem:[#allocation16_spill] sm:$0xff] %v9838_v25  ;;  %v2014_v28 = vsel %vm344_vm5, %v10924_v49, %v1994_v32 }
 0x34b   : > { %v6989_v36 = vld [vmem:[#allocation2 + $0x38c] sm:$0xf]  ;;  %v6350_v25 = vor.u32 %v7066_v2, %v6347_v5  ;;  %v5731_v1 = vld [vmem:[#allocation2 + $0x14c] sm:$0xf0]  ;;  %v2015_v54 = vsel %vm1996_vm9, %v9524_v39, %v2014_v28  ;;  %v6303_v19 = vld [vmem:[#allocation2 + $0x5c4] sm:$0xf0] }
 0x34c   : > { %4372 = vmatpush.bf16.msra.mxu3 %v5870_v8  ;;  %4317 = vmatpush.bf16.msrb.mxu0 %v5822_v24  ;;  %v10920_v8 = vrot.slane %v9659_v11, 4  ;;  %v5826_v24 = vor.u32 %v6940_v30, %v5825_v55  ;;  %v9849_v29 = vpop.f32.mrf.mxu0  ;;  %v6042_v30 = vor.u32 %v6989_v36, %v6039_v43  ;;  %2037 = vst.msk [vmem:[#allocation2 + $0x7dc] sm:$0xff] %vm9845_vm15, %v2015_v54  ;;  %v5781_v2 = vld [vmem:[#allocation2 + $0x180] sm:$0xf]  ;;  %v7055_v39 = vld [vmem:[#allocation2 + $0x59c] sm:$0xf] }
 0x34d   : > { %v5995_v5 = vld [vmem:[#allocation2 + $0x35c] sm:$0xf0]  ;;  %v5782_v32 = vor.u32 %v6929_v16, %v5781_v2  ;;  %v5687_v55 = vld [vmem:[#allocation2 + $0xf4] sm:$0xf0]  ;;  %v6918_v36 = vld [vmem:[#allocation2 + $0x150] sm:$0xf0] }
 0x34e   : > { %v1777_v34 = vsel %vm344_vm5, %v10920_v8, %v1757_v57  ;;  %4333 = vmatpush.bf16.msrb.mxu1 %v6086_v9  ;;  %v10925_v57 = vrot.slane %v9528_v58, 4  ;;  %v6912_v9 = vld [vmem:[#allocation2 + $0x124] sm:$0xf]  ;;  %4349 = vmatpush.bf16.msrb.mxu2 %v6350_v25  ;;  %v5951_v49 = vld [vmem:[#allocation2 + $0x304] sm:$0xf0] }
 0x34f   : > { %v1778_v40 = vsel %vm10923_vm10, %v9659_v11, %v1777_v34  ;;  %v6978_v34 = vld [vmem:[#allocation2 + $0x334] sm:$0xf]  ;;  %v1264_v16 = vpop.permute.xlu0 %1263 }
 0x350   : > { %v2004_v8 = vsel %vm344_vm5, %v10925_v57, %v1988_v27  ;;  %1800 = vst.msk [vmem:[#allocation2 + $0x6d4] sm:$0xff] %vm9832_vm2, %v1778_v40  ;;  %4373 = vmatpush.bf16.msra.mxu3 %v5826_v24  ;;  %4318 = vmatpush.bf16.msrb.mxu0 %v5778_v48  ;;  %v5734_v27 = vor.u32 %v6912_v9, %v5731_v1  ;;  %v1654_v24 = vpop.permute.xlu2 %1653  ;;  %v1891_v48 = vpop.permute.xlu1 %1890  ;;  %v6901_v40 = vld [vmem:[#allocation2 + $0xcc] sm:$0xf]  ;;  %v5737_v57 = vld [vmem:[#allocation2 + $0x128] sm:$0xf]  ;;  %v1276_v54 = vrot.slane %v1264_v16, 4 }
 0x351   : > { %v2005_v11 = vsel %vm1996_vm9, %v9528_v58, %v2004_v8  ;;  %vm1714_vm9 = vcmask 875524   ;;  %v6306_v58 = vor.u32 %v7055_v39, %v6303_v19  ;;  %v5998_v25 = vor.u32 %v6978_v34, %v5995_v5  ;;  %v6967_v1 = vld [vmem:[#allocation2 + $0x2dc] sm:$0xf]  ;;  %1322 = vst.msk [vmem:[#allocation2 + $0x4cc] sm:$0xf] %vm1315_vm4, %v1264_v16  ;;  %v9878_v9 = vpop.f32.mrf.mxu1  ;;  %v9880_v2 = vpop.f32.mrf.mxu2 }
 0x352   : > { %2032 = vst.msk [vmem:[#allocation2 + $0x7b0] sm:$0xff] %vm9845_vm15, %v2005_v11  ;;  %4334 = vmatpush.bf16.msrb.mxu1 %v6042_v30  ;;  %v9869_v43 = vpop.f32.mrf.mxu3  ;;  %v1672_v21 = vrot.slane %v1654_v24, 4  ;;  %v1909_v28 = vrot.slane %v1891_v48, 4  ;;  %vm9873_vm14 = vmor %vm1714_vm9, %vm344_vm5  ;;  %v5738_v11 = vor.u32 %v6918_v36, %v5737_v57  ;;  %v5690_v30 = vor.u32 %v6901_v40, %v5687_v55  ;;  %v7138_v19 = vld [vmem:[#allocation2 + $0x830] sm:$0xf0] }
 0x353   : > { %4350 = vmatpush.bf16.msrb.mxu2 %v6306_v58  ;;  %v10928_v5 = vrot.slane %v9657_v51, 4  ;;  %v10929_v39 = vrot.slane %v9599_v17, 4  ;;  %v5954_v58 = vor.u32 %v6967_v1, %v5951_v49  ;;  %v6907_v34 = vld [vmem:[#allocation2 + $0xf8] sm:$0xf0]  ;;  %v5643_v24 = vld [vmem:[#allocation2 + $0x9c] sm:$0xf0]  ;;  %6678 = vmatmul.msk.bf16.vlgmr.msrb.gmra.mxu3 %vm10930_vm13, %v8891_v31 }
 0x354   : > { %4374 = vmatpush.bf16.msra.mxu3 %v5782_v32  ;;  %4319 = vmatpush.bf16.msrb.mxu0 %v5734_v27  ;;  %v9890_v55 = vpop.f32.mrf.mxu0  ;;  %v6617_v49 = vld [vmem:[#allocation2 + $0x808] sm:$0xf]  ;;  %v5693_v16 = vld [vmem:[#allocation2 + $0xd0] sm:$0xf]  ;;  %v6890_v57 = vld [vmem:[#allocation2 + $0x74] sm:$0xf] }
 0x355   : > { %v1688_v32 = vsel %vm344_vm5, %v10928_v5, %v1672_v21  ;;  %v1925_v27 = vsel %vm344_vm5, %v10929_v39, %v1909_v28  ;;  %v6618_v28 = vor.u32 %v7138_v19, %v6617_v49  ;;  %vm1872_vm15 = vcmask 605188   ;;  %v6265_v5 = vld [vmem:[#allocation2 + $0x548] sm:$0xf] }
 0x356   : > { %4335 = vmatpush.bf16.msrb.mxu1 %v5998_v25  ;;  %v1689_v36 = vsel %vm10931_vm0, %v9657_v51, %v1688_v32  ;;  %v1926_v48 = vsel %vm1917_vm12, %v9599_v17, %v1925_v27  ;;  %v10932_v25 = vrot.slane %v9443_v42, 4  ;;  %4351 = vmatmul.bf16.vlgmr.msrb.gmra.mxu2 %v8837_v46  ;;  %v5694_v17 = vor.u32 %v6907_v34, %v5693_v16  ;;  %v7050_v32 = vld [vmem:[#allocation2 + $0x570] sm:$0xf0]  ;;  %v5649_v34 = vld [vmem:[#allocation2 + $0x78] sm:$0xf]  ;;  %vm9918_vm10 = vmor %vm1872_vm15, %vm344_vm5 }
 0x357   : > { %1716 = vst.msk [vmem:[#allocation2 + $0x650] sm:$0xff] %vm9873_vm14, %v1689_v36  ;;  %v5646_v51 = vor.u32 %v6890_v57, %v5643_v24  ;;  %vm1635_vm12 = vcmask 883716   ;;  %v1812_v27 = vpop.permute.xlu0 %1811  ;;  %v6879_v24 = vld [vmem:[#allocation2 + $0x1c] sm:$0xf]  ;;  %vm10940_vm9 = vcmask 752640   ;;  %vm10941_vm13 = vcmask 474112  }
 0x358   : > { %v1296_v40 = vsel %vm344_vm5, %v10932_v25, %v1276_v54  ;;  %4375 = vmatpush.bf16.msra.mxu3 %v5738_v11  ;;  %4320 = vmatpush.bf16.msrb.mxu0 %v5690_v30  ;;  %1953 = vst.msk [vmem:[#allocation2 + $0x758] sm:$0xff] %vm9756_vm6, %v1926_v48  ;;  %v7127_v54 = vld [vmem:[#allocation2 + $0x7d8] sm:$0xf0]  ;;  %v6896_v11 = vld [vmem:[#allocation2 + $0xa0] sm:$0xf0]  ;;  %v1824_v19 = vpop.permute.xlu1 %1823  ;;  %vm9909_vm6 = vmor %vm1635_vm12, %vm344_vm5  ;;  %v1830_v25 = vrot.slane %v1812_v27, 4 }
 0x359   : > { %v1297_v21 = vsel %vm10933_vm8, %v9443_v42, %v1296_v40  ;;  %v6573_v1 = vld [vmem:[#allocation2 + $0x7b0] sm:$0xf]  ;;  %v5599_v30 = vld [vmem:[#allocation2 + $0x44] sm:$0xf0]  ;;  %v1587_v42 = vpop.permute.xlu2 %1586  ;;  %v1836_v7 = vrot.slane %v1824_v19, 4  ;;  %v5650_v40 = vor.u32 %v6896_v11, %v5649_v34  ;;  %vm10943_vm0 = vmmov %vm10941_vm13  ;;  %v10944_v57 = vrot.slane %v9794_v14, 4 }
 0x35a   : > { %4336 = vmatpush.bf16.msrb.mxu1 %v5954_v58  ;;  %1321 = vst [vmem:[#allocation2 + $0x4c4] sm:$0xff] %v1297_v21  ;;  %v1599_v39 = vrot.slane %v1587_v42, 4  ;;  %v6574_v58 = vor.u32 %v7127_v54, %v6573_v1  ;;  %v4046_v36 = vpop.f32.mrf.mxu3  ;;  %v5602_v49 = vor.u32 %v6879_v24, %v5599_v30  ;;  %v4060_v21 = vpop.f32.mrf.mxu2  ;;  %v6266_v1 = vor.u32 %v7050_v32, %v6265_v5  ;;  %v5605_v54 = vld [vmem:[#allocation2 + $0x20] sm:$0xf]  ;;  %v6885_v11 = vld [vmem:[#allocation2 + $0x48] sm:$0xf0] }
 0x35b   : > { %v4061_v30 = vadd.f32 %v4060_v21, %v4046_v36  ;;  %v7045_v34 = vld [vmem:[#allocation2 + $0x54c] sm:$0xf]  ;;  %v6267_v24 = vld [vmem:[#allocation2 + $0x574] sm:$0xf0]  ;;  %v5606_v36 = vor.u32 %v6885_v11, %v5605_v54  ;;  %v6223_v11 = vld [vmem:[#allocation2 + $0x51c] sm:$0xf0] }
 0x35c   : > { %4376 = vmatpush.bf16.msra.mxu3 %v5694_v17  ;;  %4321 = vmatpush.bf16.msrb.mxu0 %v5646_v51  ;;  %v10939_v17 = vrot.slane %v9630_v62, 4  ;;  %v4074_v5 = vpop.f32.mrf.mxu0  ;;  %v6270_v21 = vor.u32 %v7045_v34, %v6267_v24  ;;  %vm10945_vm8 = vcmask 7168   ;;  %vm10946_vm12 = vcmask 125952  }
 0x35d   : > { %4337 = vmatmul.bf16.vlgmr.msrb.gmra.mxu1 %v9016_v18  ;;  %vm10948_vm15 = vcmask 736256  }
 0x35e   : > { %4399 = vmatpush.bf16.msra.mxu1 %v6618_v28  ;;  %v10936_v28 = vrot.slane %v9690_v56, 4  ;;  %v1856_v51 = vsel %vm344_vm5, %v10939_v17, %v1836_v7  ;;  %v6221_v7 = vld [vmem:[#allocation2 + $0x4f0] sm:$0xf] }
 0x35f   : > { %v1857_v19 = vsel %vm10941_vm13, %v9630_v62, %v1856_v51  ;;  %v6529_v32 = vld [vmem:[#allocation2 + $0x758] sm:$0xf]  ;;  %v7116_v62 = vld [vmem:[#allocation2 + $0x780] sm:$0xf0]  ;;  %v9943_v54 = vpop.permute.xlu0 %1168  ;;  %vm10954_vm13 = vcmask 441344  }
 0x360   : > { %v1619_v16 = vsel %vm344_vm5, %v10936_v28, %v1599_v39  ;;  %v10942_v39 = vrot.slane %v9485_v12, 4  ;;  %4377 = vmatpush.bf16.msra.mxu3 %v5650_v40  ;;  %4322 = vmatpush.bf16.msrb.mxu0 %v5602_v49  ;;  %1879 = vst.msk [vmem:[#allocation2 + $0x72c] sm:$0xff] %vm9918_vm10, %v1857_v19  ;;  %v7039_v40 = vld [vmem:[#allocation2 + $0x518] sm:$0xf0]  ;;  %v4075_v49 = vadd.f32 %v4074_v5, %v4061_v30  ;;  %v1181_v19 = vrot.slane %v9943_v54, 4 }
 0x361   : > { %v1620_v42 = vsel %vm10940_vm9, %v9690_v56, %v1619_v16  ;;  %v6222_v28 = vor.u32 %v7039_v40, %v6221_v7  ;;  %v7034_v16 = vld [vmem:[#allocation2 + $0x4f4] sm:$0xf]  ;;  %v1159_v17 = vpop.permute.xlu2 %1158  ;;  %v7028_v51 = vld [vmem:[#allocation2 + $0x4c0] sm:$0xf0]  ;;  %v7017_v5 = vld [vmem:[#allocation2 + $0x468] sm:$0xf0] }
 0x362   : > { %4400 = vmatpush.bf16.msra.mxu1 %v6574_v58  ;;  %v1846_v27 = vsel %vm344_vm5, %v10942_v39, %v1830_v25  ;;  %v4088_v58 = vpop.f32.mrf.mxu1  ;;  %1642 = vst.msk [vmem:[#allocation2 + $0x624] sm:$0xff] %vm9909_vm6, %v1620_v42  ;;  %v6530_v25 = vor.u32 %v7116_v62, %v6529_v32  ;;  %v1192_v30 = vsel %vm10945_vm8, %v10944_v57, %v1159_v17  ;;  %v6177_v39 = vld [vmem:[#allocation2 + $0x498] sm:$0xf]  ;;  %v10949_v32 = vrot.slane %v9628_v37, 4 }
 0x363   : > { %v1847_v56 = vsel %vm10943_vm0, %v9485_v12, %v1846_v27  ;;  %4323 = vmatmul.bf16.vlgmr.msrb.gmra.mxu0 %v8847_v35  ;;  %v1733_v12 = vpop.permute.xlu1 %1732  ;;  %1222 = vst.msk [vmem:[#allocation2 + $0x3f0] sm:$0xf] %vm10946_vm12, %v1192_v30  ;;  %v10947_v27 = vrot.slane %v9522_v4, 4  ;;  %v6226_v24 = vor.u32 %v7034_v16, %v6223_v11  ;;  %v6178_v7 = vor.u32 %v7028_v51, %v6177_v39  ;;  %vm10956_vm0 = vmmov %vm10954_vm13 }
 0x364   : > { %4385 = vmatpush.bf16.msra.mxu0 %v6266_v1  ;;  %1874 = vst.msk [vmem:[#allocation2 + $0x700] sm:$0xff] %vm9918_vm10, %v1847_v56  ;;  %4378 = vmatpush.bf16.msra.mxu3 %v5606_v36  ;;  %v9941_v1 = vadd.f32 %v4088_v58, %v4075_v49  ;;  %v1751_v42 = vrot.slane %v1733_v12, 4  ;;  %v6133_v58 = vld [vmem:[#allocation2 + $0x440] sm:$0xf]  ;;  %v9953_v56 = vpop.f32.mrf.mxu3  ;;  %v1200_v62 = vsel %vm344_vm5, %v10949_v32, %v1181_v19  ;;  %v7023_v36 = vld [vmem:[#allocation2 + $0x49c] sm:$0xf]  ;;  %vm10950_vm10 = vmmov %vm10945_vm8  ;;  %v9969_v37 = vpop.f32.mrf.mxu0 }
 0x365   : > { %v1201_v40 = vsel %vm10950_vm10, %v1200_v62, %v9943_v54  ;;  %v6135_v12 = vld [vmem:[#allocation2 + $0x46c] sm:$0xf0]  ;;  %vm2188_vm9 = vcmask 572420   ;;  %vm10958_vm12 = vcmask 752640   ;;  %vm1556_vm10 = vcmask 891908  }
 0x366   : > { %4401 = vmatpush.bf16.msra.mxu1 %v6530_v25  ;;  %v1767_v34 = vsel %vm344_vm5, %v10947_v27, %v1751_v42  ;;  %v6179_v25 = vld [vmem:[#allocation2 + $0x4c4] sm:$0xf0]  ;;  %1227 = vst [vmem:[#allocation2 + $0x414] sm:$0xff] %v1201_v40  ;;  %v9971_v42 = vpop.f32.mrf.mxu2 }
 0x367   : > { %4379 = vmatmul.bf16.vlgmr.msra.gmra.mxu3 %v8847_v35  ;;  %v1768_v14 = vsel %vm10948_vm15, %v9522_v4, %v1767_v34  ;;  %v7105_v49 = vld [vmem:[#allocation2 + $0x728] sm:$0xf0]  ;;  %v6182_v51 = vor.u32 %v7023_v36, %v6179_v25  ;;  %v2128_v57 = vpop.permute.xlu0 %2127  ;;  %v10953_v34 = vrot.slane %v9625_v20, 4  ;;  %v7094_v36 = vld [vmem:[#allocation2 + $0x6d0] sm:$0xf0]  ;;  %vm10960_vm15 = vcmask 744448  }
 0x368   : > { %4441 = vmatpush.bf16.msrb.mxu3 %v6270_v21  ;;  %4386 = vmatpush.bf16.msra.mxu0 %v6222_v28  ;;  %1795 = vst.msk [vmem:[#allocation2 + $0x6a8] sm:$0xff] %vm9832_vm2, %v1768_v14  ;;  %v7012_v21 = vld [vmem:[#allocation2 + $0x444] sm:$0xf]  ;;  %v6134_v28 = vor.u32 %v7017_v5, %v6133_v58  ;;  %vm9974_vm2 = vmor %vm2188_vm9, %vm344_vm5  ;;  %v2146_v27 = vrot.slane %v2128_v57, 4  ;;  %v10955_v14 = vrot.slane %v9726_v6, 4 }
 0x369   : > { %v6138_v30 = vor.u32 %v7012_v21, %v6135_v12  ;;  %v7001_v25 = vld [vmem:[#allocation2 + $0x3ec] sm:$0xf]  ;;  %v6047_v57 = vld [vmem:[#allocation2 + $0x3bc] sm:$0xf0]  ;;  %vm10038_vm9 = vmor %vm1556_vm10, %vm344_vm5  ;;  %vm10975_vm10 = vcmask 7168  }
 0x36a   : > { %v9967_v16 = vpop.f32.mrf.mxu1  ;;  %v2162_v32 = vsel %vm344_vm5, %v10955_v14, %v2146_v27  ;;  %v6990_v14 = vld [vmem:[#allocation2 + $0x394] sm:$0xf] }
 0x36b   : > { %v6485_v4 = vld [vmem:[#allocation2 + $0x700] sm:$0xf]  ;;  %v2140_v63 = vpop.permute.xlu1 %2139  ;;  %v2163_v40 = vsel %vm10956_vm0, %v9726_v6, %v2162_v32  ;;  %v10957_v32 = vrot.slane %v9692_v59, 4  ;;  %v7100_v54 = vld [vmem:[#allocation2 + $0x704] sm:$0xf] }
 0x36c   : > { %4442 = vmatpush.bf16.msrb.mxu3 %v6226_v24  ;;  %4387 = vmatpush.bf16.msra.mxu0 %v6178_v7  ;;  %v6486_v17 = vor.u32 %v7105_v49, %v6485_v4  ;;  %v2152_v11 = vrot.slane %v2140_v63, 4  ;;  %v6089_v7 = vld [vmem:[#allocation2 + $0x3e8] sm:$0xf]  ;;  %v4102_v58 = vpop.f32.mrf.mxu3  ;;  %2190 = vst.msk [vmem:[#allocation2 + $0x860] sm:$0xff] %vm9974_vm2, %v2163_v40  ;;  %v9992_v12 = vpop.f32.mrf.mxu0  ;;  %v4539_v6 = vld [vmem:[%s10689_s5] sm:$0xff] }
 0x36d   : > { %v7006_v49 = vld [vmem:[#allocation2 + $0x410] sm:$0xf0]  ;;  %v6091_v4 = vld [vmem:[#allocation2 + $0x414] sm:$0xf0]  ;;  %vm4541_vm8 = vcmp.gt.f32.partialorder %v4539_v6, 0.0 }
 0x36e   : > { %4402 = vmatpush.bf16.msra.mxu1 %v6486_v17  ;;  %v2172_v24 = vsel %vm344_vm5, %v10953_v34, %v2152_v11  ;;  %v4130_v27 = vpop.f32.mrf.mxu2  ;;  %v6045_v34 = vld [vmem:[#allocation2 + $0x390] sm:$0xf]  ;;  %v5915_v40 = vld [vmem:[#allocation2 + $0x2b4] sm:$0xf0] }
 0x36f   : > { %v2173_v5 = vsel %vm10954_vm13, %v9625_v20, %v2172_v24  ;;  %v6441_v62 = vld [vmem:[#allocation2 + $0x6a8] sm:$0xf]  ;;  %v6090_v20 = vor.u32 %v7006_v49, %v6089_v7  ;;  %v1666_v39 = vpop.permute.xlu0 %1665  ;;  %vm10966_vm13 = vcmask 760832  }
 0x370   : > { %4443 = vmatpush.bf16.msrb.mxu3 %v6182_v51  ;;  %4388 = vmatpush.bf16.msra.mxu0 %v6134_v28  ;;  %2195 = vst.msk [vmem:[#allocation2 + $0x88c] sm:$0xff] %vm9974_vm2, %v2173_v5  ;;  %v6442_v21 = vor.u32 %v7094_v36, %v6441_v62  ;;  %v6094_v28 = vor.u32 %v7001_v25, %v6091_v4  ;;  %v6995_v51 = vld [vmem:[#allocation2 + $0x3b8] sm:$0xf0]  ;;  %v1678_v7 = vrot.slane %v1666_v39, 4  ;;  %v6984_v36 = vld [vmem:[#allocation2 + $0x360] sm:$0xf0]  ;;  %vm10968_vm0 = vmmov %vm10966_vm13 }
 0x371   : > { %v6046_v5 = vor.u32 %v6995_v51, %v6045_v34  ;;  %v6050_v62 = vor.u32 %v6990_v14, %v6047_v57  ;;  %v6957_v25 = vld [vmem:[#allocation2 + $0x28c] sm:$0xf]  ;;  %v6003_v49 = vld [vmem:[#allocation2 + $0x364] sm:$0xf0]  ;;  %vm10965_vm2 = vcmask 130048  }
 0x372   : > { %v4116_v17 = vpop.f32.mrf.mxu1  ;;  %4403 = vmatpush.bf16.msra.mxu1 %v6442_v21  ;;  %v10002_v21 = vld [vmem:[#allocation2 + $0x25c] sm:$0xf0] }
 0x373   : > { %v4117_v63 = vadd.f32 %v4116_v17, %v4102_v58  ;;  %v1575_v11 = vpop.permute.xlu1 %1574  ;;  %v6001_v17 = vld [vmem:[#allocation2 + $0x338] sm:$0xf]  ;;  %v6661_v57 = vld [vmem:[#allocation2 + $0x860] sm:$0xf] }
 0x374   : > { %4444 = vmatpush.bf16.msrb.mxu3 %v6138_v30  ;;  %4389 = vmatpush.bf16.msra.mxu0 %v6090_v20  ;;  %v1593_v30 = vrot.slane %v1575_v11, 4  ;;  %v10959_v20 = vrot.slane %v9558_v22, 4  ;;  %v6002_v39 = vor.u32 %v6984_v36, %v6001_v17  ;;  %v10021_v14 = vpop.f32.mrf.mxu0 }
 0x375   : > { %v9997_v24 = vadd.f32 %v4130_v27, %v4117_v63  ;;  %v4059_v63 = vadd.f32 %v9880_v2, %v9869_v43  ;;  %v6979_v27 = vld [vmem:[#allocation2 + $0x33c] sm:$0xf]  ;;  %v5918_v43 = vor.u32 %v6957_v25, %v5915_v40  ;;  %v5957_v25 = vld [vmem:[#allocation2 + $0x2e0] sm:$0xf] }
 0x376   : > { %v1609_v58 = vsel %vm344_vm5, %v10957_v32, %v1593_v30  ;;  %v10017_v30 = vpop.f32.mrf.mxu3  ;;  %v6006_v2 = vor.u32 %v6979_v27, %v6003_v49  ;;  %v5959_v49 = vld [vmem:[#allocation2 + $0x30c] sm:$0xf0]  ;;  %v10964_v27 = vrot.slane %v9728_v45, 4 }
 0x377   : > { %v1610_v4 = vsel %vm10958_vm12, %v9692_v59, %v1609_v58  ;;  %v7149_v51 = vld [vmem:[#allocation2 + $0x888] sm:$0xf0]  ;;  %v4115_v59 = vadd.f32 %v9967_v16, %v9953_v56  ;;  %v3947_v56 = vadd.f32 %v9721_v23, %v9719_v60  ;;  %v4003_v16 = vadd.f32 %v9811_v41, %v9796_v33  ;;  %v6625_v58 = vld [vmem:[#allocation2 + $0x810] sm:$0xf]  ;;  %v6619_v23 = vld [vmem:[#allocation2 + $0x834] sm:$0xf0] }
 0x378   : > { %4445 = vmatpush.bf16.msrb.mxu3 %v6094_v28  ;;  %v1698_v28 = vsel %vm344_vm5, %v10959_v20, %v1678_v7  ;;  %4390 = vmatpush.bf16.msra.mxu0 %v6046_v5  ;;  %1637 = vst.msk [vmem:[#allocation2 + $0x5f8] sm:$0xff] %vm9909_vm6, %v1610_v4  ;;  %v6662_v34 = vor.u32 %v7149_v51, %v6661_v57  ;;  %v6973_v7 = vld [vmem:[#allocation2 + $0x308] sm:$0xf0]  ;;  %v6946_v5 = vld [vmem:[#allocation2 + $0x234] sm:$0xf]  ;;  %v1496_v20 = vpop.permute.xlu0 %1495 }
 0x379   : > { %v1699_v11 = vsel %vm10960_vm15, %v9558_v22, %v1698_v28  ;;  %v10961_v22 = vmov 0   ;;  %v5874_v40 = vor.u32 %v6946_v5, %v10002_v21  ;;  %v4073_v6 = vadd.f32 %v9890_v55, %v4059_v63  ;;  %v6968_v55 = vld [vmem:[#allocation2 + $0x2e4] sm:$0xf]  ;;  %v5827_v51 = vld [vmem:[#allocation2 + $0x204] sm:$0xf0] }
 0x37a   : > { %1721 = vst.msk [vmem:[#allocation2 + $0x67c] sm:$0xff] %vm9873_vm14, %v1699_v11  ;;  %v10025_v32 = vsel %vm4541_vm8, 1, %v10961_v22  ;;  %4420 = vmatpush.bf16.msra.mxu2 %v6662_v34  ;;  %v5958_v60 = vor.u32 %v6973_v7, %v5957_v25  ;;  %v4129_v33 = vadd.f32 %v9971_v42, %v4115_v59  ;;  %v1514_v21 = vrot.slane %v1496_v20, 4  ;;  %v10042_v63 = vld [vmem:[#allocation2 + $0x1ac] sm:$0xf0] }
 0x37b   : > { %v1508_v36 = vpop.permute.xlu1 %1507  ;;  %v4573_v41 = vperm.slane %v10025_v32, 0  ;;  %v4574_v28 = vperm.slane %v10025_v32, 1  ;;  %v3961_v57 = vadd.f32 %v9723_v3, %v3947_v56  ;;  %v4017_v42 = vadd.f32 %v9800_v61, %v4003_v16  ;;  %v7133_v34 = vld [vmem:[#allocation2 + $0x80c] sm:$0xf]  ;;  %v7122_v16 = vld [vmem:[#allocation2 + $0x7b4] sm:$0xf] }
 0x37c   : > { %4446 = vmatpush.bf16.msrb.mxu3 %v6050_v62  ;;  %v7139_v62 = vld [vmem:[#allocation2 + $0x838] sm:$0xf0]  ;;  %4391 = vmatpush.bf16.msra.mxu0 %v6002_v39  ;;  %v1520_v4 = vrot.slane %v1508_v36, 4  ;;  %v5962_v39 = vor.u32 %v6968_v55, %v5959_v49  ;;  %v10967_v5 = vrot.slane %v9594_v47, 4  ;;  %v6622_v61 = vor.u32 %v7133_v34, %v6619_v23  ;;  %v6397_v25 = vld [vmem:[#allocation2 + $0x650] sm:$0xf]  ;;  %v10072_v23 = vpop.f32.mrf.mxu2 }
 0x37d   : > { %v6626_v11 = vor.u32 %v7139_v62, %v6625_v58  ;;  %6679 = vmatmul.msk.bf16.vlgmr.msra.gmra.mxu2 %vm10965_vm2, %v8891_v31  ;;  %v4575_v56 = vperm.slane %v10025_v32, 2  ;;  %v6575_v58 = vld [vmem:[#allocation2 + $0x7dc] sm:$0xf0]  ;;  %v10057_v62 = vld [vmem:[#allocation2 + $0x184] sm:$0xf]  ;;  %v4087_v36 = vadd.f32 %v9878_v9, %v4073_v6  ;;  %vm10065_vm8 = vcmp.eq.s32.totalorder %v4573_v41, 1 }
 0x37e   : > { %4427 = vmatpush.bf16.msrb.mxu2 %v5918_v43  ;;  %v1540_v59 = vsel %vm344_vm5, %v10964_v27, %v1520_v4  ;;  %v6581_v43 = vld [vmem:[#allocation2 + $0x7b8] sm:$0xf]  ;;  %v1530_v3 = vsel %vm344_vm5, %v10967_v5, %v1514_v21  ;;  %v4143_v4 = vadd.f32 %v9969_v37, %v4129_v33  ;;  %v6935_v6 = vld [vmem:[#allocation2 + $0x1dc] sm:$0xf]  ;;  %v4031_v37 = vadd.f32 %v9802_v38, %v4017_v42  ;;  %v4158_v55 = vpop.f32.mrf.mxu3  ;;  %v4172_v27 = vpop.f32.mrf.mxu0  ;;  %v7106_v20 = vld [vmem:[#allocation2 + $0x730] sm:$0xf0] }
 0x37f   : > { %v1541_v7 = vsel %vm10966_vm13, %v9728_v45, %v1540_v59  ;;  %v1531_v45 = vsel %vm10968_vm0, %v9594_v47, %v1530_v3  ;;  %v5830_v33 = vor.u32 %v6935_v6, %v5827_v51  ;;  %v6353_v41 = vld [vmem:[#allocation2 + $0x5f8] sm:$0xf]  ;;  %v5786_v21 = vor.u32 %v10057_v62, %v10042_v63  ;;  %v6537_v59 = vld [vmem:[#allocation2 + $0x760] sm:$0xf]  ;;  %v7144_v6 = vld [vmem:[#allocation2 + $0x864] sm:$0xf] }
 0x380   : > { %4447 = vmatpush.bf16.msrb.mxu3 %v6006_v2  ;;  %v7128_v2 = vld [vmem:[#allocation2 + $0x7e0] sm:$0xf0]  ;;  %4392 = vmatpush.bf16.msra.mxu0 %v5958_v60  ;;  %1563 = vst.msk [vmem:[#allocation2 + $0x5cc] sm:$0xff] %vm10038_vm9, %v1541_v7  ;;  %v4576_v60 = vperm.slane %v10025_v32, 3  ;;  %vm10079_vm12 = vcmp.eq.s32.totalorder %v4574_v28, 1  ;;  %vm10085_vm15 = vcmp.eq.s32.totalorder %v4575_v56, 1  ;;  %v6578_v38 = vor.u32 %v7122_v16, %v6575_v58  ;;  %v1171_v28 = vpop.permute.xlu0 %1170 }
 0x381   : > { %v7083_v49 = vld [vmem:[#allocation2 + $0x678] sm:$0xf0]  ;;  %1558 = vst.msk [vmem:[#allocation2 + $0x5a0] sm:$0xff] %vm10038_vm9, %v1531_v45  ;;  %v6582_v47 = vor.u32 %v7128_v2, %v6581_v43  ;;  %v10090_v51 = vadd.f32 %v4172_v27, %v4158_v55  ;;  %v7072_v2 = vld [vmem:[#allocation2 + $0x620] sm:$0xf0]  ;;  %v1202_v5 = vsel %vm10975_vm10, %v1181_v19, %v1171_v28  ;;  %vm10978_vm13 = vcmask 125952  }
 0x382   : > { %4428 = vmatpush.bf16.msrb.mxu2 %v5874_v40  ;;  %v6398_v9 = vor.u32 %v7083_v49, %v6397_v25  ;;  %v3975_v40 = vadd.f32 %v9717_v13, %v3961_v57  ;;  %v7111_v7 = vld [vmem:[#allocation2 + $0x75c] sm:$0xf]  ;;  %vm10099_vm2 = vcmp.eq.s32.totalorder %v4576_v60, 1  ;;  %v6531_v56 = vld [vmem:[#allocation2 + $0x784] sm:$0xf0]  ;;  %v10118_v28 = vadd.f32 %v9992_v12, %v9997_v24 }
 0x383   : > { %4393 = vmatmul.bf16.vlgmr.msra.gmra.mxu0 %v9016_v18  ;;  %v5739_v16 = vld [vmem:[#allocation2 + $0x154] sm:$0xf0]  ;;  %v6663_v58 = vld [vmem:[#allocation2 + $0x88c] sm:$0xf0]  ;;  %1228 = vst.msk [vmem:[#allocation2 + $0x41c] sm:$0xf] %vm10978_vm13, %v1202_v5  ;;  %v6534_v19 = vor.u32 %v7111_v7, %v6531_v56 }
 0x384   : > { %4448 = vmatpush.bf16.msrb.mxu3 %v5962_v39  ;;  %4455 = vmatpush.bf16.msrb.mxu0 %v6622_v61  ;;  %v7117_v39 = vld [vmem:[#allocation2 + $0x788] sm:$0xf0]  ;;  %v6354_v61 = vor.u32 %v7072_v2, %v6353_v41  ;;  %v6493_v60 = vld [vmem:[#allocation2 + $0x708] sm:$0xf]  ;;  %v6666_v34 = vor.u32 %v7144_v6, %v6663_v58  ;;  %v5921_v2 = vld [vmem:[#allocation2 + $0x290] sm:$0xf]  ;;  %v10124_v5 = vpop.f32.mrf.mxu2 }
 0x385   : > { %4404 = vmatpush.bf16.msra.mxu1 %v6398_v9  ;;  %v6538_v62 = vor.u32 %v7117_v39, %v6537_v59  ;;  %v6913_v39 = vld [vmem:[#allocation2 + $0x12c] sm:$0xf]  ;;  %v6494_v13 = vor.u32 %v7106_v20, %v6493_v60  ;;  %v6902_v24 = vld [vmem:[#allocation2 + $0xd4] sm:$0xf]  ;;  %v6952_v56 = vld [vmem:[#allocation2 + $0x260] sm:$0xf0] }
 0x386   : > { %4429 = vmatpush.bf16.msrb.mxu2 %v5830_v33  ;;  %v7089_v7 = vld [vmem:[#allocation2 + $0x6ac] sm:$0xf]  ;;  %v7078_v60 = vld [vmem:[#allocation2 + $0x654] sm:$0xf]  ;;  %v7067_v20 = vld [vmem:[#allocation2 + $0x5fc] sm:$0xf] }
 0x387   : > { %4449 = vmatmul.bf16.vlgmr.msrb.gmra.mxu3 %v9016_v18  ;;  %v7061_v9 = vld [vmem:[#allocation2 + $0x5c8] sm:$0xf0]  ;;  %vm10979_vm0 = vcmask 130048   ;;  %vm10981_vm13 = vcmask 744448  }
 0x388   : > { %4511 = vmatpush.bf16.msra.mxu3 %v6626_v11  ;;  %v10083_v11 = vpop.permute.xlu1 %4546  ;;  %4456 = vmatpush.bf16.msrb.mxu0 %v6578_v38  ;;  %v6309_v41 = vld [vmem:[#allocation2 + $0x5a0] sm:$0xf]  ;;  %v5742_v38 = vor.u32 %v6913_v39, %v5739_v16  ;;  %v7073_v39 = vld [vmem:[#allocation2 + $0x628] sm:$0xf0] }
 0x389   : > { %v4549_v63 = vadd.f32 %v10083_v11, %v3975_v40  ;;  %v4550_v57 = vadd.f32 %v10083_v11, %v4031_v37  ;;  %v4551_v42 = vadd.f32 %v10083_v11, %v4087_v36  ;;  %v4552_v43 = vadd.f32 %v10083_v11, %v4143_v4  ;;  %v6487_v4 = vld [vmem:[#allocation2 + $0x72c] sm:$0xf0]  ;;  %4405 = vmatpush.bf16.msra.mxu1 %v6354_v61  ;;  %v6443_v61 = vld [vmem:[#allocation2 + $0x6d4] sm:$0xf0] }
 0x38a   : > { %4430 = vmatpush.bf16.msrb.mxu2 %v5786_v21  ;;  %v6310_v59 = vor.u32 %v7061_v9, %v6309_v41  ;;  %v6490_v21 = vor.u32 %v7100_v54, %v6487_v4  ;;  %v6446_v58 = vor.u32 %v7089_v7, %v6443_v61  ;;  %v6891_v4 = vld [vmem:[#allocation2 + $0x7c] sm:$0xf]  ;;  %v6941_v9 = vld [vmem:[#allocation2 + $0x208] sm:$0xf0]  ;;  %v5607_v41 = vld [vmem:[#allocation2 + $0x4c] sm:$0xf0] }
 0x38b   : > { %v4560_v36 = vmax.f32 %v4549_v63, 0.0  ;;  %v4561_v45 = vmax.f32 %v4550_v57, 0.0  ;;  %v4562_v25 = vmax.f32 %v4551_v42, 0.0  ;;  %v4563_v49 = vmax.f32 %v4552_v43, 0.0  ;;  %v6963_v63 = vld [vmem:[#allocation2 + $0x2b8] sm:$0xf0] }
 0x38c   : > { %4512 = vmatpush.bf16.msra.mxu3 %v6582_v47  ;;  %4457 = vmatpush.bf16.msrb.mxu0 %v6534_v19  ;;  %v5695_v57 = vld [vmem:[#allocation2 + $0xfc] sm:$0xf0]  ;;  %v6449_v42 = vld [vmem:[#allocation2 + $0x6b0] sm:$0xf]  ;;  %v7095_v43 = vld [vmem:[#allocation2 + $0x6d8] sm:$0xf0]  ;;  %v5922_v12 = vor.u32 %v6963_v63, %v5921_v2 }
 0x38d   : > { %v4595_v40 = vsel %vm10065_vm8, %v4560_v36, 0.0  ;;  %v4596_v47 = vsel %vm10079_vm12, %v4561_v45, 0.0  ;;  %v4597_v37 = vsel %vm10085_vm15, %v4562_v25, 0.0  ;;  %v4598_v33 = vsel %vm10099_vm2, %v4563_v49, 0.0  ;;  %4406 = vmatpush.bf16.msra.mxu1 %v6310_v59  ;;  %v6405_v36 = vld [vmem:[#allocation2 + $0x658] sm:$0xf]  ;;  %vm10980_vm15 = vmmov %vm10979_vm0 }
 0x38e   : > { %v10112_v55 = vpack.c.bf16 %v4596_v47, %v4595_v40  ;;  %v10114_v27 = vpack.c.bf16 %v4598_v33, %v4597_v37  ;;  %4431 = vmatpush.bf16.msrb.mxu2 %v5742_v38  ;;  %v5698_v3 = vor.u32 %v6902_v24, %v5695_v57  ;;  %v6450_v16 = vor.u32 %v7095_v43, %v6449_v42  ;;  %v7084_v45 = vld [vmem:[#allocation2 + $0x680] sm:$0xf0]  ;;  %v5877_v25 = vld [vmem:[#allocation2 + $0x238] sm:$0xf]  ;;  %v6399_v49 = vld [vmem:[#allocation2 + $0x67c] sm:$0xf0] }
 0x38f   : > { %v5878_v54 = vor.u32 %v6952_v56, %v5877_v25  ;;  %v5833_v19 = vld [vmem:[#allocation2 + $0x1e0] sm:$0xf]  ;;  %v6273_v40 = vld [vmem:[#allocation2 + $0x550] sm:$0xf]  ;;  %v7051_v47 = vld [vmem:[#allocation2 + $0x578] sm:$0xf0]  ;;  %v6406_v37 = vor.u32 %v7084_v45, %v6405_v36  ;;  %v6402_v33 = vor.u32 %v7078_v60, %v6399_v49 }
 0x390   : > { %4513 = vmatpush.bf16.msra.mxu3 %v6538_v62  ;;  %4765 = vst [vmem:[#allocation3 + $0xb0] sm:$0xff] %v10112_v55  ;;  %4887 = vrot.lane.b32.xlu1 %v10112_v55, %s7458_s13  ;;  %v5651_v62 = vld [vmem:[#allocation2 + $0xa4] sm:$0xf0]  ;;  %v6361_v59 = vld [vmem:[#allocation2 + $0x600] sm:$0xf]  ;;  %v5834_v38 = vor.u32 %v6941_v9, %v5833_v19  ;;  %v6274_v63 = vor.u32 %v7051_v47, %v6273_v40  ;;  %v4226_v2 = vpop.f32.mrf.mxu3 }
 0x391   : > { %4766 = vst [vmem:[#allocation3 + $0xb8] sm:$0xff] %v10114_v27  ;;  %4476 = vmatpush.bf16.msrb.mxu1 %v6666_v34  ;;  %4458 = vmatpush.bf16.msrb.mxu0 %v6490_v21  ;;  %v5654_v6 = vor.u32 %v6891_v4, %v5651_v62  ;;  %v6880_v34 = vld [vmem:[#allocation2 + $0x24] sm:$0xf]  ;;  %v5789_v21 = vld [vmem:[#allocation2 + $0x188] sm:$0xf]  ;;  %v6362_v7 = vor.u32 %v7073_v39, %v6361_v59 }
 0x392   : > { %4889 = vrot.lane.b32.xlu2 %v10114_v27, %s7458_s13  ;;  %4407 = vmatmul.bf16.vlgmr.msra.gmra.mxu1 %v8837_v46  ;;  %v5610_v57 = vor.u32 %v6880_v34, %v5607_v41  ;;  %v6930_v42 = vld [vmem:[#allocation2 + $0x1b0] sm:$0xf0]  ;;  %v4212_v43 = vpop.f32.mrf.mxu2  ;;  %v7040_v24 = vld [vmem:[#allocation2 + $0x520] sm:$0xf0]  ;;  %v6919_v36 = vld [vmem:[#allocation2 + $0x158] sm:$0xf0]  ;;  %v4171_v4 = vadd.f32 %v10021_v14, %v10017_v30 }
 0x393   : > { %4432 = vmatpush.bf16.msrb.mxu2 %v5698_v3  ;;  %v6317_v3 = vld [vmem:[#allocation2 + $0x5a8] sm:$0xf]  ;;  %v7062_v61 = vld [vmem:[#allocation2 + $0x5d0] sm:$0xf0]  ;;  %v7056_v56 = vld [vmem:[#allocation2 + $0x5a4] sm:$0xf]  ;;  %v5790_v62 = vor.u32 %v6930_v42, %v5789_v21 }
 0x394   : > { %4514 = vmatpush.bf16.msra.mxu3 %v6494_v13  ;;  %v6355_v13 = vld [vmem:[#allocation2 + $0x624] sm:$0xf0]  ;;  %v6318_v45 = vor.u32 %v7062_v61, %v6317_v3  ;;  %v5745_v19 = vld [vmem:[#allocation2 + $0x130] sm:$0xf]  ;;  %v6185_v9 = vld [vmem:[#allocation2 + $0x4a0] sm:$0xf] }
 0x395   : > { %4483 = vmatpush.bf16.msra.mxu1 %v5922_v12  ;;  %4459 = vmatpush.bf16.msrb.mxu0 %v6446_v58  ;;  %v6358_v12 = vor.u32 %v7067_v20, %v6355_v13  ;;  %v6229_v58 = vld [vmem:[#allocation2 + $0x4f8] sm:$0xf]  ;;  %v5746_v60 = vor.u32 %v6919_v36, %v5745_v19  ;;  %v6908_v47 = vld [vmem:[#allocation2 + $0x100] sm:$0xf0]  ;;  %v7018_v41 = vld [vmem:[#allocation2 + $0x470] sm:$0xf0] }
 0x396   : > { %v4184_v25 = vpop.f32.mrf.mxu1  ;;  %v5701_v40 = vld [vmem:[#allocation2 + $0xd8] sm:$0xf]  ;;  %v6669_v59 = vld [vmem:[#allocation2 + $0x868] sm:$0xf]  ;;  %v7150_v39 = vld [vmem:[#allocation2 + $0x890] sm:$0xf0] }
 0x397   : > { %4433 = vmatpush.bf16.msrb.mxu2 %v5654_v6  ;;  %v7029_v6 = vld [vmem:[#allocation2 + $0x4c8] sm:$0xf0]  ;;  %v6670_v14 = vor.u32 %v7150_v39, %v6669_v59  ;;  %v5657_v3 = vld [vmem:[#allocation2 + $0x80] sm:$0xf]  ;;  %v7007_v61 = vld [vmem:[#allocation2 + $0x418] sm:$0xf0] }
 0x398   : > { %4515 = vmatpush.bf16.msra.mxu3 %v6450_v16  ;;  %4851 = vrot.lane.b32.xlu1 %v10114_v27, %s7459_s26  ;;  %v6311_v16 = vld [vmem:[#allocation2 + $0x5cc] sm:$0xf0]  ;;  %v6186_v30 = vor.u32 %v7029_v6, %v6185_v9  ;;  %v6897_v21 = vld [vmem:[#allocation2 + $0xa8] sm:$0xf0]  ;;  %v5965_v59 = vld [vmem:[#allocation2 + $0x2e8] sm:$0xf] }
 0x399   : > { %4484 = vmatpush.bf16.msra.mxu1 %v5878_v54  ;;  %4460 = vmatpush.bf16.msrb.mxu0 %v6402_v33  ;;  %v6314_v49 = vor.u32 %v7056_v56, %v6311_v16  ;;  %v6230_v54 = vor.u32 %v7040_v24, %v6229_v58  ;;  %v4240_v33 = vpop.f32.mrf.mxu0  ;;  %v4227_v24 = vadd.f32 %v4226_v2, %v4212_v43  ;;  %v6097_v58 = vld [vmem:[#allocation2 + $0x3f0] sm:$0xf]  ;;  %v6053_v2 = vld [vmem:[#allocation2 + $0x398] sm:$0xf]  ;;  %v6974_v39 = vld [vmem:[#allocation2 + $0x310] sm:$0xf0] }
 0x39a   : > { %4813 = vrot.lane.b32.xlu2 %v10114_v27, %s7460_s29  ;;  %v4214_v20 = vpop.f32.mrf.mxu2  ;;  %v5658_v56 = vor.u32 %v6897_v21, %v5657_v3 }
 0x39b   : > { %4434 = vmatpush.bf16.msrb.mxu2 %v5610_v57  ;;  %v5702_v57 = vor.u32 %v6908_v47, %v5701_v40  ;;  %v6009_v47 = vld [vmem:[#allocation2 + $0x340] sm:$0xf] }
 0x39c   : > { %4516 = vmatpush.bf16.msra.mxu3 %v6406_v37  ;;  %v6141_v37 = vld [vmem:[#allocation2 + $0x448] sm:$0xf] }
 0x39d   : > { %4485 = vmatpush.bf16.msra.mxu1 %v5834_v38  ;;  %4461 = vmatpush.bf16.msrb.mxu0 %v6358_v12  ;;  %v4228_v38 = vpop.f32.mrf.mxu3  ;;  %v6142_v13 = vor.u32 %v7018_v41, %v6141_v37 }
 0x39e   : > { %4435 = vmatmul.bf16.vlgmr.msrb.gmra.mxu2 %v8847_v35  ;;  %v4229_v34 = vadd.f32 %v4228_v38, %v4214_v20  ;;  %v4186_v42 = vpop.f32.mrf.mxu1 }
 0x39f   : > { %4497 = vmatpush.bf16.msra.mxu2 %v6274_v63  ;;  %v4185_v63 = vadd.f32 %v4184_v25, %v4171_v4  ;;  %v4187_v12 = vadd.f32 %v4186_v42, %v10090_v51  ;;  %v4577_v51 = vperm.slane %v10025_v32, 4 }
 0x3a0   : > { %4517 = vmatpush.bf16.msra.mxu3 %v6362_v7 }
 0x3a1   : > { %4486 = vmatpush.bf16.msra.mxu1 %v5790_v62  ;;  %4462 = vmatpush.bf16.msrb.mxu0 %v6314_v49  ;;  %v4199_v7 = vadd.f32 %v10072_v23, %v4185_v63  ;;  %v10143_v16 = vadd.f32 %v10124_v5, %v4187_v12  ;;  %v6886_v62 = vld [vmem:[#allocation2 + $0x50] sm:$0xf0]  ;;  %v4242_v36 = vpop.f32.mrf.mxu0  ;;  %v4241_v49 = vadd.f32 %v4240_v33, %v4227_v24  ;;  %v5613_v23 = vld [vmem:[#allocation2 + $0x28] sm:$0xf]  ;;  %v4578_v5 = vperm.slane %v10025_v32, 5 }
 0x3a2   : > { %6680 = vmatmul.msk.bf16.vlgmr.msrb.gmra.mxu1 %vm10979_vm0, %v8891_v31  ;;  %v5614_v43 = vor.u32 %v6886_v62, %v5613_v23  ;;  %vm4588_vm8 = vcmp.eq.s32.totalorder %v4577_v51, 1  ;;  %vm10982_vm0 = vcmask 752640  }
 0x3a3   : > { %4498 = vmatpush.bf16.msra.mxu2 %v6230_v54  ;;  %v4553_v25 = vadd.f32 %v10083_v11, %v4199_v7  ;;  %v6996_v54 = vld [vmem:[#allocation2 + $0x3c0] sm:$0xf0]  ;;  %vm4589_vm12 = vcmp.eq.s32.totalorder %v4578_v5, 1 }
 0x3a4   : > { %4518 = vmatpush.bf16.msra.mxu3 %v6318_v45  ;;  %4463 = vmatmul.bf16.vlgmr.msrb.gmra.mxu0 %v8837_v46  ;;  %v4243_v45 = vadd.f32 %v4242_v36, %v4229_v34  ;;  %v6054_v19 = vor.u32 %v6996_v54, %v6053_v2  ;;  %v4580_v54 = vperm.slane %v10025_v32, 7 }
 0x3a5   : > { %4487 = vmatpush.bf16.msra.mxu1 %v5746_v60  ;;  %4532 = vmatpush.bf16.msra.mxu0 %v6670_v14  ;;  %v4564_v9 = vmax.f32 %v4553_v25, 0.0  ;;  %v6985_v60 = vld [vmem:[#allocation2 + $0x368] sm:$0xf0] }
 0x3a6   : > { %v4254_v4 = vpop.f32.mrf.mxu1  ;;  %v6010_v37 = vor.u32 %v6985_v60, %v6009_v47  ;;  %vm4591_vm2 = vcmp.eq.s32.totalorder %v4580_v54, 1 }
 0x3a7   : > { %4499 = vmatpush.bf16.msra.mxu2 %v6186_v30  ;;  %4519 = vmatmul.bf16.vlgmr.msra.gmra.mxu3 %v8837_v46  ;;  %v6098_v46 = vor.u32 %v7007_v61, %v6097_v58  ;;  %v4255_v6 = vadd.f32 %v4254_v4, %v4241_v49  ;;  %v4599_v41 = vsel %vm4588_vm8, %v4564_v9, 0.0  ;;  %v5966_v30 = vor.u32 %v6974_v39, %v5965_v59 }
 0x3a8   : > { %v4579_v49 = vperm.slane %v10025_v32, 6 }
 0x3a9   : > { %4488 = vmatpush.bf16.msra.mxu1 %v5702_v57  ;;  %v4554_v40 = vadd.f32 %v10083_v11, %v4255_v6 }
 0x3aa   : > { %vm4590_vm10 = vcmp.eq.s32.totalorder %v4579_v49, 1 }
 0x3ab   : > { %4500 = vmatpush.bf16.msra.mxu2 %v6142_v13  ;;  %v4565_v33 = vmax.f32 %v4554_v40, 0.0 }
 0x3ad   : > { %4489 = vmatpush.bf16.msra.mxu1 %v5658_v56  ;;  %v4600_v20 = vsel %vm4589_vm12, %v4565_v33, 0.0  ;;  %vm10983_vm12 = vcmask 760832  }
 0x3ae   : > { %v10152_v38 = vpack.c.bf16 %v4600_v20, %v4599_v41  ;;  %v4256_v14 = vpop.f32.mrf.mxu1 }
 0x3af   : > { %4501 = vmatpush.bf16.msra.mxu2 %v6098_v46  ;;  %v10154_v34 = vadd.f32 %v4256_v14, %v4243_v45 }
 0x3b0   : > { %4767 = vst [vmem:[#allocation3 + $0xc0] sm:$0xff] %v10152_v38  ;;  %4891 = vrot.lane.b32.xlu0 %v10152_v38, %s7458_s13  ;;  %4853 = vrot.lane.b32.xlu2 %v10152_v38, %s7459_s26 }
 0x3b1   : > { %4490 = vmatpush.bf16.msra.mxu1 %v5614_v43  ;;  %4775 = vrot.lane.b32.xlu1 %v10152_v38, %s7457_s12 }
 0x3b3   : > { %4502 = vmatpush.bf16.msra.mxu2 %v6054_v19 }
 0x3b4   : > { %4491 = vmatmul.bf16.vlgmr.msra.gmra.mxu1 %v8847_v35  ;;  %6681 = vmatmul.msk.bf16.vlgmr.msra.gmra.mxu0 %vm10980_vm15, %v8891_v31 }
 0x3b7   : > { %4503 = vmatpush.bf16.msra.mxu2 %v6010_v37  ;;  %v4282_v31 = vpop.f32.mrf.mxu2 }
 0x3b8   : > { %4815 = vrot.lane.b32.xlu0 %v10152_v38, %s7460_s29  ;;  %4811 = vrot.lane.b32.xlu2 %v10112_v55, %s7460_s29 }
 0x3b9   : > { %4689 = vrot.lane.b32.xlu1 %v10112_v55, %s7446_s19 }
 0x3ba   : > { %v4268_v35 = vpop.f32.mrf.mxu1 }
 0x3bb   : > { %4504 = vmatpush.bf16.msra.mxu2 %v5966_v30  ;;  %v4283_v24 = vadd.f32 %v4282_v31, %v4268_v35 }
 0x3be   : > { %4505 = vmatmul.bf16.vlgmr.msra.gmra.mxu2 %v9016_v18 }
 0x3bf   : > { %v4284_v57 = vpop.f32.mrf.mxu2 }
 0x3c0   : > { %4773 = vrot.lane.b32.xlu0 %v10114_v27, %s7457_s12  ;;  %4691 = vrot.lane.b32.xlu2 %v10114_v27, %s7446_s19  ;;  %v4310_v18 = vpop.f32.mrf.mxu0 }
 0x3c1   : > { %4728 = vrot.lane.b32.xlu1 %v10114_v27, %s7449_s18 }
 0x3c2   : > { %v4270_v63 = vpop.f32.mrf.mxu1 }
 0x3c3   : > { %v4285_v13 = vadd.f32 %v4284_v57, %v4270_v63 }
 0x3c6   : > { %v4296_v21 = vpop.f32.mrf.mxu3 }
 0x3c7   : > { %v4297_v61 = vadd.f32 %v4296_v21, %v4283_v24 }
 0x3c8   : > { %4849 = vrot.lane.b32.xlu0 %v10112_v55, %s7459_s26  ;;  %v4312_v12 = vpop.f32.mrf.mxu0 }
 0x3c9   : > { %4771 = vrot.lane.b32.xlu1 %v10112_v55, %s7457_s12  ;;  %v4311_v56 = vadd.f32 %v4310_v18, %v4297_v61 }
 0x3cb   : > { %v4555_v46 = vadd.f32 %v10083_v11, %v4311_v56 }
 0x3cd   : > { %v4566_v51 = vmax.f32 %v4555_v46, 0.0 }
 0x3ce   : > { %v4298_v42 = vpop.f32.mrf.mxu3 }
 0x3cf   : > { %v4299_v7 = vadd.f32 %v4298_v42, %v4285_v13  ;;  %v4601_v6 = vsel %vm4590_vm10, %v4566_v51, 0.0 }
 0x3d0   : > { %4726 = vrot.lane.b32.xlu0 %v10112_v55, %s7449_s18 }
 0x3d1   : > { %v10180_v3 = vadd.f32 %v4312_v12, %v4299_v7  ;;  %4653 = vrot.lane.b32.xlu1 %v10112_v55, %s7445_s15 }
 0x3d6   : > { %v4366_v25 = vpop.f32.mrf.mxu3 }
 0x3d9   : > { %v4352_v36 = vpop.f32.mrf.mxu2 }
 0x3da   : > { %v4338_v58 = vpop.f32.mrf.mxu1 }
 0x3de   : > { %v4368_v40 = vpop.f32.mrf.mxu3 }
 0x3e0   : > { %v4324_v62 = vpop.f32.mrf.mxu0 }
 0x3e1   : > { %v4339_v45 = vadd.f32 %v4338_v58, %v4324_v62  ;;  %v4354_v19 = vpop.f32.mrf.mxu2 }
 0x3e2   : > { %v4340_v2 = vpop.f32.mrf.mxu1 }
 0x3e3   : > { %v4353_v23 = vadd.f32 %v4352_v36, %v4339_v45 }
 0x3e5   : > { %v4367_v43 = vadd.f32 %v4366_v25, %v4353_v23 }
 0x3e7   : > { %v4556_v4 = vadd.f32 %v10083_v11, %v4367_v43 }
 0x3e8   : > { %v4326_v5 = vpop.f32.mrf.mxu0 }
 0x3e9   : > { %v4567_v9 = vmax.f32 %v4556_v4, 0.0  ;;  %v4341_v60 = vadd.f32 %v4340_v2, %v4326_v5 }
 0x3ea   : > { %v4380_v32 = vpop.f32.mrf.mxu3 }
 0x3eb   : > { %v4602_v47 = vsel %vm4591_vm2, %v4567_v9, 0.0  ;;  %v4355_v37 = vadd.f32 %v4354_v19, %v4341_v60  ;;  %v4540_v19 = vld [vmem:[%s10689_s5 + $0x8] sm:$0x7]  ;;  %vm10984_vm2 = vmmov %vm10981_vm13 }
 0x3ec   : > { %v10190_v33 = vpack.c.bf16 %v4602_v47, %v4601_v6  ;;  %v10199_v59 = vpop.permute.xlu2 %4889  ;;  %vm4542_vm8 = vcmp.gt.f32.partialorder %v4540_v19, 0.0 }
 0x3ed   : > { %v10192_v41 = vadd.f32 %v4368_v40, %v4355_v37  ;;  %v4900_v20 = vrot.slane %v10199_v59, 4 }
 0x3ee   : > { %4768 = vst [vmem:[#allocation3 + $0xc8] sm:$0xff] %v10190_v33  ;;  %4893 = vrot.lane.b32.xlu2 %v10190_v33, %s7458_s13 }
 0x3f2   : > { %v4382_v18 = vpop.f32.mrf.mxu3 }
 0x3f4   : > { %v10212_v12 = vpop.permute.xlu2 %4813 }
 0x3f5   : > { %v4824_v4 = vrot.slane %v10212_v12, 4 }
 0x3f6   : > { %4617 = vrot.lane.b32.xlu2 %v10112_v55, %s7444_s14 }
 0x3fe   : > { %4655 = vrot.lane.b32.xlu2 %v10114_v27, %s7445_s15 }
 0x400   : > { %v4394_v14 = vpop.f32.mrf.mxu0  ;;  %v4422_v61 = vpop.f32.mrf.mxu2 }
 0x401   : > { %v4395_v54 = vadd.f32 %v4394_v14, %v4380_v32 }
 0x402   : > { %v4888_v39 = vpop.permute.xlu1 %4887 }
 0x403   : > { %v4899_v30 = vrot.slane %v4888_v39, 4 }
 0x405   : > { %v4905_v35 = vsel %vm344_vm5, %v4899_v30, %v4900_v20 }
 0x406   : > { %v4906_v31 = vsel %vm10981_vm13, %v4888_v39, %v4905_v35  ;;  %4855 = vrot.lane.b32.xlu2 %v10190_v33, %s7459_s26  ;;  %v10236_v39 = vsel %vm4542_vm8, 1, %v10961_v22  ;;  %vm10985_vm13 = vmmov %vm10983_vm12 }
 0x407   : > { %v5139_v63 = vunpack.c.l.b16 %v4906_v31  ;;  %v5140_v57 = vunpack.c.h.b16 %v4906_v31 }
 0x408   : > { %v4396_v7 = vpop.f32.mrf.mxu0  ;;  %v4424_v51 = vpop.f32.mrf.mxu2 }
 0x409   : > { %v5194_v55 = vpack.c.b16 %v5139_v63, %v5139_v63  ;;  %v5195_v13 = vpack.c.b16 %v5140_v57, %v5140_v57  ;;  %v4397_v24 = vadd.f32 %v4396_v7, %v4382_v18  ;;  %v4581_v63 = vperm.slane %v10236_v39, 0 }
 0x40a   : > { %v10214_v58 = vpop.permute.xlu1 %4851  ;;  %v10216_v62 = vpop.permute.xlu2 %4853  ;;  %v4582_v57 = vperm.slane %v10236_v39, 1 }
 0x40b   : > { %v5254_v21 = vsel %vm344_vm5, %v5194_v55, 0  ;;  %v5257_v42 = vsel %vm344_vm5, %v5195_v13, 0  ;;  %v4862_v36 = vrot.slane %v10214_v58, 4  ;;  %v4863_v46 = vrot.slane %v10216_v62, 4  ;;  %v4450_v60 = vpop.f32.mrf.mxu3 }
 0x40c   : > { %5289 = vmatpush.bf16.msrb.mxu0 %v5254_v21  ;;  %5302 = vmatpush.bf16.msrb.mxu1 %v5257_v42  ;;  %vm4592_vm15 = vcmp.eq.s32.totalorder %v4581_v63, 1  ;;  %vm4593_vm10 = vcmp.eq.s32.totalorder %v4582_v57, 1 }
 0x40d   : > { %v4869_v45 = vsel %vm344_vm5, %v4862_v36, %v4863_v46 }
 0x40e   : > { %v4870_v49 = vsel %vm10982_vm0, %v10214_v58, %v4869_v45  ;;  %vm10986_vm0 = vcmask 285696  }
 0x40f   : > { %v4408_v56 = vpop.f32.mrf.mxu1  ;;  %4883 = vst [vmem:[#allocation3 + $0x13c] sm:$0xff] %v4870_v49  ;;  %vm10987_vm8 = vmmov %vm10986_vm0 }
 0x410   : > { %v4409_v5 = vadd.f32 %v4408_v56, %v4395_v54 }
 0x412   : > { %v4812_v2 = vpop.permute.xlu2 %4811  ;;  %v4423_v47 = vadd.f32 %v4422_v61, %v4409_v5 }
 0x413   : > { %v4823_v9 = vrot.slane %v4812_v2, 4  ;;  %v4452_v21 = vpop.f32.mrf.mxu3 }
 0x414   : > { %v4557_v35 = vadd.f32 %v10083_v11, %v4423_v47 }
 0x415   : > { %v4829_v6 = vsel %vm344_vm5, %v4823_v9, %v4824_v4 }
 0x416   : > { %v4830_v40 = vsel %vm10983_vm12, %v4812_v2, %v4829_v6  ;;  %v4568_v13 = vmax.f32 %v4557_v35, 0.0  ;;  %vm10988_vm12 = vcmask 1039360  }
 0x417   : > { %v4410_v25 = vpop.f32.mrf.mxu1  ;;  %4844 = vst [vmem:[#allocation3 + $0x108] sm:$0xff] %v4830_v40 }
 0x418   : > { %v4411_v23 = vadd.f32 %v4410_v25, %v4397_v24  ;;  %v4603_v25 = vsel %vm4592_vm15, %v4568_v13, 0.0  ;;  %vm10989_vm15 = vcmask 752640  }
 0x41a   : > { %v10227_v43 = vadd.f32 %v4424_v51, %v4411_v23 }
 0x41f   : > { %v4478_v14 = vpop.f32.mrf.mxu1 }
 0x421   : > { %v4464_v37 = vpop.f32.mrf.mxu0  ;;  %v4436_v32 = vpop.f32.mrf.mxu2 }
 0x422   : > { %v4451_v30 = vadd.f32 %v4450_v60, %v4436_v32  ;;  %v10242_v24 = vpop.permute.xlu0 %4891  ;;  %v10265_v60 = vpop.permute.xlu2 %4691 }
 0x423   : > { %v4901_v56 = vrot.slane %v10242_v24, 4  ;;  %v10245_v45 = vpop.permute.xlu1 %4775 }
 0x424   : > { %v4465_v31 = vadd.f32 %v4464_v37, %v4451_v30 }
 0x425   : > { %v4907_v2 = vsel %vm344_vm5, %v4900_v20, %v4901_v56 }
 0x426   : > { %v4479_v55 = vadd.f32 %v4478_v14, %v4465_v31  ;;  %v4908_v5 = vsel %vm10984_vm2, %v10199_v59, %v4907_v2  ;;  %v4700_v14 = vrot.slane %v10265_v60, 4  ;;  %vm10991_vm2 = vcmask 125952  }
 0x427   : > { %v4480_v51 = vpop.f32.mrf.mxu1  ;;  %v5141_v9 = vunpack.c.l.b16 %v4908_v5  ;;  %v5142_v6 = vunpack.c.h.b16 %v4908_v5 }
 0x428   : > { %v4558_v18 = vadd.f32 %v10083_v11, %v4479_v55 }
 0x429   : > { %v4438_v42 = vpop.f32.mrf.mxu2  ;;  %v4466_v61 = vpop.f32.mrf.mxu0  ;;  %v5196_v20 = vpack.c.b16 %v5141_v9, %v5141_v9  ;;  %v5197_v40 = vpack.c.b16 %v5142_v6, %v5142_v6 }
 0x42a   : > { %v4569_v7 = vmax.f32 %v4558_v18, 0.0  ;;  %v4453_v22 = vadd.f32 %v4452_v21, %v4438_v42  ;;  %v10267_v59 = vpop.permute.xlu0 %4815 }
 0x42b   : > { %v4825_v47 = vrot.slane %v10267_v59, 4  ;;  %v4690_v37 = vpop.permute.xlu1 %4689  ;;  %v5260_v32 = vsel %vm344_vm5, %v5196_v20, 0  ;;  %v5263_v30 = vsel %vm344_vm5, %v5197_v40, 0  ;;  %v4583_v20 = vperm.slane %v10236_v39, 2 }
 0x42c   : > { %v4604_v49 = vsel %vm4593_vm10, %v4569_v7, 0.0  ;;  %v4467_v23 = vadd.f32 %v4466_v61, %v4453_v22  ;;  %v4699_v35 = vrot.slane %v4690_v37, 4  ;;  %5315 = vmatpush.bf16.msrb.mxu2 %v5260_v32  ;;  %5328 = vmatpush.bf16.msrb.mxu3 %v5263_v30  ;;  %v7190_v7 = vld [vmem:[#allocation3 + $0x138] sm:$0xf0]  ;;  %v4520_v61 = vpop.f32.mrf.mxu3  ;;  %vm10990_vm10 = vmmov %vm10988_vm12 }
 0x42d   : > { %v10247_v54 = vpack.c.bf16 %v4604_v49, %v4603_v25  ;;  %v4831_v31 = vsel %vm344_vm5, %v4824_v4, %v4825_v47 }
 0x42e   : > { %v10256_v19 = vadd.f32 %v4480_v51, %v4467_v23  ;;  %v4832_v63 = vsel %vm10985_vm13, %v10212_v12, %v4831_v31  ;;  %v4704_v57 = vsel %vm10986_vm0, %v4699_v35, %v4690_v37  ;;  %v4705_v55 = vsel %vm344_vm5, %v4699_v35, %v4700_v14  ;;  %v6826_v23 = vld [vmem:[#allocation3 + $0x13c] sm:$0xf0] }
 0x42f   : > { %4769 = vst [vmem:[#allocation3 + $0xd0] sm:$0xff] %v10247_v54  ;;  %4895 = vrot.lane.b32.xlu0 %v10247_v54, %s7458_s13  ;;  %4779 = vrot.lane.b32.xlu2 %v10247_v54, %s7457_s12  ;;  %v4706_v13 = vsel %vm10987_vm8, %v4705_v55, %v10265_v60  ;;  %v4785_v12 = vrot.slane %v10245_v45, 4  ;;  %v7174_v55 = vld [vmem:[#allocation3 + $0xbc] sm:$0xf]  ;;  %vm10992_vm13 = vcmask 7168   ;;  %vm10994_vm8 = vcmask 293888  }
 0x430   : > { %4819 = vrot.lane.b32.xlu1 %v10247_v54, %s7460_s29  ;;  %4845 = vst [vmem:[#allocation3 + $0x110] sm:$0xff] %v4832_v63  ;;  %vm10993_vm0 = vmmov %vm10992_vm13 }
 0x431   : > { %4719 = vst.msk [vmem:[#allocation3 + $0x58] sm:$0xff] %vm8185_vm1, %v4704_v57  ;;  %v4492_v42 = vpop.f32.mrf.mxu1  ;;  %v4534_v9 = vpop.f32.mrf.mxu0  ;;  %v6780_v57 = vld [vmem:[#allocation3 + $0xb8] sm:$0xf]  ;;  %vm4594_vm1 = vcmp.eq.s32.totalorder %v4583_v20, 1  ;;  %v7184_v20 = vld [vmem:[#allocation3 + $0x10c] sm:$0xf] }
 0x432   : > { %4720 = vst [vmem:[#allocation3 + $0x60] sm:$0xff] %v4706_v13  ;;  %v4774_v4 = vpop.permute.xlu0 %4773 }
 0x433   : > { %v4784_v18 = vrot.slane %v4774_v4, 4  ;;  %v10293_v21 = vpop.permute.xlu1 %4728 }
 0x437   : > { %4619 = vrot.lane.b32.xlu0 %v10114_v27, %s7444_s14  ;;  %4730 = vrot.lane.b32.xlu2 %v10152_v38, %s7449_s18  ;;  %v4791_v27 = vsel %vm344_vm5, %v4784_v18, %v4785_v12  ;;  %v6824_v25 = vld [vmem:[#allocation3 + $0x110] sm:$0xf]  ;;  %v7185_v49 = vld [vmem:[#allocation3 + $0x114] sm:$0xf] }
 0x438   : > { %4777 = vrot.lane.b32.xlu1 %v10190_v33, %s7457_s12  ;;  %v4792_v22 = vsel %vm10988_vm12, %v4774_v4, %v4791_v27  ;;  %v6825_v2 = vor.u32 %v7190_v7, %v6824_v25  ;;  %v6829_v5 = vor.u32 %v7185_v49, %v6826_v23  ;;  %vm10995_vm12 = vcmask 744448   ;;  %v6728_v52 = vld [vmem:[#allocation3 + $0x58] sm:$0xf] }
 0x439   : > { %4806 = vst [vmem:[#allocation3 + $0xe4] sm:$0xff] %v4792_v22 }
 0x43a   : > { %5316 = vmatpush.bf16.msrb.mxu2 %v6825_v2  ;;  %5329 = vmatpush.bf16.msrb.mxu3 %v6829_v5  ;;  %v4850_v40 = vpop.permute.xlu0 %4849 }
 0x43b   : > { %v4861_v32 = vrot.slane %v4850_v40, 4  ;;  %v4772_v30 = vpop.permute.xlu1 %4771 }
 0x43c   : > { %v4783_v35 = vrot.slane %v4772_v30, 4 }
 0x43d   : > { %v4867_v63 = vsel %vm344_vm5, %v4861_v32, %v4862_v36 }
 0x43e   : > { %v4868_v13 = vsel %vm10989_vm15, %v4850_v40, %v4867_v63  ;;  %v4789_v4 = vsel %vm344_vm5, %v4783_v35, %v4784_v18 }
 0x43f   : > { %4817 = vrot.lane.b32.xlu0 %v10190_v33, %s7460_s29  ;;  %4623 = vrot.lane.b32.xlu2 %v10190_v33, %s7444_s14  ;;  %4882 = vst [vmem:[#allocation3 + $0x134] sm:$0xff] %v4868_v13  ;;  %v4790_v7 = vsel %vm10990_vm10, %v4772_v30, %v4789_v4  ;;  %vm11000_vm10 = vmmov %vm10993_vm0 }
 0x440   : > { %4695 = vrot.lane.b32.xlu1 %v10190_v33, %s7446_s19  ;;  %v6782_v39 = vld [vmem:[#allocation3 + $0xe4] sm:$0xf0]  ;;  %4805 = vst [vmem:[#allocation3 + $0xdc] sm:$0xff] %v4790_v7 }
 0x441   : > { %v4506_v50 = vpop.f32.mrf.mxu2  ;;  %v6785_v58 = vor.u32 %v7174_v55, %v6782_v39  ;;  %v7173_v55 = vld [vmem:[#allocation3 + $0xb4] sm:$0xf]  ;;  %v7162_v39 = vld [vmem:[#allocation3 + $0x5c] sm:$0xf] }
 0x442   : > { %v4507_v51 = vadd.f32 %v4506_v50, %v4492_v42  ;;  %v7179_v42 = vld [vmem:[#allocation3 + $0xe0] sm:$0xf0]  ;;  %v4727_v18 = vpop.permute.xlu0 %4726 }
 0x443   : > { %5330 = vmatpush.bf16.msrb.mxu3 %v6785_v58  ;;  %v4738_v25 = vrot.slane %v4727_v18, 4  ;;  %v10322_v49 = vpop.permute.xlu1 %4653 }
 0x444   : > { %v4521_v6 = vadd.f32 %v4520_v61, %v4507_v51  ;;  %v4739_v61 = vrot.slane %v10293_v21, 4  ;;  %v4663_v51 = vrot.slane %v10322_v49, 4 }
 0x445   : > { %v4743_v2 = vsel %vm10992_vm13, %v4738_v25, %v4727_v18 }
 0x446   : > { %v4535_v37 = vadd.f32 %v4534_v9, %v4521_v6  ;;  %v4744_v5 = vsel %vm344_vm5, %v4738_v25, %v4739_v61  ;;  %v6816_v6 = vld [vmem:[#allocation3 + $0x108] sm:$0xf]  ;;  %4759 = vst.msk [vmem:[#allocation3 + $0x84] sm:$0xff] %vm8468_vm7, %v4743_v2  ;;  %v7189_v30 = vld [vmem:[#allocation3 + $0x130] sm:$0xf0]  ;;  %vm10998_vm7 = vcmask 588800  }
 0x447   : > { %4857 = vrot.lane.b32.xlu0 %v10247_v54, %s7459_s26  ;;  %v4745_v40 = vsel %vm10993_vm0, %v4744_v5, %v10293_v21  ;;  %v6818_v35 = vld [vmem:[#allocation3 + $0x134] sm:$0xf0]  ;;  %v7178_v44 = vld [vmem:[#allocation3 + $0xd8] sm:$0xf0]  ;;  %v6774_v63 = vld [vmem:[#allocation3 + $0xdc] sm:$0xf0] }
 0x448   : > { %v4559_v31 = vadd.f32 %v10083_v11, %v4535_v37  ;;  %v6781_v11 = vor.u32 %v7179_v42, %v6780_v57  ;;  %4621 = vrot.lane.b32.xlu1 %v10152_v38, %s7444_s14  ;;  %v10319_v50 = vpop.permute.xlu2 %4893  ;;  %v4668_v37 = vsel %vm10994_vm8, %v4663_v51, %v10322_v49  ;;  %4760 = vst [vmem:[#allocation3 + $0x8c] sm:$0xff] %v4745_v40 }
 0x449   : > { %v4902_v23 = vrot.slane %v10319_v50, 4  ;;  %4683 = vst.msk [vmem:[#allocation3 + $0x2c] sm:$0xff] %vm8191_vm3, %v4668_v37  ;;  %v6777_v42 = vor.u32 %v7173_v55, %v6774_v63  ;;  %vm10996_vm3 = vcmask 302080  }
 0x44a   : > { %v4570_v27 = vmax.f32 %v4559_v31, 0.0  ;;  %5317 = vmatpush.bf16.msrb.mxu2 %v6781_v11  ;;  %v6821_v31 = vor.u32 %v7184_v20, %v6818_v35  ;;  %vm11003_vm0 = vmmov %vm10996_vm3 }
 0x44b   : > { %v4909_v9 = vsel %vm344_vm5, %v4901_v56, %v4902_v23  ;;  %v6817_v56 = vor.u32 %v7189_v30, %v6816_v6 }
 0x44c   : > { %v4605_v36 = vsel %vm4594_vm1, %v4570_v27, 0.0  ;;  %v4910_v32 = vsel %vm10995_vm12, %v10242_v24, %v4909_v9  ;;  %5303 = vmatpush.bf16.msrb.mxu1 %v6821_v31  ;;  %v6772_v24 = vld [vmem:[#allocation3 + $0xb0] sm:$0xf]  ;;  %v6736_v27 = vld [vmem:[#allocation3 + $0x60] sm:$0xf]  ;;  %vm10999_vm1 = vmmov %vm10998_vm7 }
 0x44d   : > { %v10317_v22 = vpack.c.bf16 %v4605_v36, %v4605_v36  ;;  %5290 = vmatpush.bf16.msrb.mxu0 %v6817_v56  ;;  %v6773_v4 = vor.u32 %v7178_v44, %v6772_v24  ;;  %v7167_v11 = vld [vmem:[#allocation3 + $0x80] sm:$0xf0]  ;;  %v6730_v58 = vld [vmem:[#allocation3 + $0x84] sm:$0xf0]  ;;  %v5143_v6 = vunpack.c.l.b16 %v4910_v32  ;;  %v5144_v20 = vunpack.c.h.b16 %v4910_v32 }
 0x44e   : > { %v7163_v36 = vld [vmem:[#allocation3 + $0x64] sm:$0xf]  ;;  %v6729_v18 = vor.u32 %v7167_v11, %v6728_v52  ;;  %v6733_v25 = vor.u32 %v7162_v39, %v6730_v58 }
 0x44f   : > { %4770 = vst.msk [vmem:[#allocation3 + $0xd8] sm:$0xf] %vm10991_vm2, %v10317_v22  ;;  %4897 = vrot.lane.b32.xlu2 %v10317_v22, %s7458_s13  ;;  %4693 = vrot.lane.b32.xlu0 %v10152_v38, %s7446_s19  ;;  %v7168_v49 = vld [vmem:[#allocation3 + $0x88] sm:$0xf0]  ;;  %v6738_v2 = vld [vmem:[#allocation3 + $0x8c] sm:$0xf0]  ;;  %v5199_v44 = vpack.c.b16 %v5144_v20, %v5144_v20  ;;  %vm11001_vm2 = vmmov %vm10995_vm12 }
 0x450   : > { %4659 = vrot.lane.b32.xlu1 %v10190_v33, %s7445_s15  ;;  %v10353_v57 = vpop.permute.xlu2 %4617  ;;  %5304 = vmatpush.bf16.msrb.mxu1 %v6777_v42  ;;  %v6737_v5 = vor.u32 %v7168_v49, %v6736_v27  ;;  %v6741_v9 = vor.u32 %v7163_v36, %v6738_v2  ;;  %v7156_v37 = vld [vmem:[#allocation3 + $0x28] sm:$0xf0]  ;;  %v6686_v31 = vld [vmem:[#allocation3 + $0x2c] sm:$0xf0]  ;;  %vm11002_vm13 = vmmov %vm11001_vm2 }
 0x451   : > { %v4627_v13 = vrot.slane %v10353_v57, 4  ;;  %5291 = vmatpush.bf16.msrb.mxu0 %v6773_v4  ;;  %v5269_v4 = vsel %vm344_vm5, %v5199_v44, 0  ;;  %v4980_v42 = vld [vmem:[%s10688_s4] sm:$0xff] }
 0x452   : > { %5318 = vmatpush.bf16.msrb.mxu2 %v6737_v5  ;;  %5331 = vmatpush.bf16.msrb.mxu3 %v6741_v9 }
 0x453   : > { %v4632_v7 = vsel %vm10996_vm3, %v4627_v13, %v10353_v57 }
 0x454   : > { %4647 = vst.msk [vmem:[#allocation3] sm:$0xff] %vm8081_vm11, %v4632_v7  ;;  %5305 = vmatpush.bf16.msrb.mxu1 %v6733_v25  ;;  %vm10997_vm11 = vmmov %vm10994_vm8  ;;  %vm11004_vm8 = vcmask 1039360  }
 0x455   : > { %5292 = vmatpush.bf16.msrb.mxu0 %v6729_v18  ;;  %vm11006_vm12 = vmmov %vm11004_vm8 }
 0x457   : > { %4781 = vrot.lane.b32.xlu2 %v10317_v22, %s7457_s12  ;;  %4732 = vrot.lane.b32.xlu0 %v10190_v33, %s7449_s18  ;;  %v5198_v33 = vpack.c.b16 %v5143_v6, %v5143_v6 }
 0x458   : > { %4859 = vrot.lane.b32.xlu1 %v10317_v22, %s7459_s26  ;;  %v10368_v15 = vpop.permute.xlu2 %4655 }
 0x459   : > { %v4664_v40 = vrot.slane %v10368_v15, 4  ;;  %v5266_v55 = vsel %vm344_vm5, %v5198_v33, 0 }
 0x45b   : > { %v4669_v30 = vsel %vm344_vm5, %v4663_v51, %v4664_v40  ;;  %v6684_v35 = vld [vmem:[#allocation3] sm:$0xf]  ;;  %v7151_v56 = vld [vmem:[#allocation3 + $0x4] sm:$0xf]  ;;  %v10386_v51 = vld [vmem:[%s10687_s3] sm:$0xf] }
 0x45c   : > { %v4670_v32 = vsel %vm10997_vm11, %v4669_v30, %v10368_v15  ;;  %v6685_v63 = vor.u32 %v7156_v37, %v6684_v35  ;;  %v6689_v24 = vor.u32 %v7151_v56, %v6686_v31  ;;  %vm11009_vm11 = vmmov %vm10999_vm1  ;;  %v4005_v15 = vadd.f32 %v9849_v29, %v9828_v10 }
 0x45d   : > { %4684 = vst [vmem:[#allocation3 + $0x34] sm:$0xff] %v4670_v32 }
 0x45e   : > { %5293 = vmatpush.bf16.msrb.mxu0 %v6685_v63  ;;  %5306 = vmatpush.bf16.msrb.mxu1 %v6689_v24 }
 0x45f   : > { %4736 = vrot.lane.b32.xlu2 %v10317_v22, %s7449_s18  ;;  %4657 = vrot.lane.b32.xlu0 %v10152_v38, %s7445_s15 }
 0x460   : > { %4697 = vrot.lane.b32.xlu1 %v10247_v54, %s7446_s19  ;;  %v10392_v38 = vpop.permute.xlu2 %4855  ;;  %s7198_s19 = smul.u32 88, %s7519_s25  ;;  %s5452_s25 = scalar_lea.sflag [#allocation6], %s7591_s30 }
 0x461   : > { %v4864_v52 = vrot.slane %v10392_v38, 4  ;;  %6858 = vmatmul.msk.bf16.vlgmr.msrb.gmra.mxu0 %vm10998_vm7, %v10386_v51  ;;  %6859 = vmatmul.msk.bf16.vlgmr.msrb.gmra.mxu1 %vm10999_vm1, %v10386_v51  ;;  %vm11010_vm7 = vmmov %vm10999_vm1 }
 0x462   : > { %5341 = vmatpush.bf16.msra.mxu0 %v5266_v55  ;;  %5354 = vmatpush.bf16.msra.mxu1 %v5269_v4  ;;  %vm11011_vm1 = vmmov %vm10989_vm15 }
 0x463   : > { %v4871_v39 = vsel %vm344_vm5, %v4863_v46, %v4864_v52 }
 0x464   : > { %v4872_v27 = vsel %vm10989_vm15, %v10216_v62, %v4871_v39  ;;  %vm11012_vm15 = vmmov %vm11003_vm0 }
 0x465   : > { %4884 = vst [vmem:[#allocation3 + $0x144] sm:$0xff] %v4872_v27 }
 0x467   : > { %4983 = vperm.xlu2 %7286, %v4980_v42   ;;  %4821 = vrot.lane.b32.xlu0 %v10317_v22, %s7460_s29  ;;  %v4508_v42 = vpop.f32.mrf.mxu2  ;;  %s5463_s29 = scalar_lea.hbm %s10690_s6, %s7198_s19 }
 0x468   : > { %4661 = vrot.lane.b32.xlu1 %v10247_v54, %s7445_s15  ;;  %s5467_s20 = sshll.u32 %s5463_s29, 4  ;;  %s5468_s20 = int_to_ptr.hbm [resolvable:$true] %s5467_s20 }
 0x469   : > { %s7375_s16 = sshra.s32 %s5468_s20, 4  ;;  %s7376_s16 = int_to_ptr.hbm [resolvable:$true] %s7375_s16 }
 0x46a   : > { %s7377_s10 = scalar_lea.hbm %s7376_s16, 88  ;;  %p7382_p11 = scmp.lt.s32.totalorder %s7376_s16, %s10690_s6 }
 0x46b   : > { %p7378_p1 = scmp.ne.s32.totalorder %s7376_s16, %s7377_s10  ;;  %p7383_p9 = scmp.lt.s32.totalorder %s7381_s7, %s7377_s10 }
 0x46d   : > { %p7379_p4 = pnand %p7378_p1, %p7565_p7  ;;  %p7384_p2 = por %p7383_p9, %p7382_p11 }
 0x46f   : > { %4734 = vrot.lane.b32.xlu0 %v10247_v54, %s7449_s18  ;;  %p7380_p8 = pneg %p7379_p4 }
 0x471   : > { %p7385_p10 = pnand %p7384_p2, %p7380_p8 }
 0x477   : > { %4625 = vrot.lane.b32.xlu0 %v10247_v54, %s7444_s14  ;;  %s11034_s14 = smul.u32 88, %s7591_s30 }
 0x479   : > { %s10616_s15 = scalar_lea.vmem [#allocation9], %s11034_s14 }
 0x47a   : > { %s5465_s1 = sshll.u32 %s10616_s15, 4  ;;  %s5466_s1 = int_to_ptr.vmem [resolvable:$true] %s5465_s1 }
 0x489   : > { %v4780_v7 = vpop.permute.xlu2 %4779 }
 0x48a   : > { %v4787_v37 = vrot.slane %v4780_v7, 4 }
 0x491   : > { %v10414_v11 = vpop.permute.xlu2 %4730 }
 0x492   : > { %v4740_v46 = vrot.slane %v10414_v11, 4 }
 0x494   : > { %v4746_v62 = vsel %vm344_vm5, %v4739_v61, %v4740_v46 }
 0x495   : > { %v4747_v22 = vsel %vm11000_vm10, %v4746_v62, %v10414_v11  ;;  %v7157_v62 = vld [vmem:[#allocation3 + $0x30] sm:$0xf0]  ;;  %vm11013_vm10 = vmmov %vm11003_vm0 }
 0x496   : > { %4761 = vst [vmem:[#allocation3 + $0x94] sm:$0xff] %v4747_v22 }
 0x499   : > { %v10424_v58 = vpop.permute.xlu2 %4623 }
 0x4a1   : > { %v4896_v36 = vpop.permute.xlu0 %4895 }
 0x4a2   : > { %v4903_v18 = vrot.slane %v4896_v36, 4  ;;  %v10426_v54 = vpop.permute.xlu1 %4819 }
 0x4a4   : > { %v4911_v25 = vsel %vm344_vm5, %v4902_v23, %v4903_v18 }
 0x4a5   : > { %v4912_v49 = vsel %vm11001_vm2, %v10319_v50, %v4911_v25  ;;  %vm11014_vm2 = vcmask 285696  }
 0x4a6   : > { %v5146_v44 = vunpack.c.h.b16 %v4912_v49 }
 0x4a9   : > { %v4898_v21 = vpop.permute.xlu2 %4897  ;;  %v10434_v5 = vpop.permute.xlu0 %4619 }
 0x4aa   : > { %v4904_v2 = vrot.slane %v4898_v21, 4  ;;  %v4628_v6 = vrot.slane %v10434_v5, 4  ;;  %v4778_v20 = vpop.permute.xlu1 %4777  ;;  %v6694_v21 = vld [vmem:[#allocation3 + $0x34] sm:$0xf0] }
 0x4ab   : > { %v4786_v33 = vrot.slane %v4778_v20, 4 }
 0x4ac   : > { %v4913_v61 = vsel %vm344_vm5, %v4903_v18, %v4904_v2  ;;  %v4633_v50 = vsel %vm344_vm5, %v4627_v13, %v4628_v6  ;;  %v5145_v13 = vunpack.c.l.b16 %v4912_v49 }
 0x4ad   : > { %v4914_v9 = vsel %vm11002_vm13, %v4896_v36, %v4913_v61  ;;  %v4634_v23 = vsel %vm11003_vm0, %v4633_v50, %v10434_v5  ;;  %v4793_v30 = vsel %vm344_vm5, %v4785_v12, %v4786_v33  ;;  %v4795_v35 = vsel %vm344_vm5, %v4786_v33, %v4787_v37  ;;  %vm11015_vm13 = vmmov %vm11014_vm2 }
 0x4ae   : > { %4924 = vst.msk [vmem:[#allocation3 + $0x180] sm:$0xff] %vm9873_vm14, %v4914_v9  ;;  %v4794_v8 = vsel %vm11004_vm8, %v10245_v45, %v4793_v30  ;;  %vm11005_vm14 = vmmov %vm11004_vm8  ;;  %v4827_v12 = vrot.slane %v10426_v54, 4  ;;  %v4494_v45 = vpop.f32.mrf.mxu1  ;;  %v5200_v22 = vpack.c.b16 %v5145_v13, %v5145_v13  ;;  %v5201_v36 = vpack.c.b16 %v5146_v44, %v5146_v44 }
 0x4af   : > { %4648 = vst [vmem:[#allocation3 + $0x8] sm:$0xff] %v4634_v23  ;;  %v4796_v56 = vsel %vm11005_vm14, %v4778_v20, %v4795_v35  ;;  %v4509_v9 = vadd.f32 %v4508_v42, %v4494_v45  ;;  %v4522_v20 = vpop.f32.mrf.mxu3  ;;  %v4630_v35 = vrot.slane %v10424_v58, 4  ;;  %vm11016_vm0 = vcmask 7168   ;;  %vm11017_vm8 = vmmov %vm11011_vm1 }
 0x4b0   : > { %4807 = vst [vmem:[#allocation3 + $0xec] sm:$0xff] %v4794_v8  ;;  %v5275_v33 = vsel %vm344_vm5, %v5201_v36, 0  ;;  %v6788_v36 = vld [vmem:[#allocation3 + $0xc0] sm:$0xf] }
 0x4b1   : > { %v4782_v31 = vpop.permute.xlu2 %4781  ;;  %4808 = vst [vmem:[#allocation3 + $0xf4] sm:$0xff] %v4796_v56  ;;  %v4818_v63 = vpop.permute.xlu0 %4817  ;;  %v4523_v30 = vadd.f32 %v4522_v20, %v4509_v9 }
 0x4b2   : > { %v4788_v57 = vrot.slane %v4782_v31, 4  ;;  %4810 = vst.msk [vmem:[#allocation3 + $0x104] sm:$0xf] %vm1315_vm4, %v4782_v31  ;;  %v4826_v55 = vrot.slane %v4818_v63, 4  ;;  %v10458_v4 = vpop.permute.xlu1 %4695  ;;  %vm11007_vm4 = vcmask 760832   ;;  %v4536_v56 = vpop.f32.mrf.mxu0 }
 0x4b3   : > { %vm11008_vm3 = vmmov %vm11007_vm4 }
 0x4b4   : > { %v4797_v32 = vsel %vm344_vm5, %v4787_v37, %v4788_v57  ;;  %v4833_v39 = vsel %vm344_vm5, %v4825_v47, %v4826_v55  ;;  %v4835_v27 = vsel %vm344_vm5, %v4826_v55, %v4827_v12  ;;  %v5272_v37 = vsel %vm344_vm5, %v5200_v22, 0  ;;  %v7191_v57 = vld [vmem:[#allocation3 + $0x140] sm:$0xf0]  ;;  %v6834_v55 = vld [vmem:[#allocation3 + $0x144] sm:$0xf0] }
 0x4b5   : > { %v4798_v24 = vsel %vm11006_vm12, %v4780_v7, %v4797_v32  ;;  %v4834_v7 = vsel %vm11007_vm4, %v10267_v59, %v4833_v39  ;;  %v4836_v18 = vsel %vm11008_vm3, %v4818_v63, %v4835_v27  ;;  %v4537_v27 = vadd.f32 %v4536_v56, %v4523_v30  ;;  %vm11021_vm4 = vmmov %vm11014_vm2 }
 0x4b6   : > { %4809 = vst [vmem:[#allocation3 + $0xfc] sm:$0xff] %v4798_v24  ;;  %v6692_v25 = vld [vmem:[#allocation3 + $0x8] sm:$0xf]  ;;  %v7152_v49 = vld [vmem:[#allocation3 + $0xc] sm:$0xf]  ;;  %vm11020_vm12 = vcmask 125952  }
 0x4b7   : > { %4846 = vst [vmem:[#allocation3 + $0x118] sm:$0xff] %v4834_v7  ;;  %v6693_v61 = vor.u32 %v7157_v62, %v6692_v25  ;;  %v6697_v47 = vor.u32 %v7152_v49, %v6694_v21  ;;  %v7180_v5 = vld [vmem:[#allocation3 + $0xe8] sm:$0xf0]  ;;  %v6790_v62 = vld [vmem:[#allocation3 + $0xec] sm:$0xf0] }
 0x4b8   : > { %4847 = vst [vmem:[#allocation3 + $0x120] sm:$0xff] %v4836_v18  ;;  %v6789_v21 = vor.u32 %v7180_v5, %v6788_v36  ;;  %v6746_v36 = vld [vmem:[#allocation3 + $0x94] sm:$0xf0] }
 0x4b9   : > { %v10469_v2 = vpop.permute.xlu2 %4736  ;;  %5319 = vmatpush.bf16.msrb.mxu2 %v6693_v61  ;;  %5332 = vmatpush.bf16.msrb.mxu3 %v6697_v47  ;;  %v10473_v59 = vpop.permute.xlu0 %4857 }
 0x4ba   : > { %v4865_v50 = vrot.slane %v10473_v59, 4  ;;  %v4622_v23 = vpop.permute.xlu1 %4621 }
 0x4bb   : > { %v4629_v8 = vrot.slane %v4622_v23, 4 }
 0x4bc   : > { %6860 = vmatmul.msk.bf16.vlgmr.msrb.gmra.mxu2 %vm11009_vm11, %v10386_v51  ;;  %6861 = vmatmul.msk.bf16.vlgmr.msrb.gmra.mxu3 %vm11010_vm7, %v10386_v51  ;;  %v4873_v31 = vsel %vm344_vm5, %v4864_v52, %v4865_v50  ;;  %vm11024_vm11 = vmmov %vm11020_vm12 }
 0x4bd   : > { %5367 = vmatpush.bf16.msra.mxu2 %v5272_v37  ;;  %5380 = vmatpush.bf16.msra.mxu3 %v5275_v33  ;;  %v4874_v13 = vsel %vm11011_vm1, %v10392_v38, %v4873_v31  ;;  %v4635_v44 = vsel %vm344_vm5, %v4628_v6, %v4629_v8  ;;  %v4637_v32 = vsel %vm344_vm5, %v4629_v8, %v4630_v35  ;;  %v4702_v6 = vrot.slane %v10458_v4, 4  ;;  %v6798_v31 = vld [vmem:[#allocation3 + $0xf4] sm:$0xf0]  ;;  %vm11028_vm1 = vmmov %vm11016_vm0 }
 0x4be   : > { %v6832_v63 = vld [vmem:[#allocation3 + $0x118] sm:$0xf]  ;;  %v7186_v24 = vld [vmem:[#allocation3 + $0x11c] sm:$0xf]  ;;  %4885 = vst [vmem:[#allocation3 + $0x14c] sm:$0xff] %v4874_v13  ;;  %v4636_v45 = vsel %vm11012_vm15, %v4635_v44, %v4622_v23  ;;  %v4638_v52 = vsel %vm11013_vm10, %v4637_v32, %v10424_v58 }
 0x4bf   : > { %v6833_v38 = vor.u32 %v7191_v57, %v6832_v63  ;;  %v6837_v39 = vor.u32 %v7186_v24, %v6834_v55  ;;  %4649 = vst [vmem:[#allocation3 + $0x10] sm:$0xff] %v4636_v45  ;;  %v7187_v30 = vld [vmem:[#allocation3 + $0x124] sm:$0xf]  ;;  %v6796_v13 = vld [vmem:[#allocation3 + $0xc8] sm:$0xf] }
 0x4c0   : > { %4650 = vst [vmem:[#allocation3 + $0x18] sm:$0xff] %v4638_v52  ;;  %v7176_v44 = vld [vmem:[#allocation3 + $0xcc] sm:$0xf] }
 0x4c1   : > { %v10497_v42 = vpop.permute.xlu2 %4983  ;;  %5342 = vmatpush.bf16.msra.mxu0 %v6833_v38  ;;  %5355 = vmatpush.bf16.msra.mxu1 %v6837_v39  ;;  %v4694_v49 = vpop.permute.xlu0 %4693  ;;  %v6801_v55 = vor.u32 %v7176_v44, %v6798_v31  ;;  %v7169_v38 = vld [vmem:[#allocation3 + $0x90] sm:$0xf0] }
 0x4c2   : > { %v10502_v22 = vadd.f32 %v10497_v42, %v9941_v1  ;;  %v10506_v7 = vadd.f32 %v10497_v42, %v10118_v28  ;;  %v10510_v18 = vadd.f32 %v10497_v42, %v10143_v16  ;;  %v10514_v25 = vadd.f32 %v10497_v42, %v10154_v34  ;;  %v7175_v1 = vld [vmem:[#allocation3 + $0xc4] sm:$0xf]  ;;  %v10528_v9 = vpop.permute.xlu1 %4659 }
 0x4c3   : > { %v10518_v61 = vadd.f32 %v10497_v42, %v10180_v3  ;;  %v10522_v47 = vadd.f32 %v10497_v42, %v10192_v41  ;;  %v10526_v28 = vadd.f32 %v10497_v42, %v10227_v43  ;;  %v4701_v16 = vrot.slane %v4694_v49, 4  ;;  %v6840_v43 = vld [vmem:[#allocation3 + $0x120] sm:$0xf] }
 0x4c4   : > { %v6793_v34 = vor.u32 %v7175_v1, %v6790_v62  ;;  %v10532_v20 = vadd.f32 %v10497_v42, %v10256_v19  ;;  %v10535_v37 = vadd.f32 %v10497_v42, %v4537_v27  ;;  %v4666_v1 = vrot.slane %v10528_v9, 4 }
 0x4c5   : > { %v4707_v3 = vsel %vm344_vm5, %v4700_v14, %v4701_v16  ;;  %v4709_v41 = vsel %vm344_vm5, %v4701_v16, %v4702_v6  ;;  %5343 = vmatpush.bf16.msra.mxu0 %v6789_v21  ;;  %v7192_v23 = vld [vmem:[#allocation3 + $0x148] sm:$0xf0]  ;;  %v6842_v8 = vld [vmem:[#allocation3 + $0x14c] sm:$0xf0]  ;;  %v7181_v14 = vld [vmem:[#allocation3 + $0xf0] sm:$0xf0] }
 0x4c6   : > { %5356 = vmatpush.bf16.msra.mxu1 %v6793_v34  ;;  %v4708_v33 = vsel %vm11014_vm2, %v4707_v3, %v4694_v49  ;;  %v4710_v19 = vsel %vm11015_vm13, %v4709_v41, %v10458_v4  ;;  %v6841_v56 = vor.u32 %v7192_v23, %v6840_v43  ;;  %v6845_v60 = vor.u32 %v7187_v30, %v6842_v8  ;;  %vm11031_vm2 = vmmov %vm11016_vm0 }
 0x4c7   : > { %4721 = vst [vmem:[#allocation3 + $0x68] sm:$0xff] %v4708_v33  ;;  %v6797_v24 = vor.u32 %v7181_v14, %v6796_v13  ;;  %v3949_v3 = vadd.f32 %v9760_v0, %v9773_v26  ;;  %v4979_v33 = vld [vmem:[#allocation3 + $0x188] sm:$0xf]  ;;  %v11022_v13 = vld [vmem:[#allocation15_spill] sm:$0xff]  ;;  %vm11032_vm13 = vmmov %vm11024_vm11 }
 0x4c8   : > { %4722 = vst [vmem:[#allocation3 + $0x70] sm:$0xff] %v4710_v19  ;;  %5368 = vmatpush.bf16.msra.mxu2 %v6841_v56  ;;  %5381 = vmatpush.bf16.msra.mxu3 %v6845_v60  ;;  %v4978_v60 = vld [vmem:[#allocation3 + $0x180] sm:$0xff]  ;;  %v5149_v4 = vunpack.c.l.b16 %v4979_v33  ;;  %v4019_v44 = vadd.f32 %v11022_v13, %v4005_v15  ;;  %v6856_v33 = vld [vmem:[#allocation3 + $0x130] sm:$0xf] }
 0x4c9   : > { %v10546_v57 = vpop.permute.xlu0 %4732  ;;  %v5147_v14 = vunpack.c.l.b16 %v4978_v60  ;;  %v5148_v31 = vunpack.c.h.b16 %v4978_v60 }
 0x4ca   : > { %v4741_v32 = vrot.slane %v10546_v57, 4  ;;  %v4860_v63 = vpop.permute.xlu1 %4859 }
 0x4cb   : > { %v4866_v45 = vrot.slane %v4860_v63, 4 }
 0x4cc   : > { %v4748_v52 = vsel %vm344_vm5, %v4740_v46, %v4741_v32  ;;  %5369 = vmatpush.bf16.msra.mxu2 %v6797_v24  ;;  %5382 = vmatpush.bf16.msra.mxu3 %v6801_v55  ;;  %v6700_v24 = vld [vmem:[#allocation3 + $0x10] sm:$0xf] }
 0x4cd   : > { %v4749_v39 = vsel %vm11016_vm0, %v4748_v52, %v10546_v57  ;;  %v4875_v5 = vsel %vm344_vm5, %v4865_v50, %v4866_v45  ;;  %v11023_v55 = vld [vmem:[#allocation14_spill] sm:$0xff] }
 0x4ce   : > { %v6744_v27 = vld [vmem:[#allocation3 + $0x68] sm:$0xf]  ;;  %v7164_v62 = vld [vmem:[#allocation3 + $0x6c] sm:$0xf]  ;;  %4762 = vst [vmem:[#allocation3 + $0x9c] sm:$0xff] %v4749_v39  ;;  %v4876_v49 = vsel %vm11017_vm8, %v10473_v59, %v4875_v5  ;;  %v5204_v5 = vpack.c.b16 %v5149_v4, %v5149_v4  ;;  %vm11035_vm8 = vmmov %vm11024_vm11 }
 0x4cf   : > { %v6745_v11 = vor.u32 %v7169_v38, %v6744_v27  ;;  %v6749_v21 = vor.u32 %v7164_v62, %v6746_v36  ;;  %4886 = vst.msk [vmem:[#allocation3 + $0x154] sm:$0xff] %vm9909_vm6, %v4876_v49  ;;  %v6752_v43 = vld [vmem:[#allocation3 + $0x70] sm:$0xf]  ;;  %v7165_v48 = vld [vmem:[#allocation3 + $0x74] sm:$0xf]  ;;  %vm11018_vm6 = vcmask 293888  }
 0x4d0   : > { %vm11019_vm14 = vmmov %vm11018_vm6  ;;  %v6708_v38 = vld [vmem:[#allocation3 + $0x18] sm:$0xf]  ;;  %v7154_v39 = vld [vmem:[#allocation3 + $0x1c] sm:$0xf]  ;;  %v5284_v17 = vsel %vm344_vm5, %v5204_v5, 0 }
 0x4d1   : > { %5344 = vmatpush.bf16.msra.mxu0 %v6745_v11  ;;  %5357 = vmatpush.bf16.msra.mxu1 %v6749_v21  ;;  %v4658_v46 = vpop.permute.xlu0 %4657  ;;  %v5202_v11 = vpack.c.b16 %v5147_v14, %v5147_v14  ;;  %v5203_v21 = vpack.c.b16 %v5148_v31, %v5148_v31  ;;  %vm11025_vm7 = vmmov %vm11018_vm6 }
 0x4d2   : > { %v4665_v16 = vrot.slane %v4658_v46, 4  ;;  %v4698_v34 = vpop.permute.xlu1 %4697 }
 0x4d3   : > { %v4703_v50 = vrot.slane %v4698_v34, 4  ;;  %v5281_v15 = vsel %vm344_vm5, %v5203_v21, 0 }
 0x4d4   : > { %v4671_v59 = vsel %vm344_vm5, %v4664_v40, %v4665_v16  ;;  %v4673_v41 = vsel %vm344_vm5, %v4665_v16, %v4666_v1 }
 0x4d5   : > { %v4672_v19 = vsel %vm11018_vm6, %v4671_v59, %v4658_v46  ;;  %v4674_v23 = vsel %vm11019_vm14, %v4673_v41, %v10528_v9  ;;  %v4711_v30 = vsel %vm344_vm5, %v4702_v6, %v4703_v50  ;;  %4724 = vst.msk [vmem:[#allocation3 + $0x80] sm:$0xf] %vm11020_vm12, %v4703_v50  ;;  %v7170_v0 = vld [vmem:[#allocation3 + $0x98] sm:$0xf0]  ;;  %v6754_v26 = vld [vmem:[#allocation3 + $0x9c] sm:$0xf0]  ;;  %v3963_v9 = vadd.f32 %v9762_v53, %v3949_v3 }
 0x4d6   : > { %4685 = vst [vmem:[#allocation3 + $0x3c] sm:$0xff] %v4672_v19  ;;  %v4712_v40 = vsel %vm11021_vm4, %v4711_v30, %v4698_v34  ;;  %v6753_v8 = vor.u32 %v7170_v0, %v6752_v43  ;;  %v6757_v56 = vor.u32 %v7165_v48, %v6754_v26  ;;  %v7153_v53 = vld [vmem:[#allocation3 + $0x14] sm:$0xf]  ;;  %v11026_v3 = vld [vmem:[#allocation16_spill] sm:$0xff]  ;;  %v5278_v26 = vsel %vm344_vm5, %v5202_v11, 0 }
 0x4d7   : > { %4686 = vst [vmem:[#allocation3 + $0x44] sm:$0xff] %v4674_v23  ;;  %v3977_v45 = vadd.f32 %v11023_v55, %v3963_v9  ;;  %v4033_v59 = vadd.f32 %v11026_v3, %v4019_v44  ;;  %v7194_v19 = vld [vmem:[#allocation3 + $0x158] sm:$0xf0]  ;;  %v6850_v14 = vld [vmem:[#allocation3 + $0x154] sm:$0xf0]  ;;  %vm11036_vm6 = vcmask 302080  }
 0x4d8   : > { %4723 = vst [vmem:[#allocation3 + $0x78] sm:$0xff] %v4712_v40  ;;  %5370 = vmatpush.bf16.msra.mxu2 %v6753_v8  ;;  %5383 = vmatpush.bf16.msra.mxu3 %v6757_v56  ;;  %v7183_v44 = vld [vmem:[#allocation3 + $0x100] sm:$0xf0]  ;;  %vm11040_vm4 = vcmask 130048  }
 0x4d9   : > { %v4822_v6 = vpop.permute.xlu0 %4821  ;;  %v4986_v41 = vadd.f32 %v10497_v42, %v3977_v45  ;;  %v4987_v48 = vadd.f32 %v10497_v42, %v4033_v59  ;;  %v6857_v42 = vor.u32 %v7194_v19, %v6856_v33 }
 0x4da   : > { %v4828_v63 = vrot.slane %v4822_v6, 4  ;;  %v4662_v10 = vpop.permute.xlu1 %4661  ;;  %v7193_v6 = vld [vmem:[#allocation3 + $0x150] sm:$0xf0] }
 0x4db   : > { %v4667_v29 = vrot.slane %v4662_v10, 4 }
 0x4dc   : > { %v4837_v52 = vsel %vm344_vm5, %v4827_v12, %v4828_v63  ;;  %v7182_v63 = vld [vmem:[#allocation3 + $0xf8] sm:$0xf0] }
 0x4dd   : > { %v4838_v27 = vsel %vm11008_vm3, %v10426_v54, %v4837_v52  ;;  %v4675_v62 = vsel %vm344_vm5, %v4666_v1, %v4667_v29  ;;  %4688 = vst.msk [vmem:[#allocation3 + $0x54] sm:$0xf] %vm11024_vm11, %v4667_v29  ;;  %v7158_v36 = vld [vmem:[#allocation3 + $0x38] sm:$0xf0]  ;;  %v6702_v49 = vld [vmem:[#allocation3 + $0x3c] sm:$0xf0] }
 0x4de   : > { %4848 = vst.msk [vmem:[#allocation3 + $0x128] sm:$0xff] %vm10038_vm9, %v4838_v27  ;;  %v4676_v12 = vsel %vm11025_vm7, %v4675_v62, %v4662_v10  ;;  %v6701_v46 = vor.u32 %v7158_v36, %v6700_v24  ;;  %v6705_v16 = vor.u32 %v7153_v53, %v6702_v49  ;;  %v7159_v34 = vld [vmem:[#allocation3 + $0x40] sm:$0xf0]  ;;  %v6710_v50 = vld [vmem:[#allocation3 + $0x44] sm:$0xf0]  ;;  %v5295_v43 = vpop.f32.mrf.mxu0  ;;  %v5308_v0 = vpop.f32.mrf.mxu1  ;;  %vm11027_vm9 = vcmask 588800  }
 0x4df   : > { %4687 = vst [vmem:[#allocation3 + $0x4c] sm:$0xff] %v4676_v12  ;;  %v6709_v54 = vor.u32 %v7159_v34, %v6708_v38  ;;  %v6713_v1 = vor.u32 %v7154_v39, %v6710_v50  ;;  %v5296_v30 = vadd.f32 %v5295_v43, %v4986_v41  ;;  %v5309_v8 = vadd.f32 %v5308_v0, %v4987_v48  ;;  %vm11029_vm15 = vmmov %vm11027_vm9  ;;  %v6806_v10 = vld [vmem:[#allocation3 + $0xfc] sm:$0xf0]  ;;  %v6812_v29 = vld [vmem:[#allocation3 + $0xd8] sm:$0xf] }
 0x4e0   : > { %5345 = vmatpush.bf16.msra.mxu0 %v6701_v46  ;;  %5358 = vmatpush.bf16.msra.mxu1 %v6705_v16  ;;  %vm11030_vm10 = vmmov %vm11027_vm9  ;;  %v6813_v45 = vor.u32 %v7183_v44, %v6812_v29  ;;  %v6804_v52 = vld [vmem:[#allocation3 + $0xd0] sm:$0xf]  ;;  %v7177_v53 = vld [vmem:[#allocation3 + $0xd4] sm:$0xf] }
 0x4e1   : > { %5371 = vmatpush.bf16.msra.mxu2 %v6709_v54  ;;  %5384 = vmatpush.bf16.msra.mxu3 %v6713_v1  ;;  %v4735_v23 = vpop.permute.xlu0 %4734  ;;  %v5429_v56 = vmax.f32 %v5296_v30, 0.0  ;;  %v5430_v4 = vmax.f32 %v5309_v8, 0.0  ;;  %vm11033_vm0 = vmmov %vm11027_vm9  ;;  %v6805_v5 = vor.u32 %v7182_v63, %v6804_v52  ;;  %v6809_v27 = vor.u32 %v7177_v53, %v6806_v10  ;;  %v6768_v62 = vld [vmem:[#allocation3 + $0x80] sm:$0xf]  ;;  %v6760_v11 = vld [vmem:[#allocation3 + $0x78] sm:$0xf] }
 0x4e2   : > { %v4742_v40 = vrot.slane %v4735_v23, 4  ;;  %v7166_v16 = vld [vmem:[#allocation3 + $0x7c] sm:$0xf]  ;;  %vm11038_vm14 = vmmov %vm11033_vm0 }
 0x4e3   : > { %6862 = vmatmul.msk.bf16.vlgmr.msra.gmra.mxu0 %vm11027_vm9, %v10386_v51  ;;  %6863 = vmatmul.msk.bf16.vlgmr.msra.gmra.mxu1 %vm11029_vm15, %v10386_v51  ;;  %5440 = vst [vmem:[%s10616_s15] sm:$0xff] %v5429_v56  ;;  %vm11039_vm12 = vmmov %vm11033_vm0 }
 0x4e4   : > { %5393 = vmatpush.bf16.msrb.mxu0 %v5278_v26  ;;  %5406 = vmatpush.bf16.msrb.mxu1 %v5281_v15  ;;  %v4750_v60 = vsel %vm344_vm5, %v4741_v32, %v4742_v40  ;;  %v4752_v9 = vsel %vm11028_vm1, %v4742_v40, %v10469_v2  ;;  %5441 = vst [vmem:[%s10616_s15 + $0x8] sm:$0xff] %v5430_v4 }
 0x4e5   : > { %5419 = vmatpush.bf16.msrb.mxu2 %v5284_v17  ;;  %v4751_v31 = vsel %vm11031_vm2, %v4750_v60, %v4735_v23  ;;  %4764 = vst.msk [vmem:[#allocation3 + $0xac] sm:$0xf] %vm11032_vm13, %v4752_v9  ;;  %6865 = vmatmul.msk.bf16.vlgmr.msra.gmra.mxu3 %vm11033_vm0, %v10386_v51  ;;  %v6848_v57 = vld [vmem:[#allocation3 + $0x128] sm:$0xf]  ;;  %v7188_v32 = vld [vmem:[#allocation3 + $0x12c] sm:$0xf] }
 0x4e6   : > { %6864 = vmatmul.msk.bf16.vlgmr.msra.gmra.mxu2 %vm11030_vm10, %v10386_v51  ;;  %4763 = vst [vmem:[#allocation3 + $0xa4] sm:$0xff] %v4751_v31  ;;  %v6849_v2 = vor.u32 %v7193_v6, %v6848_v57  ;;  %v6853_v13 = vor.u32 %v7188_v32, %v6850_v14  ;;  %v5297_v24 = vpop.f32.mrf.mxu0  ;;  %v5310_v38 = vpop.f32.mrf.mxu1  ;;  %v7160_v54 = vld [vmem:[#allocation3 + $0x48] sm:$0xf0]  ;;  %v6718_v43 = vld [vmem:[#allocation3 + $0x4c] sm:$0xf0] }
 0x4e8   : > { %5394 = vmatpush.bf16.msrb.mxu0 %v6849_v2  ;;  %5407 = vmatpush.bf16.msrb.mxu1 %v6853_v13 }
 0x4e9   : > { %5420 = vmatpush.bf16.msrb.mxu2 %v6857_v42  ;;  %v4626_v55 = vpop.permute.xlu0 %4625 }
 0x4ea   : > { %v4631_v39 = vrot.slane %v4626_v55, 4 }
 0x4ec   : > { %v4639_v36 = vsel %vm344_vm5, %v4630_v35, %v4631_v39  ;;  %4652 = vst.msk [vmem:[#allocation3 + $0x28] sm:$0xf] %vm11035_vm8, %v4631_v39  ;;  %5395 = vmatpush.bf16.msrb.mxu0 %v6805_v5  ;;  %5408 = vmatpush.bf16.msrb.mxu1 %v6809_v27  ;;  %v7172_v49 = vld [vmem:[#allocation3 + $0xa8] sm:$0xf0]  ;;  %v7161_v35 = vld [vmem:[#allocation3 + $0x50] sm:$0xf0]  ;;  %vm11037_vm5 = vmmov %vm11033_vm0 }
 0x4ed   : > { %5421 = vmatpush.bf16.msrb.mxu2 %v6813_v45  ;;  %v4640_v21 = vsel %vm11036_vm6, %v4639_v36, %v4626_v55  ;;  %v6769_v12 = vor.u32 %v7172_v49, %v6768_v62  ;;  %v7171_v46 = vld [vmem:[#allocation3 + $0xa0] sm:$0xf0]  ;;  %v6762_v34 = vld [vmem:[#allocation3 + $0xa4] sm:$0xf0] }
 0x4ee   : > { %4651 = vst [vmem:[#allocation3 + $0x20] sm:$0xff] %v4640_v21  ;;  %v6761_v50 = vor.u32 %v7171_v46, %v6760_v11  ;;  %v6765_v3 = vor.u32 %v7166_v16, %v6762_v34 }
 0x4f0   : > { %5396 = vmatpush.bf16.msrb.mxu0 %v6761_v50  ;;  %5409 = vmatpush.bf16.msrb.mxu1 %v6765_v3 }
 0x4f1   : > { %5422 = vmatpush.bf16.msrb.mxu2 %v6769_v12 }
 0x4f3   : > { %v6724_v58 = vld [vmem:[#allocation3 + $0x28] sm:$0xf] }
 0x4f4   : > { %v6725_v59 = vor.u32 %v7161_v35, %v6724_v58 }
 0x4f5   : > { %v6716_v1 = vld [vmem:[#allocation3 + $0x20] sm:$0xf]  ;;  %v7155_v41 = vld [vmem:[#allocation3 + $0x24] sm:$0xf] }
 0x4f6   : > { %5423 = vmatpush.bf16.msrb.mxu2 %v6725_v59  ;;  %v6717_v48 = vor.u32 %v7160_v54, %v6716_v1  ;;  %v6721_v17 = vor.u32 %v7155_v41, %v6718_v43 }
 0x4f8   : > { %5397 = vmatpush.bf16.msrb.mxu0 %v6717_v48  ;;  %5410 = vmatpush.bf16.msrb.mxu1 %v6721_v17 }
 0x4f9   : > { %6868 = vmatmul.msk.bf16.vlgmr.msrb.gmra.mxu2 %vm11037_vm5, %v10386_v51 }
 0x4fb   : > { %6866 = vmatmul.msk.bf16.vlgmr.msrb.gmra.mxu0 %vm11038_vm14, %v10386_v51  ;;  %6867 = vmatmul.msk.bf16.vlgmr.msrb.gmra.mxu1 %vm11039_vm12, %v10386_v51 }
 0x53f   : > { %v5321_v33 = vpop.f32.mrf.mxu2  ;;  %v5334_v19 = vpop.f32.mrf.mxu3 }
 0x540   : > { %v5322_v23 = vadd.f32 %v5321_v33, %v10502_v22  ;;  %v5335_v30 = vadd.f32 %v5334_v19, %v10506_v7 }
 0x542   : > { %v5431_v0 = vmax.f32 %v5322_v23, 0.0  ;;  %v5432_v26 = vmax.f32 %v5335_v30, 0.0 }
 0x544   : > { %5442 = vst [vmem:[%s10616_s15 + $0x10] sm:$0xff] %v5431_v0 }
 0x545   : > { %5443 = vst [vmem:[%s10616_s15 + $0x18] sm:$0xff] %v5432_v26 }
 0x547   : > { %v5323_v15 = vpop.f32.mrf.mxu2  ;;  %v5336_v40 = vpop.f32.mrf.mxu3 }
 0x560   : > { %v5347_v8 = vpop.f32.mrf.mxu0  ;;  %v5360_v51 = vpop.f32.mrf.mxu1 }
 0x561   : > { %v5348_v56 = vadd.f32 %v5347_v8, %v10510_v18  ;;  %v5361_v42 = vadd.f32 %v5360_v51, %v10514_v25 }
 0x563   : > { %v5433_v60 = vmax.f32 %v5348_v56, 0.0  ;;  %v5434_v9 = vmax.f32 %v5361_v42, 0.0 }
 0x565   : > { %5444 = vst [vmem:[%s10616_s15 + $0x20] sm:$0xff] %v5433_v60 }
 0x566   : > { %5445 = vst [vmem:[%s10616_s15 + $0x28] sm:$0xff] %v5434_v9 }
 0x568   : > { %v5386_v4 = vpop.f32.mrf.mxu3  ;;  %v5349_v6 = vpop.f32.mrf.mxu0 }
 0x569   : > { %v5373_v22 = vpop.f32.mrf.mxu2  ;;  %v5387_v14 = vadd.f32 %v5386_v4, %v10522_v47  ;;  %v5362_v31 = vpop.f32.mrf.mxu1 }
 0x56a   : > { %v5374_v7 = vadd.f32 %v5373_v22, %v10518_v61 }
 0x56b   : > { %v5436_v18 = vmax.f32 %v5387_v14, 0.0 }
 0x56c   : > { %v5435_v57 = vmax.f32 %v5374_v7, 0.0 }
 0x56d   : > { %5447 = vst [vmem:[%s10616_s15 + $0x38] sm:$0xff] %v5436_v18 }
 0x56e   : > { %5446 = vst [vmem:[%s10616_s15 + $0x30] sm:$0xff] %v5435_v57 }
 0x570   : > { %v5388_v32 = vpop.f32.mrf.mxu3 }
 0x571   : > { %v5375_v25 = vpop.f32.mrf.mxu2 }
 0x578   : > { %v5399_v2 = vpop.f32.mrf.mxu0  ;;  %v5412_v13 = vpop.f32.mrf.mxu1 }
 0x579   : > { %v5400_v44 = vadd.f32 %v5399_v2, %v10526_v28  ;;  %v5413_v61 = vadd.f32 %v5412_v13, %v10532_v20 }
 0x57b   : > { %v5437_v47 = vmax.f32 %v5400_v44, 0.0  ;;  %v5438_v63 = vmax.f32 %v5413_v61, 0.0 }
 0x57c   : > { %v5425_v10 = vpop.f32.mrf.mxu2 }
 0x57d   : > { %5448 = vst [vmem:[%s10616_s15 + $0x40] sm:$0xff] %v5437_v47  ;;  %v5426_v29 = vadd.f32 %v5425_v10, %v10535_v37 }
 0x57e   : > { %5449 = vst [vmem:[%s10616_s15 + $0x48] sm:$0xff] %v5438_v63 }
 0x57f   : > { %v5439_v24 = vmax.f32 %v5426_v29, 0.0 }
 0x580   : > { %v5401_v28 = vpop.f32.mrf.mxu0  ;;  %v5414_v20 = vpop.f32.mrf.mxu1 }
 0x581   : > { %5450 = vst.msk [vmem:[%s10616_s15 + $0x50] sm:$0xff] %vm11040_vm4, %v5439_v24 }
 0x582   : > { %7388 = shalt.err (!%p7385_p10)
}
 0x583   : > { %7205 = dma.vmem_to_hbm [thread:$0]  (%p7565_p7), %s5466_s1, 1408, %s5468_s20, %s5452_s25  }
 0x584   : > { %v5427_v37 = vpop.f32.mrf.mxu2 }
 0x585 PF: > { %s5479_s30 = sand.u32 1, %s7419_s21   ;;  %p11041_p12 = scmp.ge.s32.totalorder %s7431_s24, 2 }
 0x586   : > { %s5480_s13 = scalar_lea.sflag [#allocation6], %s5479_s30 }
 0x587   : > { %p7216_p13 = pnand %p11041_p12, %p7533_p6 }
 0x589   : > { %p7217_p0 = pneg %p7216_p13 }
 0x58b   : > { %7414 = dma.done.wait (%p7217_p0), %s5480_s13, 1408  }
 0x58c   : > { %7416 = vsyncadd (%p7217_p0), %s5480_s13, 4294965888  ;;  %s11042_s14 = sld [smem:[#allocation13_spill]]  ;;  %p20_p3 = scmp.ge.s32.totalorder %s7551_s11, 4  }
 0x58d   : > { %s11043_s21 = smov %s7423_s22  ;;  %s11044_s22 = smov %s7427_s23 }
 0x58e   : > { %s11046_s24 = smov %s7551_s11  ;;  %22 = sbr.rel (!%p20_p3) target bundleno = 8 (0x8), region = 93 }
 0x592   : > { %s11045_s23 = smov %s11042_s14 }
 0x593   :  { %5486 = vsyncpa [#allocation5], 1 }
 0x594   :  { %5488 = vsyncpa [#allocation5 + $0x1], 1 }
 0x595   :  { %5489 = vsyncpa [#allocation8], 1 }
 0x596   :  { %5490 = vsyncpa [#allocation6], 1 }
 0x597   :  { %5492 = vsyncpa [#allocation6 + $0x1], 1 }

</bundles_post_ra>
